<compile_context>
chip_gen: v7x
topology: tpu7x:2x2x1
jax: 0.10.0
libtpu: 0.0.40
codegen_flags: <defaults>
</compile_context>

<pallas_src>
import functools

import jax
import jax.numpy as jnp
from jax.experimental import pallas as pl
from jax.experimental.pallas import tpu as pltpu


K_CLASSES = 10   # weight1.shape[0]


def model2d_kernel(x_ref, w_ref, out_ref):
    # x_ref:   (B, D)      bf16, same block every step (stays resident)
    # w_ref:   (KP, D, D)  bf16, KP class slices of weight1 for this step
    # out_ref: (B, KP)     f32, disjoint output block owned by this step
    x = x_ref[...]
    kp = w_ref.shape[0]
    cols = []
    for j in range(kp):  # short, fully unrolled
        # MXU matmul, bf16 inputs, f32 accumulation.
        y = jnp.dot(x, w_ref[j], preferred_element_type=jnp.float32)   # (B, D)
        s = jax.nn.sigmoid(y)                                          # EUP
        cols.append(jnp.sum(s, axis=-1, keepdims=True))                # (B, 1) XLU
    # Direct placement of the KP per-class sums; single store, no one-hot.
    out_ref[...] = jnp.concatenate(cols, axis=-1)                      # (B, KP)


def pick_classes_per_step():
    """Classes handled per grid step.

    Single-TensorCore chips (v5e / v6e): one step (KP=10) -- nothing to
    pipeline against, so grid overhead is pure cost.  Otherwise (v7x's two
    TensorCores, or unknown hardware): two independent KP=5 slabs.
    """
    try:
        kind = jax.devices()[0].device_kind.lower()
    except Exception:
        return 5
    if "v5 lite" in kind or "v5e" in kind or "v6" in kind:
        return 10
    return 5


@functools.partial(jax.jit, static_argnames=("kp",))
def model2d_forward(x, weight1_bf16, *, kp=5):
    B = x.shape[0]
    K, D, _ = weight1_bf16.shape
    assert weight1_bf16.dtype == jnp.bfloat16, "convert weights to bf16 once at init"
    assert K % kp == 0
    nsteps = K // kp

    # x is tiny (B*D elements); casting it in-jit is negligible.  The weight
    # cast, by contrast, is done once outside this function (see docstring).
    x_flat = x.reshape(B, D).astype(jnp.bfloat16)

    cost = pl.CostEstimate(
        flops=2 * B * D * D * K,
        transcendentals=B * D * K,
        bytes_accessed=weight1_bf16.size * 2 + x_flat.size * 2 + B * K * 4,
    )

    out = pl.pallas_call(
        model2d_kernel,
        out_shape=jax.ShapeDtypeStruct((nsteps, B, kp), jnp.float32),
        grid_spec=pltpu.PrefetchScalarGridSpec(
            num_scalar_prefetch=0,
            grid=(nsteps,),
            in_specs=[
                # x: full (B, D) block, identical for every step (resident)
                pl.BlockSpec((B, D), lambda s: (0, 0)),
                # weight1: KP class slices per step
                pl.BlockSpec((kp, D, D), lambda s: (s, 0, 0)),
            ],
            # each step owns its disjoint (B, KP) slab of the output
            out_specs=pl.BlockSpec((None, B, kp), lambda s: (s, 0, 0)),
        ),
        compiler_params=pltpu.CompilerParams(
            # steps are fully independent (disjoint weights / outputs)
            dimension_semantics=("parallel",),
            # Double-buffered bf16 weight block, lane-padded 784->896:
            #   kp * 784 * 896 * 2 B * 2 buffers  (~13.4 MB for kp=5,
            #   ~26.8 MB for kp=10) + tiny x / out blocks.
            vmem_limit_bytes=(48 << 20) if nsteps == 1 else (32 << 20),
        ),
        cost_estimate=cost,
    )(x_flat, weight1_bf16)

    # (nsteps, B, kp) -> (B, K); class k = step*kp + j lives at out[step, :, j].
    return out.transpose(1, 0, 2).reshape(B, K)


if __name__ == "__main__":
    key = jax.random.PRNGKey(0)
    kx, kw = jax.random.split(key)

    # The module hardcodes weight1 = (10, 784, 784), so C*H*W must be 784.
    B, C, H, W = 2, 1, 28, 28
    D = C * H * W
    K = K_CLASSES

    x = jax.random.normal(kx, (B, C, H, W), dtype=jnp.float32)

    # Deterministic kaiming_normal_ equivalent for a (10, 784, 784) tensor:
    # fan_in = size(1) * prod(sizes[2:]) = 784 * 784, gain = sqrt(2).
    fan_in = D * D
    std = (2.0 / fan_in) ** 0.5
    weight1 = std * jax.random.normal(kw, (K, D, D), dtype=jnp.float32)

    # One-time conversion to the bf16 parameter storage format, OUTSIDE the
    # jitted forward -- the kernel is now the only per-call HBM consumer.
    weight1_bf16 = jax.block_until_ready(weight1.astype(jnp.bfloat16))

    kp = pick_classes_per_step()
    out = jax.block_until_ready(model2d_forward(x, weight1_bf16, kp=kp))
    assert out.shape == (B, K)

    # Pure-JAX f32 reference of the PyTorch forward.
    x_flat = x.reshape(B, D)
    y = jnp.einsum("bi,kij->kbj", x_flat, weight1,
                   precision=jax.lax.Precision.HIGHEST)        # (K, B, D)
    ref = jnp.sum(jax.nn.sigmoid(y), axis=-1).T                # (B, K)
    assert jnp.allclose(out, ref, rtol=1e-3, atol=2.5e-1), (
        float(jnp.max(jnp.abs(out - ref))))

    print("KERNEL_OK")
</pallas_src>

<mosaic_0001>
module attributes {stable_mosaic.version = 11 : i64} {
  func.func @model2d_kernel(%arg0: i32, %arg1: memref<2x784xbf16, #tpu.memory_space<vmem>>, %arg2: memref<5x784x784xbf16, #tpu.memory_space<vmem>>, %arg3: memref<1x2x5xf32, #tpu.memory_space<vmem>>) attributes {dimension_semantics = [#tpu.dimension_semantics<parallel>], iteration_bounds = array<i64: 2>, scalar_prefetch = 0 : i64, scratch_operands = 0 : i64, tpu.core_type = #tpu.core_type<tc>, window_params = [{pipeline_mode = #tpu.pipeline_mode<synchronous>, transform_indices = @transform_0, window_bounds = array<i64: 2, 784>}, {transform_indices = @transform_1, window_bounds = array<i64: 5, 784, 784>}, {transform_indices = @transform_2, window_bounds = array<i64: 1, 2, 5>}]} {
    %c0 = arith.constant 0 : index
    %c0_0 = arith.constant 0 : index
    %0 = vector.load %arg1[%c0, %c0_0] : memref<2x784xbf16, #tpu.memory_space<vmem>>, vector<2x784xbf16>
    %c0_1 = arith.constant 0 : index
    %c0_2 = arith.constant 0 : index
    %c0_3 = arith.constant 0 : index
    %1 = vector.load %arg2[%c0_1, %c0_2, %c0_3] : memref<5x784x784xbf16, #tpu.memory_space<vmem>>, vector<1x784x784xbf16>
    %2 = vector.shape_cast %1 : vector<1x784x784xbf16> to vector<784x784xbf16>
    %cst = arith.constant dense<0.000000e+00> : vector<2x784xf32>
    %3 = tpu.matmul %0, %2, %cst {dimension_numbers = #tpu.dot_dimension_numbers<[1], [0], [0], [1], [0, 0, 1, 1], [], []>} : vector<2x784xbf16>, vector<784x784xbf16>, vector<2x784xf32> -> vector<2x784xf32>
    %4 = arith.negf %3 : vector<2x784xf32>
    %5 = math.exp %4 : vector<2x784xf32>
    %cst_4 = arith.constant 1.000000e+00 : f32
    %6 = vector.broadcast %cst_4 : f32 to vector<2x784xf32>
    %7 = arith.addf %6, %5 : vector<2x784xf32>
    %8 = arith.divf %6, %7 : vector<2x784xf32>
    %cst_5 = arith.constant dense<0.000000e+00> : vector<2xf32>
    %9 = vector.multi_reduction <add>, %8, %cst_5 [1] : vector<2x784xf32> to vector<2xf32>
    %10 = vector.shape_cast %9 : vector<2xf32> to vector<2x1xf32>
    %c1 = arith.constant 1 : index
    %c0_6 = arith.constant 0 : index
    %c0_7 = arith.constant 0 : index
    %11 = vector.load %arg2[%c1, %c0_6, %c0_7] : memref<5x784x784xbf16, #tpu.memory_space<vmem>>, vector<1x784x784xbf16>
    %12 = vector.shape_cast %11 : vector<1x784x784xbf16> to vector<784x784xbf16>
    %cst_8 = arith.constant dense<0.000000e+00> : vector<2x784xf32>
    %13 = tpu.matmul %0, %12, %cst_8 {dimension_numbers = #tpu.dot_dimension_numbers<[1], [0], [0], [1], [0, 0, 1, 1], [], []>} : vector<2x784xbf16>, vector<784x784xbf16>, vector<2x784xf32> -> vector<2x784xf32>
    %14 = arith.negf %13 : vector<2x784xf32>
    %15 = math.exp %14 : vector<2x784xf32>
    %cst_9 = arith.constant 1.000000e+00 : f32
    %16 = vector.broadcast %cst_9 : f32 to vector<2x784xf32>
    %17 = arith.addf %16, %15 : vector<2x784xf32>
    %18 = arith.divf %16, %17 : vector<2x784xf32>
    %cst_10 = arith.constant dense<0.000000e+00> : vector<2xf32>
    %19 = vector.multi_reduction <add>, %18, %cst_10 [1] : vector<2x784xf32> to vector<2xf32>
    %20 = vector.shape_cast %19 : vector<2xf32> to vector<2x1xf32>
    %c2 = arith.constant 2 : index
    %c0_11 = arith.constant 0 : index
    %c0_12 = arith.constant 0 : index
    %21 = vector.load %arg2[%c2, %c0_11, %c0_12] : memref<5x784x784xbf16, #tpu.memory_space<vmem>>, vector<1x784x784xbf16>
    %22 = vector.shape_cast %21 : vector<1x784x784xbf16> to vector<784x784xbf16>
    %cst_13 = arith.constant dense<0.000000e+00> : vector<2x784xf32>
    %23 = tpu.matmul %0, %22, %cst_13 {dimension_numbers = #tpu.dot_dimension_numbers<[1], [0], [0], [1], [0, 0, 1, 1], [], []>} : vector<2x784xbf16>, vector<784x784xbf16>, vector<2x784xf32> -> vector<2x784xf32>
    %24 = arith.negf %23 : vector<2x784xf32>
    %25 = math.exp %24 : vector<2x784xf32>
    %cst_14 = arith.constant 1.000000e+00 : f32
    %26 = vector.broadcast %cst_14 : f32 to vector<2x784xf32>
    %27 = arith.addf %26, %25 : vector<2x784xf32>
    %28 = arith.divf %26, %27 : vector<2x784xf32>
    %cst_15 = arith.constant dense<0.000000e+00> : vector<2xf32>
    %29 = vector.multi_reduction <add>, %28, %cst_15 [1] : vector<2x784xf32> to vector<2xf32>
    %30 = vector.shape_cast %29 : vector<2xf32> to vector<2x1xf32>
    %c3 = arith.constant 3 : index
    %c0_16 = arith.constant 0 : index
    %c0_17 = arith.constant 0 : index
    %31 = vector.load %arg2[%c3, %c0_16, %c0_17] : memref<5x784x784xbf16, #tpu.memory_space<vmem>>, vector<1x784x784xbf16>
    %32 = vector.shape_cast %31 : vector<1x784x784xbf16> to vector<784x784xbf16>
    %cst_18 = arith.constant dense<0.000000e+00> : vector<2x784xf32>
    %33 = tpu.matmul %0, %32, %cst_18 {dimension_numbers = #tpu.dot_dimension_numbers<[1], [0], [0], [1], [0, 0, 1, 1], [], []>} : vector<2x784xbf16>, vector<784x784xbf16>, vector<2x784xf32> -> vector<2x784xf32>
    %34 = arith.negf %33 : vector<2x784xf32>
    %35 = math.exp %34 : vector<2x784xf32>
    %cst_19 = arith.constant 1.000000e+00 : f32
    %36 = vector.broadcast %cst_19 : f32 to vector<2x784xf32>
    %37 = arith.addf %36, %35 : vector<2x784xf32>
    %38 = arith.divf %36, %37 : vector<2x784xf32>
    %cst_20 = arith.constant dense<0.000000e+00> : vector<2xf32>
    %39 = vector.multi_reduction <add>, %38, %cst_20 [1] : vector<2x784xf32> to vector<2xf32>
    %40 = vector.shape_cast %39 : vector<2xf32> to vector<2x1xf32>
    %c4 = arith.constant 4 : index
    %c0_21 = arith.constant 0 : index
    %c0_22 = arith.constant 0 : index
    %41 = vector.load %arg2[%c4, %c0_21, %c0_22] : memref<5x784x784xbf16, #tpu.memory_space<vmem>>, vector<1x784x784xbf16>
    %42 = vector.shape_cast %41 : vector<1x784x784xbf16> to vector<784x784xbf16>
    %cst_23 = arith.constant dense<0.000000e+00> : vector<2x784xf32>
    %43 = tpu.matmul %0, %42, %cst_23 {dimension_numbers = #tpu.dot_dimension_numbers<[1], [0], [0], [1], [0, 0, 1, 1], [], []>} : vector<2x784xbf16>, vector<784x784xbf16>, vector<2x784xf32> -> vector<2x784xf32>
    %44 = arith.negf %43 : vector<2x784xf32>
    %45 = math.exp %44 : vector<2x784xf32>
    %cst_24 = arith.constant 1.000000e+00 : f32
    %46 = vector.broadcast %cst_24 : f32 to vector<2x784xf32>
    %47 = arith.addf %46, %45 : vector<2x784xf32>
    %48 = arith.divf %46, %47 : vector<2x784xf32>
    %cst_25 = arith.constant dense<0.000000e+00> : vector<2xf32>
    %49 = vector.multi_reduction <add>, %48, %cst_25 [1] : vector<2x784xf32> to vector<2xf32>
    %50 = vector.shape_cast %49 : vector<2xf32> to vector<2x1xf32>
    %51 = tpu.concatenate %10, %20, %30, %40, %50 in 1 : vector<2x1xf32>, vector<2x1xf32>, vector<2x1xf32>, vector<2x1xf32>, vector<2x1xf32> -> vector<2x5xf32>
    %c0_26 = arith.constant 0 : index
    %c0_27 = arith.constant 0 : index
    %c0_28 = arith.constant 0 : index
    %52 = vector.load %arg3[%c0_26, %c0_27, %c0_28] : memref<1x2x5xf32, #tpu.memory_space<vmem>>, vector<1x2x5xf32>
    %53 = vector.shape_cast %52 : vector<1x2x5xf32> to vector<2x5xf32>
    %54 = vector.shape_cast %51 : vector<2x5xf32> to vector<1x2x5xf32>
    tpu.vector_store %arg3[%c0_26, %c0_27, %c0_28], %54 {strides = array<i32>} : memref<1x2x5xf32, #tpu.memory_space<vmem>>, vector<1x2x5xf32>,
    return
  }
  func.func @transform_0(%arg0: i32) -> (i32, i32) {
    %c0_i32 = arith.constant 0 : i32
    %c0_i32_0 = arith.constant 0 : i32
    %c0_i32_1 = arith.constant 0 : i32
    return %c0_i32, %c0_i32_0 : i32, i32
  }
  func.func @transform_1(%arg0: i32) -> (i32, i32, i32) {
    %c0_i32 = arith.constant 0 : i32
    %c0_i32_0 = arith.constant 0 : i32
    %c0_i32_1 = arith.constant 0 : i32
    return %arg0, %c0_i32, %c0_i32_0 : i32, i32, i32
  }
  func.func @transform_2(%arg0: i32) -> (i32, i32, i32) {
    %c0_i32 = arith.constant 0 : i32
    %c0_i32_0 = arith.constant 0 : i32
    %c0_i32_1 = arith.constant 0 : i32
    return %arg0, %c0_i32, %c0_i32_0 : i32, i32, i32
  }
}

</mosaic_0001>

<bundles_post_ra>
// kernel: model2d_forward.1
= control target key start
LH: loop header
LB: loop body
LE: loop exit
PB: predicated region body
PF: predicated region fallthrough
CT: control target
= control target key end

     0   :  { %7 = vsyncpa [#allocation3], 0  ;;  %s23387_s0 = inlined_call_operand.vmem [shape: bf16[2,784], index: 0, kind: input, shape index: {}]   ;;  %s23388_s1 = inlined_call_operand.hbm [shape: bf16[10,784,784], index: 1, kind: input, shape index: {}]   ;;  %s23389_s2 = inlined_call_operand.vmem [shape: f32[2,2,5], index: 2, kind: output, shape index: {}]  }
   0x1   :  { %9 = vsyncpa [#allocation3 + $0x1], 0  ;;  %s21251_s9 = smov 0   ;;  %s21253_s10 = smov 0  }
   0x2   :  { %s21255_s11 = smov 0   ;;  %s21257_s12 = smov 0  }
   0x3 LB: > { %s21270_s13 = sadd.s32 4294967295, %s21227_s12   ;;  %s21273_s14 = sadd.s32 1, %s21227_s12   ;;  %s21227_s12 = sphi %s21257_s12, %s23395_s12   ;;  %s21223_s11 = sphi %s21255_s11, %s23394_s11   ;;  %s21219_s10 = sphi %s21253_s10, %s23393_s10   ;;  %s21215_s9 = sphi %s21251_s9, %s23392_s9  }
   0x4   : > { %s40_s15 = ssub.s32 %s21227_s12, %s21273_s14  ;;  %s43_s16 = sadd.s32 1, %s21223_s11 }
   0x5   : > { %p41_p0 = scmp.eq.s32.totalorder %s40_s15, 0  ;;  %p50_p1 = scmp.ne.s32.totalorder %s21223_s11, %s21219_s10 }
   0x6   : > { %p51_p2 = scmp.eq.s32.totalorder %s21227_s12, 0  ;;  %p56_p3 = scmp.ne.s32.totalorder %s21219_s10, %s21215_s9 }
   0x7   : > { %s21283_s17 = scalar_select %p41_p0, %s21223_s11, %s43_s16  }
   0x8   : > { %p52_p4 = por %p51_p2, %p50_p1  ;;  %p57_p5 = scmp.eq.s32.totalorder %s21270_s13, 0 }
   0x9   : > { %p18532_p6 = scmp.lt.s32.totalorder %s21227_s12, 2  ;;  %s109_s19 = sand.u32 1, %s21223_s11  }
   0xa   : > { %p21287_p7 = por %p57_p5, %p56_p3  ;;  %s18523_s20 = smul.u32 13720, %s109_s19 }
   0xb   : > { %p21292_p8 = pnand %p18532_p6, %p52_p4  ;;  %s18533_s22 = smul.u32 219520, %s21227_s12 }
   0xc   : > { %s113_s23 = scalar_lea.vmem [#allocation2], %s18523_s20  ;;  %s21304_s28 = scalar_lea.sflag [#allocation3], %s109_s19 }
   0xd   : > { %s121_s24 = sshll.u32 %s113_s23, 4  ;;  %s21300_s27 = scalar_lea.hbm %s23388_s1, %s18533_s22  ;;  %s21302_s24 = int_to_ptr.vmem [resolvable:$true] %s121_s24 }
   0xe   : > { %s21163_s29 = scalar_lea.hbm %s21300_s27, 219520  ;;  %p21165_p10 = pneg %p21292_p8 }
   0xf   : > { %p21164_p9 = scmp.ne.s32.totalorder %s21300_s27, %s21163_s29  ;;  %s21168_s4 = scalar_lea.hbm %s23388_s1, 439040 }
  0x10   : > { %p21169_p13 = scmp.lt.u32.totalorder %s21300_s27, %s23388_s1  ;;  %p21170_p0 = scmp.lt.u32.totalorder %s21168_s4, %s21163_s29 }
  0x11   : > { %p21166_p11 = pnand %p21165_p10, %p21164_p9  ;;  %p21172_p2 = scmp.lt.u32.totalorder %s21163_s29, %s21300_s27 }
  0x12   : > { %p21171_p1 = por %p21170_p0, %p21169_p13 }
  0x13   : > { %p21167_p12 = pneg %p21166_p11 }
  0x14   : > { %p21173_p3 = por %p21172_p2, %p21171_p1 }
  0x16   : > { %p21174_p4 = pnand %p21173_p3, %p21167_p12 }
  0x18   : > { %21177 = shalt.err (!%p21174_p4)
}
  0x19   : > { %s21178_s7 = scalar_lea.vmem %s21302_s24, 219520  ;;  %s21229_s8 = smov [#allocation2]  }
  0x1a   : > { %p21179_p5 = scmp.ne.s32.totalorder %s21302_s24, %s21178_s7  ;;  %s21183_s9 = sshll.u32 %s21229_s8, 4  ;;  %s21184_s9 = int_to_ptr.vmem [resolvable:$false] %s21183_s9 }
  0x1b   : > { %s21185_s15 = scalar_lea.vmem %s21184_s9, 439040  ;;  %p21186_p11 = scmp.lt.s32.totalorder %s21302_s24, %s21184_s9 }
  0x1c   : > { %p21181_p6 = pnand %p21179_p5, %p21165_p10  ;;  %p21187_p13 = scmp.lt.s32.totalorder %s21185_s15, %s21178_s7 }
  0x1e   : > { %p21182_p9 = pneg %p21181_p6  ;;  %p21188_p0 = por %p21187_p13, %p21186_p11 }
  0x20   : > { %p21189_p1 = pnand %p21188_p0, %p21182_p9 }
  0x22   : > { %21192 = shalt.err (!%p21189_p1)
}
  0x23   : > { %s21230_s16 = smov 448   ;;  %s21231_s19 = smov 28  }
  0x24   : > { %18531 = dma.hbm_to_vmem [thread:$0]  (!%p21292_p8), %s21300_s27, 219520, %s21302_s24, %s21304_s28, %s21230_s16, %s21230_s16, %s21231_s19  }
  0x25   : > { %p14635_p10 = scmp.ge.s32.totalorder %s21227_s12, 1  ;;  %p129_p12 = scmp.lt.s32.totalorder %s21227_s12, 3 }
  0x27   : > { %p130_p2 = pnand %p14635_p10, %p129_p12 }
  0x28   : > { %s135_s20 = sand.u32 (!%p130_p2), 1, %s21219_s10  }
  0x29   : > { %133 = sbr.rel (%p130_p2) target bundleno = 2233 (0x8b9), region = 28  ;;  %s136_s23 = scalar_lea.sflag (!%p130_p2), [#allocation3], %s135_s20 }
  0x2a   : > { %s18525_s22 = smul.u32 (!%p130_p2), 13720, %s135_s20 }
  0x2c   : > { %s21335_s25 = scalar_lea.vmem (!%p130_p2), [#allocation2], %s18525_s22 }
  0x30   : > { %21210 = dma.done.wait (%p21287_p7), %s136_s23, 219520  }
  0x31   : > { %21212 = vsyncadd (%p21287_p7), %s136_s23, 4294747776  ;;  %v18572_v0 = vld [vmem:[%s21335_s25 + $0x4] ss:$28 sps:$4 sm:$0xff]   ;;  %v18578_v4 = vld [vmem:[%s21335_s25 + $0x3c] ss:$28 sps:$4 sm:$0xff]   ;;  %v563_v38 = vlaneseq  ;;  %vm2377_vm0 = vcmask 130048  }
  0x32   : > { %v18574_v1 = vld [vmem:[%s21335_s25 + $0x384] ss:$28 sps:$4 sm:$0xff]   ;;  %2381 = vmatprep.subr.bf16.mxu1 %v18572_v0  ;;  %v18580_v5 = vld [vmem:[%s21335_s25 + $0x3bc] ss:$28 sps:$4 sm:$0xff]   ;;  %v18584_v8 = vld [vmem:[%s21335_s25 + $0x74] ss:$28 sps:$4 sm:$0xff]  }
  0x33   : > { %v18576_v2 = vld [vmem:[%s21335_s25] ss:$28 sps:$4 sm:$0xff]   ;;  %2422 = vmatprep.subr.bf16.mxu0 %v18574_v1  ;;  %v18582_v6 = vld [vmem:[%s21335_s25 + $0x38] ss:$28 sps:$4 sm:$0xff]   ;;  %v18588_v10 = vld [vmem:[%s21335_s25 + $0x70] ss:$28 sps:$4 sm:$0xff]  }
  0x34   : > { %v18577_v3 = vld [vmem:[%s21335_s25 + $0x380] ss:$28 sps:$4 sm:$0xff]   ;;  %2382 = vmatpush1.bf16.msra.mxu1 %v18576_v2  ;;  %v18583_v7 = vld [vmem:[%s21335_s25 + $0x3b8] ss:$28 sps:$4 sm:$0xff]   ;;  %v18589_v11 = vld [vmem:[%s21335_s25 + $0x3f0] ss:$28 sps:$4 sm:$0xff]  }
  0x35   : > { %2423 = vmatpush1.bf16.msra.mxu0 %v18577_v3  ;;  %2383 = vmatprep.subr.bf16.mxu1 %v18578_v4  ;;  %v18586_v9 = vld [vmem:[%s21335_s25 + $0x3f4] ss:$28 sps:$4 sm:$0xff]   ;;  %v18590_v12 = vld [vmem:[%s21335_s25 + $0xac] ss:$28 sps:$4 sm:$0xff]   ;;  %v18596_v16 = vld [vmem:[%s21335_s25 + $0xe4] ss:$28 sps:$4 sm:$0xff]  }
  0x36   : > { %2424 = vmatprep.subr.bf16.mxu0 %v18580_v5  ;;  %v18592_v13 = vld [vmem:[%s21335_s25 + $0x42c] ss:$28 sps:$4 sm:$0xff]   ;;  %v18598_v17 = vld [vmem:[%s21335_s25 + $0x464] ss:$28 sps:$4 sm:$0xff]   ;;  %v18602_v20 = vld [vmem:[%s21335_s25 + $0x11c] ss:$28 sps:$4 sm:$0xff]  }
  0x37   : > { %v18594_v14 = vld [vmem:[%s21335_s25 + $0xa8] ss:$28 sps:$4 sm:$0xff]   ;;  %v18600_v18 = vld [vmem:[%s21335_s25 + $0xe0] ss:$28 sps:$4 sm:$0xff]   ;;  %v18606_v22 = vld [vmem:[%s21335_s25 + $0x118] ss:$28 sps:$4 sm:$0xff]  }
  0x38   : > { %2384 = vmatpush1.bf16.msra.mxu1 %v18582_v6  ;;  %v18595_v15 = vld [vmem:[%s21335_s25 + $0x428] ss:$28 sps:$4 sm:$0xff]   ;;  %v18601_v19 = vld [vmem:[%s21335_s25 + $0x460] ss:$28 sps:$4 sm:$0xff]   ;;  %v18607_v23 = vld [vmem:[%s21335_s25 + $0x498] ss:$28 sps:$4 sm:$0xff]  }
  0x39   : > { %2425 = vmatpush1.bf16.msra.mxu0 %v18583_v7  ;;  %2385 = vmatprep.subr.bf16.mxu1 %v18584_v8  ;;  %v18604_v21 = vld [vmem:[%s21335_s25 + $0x49c] ss:$28 sps:$4 sm:$0xff]   ;;  %v18608_v24 = vld [vmem:[%s21335_s25 + $0x154] ss:$28 sps:$4 sm:$0xff]   ;;  %v18614_v28 = vld [vmem:[%s21335_s25 + $0x18c] ss:$28 sps:$4 sm:$0xff]  }
  0x3a   : > { %2426 = vmatprep.subr.bf16.mxu0 %v18586_v9  ;;  %v18610_v25 = vld [vmem:[%s21335_s25 + $0x4d4] ss:$28 sps:$4 sm:$0xff]   ;;  %v18616_v29 = vld [vmem:[%s21335_s25 + $0x50c] ss:$28 sps:$4 sm:$0xff]   ;;  %v18620_v32 = vld [vmem:[%s21335_s25 + $0x1c4] ss:$28 sps:$4 sm:$0xff]  }
  0x3b   : > { %v18612_v26 = vld [vmem:[%s21335_s25 + $0x150] ss:$28 sps:$4 sm:$0xff]   ;;  %v18618_v30 = vld [vmem:[%s21335_s25 + $0x188] ss:$28 sps:$4 sm:$0xff]   ;;  %v18624_v34 = vld [vmem:[%s21335_s25 + $0x1c0] ss:$28 sps:$4 sm:$0xff]  }
  0x3c   : > { %2386 = vmatpush1.bf16.msra.mxu1 %v18588_v10  ;;  %v18613_v27 = vld [vmem:[%s21335_s25 + $0x4d0] ss:$28 sps:$4 sm:$0xff]   ;;  %v18619_v31 = vld [vmem:[%s21335_s25 + $0x508] ss:$28 sps:$4 sm:$0xff]   ;;  %v18625_v35 = vld [vmem:[%s21335_s25 + $0x540] ss:$28 sps:$4 sm:$0xff]  }
  0x3d   : > { %2427 = vmatpush1.bf16.msra.mxu0 %v18589_v11  ;;  %2387 = vmatprep.subr.bf16.mxu1 %v18590_v12  ;;  %v18622_v33 = vld [vmem:[%s21335_s25 + $0x544] ss:$28 sps:$4 sm:$0xff]   ;;  %v21232_v36 = vmov 1966171168   ;;  %v18626_v39 = vld [vmem:[%s21335_s25 + $0x1fc] ss:$28 sps:$4 sm:$0xff]  }
  0x3e   : > { %2428 = vmatprep.subr.bf16.mxu0 %v18592_v13  ;;  %v561_v37 = vunpack.c.l.s4 %v21232_v36  ;;  %v18628_v40 = vld [vmem:[%s21335_s25 + $0x57c] ss:$28 sps:$4 sm:$0xff]   ;;  %v564_v43 = vshrl.u32 %v563_v38, 7  ;;  %v18632_v45 = vld [vmem:[%s21335_s25 + $0x234] ss:$28 sps:$4 sm:$0xff]   ;;  %vm21235_vm1 = vmmov 0  }
  0x3f   : > { %v18630_v41 = vld [vmem:[%s21335_s25 + $0x1f8] ss:$28 sps:$4 sm:$0xff]   ;;  %v18636_v47 = vld [vmem:[%s21335_s25 + $0x230] ss:$28 sps:$4 sm:$0xff]   ;;  %v18642_v53 = vld [vmem:[%s21335_s25 + $0x268] ss:$28 sps:$4 sm:$0xff]  }
  0x40   : > { %2388 = vmatpush1.bf16.msra.mxu1 %v18594_v14  ;;  %v562_v42 = vunpack.c.0.s8 %v561_v37  ;;  %v18631_v44 = vld [vmem:[%s21335_s25 + $0x578] ss:$28 sps:$4 sm:$0xff]   ;;  %v18637_v48 = vld [vmem:[%s21335_s25 + $0x5b0] ss:$28 sps:$4 sm:$0xff]   ;;  %v18643_v56 = vld [vmem:[%s21335_s25 + $0x5e8] ss:$28 sps:$4 sm:$0xff]  }
  0x41   : > { %2429 = vmatpush1.bf16.msra.mxu0 %v18595_v15  ;;  %2389 = vmatprep.subr.bf16.mxu1 %v18596_v16  ;;  %v18634_v46 = vld [vmem:[%s21335_s25 + $0x5b4] ss:$28 sps:$4 sm:$0xff]   ;;  %v18638_v50 = vld [vmem:[%s21335_s25 + $0x26c] ss:$28 sps:$4 sm:$0xff]   ;;  %v18644_v57 = vld [vmem:[%s21335_s25 + $0x2a4] ss:$28 sps:$4 sm:$0xff]  }
  0x42   : > { %2430 = vmatprep.subr.bf16.mxu0 %v18598_v17  ;;  %v21385_v49 = vsub.s32 %v562_v42, %v564_v43  ;;  %v18640_v51 = vld [vmem:[%s21335_s25 + $0x5ec] ss:$28 sps:$4 sm:$0xff]   ;;  %v18646_v58 = vld [vmem:[%s21335_s25 + $0x624] ss:$28 sps:$4 sm:$0xff]   ;;  %v18650_v1 = vld [vmem:[%s21335_s25 + $0x2dc] ss:$28 sps:$4 sm:$0xff]  }
  0x43   : > { %v165_v52 = vld [vmem:[%s23387_s0] sm:$0x7f]  ;;  %v18652_v2 = vld [vmem:[%s21335_s25 + $0x65c] ss:$28 sps:$4 sm:$0xff]   ;;  %v18656_v6 = vld [vmem:[%s21335_s25 + $0x314] ss:$28 sps:$4 sm:$0xff]  }
  0x44   : > { %2390 = vmatpush1.bf16.msra.mxu1 %v18600_v18  ;;  %v566_v54 = vrot.slane %v165_v52, %v21385_v49  ;;  %v559_v55 = vcombine.high %v165_v52, %v165_v52  ;;  %v18648_v61 = vld [vmem:[%s21335_s25 + $0x2a0] ss:$28 sps:$4 sm:$0xff]   ;;  %v18654_v4 = vld [vmem:[%s21335_s25 + $0x2d8] ss:$28 sps:$4 sm:$0xff]   ;;  %v18660_v8 = vld [vmem:[%s21335_s25 + $0x310] ss:$28 sps:$4 sm:$0xff]  }
  0x45   : > { %2431 = vmatpush1.bf16.msra.mxu0 %v18601_v19  ;;  %2391 = vmatprep.subr.bf16.mxu1 %v18602_v20  ;;  %v18649_v0 = vld [vmem:[%s21335_s25 + $0x620] ss:$28 sps:$4 sm:$0xff]   ;;  %v18655_v5 = vld [vmem:[%s21335_s25 + $0x658] ss:$28 sps:$4 sm:$0xff]   ;;  %v18661_v9 = vld [vmem:[%s21335_s25 + $0x690] ss:$28 sps:$4 sm:$0xff]  }
  0x46   : > { %2432 = vmatprep.subr.bf16.mxu0 %v18604_v21  ;;  %v574_v59 = vcombine.high %v566_v54, %v566_v54  ;;  %v573_v60 = vrot.slane %v559_v55, %v21385_v49  ;;  %v18658_v7 = vld [vmem:[%s21335_s25 + $0x694] ss:$28 sps:$4 sm:$0xff]   ;;  %v18662_v10 = vld [vmem:[%s21335_s25 + $0x34c] ss:$28 sps:$4 sm:$0xff]   ;;  %v21424_v13 = vrot.slane %v566_v54, %v21385_v49  ;;  %v18670_v15 = vld [vmem:[%s21335_s25 + $0x704] ss:$28 sps:$4 sm:$0xff]  }
  0x47   : > { %v18664_v11 = vld [vmem:[%s21335_s25 + $0x6cc] ss:$28 sps:$4 sm:$0xff]   ;;  %v18668_v18 = vld [vmem:[%s21335_s25 + $0x700] ss:$28 sps:$4 sm:$0xff]   ;;  %v18706_v42 = vld [vmem:[%s21335_s25 + $0x854] ss:$28 sps:$4 sm:$0xff]  }
  0x48   : > { %2392 = vmatpush1.bf16.msra.mxu1 %v18606_v22  ;;  %v21400_v62 = vrot.slane %v574_v59, %v21385_v49  ;;  %v21403_v63 = vrot.slane %v573_v60, %v21385_v49  ;;  %v18666_v12 = vld [vmem:[%s21335_s25 + $0x348] ss:$28 sps:$4 sm:$0xff]   ;;  %v575_v17 = vcombine.high %v573_v60, %v573_v60  ;;  %v21432_v19 = vcombine.high %v21424_v13, %v21424_v13  ;;  %v18676_v21 = vld [vmem:[%s21335_s25 + $0x73c] ss:$28 sps:$4 sm:$0xff]   ;;  %v18728_v60 = vld [vmem:[%s21335_s25 + $0x930] ss:$28 sps:$4 sm:$0xff]  }
  0x49   : > { %2433 = vmatpush1.bf16.msra.mxu0 %v18607_v23  ;;  %2393 = vmatprep.subr.bf16.mxu1 %v18608_v24  ;;  %v18667_v14 = vld [vmem:[%s21335_s25 + $0x6c8] ss:$28 sps:$4 sm:$0xff]   ;;  %v18674_v24 = vld [vmem:[%s21335_s25 + $0x738] ss:$28 sps:$4 sm:$0xff]   ;;  %v18692_v36 = vld [vmem:[%s21335_s25 + $0x7e0] ss:$28 sps:$4 sm:$0xff]  }
  0x4a   : > { %2434 = vmatprep.subr.bf16.mxu0 %v18610_v25  ;;  %v21410_v3 = vcombine.high %v21400_v62, %v21400_v62  ;;  %2413 = vmatprep.mubr.bf16.mxu1 %v21400_v62  ;;  %v18673_v16 = vld [vmem:[%s21335_s25 + $0xc] ss:$28 sps:$4 sm:$0xff]   ;;  %v18679_v22 = vld [vmem:[%s21335_s25 + $0x44] ss:$28 sps:$4 sm:$0xff]   ;;  %v21438_v23 = vrot.slane %v575_v17, %v21385_v49  ;;  %v18700_v38 = vld [vmem:[%s21335_s25 + $0x81c] ss:$28 sps:$4 sm:$0xff]  }
  0x4b   : > { %v18671_v20 = vld [vmem:[%s21335_s25 + $0x8] ss:$28 sps:$4 sm:$0xff]   ;;  %v18677_v25 = vld [vmem:[%s21335_s25 + $0x40] ss:$28 sps:$4 sm:$0xff]   ;;  %v18713_v49 = vld [vmem:[%s21335_s25 + $0x190] ss:$28 sps:$4 sm:$0xff]  }
  0x4c   : > { %2394 = vmatpush1.bf16.msra.mxu1 %v18612_v26  ;;  %2454 = vmatprep.mubr.bf16.mxu0 %v21410_v3  ;;  %v18682_v26 = vld [vmem:[%s21335_s25 + $0x774] ss:$28 sps:$4 sm:$0xff]   ;;  %v18695_v37 = vld [vmem:[%s21335_s25 + $0xe8] ss:$28 sps:$4 sm:$0xff]   ;;  %v18709_v43 = vld [vmem:[%s21335_s25 + $0x15c] ss:$28 sps:$4 sm:$0xff]  }
  0x4d   : > { %2435 = vmatpush1.bf16.msra.mxu0 %v18613_v27  ;;  %2395 = vmatprep.subr.bf16.mxu1 %v18614_v28  ;;  %v18685_v27 = vld [vmem:[%s21335_s25 + $0x7c] ss:$28 sps:$4 sm:$0xff]   ;;  %v18680_v28 = vld [vmem:[%s21335_s25 + $0x770] ss:$28 sps:$4 sm:$0xff]   ;;  %v18727_v55 = vld [vmem:[%s21335_s25 + $0x204] ss:$28 sps:$4 sm:$0xff]  }
  0x4e   : > { %2436 = vmatprep.subr.bf16.mxu0 %v18616_v29  ;;  %v18683_v29 = vld [vmem:[%s21335_s25 + $0x78] ss:$28 sps:$4 sm:$0xff]   ;;  %v18716_v52 = vld [vmem:[%s21335_s25 + $0x8c0] ss:$28 sps:$4 sm:$0xff]   ;;  %vm3075_vm2 = vcmask 1041408   ;;  %vm3087_vm3 = vcmask 123904  }
  0x4f   : > { %v18724_v54 = vld [vmem:[%s21335_s25 + $0x8fc] ss:$28 sps:$4 sm:$0xff]   ;;  %p160_p7 = scmp.lt.s32.totalorder %s21270_s13, 1  ;;  %vm14556_vm4 = vcmask 7168   ;;  %vm14558_vm5 = vcmask 15360   ;;  %vm14560_vm6 = vcmask 23552  }
  0x50   : > { %2396 = vmatpush1.bf16.msra.mxu1 %v18618_v30  ;;  %v18688_v30 = vld [vmem:[%s21335_s25 + $0x7ac] ss:$28 sps:$4 sm:$0xff]   ;;  %v18733_v59 = vld [vmem:[%s21335_s25 + $0x23c] ss:$28 sps:$4 sm:$0xff]   ;;  %vm14562_vm7 = vcmask 31744   ;;  %vm14564_vm8 = vcmask 33792  }
  0x51   : > { %2437 = vmatpush1.bf16.msra.mxu0 %v18619_v31  ;;  %2397 = vmatprep.subr.bf16.mxu1 %v18620_v32  ;;  %v18691_v31 = vld [vmem:[%s21335_s25 + $0xb4] ss:$28 sps:$4 sm:$0xff]   ;;  %v18686_v32 = vld [vmem:[%s21335_s25 + $0x7a8] ss:$28 sps:$4 sm:$0xff]   ;;  %s23397_s13 = smov (!%p160_p7, %s21270_s13), 1 }
  0x52   : > { %2438 = vmatprep.subr.bf16.mxu0 %v18622_v33  ;;  %v18689_v33 = vld [vmem:[%s21335_s25 + $0xb0] ss:$28 sps:$4 sm:$0xff]   ;;  %v18755_v17 = vld [vmem:[%s21335_s25 + $0x318] ss:$28 sps:$4 sm:$0xff]   ;;  %s14636_s21 = sshll.u32 %s23397_s13, 1 }
  0x53   : > { %s163_s27 = scalar_lea.vmem %s23389_s2, %s14636_s21 }
  0x54   : > { %2398 = vmatpush1.bf16.msra.mxu1 %v18624_v34  ;;  %v18694_v34 = vld [vmem:[%s21335_s25 + $0x7e4] ss:$28 sps:$4 sm:$0xff]  }
  0x55   : > { %2439 = vmatpush1.bf16.msra.mxu0 %v18625_v35  ;;  %2399 = vmatprep.subr.bf16.mxu1 %v18626_v39  ;;  %v18697_v35 = vld [vmem:[%s21335_s25 + $0xec] ss:$28 sps:$4 sm:$0xff]   ;;  %v18703_v39 = vld [vmem:[%s21335_s25 + $0x124] ss:$28 sps:$4 sm:$0xff]  }
  0x56   : > { %2440 = vmatprep.subr.bf16.mxu0 %v18628_v40  ;;  %v18698_v40 = vld [vmem:[%s21335_s25 + $0x818] ss:$28 sps:$4 sm:$0xff]  }
  0x58   : > { %2400 = vmatpush1.bf16.msra.mxu1 %v18630_v41  ;;  %v18701_v41 = vld [vmem:[%s21335_s25 + $0x120] ss:$28 sps:$4 sm:$0xff]  }
  0x59   : > { %2441 = vmatpush1.bf16.msra.mxu0 %v18631_v44  ;;  %2401 = vmatprep.subr.bf16.mxu1 %v18632_v45  ;;  %v18704_v44 = vld [vmem:[%s21335_s25 + $0x850] ss:$28 sps:$4 sm:$0xff]   ;;  %v18707_v45 = vld [vmem:[%s21335_s25 + $0x158] ss:$28 sps:$4 sm:$0xff]  }
  0x5a   : > { %2442 = vmatprep.subr.bf16.mxu0 %v18634_v46  ;;  %v18712_v46 = vld [vmem:[%s21335_s25 + $0x88c] ss:$28 sps:$4 sm:$0xff]  }
  0x5c   : > { %2402 = vmatpush1.bf16.msra.mxu1 %v18636_v47  ;;  %v18715_v47 = vld [vmem:[%s21335_s25 + $0x194] ss:$28 sps:$4 sm:$0xff]  }
  0x5d   : > { %2443 = vmatpush1.bf16.msra.mxu0 %v18637_v48  ;;  %2403 = vmatprep.subr.bf16.mxu1 %v18638_v50  ;;  %v18710_v48 = vld [vmem:[%s21335_s25 + $0x888] ss:$28 sps:$4 sm:$0xff]  }
  0x5e   : > { %2444 = vmatprep.subr.bf16.mxu0 %v18640_v51  ;;  %v18718_v50 = vld [vmem:[%s21335_s25 + $0x8c4] ss:$28 sps:$4 sm:$0xff]   ;;  %v18721_v51 = vld [vmem:[%s21335_s25 + $0x1cc] ss:$28 sps:$4 sm:$0xff]  }
  0x60   : > { %2404 = vmatpush1.bf16.msra.mxu1 %v18642_v53  ;;  %v18719_v53 = vld [vmem:[%s21335_s25 + $0x1c8] ss:$28 sps:$4 sm:$0xff]  }
  0x61   : > { %2445 = vmatpush1.bf16.msra.mxu0 %v18643_v56  ;;  %2405 = vmatprep.subr.bf16.mxu1 %v18644_v57  ;;  %v18722_v56 = vld [vmem:[%s21335_s25 + $0x8f8] ss:$28 sps:$4 sm:$0xff]   ;;  %v18725_v57 = vld [vmem:[%s21335_s25 + $0x200] ss:$28 sps:$4 sm:$0xff]  }
  0x62   : > { %2446 = vmatprep.subr.bf16.mxu0 %v18646_v58  ;;  %v18730_v58 = vld [vmem:[%s21335_s25 + $0x934] ss:$28 sps:$4 sm:$0xff]  }
  0x64   : > { %2406 = vmatpush1.bf16.msra.mxu1 %v18648_v61  ;;  %v18731_v61 = vld [vmem:[%s21335_s25 + $0x238] ss:$28 sps:$4 sm:$0xff]  }
  0x65   : > { %2447 = vmatpush1.bf16.msra.mxu0 %v18649_v0  ;;  %2407 = vmatprep.subr.bf16.mxu1 %v18650_v1  ;;  %v18736_v0 = vld [vmem:[%s21335_s25 + $0x96c] ss:$28 sps:$4 sm:$0xff]   ;;  %v18739_v1 = vld [vmem:[%s21335_s25 + $0x274] ss:$28 sps:$4 sm:$0xff]  }
  0x66   : > { %2448 = vmatprep.subr.bf16.mxu0 %v18652_v2  ;;  %v18734_v2 = vld [vmem:[%s21335_s25 + $0x968] ss:$28 sps:$4 sm:$0xff]  }
  0x68   : > { %2408 = vmatpush1.bf16.msra.mxu1 %v18654_v4  ;;  %v18737_v4 = vld [vmem:[%s21335_s25 + $0x270] ss:$28 sps:$4 sm:$0xff]  }
  0x69   : > { %2449 = vmatpush1.bf16.msra.mxu0 %v18655_v5  ;;  %2409 = vmatprep.subr.bf16.mxu1 %v18656_v6  ;;  %v18742_v5 = vld [vmem:[%s21335_s25 + $0x9a4] ss:$28 sps:$4 sm:$0xff]   ;;  %v18745_v6 = vld [vmem:[%s21335_s25 + $0x2ac] ss:$28 sps:$4 sm:$0xff]  }
  0x6a   : > { %2450 = vmatprep.subr.bf16.mxu0 %v18658_v7  ;;  %v18740_v7 = vld [vmem:[%s21335_s25 + $0x9a0] ss:$28 sps:$4 sm:$0xff]  }
  0x6c   : > { %2410 = vmatpush1.bf16.msra.mxu1 %v18660_v8  ;;  %v18743_v8 = vld [vmem:[%s21335_s25 + $0x2a8] ss:$28 sps:$4 sm:$0xff]  }
  0x6d   : > { %2451 = vmatpush1.bf16.msra.mxu0 %v18661_v9  ;;  %2411 = vmatprep.subr.bf16.mxu1 %v18662_v10  ;;  %v18748_v9 = vld [vmem:[%s21335_s25 + $0x9dc] ss:$28 sps:$4 sm:$0xff]   ;;  %v18751_v10 = vld [vmem:[%s21335_s25 + $0x2e4] ss:$28 sps:$4 sm:$0xff]  }
  0x6e   : > { %2452 = vmatprep.subr.bf16.mxu0 %v18664_v11  ;;  %v18746_v11 = vld [vmem:[%s21335_s25 + $0x9d8] ss:$28 sps:$4 sm:$0xff]  }
  0x70   : > { %2412 = vmatpush1.bf16.msra.mxu1 %v18666_v12  ;;  %v18749_v12 = vld [vmem:[%s21335_s25 + $0x2e0] ss:$28 sps:$4 sm:$0xff]  }
  0x71   : > { %2453 = vmatpush1.bf16.msra.mxu0 %v18667_v14  ;;  %2545 = vmatprep.subr.bf16.mxu1 %v18673_v16  ;;  %v18754_v14 = vld [vmem:[%s21335_s25 + $0xa14] ss:$28 sps:$4 sm:$0xff]  }
  0x72   : > { %2463 = vmatprep.subr.bf16.mxu0 %v18670_v15  ;;  %v18757_v15 = vld [vmem:[%s21335_s25 + $0x31c] ss:$28 sps:$4 sm:$0xff]   ;;  %v18752_v16 = vld [vmem:[%s21335_s25 + $0xa10] ss:$28 sps:$4 sm:$0xff]  }
  0x73   : > { %2414 = vmatmul.mubr.bf16.vlgmr.msra.gmra.mrb[0].mxu1 %v21424_v13 }
  0x74   : > { %2455 = vmatmul.mubr.bf16.vlgmr.msra.gmra.mrb[0].mxu0 %v21432_v19  ;;  %2546 = vmatpush1.bf16.msra.mxu1 %v18671_v20  ;;  %v18763_v20 = vld [vmem:[%s21335_s25 + $0x354] ss:$28 sps:$4 sm:$0xff]  }
  0x75   : > { %2464 = vmatpush1.bf16.msra.mxu0 %v18668_v18  ;;  %2547 = vmatprep.subr.bf16.mxu1 %v18679_v22  ;;  %v18760_v18 = vld [vmem:[%s21335_s25 + $0xa4c] ss:$28 sps:$4 sm:$0xff]  }
  0x76   : > { %2465 = vmatprep.subr.bf16.mxu0 %v18676_v21  ;;  %2495 = vmatprep.mubr.bf16.mxu0 %v21438_v23  ;;  %v18758_v21 = vld [vmem:[%s21335_s25 + $0xa48] ss:$28 sps:$4 sm:$0xff]   ;;  %v18761_v22 = vld [vmem:[%s21335_s25 + $0x350] ss:$28 sps:$4 sm:$0xff]  }
  0x77   : > { %2577 = vmatprep.mubr.bf16.mxu1 %v21400_v62 }
  0x78   : > { %2548 = vmatpush1.bf16.msra.mxu1 %v18677_v25  ;;  %v18770_v25 = vld [vmem:[%s21335_s25 + $0x38c] ss:$28 sps:$4 sm:$0xff]  }
  0x79   : > { %2466 = vmatpush1.bf16.msra.mxu0 %v18674_v24  ;;  %2549 = vmatprep.subr.bf16.mxu1 %v18685_v27  ;;  %v18767_v24 = vld [vmem:[%s21335_s25 + $0xa84] ss:$28 sps:$4 sm:$0xff]  }
  0x7a   : > { %2467 = vmatprep.subr.bf16.mxu0 %v18682_v26  ;;  %v18765_v26 = vld [vmem:[%s21335_s25 + $0xa80] ss:$28 sps:$4 sm:$0xff]   ;;  %v18768_v27 = vld [vmem:[%s21335_s25 + $0x388] ss:$28 sps:$4 sm:$0xff]  }
  0x7c   : > { %2550 = vmatpush1.bf16.msra.mxu1 %v18683_v29  ;;  %v18782_v29 = vld [vmem:[%s21335_s25 + $0xa8c] ss:$28 sps:$4 sm:$0xff]  }
  0x7d   : > { %2468 = vmatpush1.bf16.msra.mxu0 %v18680_v28  ;;  %2551 = vmatprep.subr.bf16.mxu1 %v18691_v31  ;;  %v18773_v28 = vld [vmem:[%s21335_s25 + $0x3c4] ss:$28 sps:$4 sm:$0xff]   ;;  %v18776_v31 = vld [vmem:[%s21335_s25 + $0x3fc] ss:$28 sps:$4 sm:$0xff]  }
  0x7e   : > { %2469 = vmatprep.subr.bf16.mxu0 %v18688_v30  ;;  %v18771_v30 = vld [vmem:[%s21335_s25 + $0x3c0] ss:$28 sps:$4 sm:$0xff]  }
  0x80   : > { %2552 = vmatpush1.bf16.msra.mxu1 %v18689_v33  ;;  %v18774_v33 = vld [vmem:[%s21335_s25 + $0x3f8] ss:$28 sps:$4 sm:$0xff]  }
  0x81   : > { %2470 = vmatpush1.bf16.msra.mxu0 %v18686_v32  ;;  %2553 = vmatprep.subr.bf16.mxu1 %v18697_v35  ;;  %v21233_v32 = vmov 0   ;;  %v21518_v35 = vcombine.high %v21403_v63, %v21403_v63 }
  0x82   : > { %2471 = vmatprep.subr.bf16.mxu0 %v18694_v34  ;;  %v18779_v34 = vld [vmem:[%s21335_s25 + $0x434] ss:$28 sps:$4 sm:$0xff]  }
  0x84   : > { %2554 = vmatpush1.bf16.msra.mxu1 %v18695_v37  ;;  %v18780_v37 = vld [vmem:[%s21335_s25 + $0xa88] ss:$28 sps:$4 sm:$0xff]  }
  0x85   : > { %2472 = vmatpush1.bf16.msra.mxu0 %v18692_v36  ;;  %2555 = vmatprep.subr.bf16.mxu1 %v18703_v39  ;;  %v18777_v36 = vld [vmem:[%s21335_s25 + $0x430] ss:$28 sps:$4 sm:$0xff]  }
  0x86   : > { %2473 = vmatprep.subr.bf16.mxu0 %v18700_v38  ;;  %v18785_v38 = vld [vmem:[%s21335_s25 + $0x46c] ss:$28 sps:$4 sm:$0xff]   ;;  %v18788_v39 = vld [vmem:[%s21335_s25 + $0x14] ss:$28 sps:$4 sm:$0xff]  }
  0x88   : > { %2556 = vmatpush1.bf16.msra.mxu1 %v18701_v41  ;;  %v18791_v41 = vld [vmem:[%s21335_s25 + $0x4a4] ss:$28 sps:$4 sm:$0xff]  }
  0x89   : > { %2474 = vmatpush1.bf16.msra.mxu0 %v18698_v40  ;;  %2557 = vmatprep.subr.bf16.mxu1 %v18709_v43  ;;  %v18783_v40 = vld [vmem:[%s21335_s25 + $0x468] ss:$28 sps:$4 sm:$0xff]   ;;  %v18789_v43 = vld [vmem:[%s21335_s25 + $0x4a0] ss:$28 sps:$4 sm:$0xff]  }
  0x8a   : > { %2475 = vmatprep.subr.bf16.mxu0 %v18706_v42  ;;  %v18786_v42 = vld [vmem:[%s21335_s25 + $0x10] ss:$28 sps:$4 sm:$0xff]  }
  0x8c   : > { %2558 = vmatpush1.bf16.msra.mxu1 %v18707_v45  ;;  %v18797_v45 = vld [vmem:[%s21335_s25 + $0x4dc] ss:$28 sps:$4 sm:$0xff]  }
  0x8d   : > { %2476 = vmatpush1.bf16.msra.mxu0 %v18704_v44  ;;  %2559 = vmatprep.subr.bf16.mxu1 %v18715_v47  ;;  %v18794_v44 = vld [vmem:[%s21335_s25 + $0x4c] ss:$28 sps:$4 sm:$0xff]   ;;  %v18795_v47 = vld [vmem:[%s21335_s25 + $0x4d8] ss:$28 sps:$4 sm:$0xff]  }
  0x8e   : > { %2477 = vmatprep.subr.bf16.mxu0 %v18712_v46  ;;  %v18792_v46 = vld [vmem:[%s21335_s25 + $0x48] ss:$28 sps:$4 sm:$0xff]  }
  0x90   : > { %2560 = vmatpush1.bf16.msra.mxu1 %v18713_v49  ;;  %v18803_v49 = vld [vmem:[%s21335_s25 + $0x514] ss:$28 sps:$4 sm:$0xff]  }
  0x91   : > { %2478 = vmatpush1.bf16.msra.mxu0 %v18710_v48  ;;  %2561 = vmatprep.subr.bf16.mxu1 %v18721_v51  ;;  %v18800_v48 = vld [vmem:[%s21335_s25 + $0x84] ss:$28 sps:$4 sm:$0xff]   ;;  %v18801_v51 = vld [vmem:[%s21335_s25 + $0x510] ss:$28 sps:$4 sm:$0xff]  }
  0x92   : > { %2479 = vmatprep.subr.bf16.mxu0 %v18718_v50  ;;  %v18798_v50 = vld [vmem:[%s21335_s25 + $0x80] ss:$28 sps:$4 sm:$0xff]  }
  0x94   : > { %2562 = vmatpush1.bf16.msra.mxu1 %v18719_v53  ;;  %v18809_v53 = vld [vmem:[%s21335_s25 + $0x54c] ss:$28 sps:$4 sm:$0xff]  }
  0x95   : > { %2480 = vmatpush1.bf16.msra.mxu0 %v18716_v52  ;;  %2563 = vmatprep.subr.bf16.mxu1 %v18727_v55  ;;  %v18806_v52 = vld [vmem:[%s21335_s25 + $0xbc] ss:$28 sps:$4 sm:$0xff]   ;;  %v18807_v55 = vld [vmem:[%s21335_s25 + $0x548] ss:$28 sps:$4 sm:$0xff]  }
  0x96   : > { %2481 = vmatprep.subr.bf16.mxu0 %v18724_v54  ;;  %v18804_v54 = vld [vmem:[%s21335_s25 + $0xb8] ss:$28 sps:$4 sm:$0xff]  }
  0x98   : > { %2564 = vmatpush1.bf16.msra.mxu1 %v18725_v57  ;;  %v18815_v57 = vld [vmem:[%s21335_s25 + $0x584] ss:$28 sps:$4 sm:$0xff]  }
  0x99   : > { %2482 = vmatpush1.bf16.msra.mxu0 %v18722_v56  ;;  %2565 = vmatprep.subr.bf16.mxu1 %v18733_v59  ;;  %v18812_v56 = vld [vmem:[%s21335_s25 + $0xf4] ss:$28 sps:$4 sm:$0xff]   ;;  %v18813_v59 = vld [vmem:[%s21335_s25 + $0x580] ss:$28 sps:$4 sm:$0xff]  }
  0x9a   : > { %2483 = vmatprep.subr.bf16.mxu0 %v18730_v58  ;;  %v18810_v58 = vld [vmem:[%s21335_s25 + $0xf0] ss:$28 sps:$4 sm:$0xff]  }
  0x9c   : > { %2566 = vmatpush1.bf16.msra.mxu1 %v18731_v61  ;;  %v18821_v61 = vld [vmem:[%s21335_s25 + $0x5bc] ss:$28 sps:$4 sm:$0xff]  }
  0x9d   : > { %2484 = vmatpush1.bf16.msra.mxu0 %v18728_v60  ;;  %2567 = vmatprep.subr.bf16.mxu1 %v18739_v1  ;;  %v18818_v60 = vld [vmem:[%s21335_s25 + $0x12c] ss:$28 sps:$4 sm:$0xff]   ;;  %v18819_v1 = vld [vmem:[%s21335_s25 + $0x5b8] ss:$28 sps:$4 sm:$0xff]  }
  0x9e   : > { %2485 = vmatprep.subr.bf16.mxu0 %v18736_v0  ;;  %v18816_v0 = vld [vmem:[%s21335_s25 + $0x128] ss:$28 sps:$4 sm:$0xff]  }
  0xa0   : > { %2568 = vmatpush1.bf16.msra.mxu1 %v18737_v4  ;;  %v18827_v4 = vld [vmem:[%s21335_s25 + $0x5f4] ss:$28 sps:$4 sm:$0xff]  }
  0xa1   : > { %2486 = vmatpush1.bf16.msra.mxu0 %v18734_v2  ;;  %2569 = vmatprep.subr.bf16.mxu1 %v18745_v6  ;;  %v18824_v2 = vld [vmem:[%s21335_s25 + $0x164] ss:$28 sps:$4 sm:$0xff]   ;;  %v18825_v6 = vld [vmem:[%s21335_s25 + $0x5f0] ss:$28 sps:$4 sm:$0xff]  }
  0xa2   : > { %2487 = vmatprep.subr.bf16.mxu0 %v18742_v5  ;;  %v18822_v5 = vld [vmem:[%s21335_s25 + $0x160] ss:$28 sps:$4 sm:$0xff]  }
  0xa4   : > { %2570 = vmatpush1.bf16.msra.mxu1 %v18743_v8  ;;  %v18833_v8 = vld [vmem:[%s21335_s25 + $0x62c] ss:$28 sps:$4 sm:$0xff]  }
  0xa5   : > { %2488 = vmatpush1.bf16.msra.mxu0 %v18740_v7  ;;  %2571 = vmatprep.subr.bf16.mxu1 %v18751_v10  ;;  %v18830_v7 = vld [vmem:[%s21335_s25 + $0x19c] ss:$28 sps:$4 sm:$0xff]   ;;  %v18831_v10 = vld [vmem:[%s21335_s25 + $0x628] ss:$28 sps:$4 sm:$0xff]  }
  0xa6   : > { %2489 = vmatprep.subr.bf16.mxu0 %v18748_v9  ;;  %v18828_v9 = vld [vmem:[%s21335_s25 + $0x198] ss:$28 sps:$4 sm:$0xff]  }
  0xa8   : > { %2572 = vmatpush1.bf16.msra.mxu1 %v18749_v12  ;;  %v18839_v12 = vld [vmem:[%s21335_s25 + $0x664] ss:$28 sps:$4 sm:$0xff]  }
  0xa9   : > { %2490 = vmatpush1.bf16.msra.mxu0 %v18746_v11  ;;  %2573 = vmatprep.subr.bf16.mxu1 %v18757_v15  ;;  %v18836_v11 = vld [vmem:[%s21335_s25 + $0x1d4] ss:$28 sps:$4 sm:$0xff]   ;;  %v18837_v15 = vld [vmem:[%s21335_s25 + $0x660] ss:$28 sps:$4 sm:$0xff]  }
  0xaa   : > { %2491 = vmatprep.subr.bf16.mxu0 %v18754_v14  ;;  %v18834_v14 = vld [vmem:[%s21335_s25 + $0x1d0] ss:$28 sps:$4 sm:$0xff]  }
  0xac   : > { %2574 = vmatpush1.bf16.msra.mxu1 %v18755_v17  ;;  %v18845_v17 = vld [vmem:[%s21335_s25 + $0x69c] ss:$28 sps:$4 sm:$0xff]  }
  0xad   : > { %2492 = vmatpush1.bf16.msra.mxu0 %v18752_v16  ;;  %2575 = vmatprep.subr.bf16.mxu1 %v18763_v20  ;;  %v18842_v16 = vld [vmem:[%s21335_s25 + $0x20c] ss:$28 sps:$4 sm:$0xff]   ;;  %v18843_v20 = vld [vmem:[%s21335_s25 + $0x698] ss:$28 sps:$4 sm:$0xff]  }
  0xae   : > { %2493 = vmatprep.subr.bf16.mxu0 %v18760_v18  ;;  %v18840_v18 = vld [vmem:[%s21335_s25 + $0x208] ss:$28 sps:$4 sm:$0xff]  }
  0xb0   : > { %2576 = vmatpush1.bf16.msra.mxu1 %v18761_v22  ;;  %v18851_v22 = vld [vmem:[%s21335_s25 + $0x6d4] ss:$28 sps:$4 sm:$0xff]  }
  0xb1   : > { %2494 = vmatpush1.bf16.msra.mxu0 %v18758_v21  ;;  %2586 = vmatprep.subr.bf16.mxu1 %v18770_v25  ;;  %v18848_v21 = vld [vmem:[%s21335_s25 + $0x244] ss:$28 sps:$4 sm:$0xff]   ;;  %v18849_v25 = vld [vmem:[%s21335_s25 + $0x6d0] ss:$28 sps:$4 sm:$0xff]  }
  0xb2   : > { %2504 = vmatprep.subr.bf16.mxu0 %v18767_v24  ;;  %v18846_v24 = vld [vmem:[%s21335_s25 + $0x240] ss:$28 sps:$4 sm:$0xff]  }
  0xb3   : > { %2578 = vmatmul.mubr.bf16.vlgmr.msra.gmra.mrb[4].mxu1 %v21424_v13 }
  0xb4   : > { %2496 = vmatmul.mubr.bf16.vlgmr.msra.gmra.mrb[0].mxu0 %v21403_v63  ;;  %2587 = vmatpush1.bf16.msra.mxu1 %v18768_v27  ;;  %v18857_v27 = vld [vmem:[%s21335_s25 + $0x70c] ss:$28 sps:$4 sm:$0xff]  }
  0xb5   : > { %2505 = vmatpush1.bf16.msra.mxu0 %v18765_v26  ;;  %2588 = vmatprep.subr.bf16.mxu1 %v18773_v28  ;;  %v18854_v26 = vld [vmem:[%s21335_s25 + $0x27c] ss:$28 sps:$4 sm:$0xff]  }
  0xb6   : > { %2536 = vmatprep.mubr.bf16.mxu0 %v21233_v32  ;;  %2668 = vmatprep.subr.bf16.mxu0 %v18782_v29  ;;  %v18852_v28 = vld [vmem:[%s21335_s25 + $0x278] ss:$28 sps:$4 sm:$0xff]   ;;  %v18855_v29 = vld [vmem:[%s21335_s25 + $0x708] ss:$28 sps:$4 sm:$0xff]  }
  0xb7   : > { %2618 = vmatprep.mubr.bf16.mxu1 %v21410_v3 }
  0xb8   : > { %2589 = vmatpush1.bf16.msra.mxu1 %v18771_v30  ;;  %v18860_v30 = vld [vmem:[%s21335_s25 + $0x2b4] ss:$28 sps:$4 sm:$0xff]  }
  0xb9   : > { %2590 = vmatprep.subr.bf16.mxu1 %v18776_v31  ;;  %v18863_v31 = vld [vmem:[%s21335_s25 + $0x744] ss:$28 sps:$4 sm:$0xff]  }
  0xbc   : > { %2591 = vmatpush1.bf16.msra.mxu1 %v18774_v33  ;;  %v18858_v33 = vld [vmem:[%s21335_s25 + $0x2b0] ss:$28 sps:$4 sm:$0xff]  }
  0xbd   : > { %2592 = vmatprep.subr.bf16.mxu1 %v18779_v34  ;;  %v18861_v34 = vld [vmem:[%s21335_s25 + $0x740] ss:$28 sps:$4 sm:$0xff]  }
  0xc0   : > { %14980 = vmatmul.mubr.msk.bf16.vlgmr.msra.gmra.mrb[0].mxu0 %vm2377_vm0, %v21518_v35  ;;  %2593 = vmatpush1.bf16.msra.mxu1 %v18777_v36  ;;  %v18866_v36 = vld [vmem:[%s21335_s25 + $0x2ec] ss:$28 sps:$4 sm:$0xff]  }
  0xc1   : > { %2669 = vmatpush1.bf16.msra.mxu0 %v18780_v37  ;;  %2594 = vmatprep.subr.bf16.mxu1 %v18785_v38  ;;  %v18869_v37 = vld [vmem:[%s21335_s25 + $0x77c] ss:$28 sps:$4 sm:$0xff]   ;;  %v18864_v38 = vld [vmem:[%s21335_s25 + $0x2e8] ss:$28 sps:$4 sm:$0xff]  }
  0xc2   : > { %2700 = vmatprep.mubr.bf16.mxu0 %v21233_v32  ;;  %2709 = vmatprep.subr.bf16.mxu0 %v18788_v39  ;;  %v18867_v39 = vld [vmem:[%s21335_s25 + $0x778] ss:$28 sps:$4 sm:$0xff]  }
  0xc4   : > { %2595 = vmatpush1.bf16.msra.mxu1 %v18783_v40  ;;  %v18872_v40 = vld [vmem:[%s21335_s25 + $0x324] ss:$28 sps:$4 sm:$0xff]  }
  0xc5   : > { %2596 = vmatprep.subr.bf16.mxu1 %v18791_v41  ;;  %v18875_v41 = vld [vmem:[%s21335_s25 + $0x7b4] ss:$28 sps:$4 sm:$0xff]  }
  0xc8   : > { %14981 = vmatmul.mubr.msk.bf16.vlgmr.msra.gmra.mrb[4].mxu0 %vm2377_vm0, %v21518_v35  ;;  %2597 = vmatpush1.bf16.msra.mxu1 %v18789_v43  ;;  %v18873_v43 = vld [vmem:[%s21335_s25 + $0x7b0] ss:$28 sps:$4 sm:$0xff]  }
  0xc9   : > { %2710 = vmatpush1.bf16.msra.mxu0 %v18786_v42  ;;  %2598 = vmatprep.subr.bf16.mxu1 %v18797_v45  ;;  %v18870_v42 = vld [vmem:[%s21335_s25 + $0x320] ss:$28 sps:$4 sm:$0xff]   ;;  %v18881_v45 = vld [vmem:[%s21335_s25 + $0x7ec] ss:$28 sps:$4 sm:$0xff]  }
  0xca   : > { %2711 = vmatprep.subr.bf16.mxu0 %v18794_v44  ;;  %2741 = vmatprep.mubr.bf16.mxu0 %v21400_v62  ;;  %v18878_v44 = vld [vmem:[%s21335_s25 + $0x35c] ss:$28 sps:$4 sm:$0xff]  }
  0xcc   : > { %2599 = vmatpush1.bf16.msra.mxu1 %v18795_v47  ;;  %v18879_v47 = vld [vmem:[%s21335_s25 + $0x7e8] ss:$28 sps:$4 sm:$0xff]  }
  0xcd   : > { %2712 = vmatpush1.bf16.msra.mxu0 %v18792_v46  ;;  %2600 = vmatprep.subr.bf16.mxu1 %v18803_v49  ;;  %v18876_v46 = vld [vmem:[%s21335_s25 + $0x358] ss:$28 sps:$4 sm:$0xff]   ;;  %v18887_v49 = vld [vmem:[%s21335_s25 + $0x824] ss:$28 sps:$4 sm:$0xff]  }
  0xce   : > { %2713 = vmatprep.subr.bf16.mxu0 %v18800_v48  ;;  %v18884_v48 = vld [vmem:[%s21335_s25 + $0x394] ss:$28 sps:$4 sm:$0xff]  }
  0xd0   : > { %2601 = vmatpush1.bf16.msra.mxu1 %v18801_v51  ;;  %v18885_v51 = vld [vmem:[%s21335_s25 + $0x820] ss:$28 sps:$4 sm:$0xff]  }
  0xd1   : > { %2714 = vmatpush1.bf16.msra.mxu0 %v18798_v50  ;;  %2602 = vmatprep.subr.bf16.mxu1 %v18809_v53  ;;  %v18882_v50 = vld [vmem:[%s21335_s25 + $0x390] ss:$28 sps:$4 sm:$0xff]   ;;  %v18893_v53 = vld [vmem:[%s21335_s25 + $0x85c] ss:$28 sps:$4 sm:$0xff]  }
  0xd2   : > { %2715 = vmatprep.subr.bf16.mxu0 %v18806_v52  ;;  %v18890_v52 = vld [vmem:[%s21335_s25 + $0x3cc] ss:$28 sps:$4 sm:$0xff]  }
  0xd4   : > { %2603 = vmatpush1.bf16.msra.mxu1 %v18807_v55  ;;  %v18891_v55 = vld [vmem:[%s21335_s25 + $0x858] ss:$28 sps:$4 sm:$0xff]  }
  0xd5   : > { %2716 = vmatpush1.bf16.msra.mxu0 %v18804_v54  ;;  %2604 = vmatprep.subr.bf16.mxu1 %v18815_v57  ;;  %v18888_v54 = vld [vmem:[%s21335_s25 + $0x3c8] ss:$28 sps:$4 sm:$0xff]   ;;  %v18899_v57 = vld [vmem:[%s21335_s25 + $0x894] ss:$28 sps:$4 sm:$0xff]  }
  0xd6   : > { %2717 = vmatprep.subr.bf16.mxu0 %v18812_v56  ;;  %v18896_v56 = vld [vmem:[%s21335_s25 + $0x404] ss:$28 sps:$4 sm:$0xff]  }
  0xd8   : > { %2605 = vmatpush1.bf16.msra.mxu1 %v18813_v59  ;;  %v18897_v59 = vld [vmem:[%s21335_s25 + $0x890] ss:$28 sps:$4 sm:$0xff]  }
  0xd9   : > { %2718 = vmatpush1.bf16.msra.mxu0 %v18810_v58  ;;  %2606 = vmatprep.subr.bf16.mxu1 %v18821_v61  ;;  %v18894_v58 = vld [vmem:[%s21335_s25 + $0x400] ss:$28 sps:$4 sm:$0xff]   ;;  %v18905_v61 = vld [vmem:[%s21335_s25 + $0x8cc] ss:$28 sps:$4 sm:$0xff]  }
  0xda   : > { %2719 = vmatprep.subr.bf16.mxu0 %v18818_v60  ;;  %v18902_v60 = vld [vmem:[%s21335_s25 + $0x43c] ss:$28 sps:$4 sm:$0xff]  }
  0xdc   : > { %2607 = vmatpush1.bf16.msra.mxu1 %v18819_v1  ;;  %v18903_v1 = vld [vmem:[%s21335_s25 + $0x8c8] ss:$28 sps:$4 sm:$0xff]  }
  0xdd   : > { %2720 = vmatpush1.bf16.msra.mxu0 %v18816_v0  ;;  %2608 = vmatprep.subr.bf16.mxu1 %v18827_v4  ;;  %v18900_v0 = vld [vmem:[%s21335_s25 + $0x438] ss:$28 sps:$4 sm:$0xff]   ;;  %v18911_v4 = vld [vmem:[%s21335_s25 + $0x904] ss:$28 sps:$4 sm:$0xff]  }
  0xde   : > { %2721 = vmatprep.subr.bf16.mxu0 %v18824_v2  ;;  %v18908_v2 = vld [vmem:[%s21335_s25 + $0x474] ss:$28 sps:$4 sm:$0xff]  }
  0xe0   : > { %2609 = vmatpush1.bf16.msra.mxu1 %v18825_v6  ;;  %v18909_v6 = vld [vmem:[%s21335_s25 + $0x900] ss:$28 sps:$4 sm:$0xff]  }
  0xe1   : > { %2722 = vmatpush1.bf16.msra.mxu0 %v18822_v5  ;;  %2610 = vmatprep.subr.bf16.mxu1 %v18833_v8  ;;  %v18906_v5 = vld [vmem:[%s21335_s25 + $0x470] ss:$28 sps:$4 sm:$0xff]   ;;  %v18917_v8 = vld [vmem:[%s21335_s25 + $0x93c] ss:$28 sps:$4 sm:$0xff]  }
  0xe2   : > { %2723 = vmatprep.subr.bf16.mxu0 %v18830_v7  ;;  %v18914_v7 = vld [vmem:[%s21335_s25 + $0x4ac] ss:$28 sps:$4 sm:$0xff]  }
  0xe4   : > { %2611 = vmatpush1.bf16.msra.mxu1 %v18831_v10  ;;  %v18915_v10 = vld [vmem:[%s21335_s25 + $0x938] ss:$28 sps:$4 sm:$0xff]  }
  0xe5   : > { %2724 = vmatpush1.bf16.msra.mxu0 %v18828_v9  ;;  %2612 = vmatprep.subr.bf16.mxu1 %v18839_v12  ;;  %v18912_v9 = vld [vmem:[%s21335_s25 + $0x4a8] ss:$28 sps:$4 sm:$0xff]   ;;  %v18923_v12 = vld [vmem:[%s21335_s25 + $0x974] ss:$28 sps:$4 sm:$0xff]  }
  0xe6   : > { %2725 = vmatprep.subr.bf16.mxu0 %v18836_v11  ;;  %v18920_v11 = vld [vmem:[%s21335_s25 + $0x4e4] ss:$28 sps:$4 sm:$0xff]  }
  0xe8   : > { %2613 = vmatpush1.bf16.msra.mxu1 %v18837_v15  ;;  %v18921_v15 = vld [vmem:[%s21335_s25 + $0x970] ss:$28 sps:$4 sm:$0xff]  }
  0xe9   : > { %2726 = vmatpush1.bf16.msra.mxu0 %v18834_v14  ;;  %2614 = vmatprep.subr.bf16.mxu1 %v18845_v17  ;;  %v18918_v14 = vld [vmem:[%s21335_s25 + $0x4e0] ss:$28 sps:$4 sm:$0xff]   ;;  %v18929_v17 = vld [vmem:[%s21335_s25 + $0x9ac] ss:$28 sps:$4 sm:$0xff]  }
  0xea   : > { %2727 = vmatprep.subr.bf16.mxu0 %v18842_v16  ;;  %v18926_v16 = vld [vmem:[%s21335_s25 + $0x51c] ss:$28 sps:$4 sm:$0xff]  }
  0xec   : > { %2615 = vmatpush1.bf16.msra.mxu1 %v18843_v20  ;;  %v18927_v20 = vld [vmem:[%s21335_s25 + $0x9a8] ss:$28 sps:$4 sm:$0xff]  }
  0xed   : > { %2728 = vmatpush1.bf16.msra.mxu0 %v18840_v18  ;;  %2616 = vmatprep.subr.bf16.mxu1 %v18851_v22  ;;  %v18924_v18 = vld [vmem:[%s21335_s25 + $0x518] ss:$28 sps:$4 sm:$0xff]   ;;  %v18935_v22 = vld [vmem:[%s21335_s25 + $0x9e4] ss:$28 sps:$4 sm:$0xff]  }
  0xee   : > { %2729 = vmatprep.subr.bf16.mxu0 %v18848_v21  ;;  %v18932_v21 = vld [vmem:[%s21335_s25 + $0x554] ss:$28 sps:$4 sm:$0xff]  }
  0xf0   : > { %2617 = vmatpush1.bf16.msra.mxu1 %v18849_v25  ;;  %v18933_v25 = vld [vmem:[%s21335_s25 + $0x9e0] ss:$28 sps:$4 sm:$0xff]  }
  0xf1   : > { %2730 = vmatpush1.bf16.msra.mxu0 %v18846_v24  ;;  %2627 = vmatprep.subr.bf16.mxu1 %v18857_v27  ;;  %v18930_v24 = vld [vmem:[%s21335_s25 + $0x550] ss:$28 sps:$4 sm:$0xff]   ;;  %v18941_v27 = vld [vmem:[%s21335_s25 + $0xa1c] ss:$28 sps:$4 sm:$0xff]  }
  0xf2   : > { %2731 = vmatprep.subr.bf16.mxu0 %v18854_v26  ;;  %v18938_v26 = vld [vmem:[%s21335_s25 + $0x58c] ss:$28 sps:$4 sm:$0xff]  }
  0xf3   : > { %2619 = vmatmul.mubr.bf16.vlgmr.msra.gmra.mrb[4].mxu1 %v21432_v19 }
  0xf4   : > { %2628 = vmatpush1.bf16.msra.mxu1 %v18855_v29  ;;  %2659 = vmatprep.mubr.bf16.mxu1 %v21438_v23  ;;  %v18939_v29 = vld [vmem:[%s21335_s25 + $0xa18] ss:$28 sps:$4 sm:$0xff]  }
  0xf5   : > { %2732 = vmatpush1.bf16.msra.mxu0 %v18852_v28  ;;  %2629 = vmatprep.subr.bf16.mxu1 %v18863_v31  ;;  %v18936_v28 = vld [vmem:[%s21335_s25 + $0x588] ss:$28 sps:$4 sm:$0xff]   ;;  %v18947_v31 = vld [vmem:[%s21335_s25 + $0xa54] ss:$28 sps:$4 sm:$0xff]  }
  0xf6   : > { %2733 = vmatprep.subr.bf16.mxu0 %v18860_v30  ;;  %v18944_v30 = vld [vmem:[%s21335_s25 + $0x5c4] ss:$28 sps:$4 sm:$0xff]  }
  0xf8   : > { %2630 = vmatpush1.bf16.msra.mxu1 %v18861_v34  ;;  %v18945_v34 = vld [vmem:[%s21335_s25 + $0xa50] ss:$28 sps:$4 sm:$0xff]  }
  0xf9   : > { %2734 = vmatpush1.bf16.msra.mxu0 %v18858_v33  ;;  %2631 = vmatprep.subr.bf16.mxu1 %v18869_v37  ;;  %v18942_v33 = vld [vmem:[%s21335_s25 + $0x5c0] ss:$28 sps:$4 sm:$0xff]   ;;  %v18951_v37 = vld [vmem:[%s21335_s25 + $0x1d8] ss:$28 sps:$4 sm:$0xff]  }
  0xfa   : > { %2735 = vmatprep.subr.bf16.mxu0 %v18866_v36  ;;  %v18950_v36 = vld [vmem:[%s21335_s25 + $0x5fc] ss:$28 sps:$4 sm:$0xff]  }
  0xfc   : > { %2632 = vmatpush1.bf16.msra.mxu1 %v18867_v39  ;;  %v18952_v39 = vld [vmem:[%s21335_s25 + $0x18] ss:$28 sps:$4 sm:$0xff]  }
  0xfd   : > { %2736 = vmatpush1.bf16.msra.mxu0 %v18864_v38  ;;  %2633 = vmatprep.subr.bf16.mxu1 %v18875_v41  ;;  %v18948_v38 = vld [vmem:[%s21335_s25 + $0x5f8] ss:$28 sps:$4 sm:$0xff]   ;;  %v18956_v41 = vld [vmem:[%s21335_s25 + $0x210] ss:$28 sps:$4 sm:$0xff]  }
  0xfe   : > { %2737 = vmatprep.subr.bf16.mxu0 %v18872_v40  ;;  %v18955_v40 = vld [vmem:[%s21335_s25 + $0x634] ss:$28 sps:$4 sm:$0xff]  }
 0x100   : > { %2634 = vmatpush1.bf16.msra.mxu1 %v18873_v43  ;;  %v18957_v43 = vld [vmem:[%s21335_s25 + $0x50] ss:$28 sps:$4 sm:$0xff]  }
 0x101   : > { %2738 = vmatpush1.bf16.msra.mxu0 %v18870_v42  ;;  %2635 = vmatprep.subr.bf16.mxu1 %v18881_v45  ;;  %v18953_v42 = vld [vmem:[%s21335_s25 + $0x630] ss:$28 sps:$4 sm:$0xff]   ;;  %v18961_v45 = vld [vmem:[%s21335_s25 + $0x248] ss:$28 sps:$4 sm:$0xff]  }
 0x102   : > { %2739 = vmatprep.subr.bf16.mxu0 %v18878_v44  ;;  %v18960_v44 = vld [vmem:[%s21335_s25 + $0x66c] ss:$28 sps:$4 sm:$0xff]  }
 0x104   : > { %2636 = vmatpush1.bf16.msra.mxu1 %v18879_v47  ;;  %v18962_v47 = vld [vmem:[%s21335_s25 + $0x88] ss:$28 sps:$4 sm:$0xff]  }
 0x105   : > { %2740 = vmatpush1.bf16.msra.mxu0 %v18876_v46  ;;  %2637 = vmatprep.subr.bf16.mxu1 %v18887_v49  ;;  %v18958_v46 = vld [vmem:[%s21335_s25 + $0x668] ss:$28 sps:$4 sm:$0xff]   ;;  %v18966_v49 = vld [vmem:[%s21335_s25 + $0x280] ss:$28 sps:$4 sm:$0xff]  }
 0x106   : > { %2750 = vmatprep.subr.bf16.mxu0 %v18884_v48  ;;  %v18965_v48 = vld [vmem:[%s21335_s25 + $0x6a4] ss:$28 sps:$4 sm:$0xff]  }
 0x108   : > { %2742 = vmatmul.mubr.bf16.vlgmr.msra.gmra.mrb[8].mxu0 %v21424_v13  ;;  %2638 = vmatpush1.bf16.msra.mxu1 %v18885_v51  ;;  %v18967_v51 = vld [vmem:[%s21335_s25 + $0xc0] ss:$28 sps:$4 sm:$0xff]  }
 0x109   : > { %2751 = vmatpush1.bf16.msra.mxu0 %v18882_v50  ;;  %2639 = vmatprep.subr.bf16.mxu1 %v18893_v53  ;;  %v18963_v50 = vld [vmem:[%s21335_s25 + $0x6a0] ss:$28 sps:$4 sm:$0xff]   ;;  %v18971_v53 = vld [vmem:[%s21335_s25 + $0x2b8] ss:$28 sps:$4 sm:$0xff]  }
 0x10a   : > { %2752 = vmatprep.subr.bf16.mxu0 %v18890_v52  ;;  %2782 = vmatprep.mubr.bf16.mxu0 %v21410_v3  ;;  %v18970_v52 = vld [vmem:[%s21335_s25 + $0x6dc] ss:$28 sps:$4 sm:$0xff]  }
 0x10c   : > { %2640 = vmatpush1.bf16.msra.mxu1 %v18891_v55  ;;  %v18972_v55 = vld [vmem:[%s21335_s25 + $0xf8] ss:$28 sps:$4 sm:$0xff]  }
 0x10d   : > { %2753 = vmatpush1.bf16.msra.mxu0 %v18888_v54  ;;  %2641 = vmatprep.subr.bf16.mxu1 %v18899_v57  ;;  %v18968_v54 = vld [vmem:[%s21335_s25 + $0x6d8] ss:$28 sps:$4 sm:$0xff]   ;;  %v18976_v57 = vld [vmem:[%s21335_s25 + $0x2f0] ss:$28 sps:$4 sm:$0xff]  }
 0x10e   : > { %2754 = vmatprep.subr.bf16.mxu0 %v18896_v56  ;;  %v18975_v56 = vld [vmem:[%s21335_s25 + $0x714] ss:$28 sps:$4 sm:$0xff]  }
 0x110   : > { %2642 = vmatpush1.bf16.msra.mxu1 %v18897_v59  ;;  %v18977_v59 = vld [vmem:[%s21335_s25 + $0x130] ss:$28 sps:$4 sm:$0xff]  }
 0x111   : > { %2755 = vmatpush1.bf16.msra.mxu0 %v18894_v58  ;;  %2643 = vmatprep.subr.bf16.mxu1 %v18905_v61  ;;  %v18973_v58 = vld [vmem:[%s21335_s25 + $0x710] ss:$28 sps:$4 sm:$0xff]   ;;  %v18981_v61 = vld [vmem:[%s21335_s25 + $0x328] ss:$28 sps:$4 sm:$0xff]  }
 0x112   : > { %2756 = vmatprep.subr.bf16.mxu0 %v18902_v60  ;;  %v18980_v60 = vld [vmem:[%s21335_s25 + $0x74c] ss:$28 sps:$4 sm:$0xff]  }
 0x114   : > { %2644 = vmatpush1.bf16.msra.mxu1 %v18903_v1  ;;  %v18978_v1 = vld [vmem:[%s21335_s25 + $0x748] ss:$28 sps:$4 sm:$0xff]  }
 0x115   : > { %2757 = vmatpush1.bf16.msra.mxu0 %v18900_v0  ;;  %2645 = vmatprep.subr.bf16.mxu1 %v18911_v4  ;;  %v18982_v4 = vld [vmem:[%s21335_s25 + $0x168] ss:$28 sps:$4 sm:$0xff]  }
 0x116   : > { %2758 = vmatprep.subr.bf16.mxu0 %v18908_v2 }
 0x118   : > { %2646 = vmatpush1.bf16.msra.mxu1 %v18909_v6  ;;  %v18985_v6 = vld [vmem:[%s21335_s25 + $0x784] ss:$28 sps:$4 sm:$0xff]  }
 0x119   : > { %2759 = vmatpush1.bf16.msra.mxu0 %v18906_v5  ;;  %2647 = vmatprep.subr.bf16.mxu1 %v18917_v8  ;;  %v18986_v8 = vld [vmem:[%s21335_s25 + $0x360] ss:$28 sps:$4 sm:$0xff]  }
 0x11a   : > { %2760 = vmatprep.subr.bf16.mxu0 %v18914_v7 }
 0x11c   : > { %2648 = vmatpush1.bf16.msra.mxu1 %v18915_v10  ;;  %v18987_v10 = vld [vmem:[%s21335_s25 + $0x1a0] ss:$28 sps:$4 sm:$0xff]  }
 0x11d   : > { %2761 = vmatpush1.bf16.msra.mxu0 %v18912_v9  ;;  %2649 = vmatprep.subr.bf16.mxu1 %v18923_v12  ;;  %v18983_v9 = vld [vmem:[%s21335_s25 + $0x780] ss:$28 sps:$4 sm:$0xff]   ;;  %v18991_v12 = vld [vmem:[%s21335_s25 + $0x558] ss:$28 sps:$4 sm:$0xff]  }
 0x11e   : > { %2762 = vmatprep.subr.bf16.mxu0 %v18920_v11  ;;  %v18990_v11 = vld [vmem:[%s21335_s25 + $0x7bc] ss:$28 sps:$4 sm:$0xff]  }
 0x120   : > { %2650 = vmatpush1.bf16.msra.mxu1 %v18921_v15  ;;  %v18992_v15 = vld [vmem:[%s21335_s25 + $0x398] ss:$28 sps:$4 sm:$0xff]  }
 0x121   : > { %2763 = vmatpush1.bf16.msra.mxu0 %v18918_v14  ;;  %2651 = vmatprep.subr.bf16.mxu1 %v18929_v17  ;;  %v18988_v14 = vld [vmem:[%s21335_s25 + $0x7b8] ss:$28 sps:$4 sm:$0xff]   ;;  %v18996_v17 = vld [vmem:[%s21335_s25 + $0x590] ss:$28 sps:$4 sm:$0xff]  }
 0x122   : > { %2764 = vmatprep.subr.bf16.mxu0 %v18926_v16  ;;  %v18995_v16 = vld [vmem:[%s21335_s25 + $0x7f4] ss:$28 sps:$4 sm:$0xff]  }
 0x124   : > { %2652 = vmatpush1.bf16.msra.mxu1 %v18927_v20  ;;  %v18997_v20 = vld [vmem:[%s21335_s25 + $0x3d0] ss:$28 sps:$4 sm:$0xff]  }
 0x125   : > { %2765 = vmatpush1.bf16.msra.mxu0 %v18924_v18  ;;  %2653 = vmatprep.subr.bf16.mxu1 %v18935_v22  ;;  %v18993_v18 = vld [vmem:[%s21335_s25 + $0x7f0] ss:$28 sps:$4 sm:$0xff]   ;;  %v19001_v22 = vld [vmem:[%s21335_s25 + $0x5c8] ss:$28 sps:$4 sm:$0xff]  }
 0x126   : > { %2766 = vmatprep.subr.bf16.mxu0 %v18932_v21  ;;  %v19000_v21 = vld [vmem:[%s21335_s25 + $0x82c] ss:$28 sps:$4 sm:$0xff]  }
 0x128   : > { %2654 = vmatpush1.bf16.msra.mxu1 %v18933_v25  ;;  %v19002_v25 = vld [vmem:[%s21335_s25 + $0x408] ss:$28 sps:$4 sm:$0xff]  }
 0x129   : > { %2767 = vmatpush1.bf16.msra.mxu0 %v18930_v24  ;;  %2655 = vmatprep.subr.bf16.mxu1 %v18941_v27  ;;  %v18998_v24 = vld [vmem:[%s21335_s25 + $0x828] ss:$28 sps:$4 sm:$0xff]   ;;  %v19006_v27 = vld [vmem:[%s21335_s25 + $0x600] ss:$28 sps:$4 sm:$0xff]  }
 0x12a   : > { %2768 = vmatprep.subr.bf16.mxu0 %v18938_v26  ;;  %v19005_v26 = vld [vmem:[%s21335_s25 + $0x864] ss:$28 sps:$4 sm:$0xff]  }
 0x12c   : > { %2656 = vmatpush1.bf16.msra.mxu1 %v18939_v29  ;;  %v19007_v29 = vld [vmem:[%s21335_s25 + $0x440] ss:$28 sps:$4 sm:$0xff]  }
 0x12d   : > { %2769 = vmatpush1.bf16.msra.mxu0 %v18936_v28  ;;  %2657 = vmatprep.subr.bf16.mxu1 %v18947_v31  ;;  %v19003_v28 = vld [vmem:[%s21335_s25 + $0x860] ss:$28 sps:$4 sm:$0xff]   ;;  %v19011_v31 = vld [vmem:[%s21335_s25 + $0x638] ss:$28 sps:$4 sm:$0xff]  }
 0x12e   : > { %2770 = vmatprep.subr.bf16.mxu0 %v18944_v30  ;;  %v19010_v30 = vld [vmem:[%s21335_s25 + $0x89c] ss:$28 sps:$4 sm:$0xff]  }
 0x130   : > { %2658 = vmatpush1.bf16.msra.mxu1 %v18945_v34  ;;  %v19012_v34 = vld [vmem:[%s21335_s25 + $0x478] ss:$28 sps:$4 sm:$0xff]  }
 0x131   : > { %2771 = vmatpush1.bf16.msra.mxu0 %v18942_v33  ;;  %17977 = vmatprep.subr.bf16.mxu1 %v18951_v37  ;;  %v19008_v33 = vld [vmem:[%s21335_s25 + $0x898] ss:$28 sps:$4 sm:$0xff]   ;;  %v19016_v37 = vld [vmem:[%s21335_s25 + $0x670] ss:$28 sps:$4 sm:$0xff]  }
 0x132   : > { %2772 = vmatprep.subr.bf16.mxu0 %v18950_v36  ;;  %v19015_v36 = vld [vmem:[%s21335_s25 + $0x8d4] ss:$28 sps:$4 sm:$0xff]  }
 0x133   : > { %2660 = vmatmul.mubr.bf16.vlgmr.msra.gmra.mrb[4].mxu1 %v21403_v63 }
 0x134   : > { %17978 = vmatpush3.bf16.msra.mxu1 %v18952_v39  ;;  %2905 = vmatprep.mubr.bf16.mxu1 %v21400_v62  ;;  %v19017_v39 = vld [vmem:[%s21335_s25 + $0x4b0] ss:$28 sps:$4 sm:$0xff]  }
 0x135   : > { %2773 = vmatpush1.bf16.msra.mxu0 %v18948_v38  ;;  %17979 = vmatprep.subr.bf16.mxu1 %v18956_v41  ;;  %v19013_v38 = vld [vmem:[%s21335_s25 + $0x8d0] ss:$28 sps:$4 sm:$0xff]   ;;  %v19021_v41 = vld [vmem:[%s21335_s25 + $0x6a8] ss:$28 sps:$4 sm:$0xff]  }
 0x136   : > { %2774 = vmatprep.subr.bf16.mxu0 %v18955_v40  ;;  %v19020_v40 = vld [vmem:[%s21335_s25 + $0x90c] ss:$28 sps:$4 sm:$0xff]  }
 0x138   : > { %17980 = vmatpush3.bf16.msra.mxu1 %v18957_v43  ;;  %v19022_v43 = vld [vmem:[%s21335_s25 + $0x4e8] ss:$28 sps:$4 sm:$0xff]  }
 0x139   : > { %2775 = vmatpush1.bf16.msra.mxu0 %v18953_v42  ;;  %17981 = vmatprep.subr.bf16.mxu1 %v18961_v45  ;;  %v19018_v42 = vld [vmem:[%s21335_s25 + $0x908] ss:$28 sps:$4 sm:$0xff]   ;;  %v19026_v45 = vld [vmem:[%s21335_s25 + $0x6e0] ss:$28 sps:$4 sm:$0xff]  }
 0x13a   : > { %2776 = vmatprep.subr.bf16.mxu0 %v18960_v44  ;;  %v19025_v44 = vld [vmem:[%s21335_s25 + $0x944] ss:$28 sps:$4 sm:$0xff]  }
 0x13c   : > { %17982 = vmatpush3.bf16.msra.mxu1 %v18962_v47  ;;  %v19027_v47 = vld [vmem:[%s21335_s25 + $0x520] ss:$28 sps:$4 sm:$0xff]  }
 0x13d   : > { %2777 = vmatpush1.bf16.msra.mxu0 %v18958_v46  ;;  %17983 = vmatprep.subr.bf16.mxu1 %v18966_v49  ;;  %v19023_v46 = vld [vmem:[%s21335_s25 + $0x940] ss:$28 sps:$4 sm:$0xff]   ;;  %v19031_v49 = vld [vmem:[%s21335_s25 + $0x8d8] ss:$28 sps:$4 sm:$0xff]  }
 0x13e   : > { %2778 = vmatprep.subr.bf16.mxu0 %v18965_v48  ;;  %v19030_v48 = vld [vmem:[%s21335_s25 + $0x97c] ss:$28 sps:$4 sm:$0xff]  }
 0x140   : > { %17984 = vmatpush3.bf16.msra.mxu1 %v18967_v51  ;;  %v19032_v51 = vld [vmem:[%s21335_s25 + $0x718] ss:$28 sps:$4 sm:$0xff]  }
 0x141   : > { %2779 = vmatpush1.bf16.msra.mxu0 %v18963_v50  ;;  %17985 = vmatprep.subr.bf16.mxu1 %v18971_v53  ;;  %v19028_v50 = vld [vmem:[%s21335_s25 + $0x978] ss:$28 sps:$4 sm:$0xff]   ;;  %v19036_v53 = vld [vmem:[%s21335_s25 + $0x910] ss:$28 sps:$4 sm:$0xff]  }
 0x142   : > { %2780 = vmatprep.subr.bf16.mxu0 %v18970_v52  ;;  %v19035_v52 = vld [vmem:[%s21335_s25 + $0x9b4] ss:$28 sps:$4 sm:$0xff]  }
 0x144   : > { %17986 = vmatpush3.bf16.msra.mxu1 %v18972_v55  ;;  %v19037_v55 = vld [vmem:[%s21335_s25 + $0x750] ss:$28 sps:$4 sm:$0xff]  }
 0x145   : > { %2781 = vmatpush1.bf16.msra.mxu0 %v18968_v54  ;;  %17987 = vmatprep.subr.bf16.mxu1 %v18976_v57  ;;  %v19033_v54 = vld [vmem:[%s21335_s25 + $0x9b0] ss:$28 sps:$4 sm:$0xff]   ;;  %v19041_v57 = vld [vmem:[%s21335_s25 + $0x948] ss:$28 sps:$4 sm:$0xff]  }
 0x146   : > { %2791 = vmatprep.subr.bf16.mxu0 %v18975_v56  ;;  %v21670_v0 = vpop.f32.mrb[0].mxu1  ;;  %v19040_v56 = vld [vmem:[%s21335_s25 + $0x9ec] ss:$28 sps:$4 sm:$0xff]  }
 0x147   : > { %v21674_v2 = vpop.f32.mrb[1].mxu1 }
 0x148   : > { %2783 = vmatmul.mubr.bf16.vlgmr.msra.gmra.mrb[8].mxu0 %v21432_v19  ;;  %17988 = vmatpush3.bf16.msra.mxu1 %v18977_v59  ;;  %v2419_v5 = vpop.f32.mrb[2].mxu1  ;;  %v19042_v59 = vld [vmem:[%s21335_s25 + $0x788] ss:$28 sps:$4 sm:$0xff]  }
 0x149   : > { %2792 = vmatpush1.bf16.msra.mxu0 %v18973_v58  ;;  %17989 = vmatprep.subr.bf16.mxu1 %v18981_v61  ;;  %v2420_v7 = vpop.f32.mrb[3].mxu1  ;;  %v19038_v58 = vld [vmem:[%s21335_s25 + $0x9e8] ss:$28 sps:$4 sm:$0xff]   ;;  %v19046_v61 = vld [vmem:[%s21335_s25 + $0x980] ss:$28 sps:$4 sm:$0xff]  }
 0x14a   : > { %2793 = vmatprep.subr.bf16.mxu0 %v18980_v60  ;;  %2823 = vmatprep.mubr.bf16.mxu0 %v21438_v23  ;;  %v19045_v60 = vld [vmem:[%s21335_s25 + $0xa24] ss:$28 sps:$4 sm:$0xff]   ;;  %v19050_v5 = vld [vmem:[%s21335_s25 + $0xa5c] ss:$28 sps:$4 sm:$0xff]  }
 0x14b   : > { %v19048_v7 = vld [vmem:[%s21335_s25 + $0xa58] ss:$28 sps:$4 sm:$0xff]  }
 0x14c   : > { %17990 = vmatpush3.bf16.msra.mxu1 %v18982_v4  ;;  %v19047_v4 = vld [vmem:[%s21335_s25 + $0x7c0] ss:$28 sps:$4 sm:$0xff]  }
 0x14d   : > { %2794 = vmatpush1.bf16.msra.mxu0 %v18978_v1  ;;  %17991 = vmatprep.subr.bf16.mxu1 %v18986_v8  ;;  %v19043_v1 = vld [vmem:[%s21335_s25 + $0xa20] ss:$28 sps:$4 sm:$0xff]   ;;  %v19052_v8 = vld [vmem:[%s21335_s25 + $0x7f8] ss:$28 sps:$4 sm:$0xff]  }
 0x14e   : > { %2795 = vmatprep.subr.bf16.mxu0 %v18985_v6  ;;  %v19051_v6 = vld [vmem:[%s21335_s25 + $0x9b8] ss:$28 sps:$4 sm:$0xff]  }
 0x150   : > { %17992 = vmatpush3.bf16.msra.mxu1 %v18987_v10  ;;  %v19056_v10 = vld [vmem:[%s21335_s25 + $0x9f0] ss:$28 sps:$4 sm:$0xff]  }
 0x151   : > { %2796 = vmatpush1.bf16.msra.mxu0 %v18983_v9  ;;  %17999 = vmatprep.subr.bf16.mxu1 %v18991_v12  ;;  %v19055_v9 = vld [vmem:[%s21335_s25 + $0xa94] ss:$28 sps:$4 sm:$0xff]  }
 0x152   : > { %2797 = vmatprep.subr.bf16.mxu0 %v18990_v11  ;;  %v19053_v11 = vld [vmem:[%s21335_s25 + $0xa90] ss:$28 sps:$4 sm:$0xff]  }
 0x153   : > { %2906 = vmatmul.mubr.bf16.vlgmr.msra.gmra.mrb[8].mxu1 %v21424_v13  ;;  %v19057_v12 = vld [vmem:[%s21335_s25 + $0x830] ss:$28 sps:$4 sm:$0xff]  }
 0x154   : > { %18000 = vmatpush3.bf16.msra.mxu1 %v18992_v15  ;;  %2945 = vmatprep.mubr.bf16.mxu1 %v21410_v3  ;;  %v19059_v15 = vld [vmem:[%s21335_s25 + $0x868] ss:$28 sps:$4 sm:$0xff]  }
 0x155   : > { %2798 = vmatpush1.bf16.msra.mxu0 %v18988_v14  ;;  %18001 = vmatprep.subr.bf16.mxu1 %v18996_v17  ;;  %v19058_v14 = vld [vmem:[%s21335_s25 + $0xa28] ss:$28 sps:$4 sm:$0xff]   ;;  %v21234_v17 = vmov 0.0  }
 0x156   : > { %2799 = vmatprep.subr.bf16.mxu0 %v18995_v16  ;;  %v19060_v16 = vld [vmem:[%s21335_s25 + $0xa60] ss:$28 sps:$4 sm:$0xff]  }
 0x158   : > { %18002 = vmatpush3.bf16.msra.mxu1 %v18997_v20  ;;  %v19065_v20 = vld [vmem:[%s21335_s25 + $0xabc] ss:$28 sps:$4 sm:$0xff]  }
 0x159   : > { %2800 = vmatpush1.bf16.msra.mxu0 %v18993_v18  ;;  %18003 = vmatprep.subr.bf16.mxu1 %v19001_v22  ;;  %v19061_v18 = vld [vmem:[%s21335_s25 + $0x8a0] ss:$28 sps:$4 sm:$0xff]   ;;  %v19063_v22 = vld [vmem:[%s21335_s25 + $0xab8] ss:$28 sps:$4 sm:$0xff]  }
 0x15a   : > { %2801 = vmatprep.subr.bf16.mxu0 %v19000_v21  ;;  %v19062_v21 = vld [vmem:[%s21335_s25 + $0xa98] ss:$28 sps:$4 sm:$0xff]  }
 0x15c   : > { %18004 = vmatpush3.bf16.msra.mxu1 %v19002_v25 }
 0x15d   : > { %2802 = vmatpush1.bf16.msra.mxu0 %v18998_v24  ;;  %18005 = vmatprep.subr.bf16.mxu1 %v19006_v27  ;;  %v19068_v24 = vld [vmem:[%s21335_s25 + $0xaf4] ss:$28 sps:$4 sm:$0xff]  }
 0x15e   : > { %2803 = vmatprep.subr.bf16.mxu0 %v19005_v26  ;;  %v19071_v26 = vld [vmem:[%s21335_s25 + $0xac4] ss:$28 sps:$4 sm:$0xff]  }
 0x160   : > { %18006 = vmatpush3.bf16.msra.mxu1 %v19007_v29 }
 0x161   : > { %2804 = vmatpush1.bf16.msra.mxu0 %v19003_v28  ;;  %18007 = vmatprep.subr.bf16.mxu1 %v19011_v31  ;;  %v19066_v31 = vld [vmem:[%s21335_s25 + $0xaf0] ss:$28 sps:$4 sm:$0xff]  }
 0x162   : > { %2805 = vmatprep.subr.bf16.mxu0 %v19010_v30 }
 0x164   : > { %18008 = vmatpush3.bf16.msra.mxu1 %v19012_v34 }
 0x165   : > { %2806 = vmatpush1.bf16.msra.mxu0 %v19008_v33  ;;  %18009 = vmatprep.subr.bf16.mxu1 %v19016_v37  ;;  %v19072_v37 = vld [vmem:[%s21335_s25 + $0xb28] ss:$28 sps:$4 sm:$0xff]  }
 0x166   : > { %2807 = vmatprep.subr.bf16.mxu0 %v19015_v36 }
 0x168   : > { %18010 = vmatpush3.bf16.msra.mxu1 %v19017_v39  ;;  %v19080_v39 = vld [vmem:[%s21335_s25 + $0xb64] ss:$28 sps:$4 sm:$0xff]  }
 0x169   : > { %2808 = vmatpush1.bf16.msra.mxu0 %v19013_v38  ;;  %18011 = vmatprep.subr.bf16.mxu1 %v19021_v41  ;;  %v19077_v38 = vld [vmem:[%s21335_s25 + $0xafc] ss:$28 sps:$4 sm:$0xff]  }
 0x16a   : > { %2809 = vmatprep.subr.bf16.mxu0 %v19020_v40 }
 0x16c   : > { %18012 = vmatpush3.bf16.msra.mxu1 %v19022_v43 }
 0x16d   : > { %2810 = vmatpush1.bf16.msra.mxu0 %v19018_v42  ;;  %18013 = vmatprep.subr.bf16.mxu1 %v19026_v45  ;;  %v19075_v42 = vld [vmem:[%s21335_s25 + $0xaf8] ss:$28 sps:$4 sm:$0xff]  }
 0x16e   : > { %2811 = vmatprep.subr.bf16.mxu0 %v19025_v44  ;;  %v19078_v44 = vld [vmem:[%s21335_s25 + $0xb60] ss:$28 sps:$4 sm:$0xff]   ;;  %v19083_v45 = vld [vmem:[%s21335_s25 + $0xb34] ss:$28 sps:$4 sm:$0xff]  }
 0x170   : > { %18014 = vmatpush3.bf16.msra.mxu1 %v19027_v47  ;;  %v19086_v47 = vld [vmem:[%s21335_s25 + $0xb9c] ss:$28 sps:$4 sm:$0xff]  }
 0x171   : > { %2812 = vmatpush1.bf16.msra.mxu0 %v19023_v46  ;;  %18021 = vmatprep.subr.bf16.mxu1 %v19031_v49  ;;  %v19084_v49 = vld [vmem:[%s21335_s25 + $0xb98] ss:$28 sps:$4 sm:$0xff]  }
 0x172   : > { %2813 = vmatprep.subr.bf16.mxu0 %v19030_v48  ;;  %v19081_v48 = vld [vmem:[%s21335_s25 + $0xb30] ss:$28 sps:$4 sm:$0xff]  }
 0x173   : > { %2946 = vmatmul.mubr.bf16.vlgmr.msra.gmra.mrb[12].mxu1 %v21432_v19 }
 0x174   : > { %18022 = vmatpush3.bf16.msra.mxu1 %v19032_v51  ;;  %2985 = vmatprep.mubr.bf16.mxu1 %v21438_v23  ;;  %v19092_v51 = vld [vmem:[%s21335_s25 + $0xbd4] ss:$28 sps:$4 sm:$0xff]  }
 0x175   : > { %2814 = vmatpush1.bf16.msra.mxu0 %v19028_v50  ;;  %18023 = vmatprep.subr.bf16.mxu1 %v19036_v53  ;;  %v19089_v50 = vld [vmem:[%s21335_s25 + $0xb6c] ss:$28 sps:$4 sm:$0xff]  }
 0x176   : > { %2815 = vmatprep.subr.bf16.mxu0 %v19035_v52 }
 0x178   : > { %18024 = vmatpush3.bf16.msra.mxu1 %v19037_v55 }
 0x179   : > { %2816 = vmatpush1.bf16.msra.mxu0 %v19033_v54  ;;  %18025 = vmatprep.subr.bf16.mxu1 %v19041_v57  ;;  %v19090_v57 = vld [vmem:[%s21335_s25 + $0xbd0] ss:$28 sps:$4 sm:$0xff]  }
 0x17a   : > { %2817 = vmatprep.subr.bf16.mxu0 %v19040_v56  ;;  %v19087_v56 = vld [vmem:[%s21335_s25 + $0xb68] ss:$28 sps:$4 sm:$0xff]  }
 0x17c   : > { %18026 = vmatpush3.bf16.msra.mxu1 %v19042_v59  ;;  %v19098_v59 = vld [vmem:[%s21335_s25 + $0xc0c] ss:$28 sps:$4 sm:$0xff]  }
 0x17d   : > { %2818 = vmatpush1.bf16.msra.mxu0 %v19038_v58  ;;  %18027 = vmatprep.subr.bf16.mxu1 %v19046_v61  ;;  %v19095_v58 = vld [vmem:[%s21335_s25 + $0xba4] ss:$28 sps:$4 sm:$0xff]  }
 0x17e   : > { %2819 = vmatprep.subr.bf16.mxu0 %v19045_v60  ;;  %v19093_v60 = vld [vmem:[%s21335_s25 + $0xba0] ss:$28 sps:$4 sm:$0xff]   ;;  %v19096_v61 = vld [vmem:[%s21335_s25 + $0xc08] ss:$28 sps:$4 sm:$0xff]  }
 0x180   : > { %18028 = vmatpush3.bf16.msra.mxu1 %v19047_v4  ;;  %v19104_v4 = vld [vmem:[%s21335_s25 + $0xc44] ss:$28 sps:$4 sm:$0xff]  }
 0x181   : > { %2820 = vmatpush1.bf16.msra.mxu0 %v19043_v1  ;;  %18029 = vmatprep.subr.bf16.mxu1 %v19051_v6  ;;  %v19101_v1 = vld [vmem:[%s21335_s25 + $0xbdc] ss:$28 sps:$4 sm:$0xff]  }
 0x182   : > { %2821 = vmatprep.subr.bf16.mxu0 %v19050_v5  ;;  %v19099_v5 = vld [vmem:[%s21335_s25 + $0xbd8] ss:$28 sps:$4 sm:$0xff]   ;;  %v19102_v6 = vld [vmem:[%s21335_s25 + $0xc40] ss:$28 sps:$4 sm:$0xff]  }
 0x184   : > { %18030 = vmatpush3.bf16.msra.mxu1 %v19052_v8  ;;  %v19110_v8 = vld [vmem:[%s21335_s25 + $0xc7c] ss:$28 sps:$4 sm:$0xff]  }
 0x185   : > { %2822 = vmatpush1.bf16.msra.mxu0 %v19048_v7  ;;  %18031 = vmatprep.subr.bf16.mxu1 %v19056_v10  ;;  %v19107_v7 = vld [vmem:[%s21335_s25 + $0xc14] ss:$28 sps:$4 sm:$0xff]  }
 0x186   : > { %2832 = vmatprep.subr.bf16.mxu0 %v19055_v9 }
 0x188   : > { %2824 = vmatmul.mubr.bf16.vlgmr.msra.gmra.mrb[8].mxu0 %v21403_v63  ;;  %18032 = vmatpush3.bf16.msra.mxu1 %v19057_v12 }
 0x189   : > { %2833 = vmatpush1.bf16.msra.mxu0 %v19053_v11  ;;  %18033 = vmatprep.subr.bf16.mxu1 %v19058_v14  ;;  %v19105_v11 = vld [vmem:[%s21335_s25 + $0xc10] ss:$28 sps:$4 sm:$0xff]   ;;  %v19108_v14 = vld [vmem:[%s21335_s25 + $0xc78] ss:$28 sps:$4 sm:$0xff]  }
 0x18a   : > { %2864 = vmatprep.mubr.bf16.mxu0 %v21233_v32  ;;  %18317 = vmatprep.subr.bf16.mxu0 %v21234_v17 }
 0x18c   : > { %18034 = vmatpush3.bf16.msra.mxu1 %v19059_v15  ;;  %v19113_v15 = vld [vmem:[%s21335_s25 + $0xc4c] ss:$28 sps:$4 sm:$0xff]  }
 0x18d   : > { %18035 = vmatprep.subr.bf16.mxu1 %v19060_v16  ;;  %v19116_v16 = vld [vmem:[%s21335_s25 + $0xcb4] ss:$28 sps:$4 sm:$0xff]  }
 0x190   : > { %18036 = vmatpush3.bf16.msra.mxu1 %v19061_v18 }
 0x191   : > { %5249 = vmatprep.subr.bf16.mxu1 %v19065_v20 }
 0x193   : > { %v2538_v25 = vpop.f32.mrb[0].mxu0  ;;  %2986 = vmatmul.mubr.bf16.vlgmr.msra.gmra.mrb[16].mxu1 %v21403_v63 }
 0x194   : > { %v18347_v27 = vadd.f32 %v2538_v25, %v21670_v0  ;;  %14982 = vmatmul.mubr.msk.bf16.vlgmr.msra.gmra.mrb[8].mxu0 %vm2377_vm0, %v21518_v35  ;;  %v2540_v28 = vpop.f32.mrb[1].mxu0  ;;  %5250 = vmatpush1.bf16.msra.mxu1 %v19063_v22  ;;  %v19074_v0 = vld [vmem:[%s21335_s25 + $0xb2c] ss:$28 sps:$4 sm:$0xff]  }
 0x195   : > { %v18348_v29 = vadd.f32 %v2540_v28, %v21674_v2  ;;  %18318 = vmatpush3.bf16.msra.mxu0 %v19062_v21  ;;  %v2542_v30 = vpop.f32.mrb[2].mxu0  ;;  %5251 = vmatprep.subr.bf16.mxu1 %v19068_v24  ;;  %v19069_v2 = vld [vmem:[%s21335_s25 + $0xac0] ss:$28 sps:$4 sm:$0xff]   ;;  %v19111_v21 = vld [vmem:[%s21335_s25 + $0xc48] ss:$28 sps:$4 sm:$0xff]  }
 0x196   : > { %v14984_v33 = vmul.f32 -1.442695, %v18347_v27  ;;  %v2543_v34 = vpop.f32.mrb[3].mxu0  ;;  %18319 = vmatprep.mubr.msk.bf16.mxu0 %vm21235_vm1, %v21234_v17  ;;  %5413 = vmatprep.subr.bf16.mxu0 %v19071_v26  ;;  %v19114_v22 = vld [vmem:[%s21335_s25 + $0xcb0] ss:$28 sps:$4 sm:$0xff]  }
 0x197   : > { %v14985_v36 = vmul.f32 -1.442695, %v18348_v29  ;;  %5281 = vmatprep.mubr.bf16.mxu1 %v21400_v62  ;;  %v19119_v24 = vld [vmem:[%s21335_s25 + $0xc84] ss:$28 sps:$4 sm:$0xff]   ;;  %v19122_v25 = vld [vmem:[%s21335_s25 + $0xcec] ss:$28 sps:$4 sm:$0xff]  }
 0x198   : > { %21023 = vpow2.f32 %v14984_v33  ;;  %5252 = vmatpush1.bf16.msra.mxu1 %v19066_v31  ;;  %v19117_v26 = vld [vmem:[%s21335_s25 + $0xc80] ss:$28 sps:$4 sm:$0xff]   ;;  %v19120_v27 = vld [vmem:[%s21335_s25 + $0xce8] ss:$28 sps:$4 sm:$0xff]   ;;  %v19123_v30 = vld [vmem:[%s21335_s25 + $0xcb8] ss:$28 sps:$4 sm:$0xff]  }
 0x199   : > { %21025 = vpow2.f32 %v14985_v36  ;;  %5253 = vmatprep.subr.bf16.mxu1 %v19074_v0  ;;  %v19125_v28 = vld [vmem:[%s21335_s25 + $0xcbc] ss:$28 sps:$4 sm:$0xff]   ;;  %v19128_v29 = vld [vmem:[%s21335_s25 + $0xd24] ss:$28 sps:$4 sm:$0xff]   ;;  %v19131_v33 = vld [vmem:[%s21335_s25 + $0xcf4] ss:$28 sps:$4 sm:$0xff]  }
 0x19a   : > { %v19126_v31 = vld [vmem:[%s21335_s25 + $0xd20] ss:$28 sps:$4 sm:$0xff]   ;;  %v19129_v0 = vld [vmem:[%s21335_s25 + $0xcf0] ss:$28 sps:$4 sm:$0xff]   ;;  %v19132_v36 = vld [vmem:[%s21335_s25 + $0xd58] ss:$28 sps:$4 sm:$0xff]  }
 0x19b   : > { %v21768_v40 = vpop.f32.mrb[4].mxu0  ;;  %v19134_v34 = vld [vmem:[%s21335_s25 + $0xd5c] ss:$28 sps:$4 sm:$0xff]  }
 0x19c   : > { %18320 = vmatmul.mubr.msk.bf16.vlgmr.msra.gmra.mrb[12].mxu0 %vm2377_vm0, %v21518_v35  ;;  %v21772_v41 = vpop.f32.mrb[5].mxu0  ;;  %5254 = vmatpush1.bf16.msra.mxu1 %v19072_v37  ;;  %v19140_v37 = vld [vmem:[%s21335_s25 + $0xd94] ss:$28 sps:$4 sm:$0xff]  }
 0x19d   : > { %5414 = vmatpush1.bf16.msra.mxu0 %v19069_v2  ;;  %v2706_v43 = vpop.f32.mrb[6].mxu0  ;;  %5255 = vmatprep.subr.bf16.mxu1 %v19080_v39  ;;  %v19137_v2 = vld [vmem:[%s21335_s25 + $0xd2c] ss:$28 sps:$4 sm:$0xff]  }
 0x19e   : > { %v2707_v46 = vpop.f32.mrb[7].mxu0  ;;  %5415 = vmatprep.subr.bf16.mxu0 %v19077_v38  ;;  %5445 = vmatprep.mubr.bf16.mxu0 %v21400_v62  ;;  %v19135_v38 = vld [vmem:[%s21335_s25 + $0xd28] ss:$28 sps:$4 sm:$0xff]   ;;  %v19138_v39 = vld [vmem:[%s21335_s25 + $0xd90] ss:$28 sps:$4 sm:$0xff]  }
 0x19f   : > { %v19146_v43 = vld [vmem:[%s21335_s25 + $0xdcc] ss:$28 sps:$4 sm:$0xff]   ;;  %v19149_v46 = vld [vmem:[%s21335_s25 + $0xd9c] ss:$28 sps:$4 sm:$0xff]  }
 0x1a0   : > { %5256 = vmatpush1.bf16.msra.mxu1 %v19078_v44  ;;  %v19141_v44 = vld [vmem:[%s21335_s25 + $0xd60] ss:$28 sps:$4 sm:$0xff]  }
 0x1a1   : > { %5416 = vmatpush1.bf16.msra.mxu0 %v19075_v42  ;;  %5257 = vmatprep.subr.bf16.mxu1 %v19086_v47  ;;  %v19143_v42 = vld [vmem:[%s21335_s25 + $0xd64] ss:$28 sps:$4 sm:$0xff]  }
 0x1a2   : > { %v21024_v52 = vpop.eup %21023  ;;  %5417 = vmatprep.subr.bf16.mxu0 %v19083_v45  ;;  %v19144_v45 = vld [vmem:[%s21335_s25 + $0xdc8] ss:$28 sps:$4 sm:$0xff]  }
 0x1a3   : > { %v21026_v53 = vpop.eup %21025  ;;  %v3054_v54 = vadd.f32 1.0, %v21024_v52  ;;  %v19152_v47 = vld [vmem:[%s21335_s25 + $0xe04] ss:$28 sps:$4 sm:$0xff]   ;;  %v19153_v52 = vld [vmem:[%s21335_s25 + $0xdd0] ss:$28 sps:$4 sm:$0xff]  }
 0x1a4   : > { %v3055_v55 = vadd.f32 1.0, %v21026_v53  ;;  %5258 = vmatpush1.bf16.msra.mxu1 %v19084_v49  ;;  %v19150_v49 = vld [vmem:[%s21335_s25 + $0xe00] ss:$28 sps:$4 sm:$0xff]   ;;  %v19156_v53 = vld [vmem:[%s21335_s25 + $0xe38] ss:$28 sps:$4 sm:$0xff]  }
 0x1a5   : > { %21027 = vrcp.f32 %v3054_v54  ;;  %5418 = vmatpush1.bf16.msra.mxu0 %v19081_v48  ;;  %5259 = vmatprep.subr.bf16.mxu1 %v19092_v51  ;;  %v19147_v48 = vld [vmem:[%s21335_s25 + $0xd98] ss:$28 sps:$4 sm:$0xff]   ;;  %v19161_v54 = vld [vmem:[%s21335_s25 + $0xe0c] ss:$28 sps:$4 sm:$0xff]  }
 0x1a6   : > { %21029 = vrcp.f32 %v3055_v55  ;;  %5419 = vmatprep.subr.bf16.mxu0 %v19089_v50  ;;  %v19155_v50 = vld [vmem:[%s21335_s25 + $0xdd4] ss:$28 sps:$4 sm:$0xff]   ;;  %v19158_v51 = vld [vmem:[%s21335_s25 + $0xe3c] ss:$28 sps:$4 sm:$0xff]  }
 0x1a7   : > { %v19164_v55 = vld [vmem:[%s21335_s25 + $0xe74] ss:$28 sps:$4 sm:$0xff]  }
 0x1a8   : > { %5260 = vmatpush1.bf16.msra.mxu1 %v19090_v57  ;;  %v19162_v57 = vld [vmem:[%s21335_s25 + $0xe70] ss:$28 sps:$4 sm:$0xff]  }
 0x1a9   : > { %5420 = vmatpush1.bf16.msra.mxu0 %v19087_v56  ;;  %5261 = vmatprep.subr.bf16.mxu1 %v19098_v59  ;;  %v19159_v56 = vld [vmem:[%s21335_s25 + $0xe08] ss:$28 sps:$4 sm:$0xff]  }
 0x1aa   : > { %5421 = vmatprep.subr.bf16.mxu0 %v19095_v58  ;;  %v19167_v58 = vld [vmem:[%s21335_s25 + $0xe44] ss:$28 sps:$4 sm:$0xff]   ;;  %v19170_v59 = vld [vmem:[%s21335_s25 + $0xeac] ss:$28 sps:$4 sm:$0xff]  }
 0x1ac   : > { %5262 = vmatpush1.bf16.msra.mxu1 %v19096_v61  ;;  %v19168_v61 = vld [vmem:[%s21335_s25 + $0xea8] ss:$28 sps:$4 sm:$0xff]  }
 0x1ad   : > { %5422 = vmatpush1.bf16.msra.mxu0 %v19093_v60  ;;  %5263 = vmatprep.subr.bf16.mxu1 %v19104_v4  ;;  %v19165_v60 = vld [vmem:[%s21335_s25 + $0xe40] ss:$28 sps:$4 sm:$0xff]  }
 0x1ae   : > { %5423 = vmatprep.subr.bf16.mxu0 %v19101_v1  ;;  %v19173_v1 = vld [vmem:[%s21335_s25 + $0xe7c] ss:$28 sps:$4 sm:$0xff]   ;;  %v19176_v4 = vld [vmem:[%s21335_s25 + $0xee4] ss:$28 sps:$4 sm:$0xff]  }
 0x1af   : > { %v21028_v9 = vpop.eup %21027 }
 0x1b0   : > { %v21030_v10 = vpop.eup %21029  ;;  %v3076_v12 = vsel %vm3075_vm2, %v21028_v9, 0.0  ;;  %5264 = vmatpush1.bf16.msra.mxu1 %v19102_v6  ;;  %v19174_v6 = vld [vmem:[%s21335_s25 + $0xee0] ss:$28 sps:$4 sm:$0xff]   ;;  %v19177_v9 = vld [vmem:[%s21335_s25 + $0xeb0] ss:$28 sps:$4 sm:$0xff]  }
 0x1b1   : > { %5424 = vmatpush1.bf16.msra.mxu0 %v19099_v5  ;;  %5265 = vmatprep.subr.bf16.mxu1 %v19110_v8  ;;  %v3077_v18 = vsel %vm3075_vm2, %v21030_v10, 0.0  ;;  %v19171_v5 = vld [vmem:[%s21335_s25 + $0xe78] ss:$28 sps:$4 sm:$0xff]  }
 0x1b2   : > { %5425 = vmatprep.subr.bf16.mxu0 %v19107_v7  ;;  %v21801_v20 = vadd.f32 %v3077_v18, %v3076_v12  ;;  %v19179_v7 = vld [vmem:[%s21335_s25 + $0xeb4] ss:$28 sps:$4 sm:$0xff]   ;;  %v19182_v8 = vld [vmem:[%s21335_s25 + $0xf1c] ss:$28 sps:$4 sm:$0xff]   ;;  %v19194_v18 = vld [vmem:[%s21335_s25 + $0xf8c] ss:$28 sps:$4 sm:$0xff]  }
 0x1b3   : > { %v19180_v10 = vld [vmem:[%s21335_s25 + $0xf18] ss:$28 sps:$4 sm:$0xff]  }
 0x1b4   : > { %5266 = vmatpush1.bf16.msra.mxu1 %v19108_v14  ;;  %v19188_v12 = vld [vmem:[%s21335_s25 + $0xf54] ss:$28 sps:$4 sm:$0xff]   ;;  %v19183_v14 = vld [vmem:[%s21335_s25 + $0xee8] ss:$28 sps:$4 sm:$0xff]  }
 0x1b5   : > { %5426 = vmatpush1.bf16.msra.mxu0 %v19105_v11  ;;  %5267 = vmatprep.subr.bf16.mxu1 %v19116_v16  ;;  %v19185_v11 = vld [vmem:[%s21335_s25 + $0xeec] ss:$28 sps:$4 sm:$0xff]   ;;  %v19191_v16 = vld [vmem:[%s21335_s25 + $0xf24] ss:$28 sps:$4 sm:$0xff]  }
 0x1b6   : > { %5427 = vmatprep.subr.bf16.mxu0 %v19113_v15  ;;  %v19186_v15 = vld [vmem:[%s21335_s25 + $0xf50] ss:$28 sps:$4 sm:$0xff]  }
 0x1b8   : > { %5268 = vmatpush1.bf16.msra.mxu1 %v19114_v22  ;;  %v19192_v22 = vld [vmem:[%s21335_s25 + $0xf88] ss:$28 sps:$4 sm:$0xff]  }
 0x1b9   : > { %5428 = vmatpush1.bf16.msra.mxu0 %v19111_v21  ;;  %5269 = vmatprep.subr.bf16.mxu1 %v19122_v25  ;;  %v19189_v21 = vld [vmem:[%s21335_s25 + $0xf20] ss:$28 sps:$4 sm:$0xff]  }
 0x1ba   : > { %5429 = vmatprep.subr.bf16.mxu0 %v19119_v24  ;;  %v19197_v24 = vld [vmem:[%s21335_s25 + $0xf5c] ss:$28 sps:$4 sm:$0xff]   ;;  %v19200_v25 = vld [vmem:[%s21335_s25 + $0xfc4] ss:$28 sps:$4 sm:$0xff]  }
 0x1bc   : > { %5270 = vmatpush1.bf16.msra.mxu1 %v19120_v27  ;;  %v19198_v27 = vld [vmem:[%s21335_s25 + $0xfc0] ss:$28 sps:$4 sm:$0xff]  }
 0x1bd   : > { %5430 = vmatpush1.bf16.msra.mxu0 %v19117_v26  ;;  %5271 = vmatprep.subr.bf16.mxu1 %v19128_v29  ;;  %v19195_v26 = vld [vmem:[%s21335_s25 + $0xf58] ss:$28 sps:$4 sm:$0xff]  }
 0x1be   : > { %5431 = vmatprep.subr.bf16.mxu0 %v19125_v28  ;;  %v19203_v28 = vld [vmem:[%s21335_s25 + $0xf94] ss:$28 sps:$4 sm:$0xff]   ;;  %v19206_v29 = vld [vmem:[%s21335_s25 + $0xffc] ss:$28 sps:$4 sm:$0xff]  }
 0x1c0   : > { %5272 = vmatpush1.bf16.msra.mxu1 %v19126_v31  ;;  %v19204_v31 = vld [vmem:[%s21335_s25 + $0xff8] ss:$28 sps:$4 sm:$0xff]  }
 0x1c1   : > { %5432 = vmatpush1.bf16.msra.mxu0 %v19123_v30  ;;  %5273 = vmatprep.subr.bf16.mxu1 %v19134_v34  ;;  %v19201_v30 = vld [vmem:[%s21335_s25 + $0xf90] ss:$28 sps:$4 sm:$0xff]  }
 0x1c2   : > { %5433 = vmatprep.subr.bf16.mxu0 %v19131_v33  ;;  %v19209_v33 = vld [vmem:[%s21335_s25 + $0xfcc] ss:$28 sps:$4 sm:$0xff]   ;;  %v19212_v34 = vld [vmem:[%s21335_s25 + $0x1034] ss:$28 sps:$4 sm:$0xff]  }
 0x1c4   : > { %5274 = vmatpush1.bf16.msra.mxu1 %v19132_v36  ;;  %v19210_v36 = vld [vmem:[%s21335_s25 + $0x1030] ss:$28 sps:$4 sm:$0xff]  }
 0x1c5   : > { %5434 = vmatpush1.bf16.msra.mxu0 %v19129_v0  ;;  %5275 = vmatprep.subr.bf16.mxu1 %v19140_v37  ;;  %v19207_v0 = vld [vmem:[%s21335_s25 + $0xfc8] ss:$28 sps:$4 sm:$0xff]  }
 0x1c6   : > { %5435 = vmatprep.subr.bf16.mxu0 %v19137_v2  ;;  %v19215_v2 = vld [vmem:[%s21335_s25 + $0x1004] ss:$28 sps:$4 sm:$0xff]   ;;  %v19218_v37 = vld [vmem:[%s21335_s25 + $0x106c] ss:$28 sps:$4 sm:$0xff]  }
 0x1c8   : > { %5276 = vmatpush1.bf16.msra.mxu1 %v19138_v39  ;;  %v19216_v39 = vld [vmem:[%s21335_s25 + $0x1068] ss:$28 sps:$4 sm:$0xff]  }
 0x1c9   : > { %5436 = vmatpush1.bf16.msra.mxu0 %v19135_v38  ;;  %5277 = vmatprep.subr.bf16.mxu1 %v19146_v43  ;;  %v19213_v38 = vld [vmem:[%s21335_s25 + $0x1000] ss:$28 sps:$4 sm:$0xff]  }
 0x1ca   : > { %5437 = vmatprep.subr.bf16.mxu0 %v19143_v42  ;;  %v19221_v42 = vld [vmem:[%s21335_s25 + $0x103c] ss:$28 sps:$4 sm:$0xff]   ;;  %v19224_v43 = vld [vmem:[%s21335_s25 + $0x10a4] ss:$28 sps:$4 sm:$0xff]  }
 0x1cc   : > { %5278 = vmatpush1.bf16.msra.mxu1 %v19144_v45  ;;  %v19222_v45 = vld [vmem:[%s21335_s25 + $0x10a0] ss:$28 sps:$4 sm:$0xff]  }
 0x1cd   : > { %5438 = vmatpush1.bf16.msra.mxu0 %v19141_v44  ;;  %5279 = vmatprep.subr.bf16.mxu1 %v19152_v47  ;;  %v19219_v44 = vld [vmem:[%s21335_s25 + $0x1038] ss:$28 sps:$4 sm:$0xff]  }
 0x1ce   : > { %5439 = vmatprep.subr.bf16.mxu0 %v19149_v46  ;;  %v19227_v46 = vld [vmem:[%s21335_s25 + $0x1074] ss:$28 sps:$4 sm:$0xff]   ;;  %v19230_v47 = vld [vmem:[%s21335_s25 + $0x10dc] ss:$28 sps:$4 sm:$0xff]  }
 0x1d0   : > { %5280 = vmatpush1.bf16.msra.mxu1 %v19150_v49  ;;  %v19228_v49 = vld [vmem:[%s21335_s25 + $0x10d8] ss:$28 sps:$4 sm:$0xff]  }
 0x1d1   : > { %5440 = vmatpush1.bf16.msra.mxu0 %v19147_v48  ;;  %5290 = vmatprep.subr.bf16.mxu1 %v19158_v51  ;;  %v19225_v48 = vld [vmem:[%s21335_s25 + $0x1070] ss:$28 sps:$4 sm:$0xff]  }
 0x1d2   : > { %5441 = vmatprep.subr.bf16.mxu0 %v19155_v50  ;;  %v19233_v50 = vld [vmem:[%s21335_s25 + $0x10ac] ss:$28 sps:$4 sm:$0xff]   ;;  %v19236_v51 = vld [vmem:[%s21335_s25 + $0x1114] ss:$28 sps:$4 sm:$0xff]  }
 0x1d3   : > { %5282 = vmatmul.mubr.bf16.vlgmr.msra.gmra.mrb[20].mxu1 %v21424_v13 }
 0x1d4   : > { %5291 = vmatpush1.bf16.msra.mxu1 %v19156_v53  ;;  %5322 = vmatprep.mubr.bf16.mxu1 %v21410_v3  ;;  %v19234_v53 = vld [vmem:[%s21335_s25 + $0x1110] ss:$28 sps:$4 sm:$0xff]  }
 0x1d5   : > { %5442 = vmatpush1.bf16.msra.mxu0 %v19153_v52  ;;  %5292 = vmatprep.subr.bf16.mxu1 %v19164_v55  ;;  %v19231_v52 = vld [vmem:[%s21335_s25 + $0x10a8] ss:$28 sps:$4 sm:$0xff]  }
 0x1d6   : > { %5443 = vmatprep.subr.bf16.mxu0 %v19161_v54  ;;  %v19239_v54 = vld [vmem:[%s21335_s25 + $0x10e4] ss:$28 sps:$4 sm:$0xff]   ;;  %v19242_v55 = vld [vmem:[%s21335_s25 + $0x114c] ss:$28 sps:$4 sm:$0xff]  }
 0x1d8   : > { %5293 = vmatpush1.bf16.msra.mxu1 %v19162_v57 }
 0x1d9   : > { %5444 = vmatpush1.bf16.msra.mxu0 %v19159_v56  ;;  %5294 = vmatprep.subr.bf16.mxu1 %v19170_v59  ;;  %v19237_v59 = vld [vmem:[%s21335_s25 + $0x10e0] ss:$28 sps:$4 sm:$0xff]  }
 0x1da   : > { %5454 = vmatprep.subr.bf16.mxu0 %v19167_v58 }
 0x1dc   : > { %5446 = vmatmul.mubr.bf16.vlgmr.msra.gmra.mrb[16].mxu0 %v21424_v13  ;;  %5295 = vmatpush1.bf16.msra.mxu1 %v19168_v61 }
 0x1dd   : > { %5455 = vmatpush1.bf16.msra.mxu0 %v19165_v60  ;;  %5296 = vmatprep.subr.bf16.mxu1 %v19176_v4  ;;  %v19245_v4 = vld [vmem:[%s21335_s25 + $0x111c] ss:$28 sps:$4 sm:$0xff]  }
 0x1de   : > { %5456 = vmatprep.subr.bf16.mxu0 %v19173_v1  ;;  %5486 = vmatprep.mubr.bf16.mxu0 %v21410_v3  ;;  %v19240_v1 = vld [vmem:[%s21335_s25 + $0x1148] ss:$28 sps:$4 sm:$0xff]  }
 0x1e0   : > { %5297 = vmatpush1.bf16.msra.mxu1 %v19174_v6 }
 0x1e1   : > { %5457 = vmatpush1.bf16.msra.mxu0 %v19171_v5  ;;  %5298 = vmatprep.subr.bf16.mxu1 %v19182_v8  ;;  %v19243_v8 = vld [vmem:[%s21335_s25 + $0x1118] ss:$28 sps:$4 sm:$0xff]  }
 0x1e2   : > { %5458 = vmatprep.subr.bf16.mxu0 %v19179_v7 }
 0x1e4   : > { %5299 = vmatpush1.bf16.msra.mxu1 %v19180_v10  ;;  %v19254_v10 = vld [vmem:[%s21335_s25 + $0x11bc] ss:$28 sps:$4 sm:$0xff]  }
 0x1e5   : > { %5459 = vmatpush1.bf16.msra.mxu0 %v19177_v9  ;;  %5300 = vmatprep.subr.bf16.mxu1 %v19188_v12  ;;  %v19251_v9 = vld [vmem:[%s21335_s25 + $0x1154] ss:$28 sps:$4 sm:$0xff]  }
 0x1e6   : > { %5460 = vmatprep.subr.bf16.mxu0 %v19185_v11  ;;  %v19249_v11 = vld [vmem:[%s21335_s25 + $0x1150] ss:$28 sps:$4 sm:$0xff]   ;;  %v19252_v12 = vld [vmem:[%s21335_s25 + $0x11b8] ss:$28 sps:$4 sm:$0xff]  }
 0x1e8   : > { %5301 = vmatpush1.bf16.msra.mxu1 %v19186_v15  ;;  %v19260_v15 = vld [vmem:[%s21335_s25 + $0x11f4] ss:$28 sps:$4 sm:$0xff]  }
 0x1e9   : > { %5461 = vmatpush1.bf16.msra.mxu0 %v19183_v14  ;;  %5302 = vmatprep.subr.bf16.mxu1 %v19194_v18  ;;  %v19257_v14 = vld [vmem:[%s21335_s25 + $0x118c] ss:$28 sps:$4 sm:$0xff]  }
 0x1ea   : > { %5462 = vmatprep.subr.bf16.mxu0 %v19191_v16  ;;  %v19255_v16 = vld [vmem:[%s21335_s25 + $0x1188] ss:$28 sps:$4 sm:$0xff]   ;;  %v19258_v18 = vld [vmem:[%s21335_s25 + $0x11f0] ss:$28 sps:$4 sm:$0xff]  }
 0x1ec   : > { %5303 = vmatpush1.bf16.msra.mxu1 %v19192_v22 }
 0x1ed   : > { %5463 = vmatpush1.bf16.msra.mxu0 %v19189_v21  ;;  %5304 = vmatprep.subr.bf16.mxu1 %v19200_v25  ;;  %v19263_v21 = vld [vmem:[%s21335_s25 + $0x11c4] ss:$28 sps:$4 sm:$0xff]  }
 0x1ee   : > { %5464 = vmatprep.subr.bf16.mxu0 %v19197_v24  ;;  %v19266_v24 = vld [vmem:[%s21335_s25 + $0x122c] ss:$28 sps:$4 sm:$0xff]  }
 0x1f0   : > { %5305 = vmatpush1.bf16.msra.mxu1 %v19198_v27 }
 0x1f1   : > { %5465 = vmatpush1.bf16.msra.mxu0 %v19195_v26  ;;  %5306 = vmatprep.subr.bf16.mxu1 %v19206_v29  ;;  %v19264_v29 = vld [vmem:[%s21335_s25 + $0x1228] ss:$28 sps:$4 sm:$0xff]  }
 0x1f2   : > { %5466 = vmatprep.subr.bf16.mxu0 %v19203_v28  ;;  %v19261_v28 = vld [vmem:[%s21335_s25 + $0x11c0] ss:$28 sps:$4 sm:$0xff]  }
 0x1f4   : > { %5307 = vmatpush1.bf16.msra.mxu1 %v19204_v31  ;;  %v19272_v31 = vld [vmem:[%s21335_s25 + $0x1264] ss:$28 sps:$4 sm:$0xff]  }
 0x1f5   : > { %5467 = vmatpush1.bf16.msra.mxu0 %v19201_v30  ;;  %5308 = vmatprep.subr.bf16.mxu1 %v19212_v34  ;;  %v19269_v30 = vld [vmem:[%s21335_s25 + $0x11fc] ss:$28 sps:$4 sm:$0xff]  }
 0x1f6   : > { %5468 = vmatprep.subr.bf16.mxu0 %v19209_v33  ;;  %v19267_v33 = vld [vmem:[%s21335_s25 + $0x11f8] ss:$28 sps:$4 sm:$0xff]   ;;  %v19270_v34 = vld [vmem:[%s21335_s25 + $0x1260] ss:$28 sps:$4 sm:$0xff]  }
 0x1f8   : > { %5309 = vmatpush1.bf16.msra.mxu1 %v19210_v36  ;;  %v19278_v36 = vld [vmem:[%s21335_s25 + $0x129c] ss:$28 sps:$4 sm:$0xff]  }
 0x1f9   : > { %5469 = vmatpush1.bf16.msra.mxu0 %v19207_v0  ;;  %5310 = vmatprep.subr.bf16.mxu1 %v19218_v37  ;;  %v19275_v0 = vld [vmem:[%s21335_s25 + $0x1234] ss:$28 sps:$4 sm:$0xff]  }
 0x1fa   : > { %5470 = vmatprep.subr.bf16.mxu0 %v19215_v2  ;;  %v19273_v2 = vld [vmem:[%s21335_s25 + $0x1230] ss:$28 sps:$4 sm:$0xff]   ;;  %v19276_v37 = vld [vmem:[%s21335_s25 + $0x1298] ss:$28 sps:$4 sm:$0xff]  }
 0x1fc   : > { %5311 = vmatpush1.bf16.msra.mxu1 %v19216_v39  ;;  %v19284_v39 = vld [vmem:[%s21335_s25 + $0x12d4] ss:$28 sps:$4 sm:$0xff]  }
 0x1fd   : > { %5471 = vmatpush1.bf16.msra.mxu0 %v19213_v38  ;;  %5312 = vmatprep.subr.bf16.mxu1 %v19224_v43  ;;  %v19281_v38 = vld [vmem:[%s21335_s25 + $0x126c] ss:$28 sps:$4 sm:$0xff]  }
 0x1fe   : > { %5472 = vmatprep.subr.bf16.mxu0 %v19221_v42  ;;  %v19279_v43 = vld [vmem:[%s21335_s25 + $0x1268] ss:$28 sps:$4 sm:$0xff]  }
 0x200   : > { %5313 = vmatpush1.bf16.msra.mxu1 %v19222_v45  ;;  %v19282_v45 = vld [vmem:[%s21335_s25 + $0x12d0] ss:$28 sps:$4 sm:$0xff]  }
 0x201   : > { %5473 = vmatpush1.bf16.msra.mxu0 %v19219_v44  ;;  %5314 = vmatprep.subr.bf16.mxu1 %v19230_v47  ;;  %v19287_v47 = vld [vmem:[%s21335_s25 + $0x12a4] ss:$28 sps:$4 sm:$0xff]  }
 0x202   : > { %5474 = vmatprep.subr.bf16.mxu0 %v19227_v46 }
 0x204   : > { %5315 = vmatpush1.bf16.msra.mxu1 %v19228_v49 }
 0x205   : > { %5475 = vmatpush1.bf16.msra.mxu0 %v19225_v48  ;;  %5316 = vmatprep.subr.bf16.mxu1 %v19236_v51 }
 0x206   : > { %5476 = vmatprep.subr.bf16.mxu0 %v19233_v50  ;;  %v2661_v56 = vpop.f32.mrb[4].mxu1  ;;  %v19290_v50 = vld [vmem:[%s21335_s25 + $0x130c] ss:$28 sps:$4 sm:$0xff]  }
 0x207   : > { %v18349_v57 = vadd.f32 %v21768_v40, %v2661_v56  ;;  %v2663_v58 = vpop.f32.mrb[5].mxu1  ;;  %v19248_v40 = vld [vmem:[%s21335_s25 + $0x1184] ss:$28 sps:$4 sm:$0xff]   ;;  %v19293_v56 = vld [vmem:[%s21335_s25 + $0x12dc] ss:$28 sps:$4 sm:$0xff]  }
 0x208   : > { %v18350_v60 = vadd.f32 %v21772_v41, %v2663_v58  ;;  %v2665_v61 = vpop.f32.mrb[6].mxu1  ;;  %5317 = vmatpush1.bf16.msra.mxu1 %v19234_v53  ;;  %v19246_v41 = vld [vmem:[%s21335_s25 + $0x1180] ss:$28 sps:$4 sm:$0xff]  }
 0x209   : > { %5477 = vmatpush1.bf16.msra.mxu0 %v19231_v52  ;;  %v14986_v5 = vmul.f32 -1.442695, %v18349_v57  ;;  %v2666_v6 = vpop.f32.mrb[7].mxu1  ;;  %5318 = vmatprep.subr.bf16.mxu1 %v19242_v55  ;;  %v19285_v53 = vld [vmem:[%s21335_s25 + $0x12a0] ss:$28 sps:$4 sm:$0xff]  }
 0x20a   : > { %5478 = vmatprep.subr.bf16.mxu0 %v19239_v54  ;;  %v14987_v7 = vmul.f32 -1.442695, %v18350_v60  ;;  %v19288_v55 = vld [vmem:[%s21335_s25 + $0x1308] ss:$28 sps:$4 sm:$0xff]   ;;  %v19291_v60 = vld [vmem:[%s21335_s25 + $0x12d8] ss:$28 sps:$4 sm:$0xff]  }
 0x20b   : > { %21031 = vpow2.f32 %v14986_v5  ;;  %v19294_v61 = vld [vmem:[%s21335_s25 + $0x1340] ss:$28 sps:$4 sm:$0xff]   ;;  %v19297_v5 = vld [vmem:[%s21335_s25 + $0x1310] ss:$28 sps:$4 sm:$0xff]   ;;  %v19300_v6 = vld [vmem:[%s21335_s25 + $0x1378] ss:$28 sps:$4 sm:$0xff]  }
 0x20c   : > { %21033 = vpow2.f32 %v14987_v7  ;;  %5319 = vmatpush1.bf16.msra.mxu1 %v19240_v1  ;;  %v19299_v1 = vld [vmem:[%s21335_s25 + $0x1314] ss:$28 sps:$4 sm:$0xff]  }
 0x20d   : > { %5479 = vmatpush1.bf16.msra.mxu0 %v19237_v59  ;;  %5320 = vmatprep.subr.bf16.mxu1 %v19248_v40  ;;  %v19296_v59 = vld [vmem:[%s21335_s25 + $0x1344] ss:$28 sps:$4 sm:$0xff]   ;;  %v19305_v40 = vld [vmem:[%s21335_s25 + $0x134c] ss:$28 sps:$4 sm:$0xff]   ;;  %v19308_v7 = vld [vmem:[%s21335_s25 + $0x13b4] ss:$28 sps:$4 sm:$0xff]  }
 0x20e   : > { %5480 = vmatprep.subr.bf16.mxu0 %v19245_v4  ;;  %v19302_v4 = vld [vmem:[%s21335_s25 + $0x137c] ss:$28 sps:$4 sm:$0xff]  }
 0x210   : > { %5321 = vmatpush1.bf16.msra.mxu1 %v19246_v41  ;;  %v19306_v41 = vld [vmem:[%s21335_s25 + $0x13b0] ss:$28 sps:$4 sm:$0xff]  }
 0x211   : > { %5481 = vmatpush1.bf16.msra.mxu0 %v19243_v8  ;;  %5331 = vmatprep.subr.bf16.mxu1 %v19254_v10  ;;  %v19303_v8 = vld [vmem:[%s21335_s25 + $0x1348] ss:$28 sps:$4 sm:$0xff]  }
 0x212   : > { %5482 = vmatprep.subr.bf16.mxu0 %v19251_v9  ;;  %v19311_v9 = vld [vmem:[%s21335_s25 + $0x1384] ss:$28 sps:$4 sm:$0xff]   ;;  %v19314_v10 = vld [vmem:[%s21335_s25 + $0x13ec] ss:$28 sps:$4 sm:$0xff]  }
 0x213   : > { %5323 = vmatmul.mubr.bf16.vlgmr.msra.gmra.mrb[20].mxu1 %v21432_v19 }
 0x214   : > { %5332 = vmatpush1.bf16.msra.mxu1 %v19252_v12  ;;  %5363 = vmatprep.mubr.bf16.mxu1 %v21438_v23  ;;  %v19312_v12 = vld [vmem:[%s21335_s25 + $0x13e8] ss:$28 sps:$4 sm:$0xff]  }
 0x215   : > { %5483 = vmatpush1.bf16.msra.mxu0 %v19249_v11  ;;  %v21032_v22 = vpop.eup %21031  ;;  %5333 = vmatprep.subr.bf16.mxu1 %v19260_v15  ;;  %v19309_v11 = vld [vmem:[%s21335_s25 + $0x1380] ss:$28 sps:$4 sm:$0xff]  }
 0x216   : > { %5484 = vmatprep.subr.bf16.mxu0 %v19257_v14  ;;  %v21034_v25 = vpop.eup %21033  ;;  %v3056_v26 = vadd.f32 1.0, %v21032_v22  ;;  %v19317_v14 = vld [vmem:[%s21335_s25 + $0x13bc] ss:$28 sps:$4 sm:$0xff]   ;;  %v19320_v15 = vld [vmem:[%s21335_s25 + $0x1424] ss:$28 sps:$4 sm:$0xff]  }
 0x217   : > { %v3057_v27 = vadd.f32 1.0, %v21034_v25  ;;  %v19326_v22 = vld [vmem:[%s21335_s25 + $0x145c] ss:$28 sps:$4 sm:$0xff]  }
 0x218   : > { %21035 = vrcp.f32 %v3056_v26  ;;  %5334 = vmatpush1.bf16.msra.mxu1 %v19258_v18  ;;  %v19318_v18 = vld [vmem:[%s21335_s25 + $0x1420] ss:$28 sps:$4 sm:$0xff]   ;;  %v19324_v25 = vld [vmem:[%s21335_s25 + $0x1458] ss:$28 sps:$4 sm:$0xff]   ;;  %v19329_v26 = vld [vmem:[%s21335_s25 + $0x142c] ss:$28 sps:$4 sm:$0xff]  }
 0x219   : > { %5485 = vmatpush1.bf16.msra.mxu0 %v19255_v16  ;;  %21037 = vrcp.f32 %v3057_v27  ;;  %5335 = vmatprep.subr.bf16.mxu1 %v19266_v24  ;;  %v19315_v16 = vld [vmem:[%s21335_s25 + $0x13b8] ss:$28 sps:$4 sm:$0xff]   ;;  %v19321_v24 = vld [vmem:[%s21335_s25 + $0x13f0] ss:$28 sps:$4 sm:$0xff]  }
 0x21a   : > { %5495 = vmatprep.subr.bf16.mxu0 %v19263_v21  ;;  %v19323_v21 = vld [vmem:[%s21335_s25 + $0x13f4] ss:$28 sps:$4 sm:$0xff]  }
 0x21b   : > { %v19332_v27 = vld [vmem:[%s21335_s25 + $0x1494] ss:$28 sps:$4 sm:$0xff]  }
 0x21c   : > { %5487 = vmatmul.mubr.bf16.vlgmr.msra.gmra.mrb[16].mxu0 %v21432_v19  ;;  %5336 = vmatpush1.bf16.msra.mxu1 %v19264_v29  ;;  %v19330_v29 = vld [vmem:[%s21335_s25 + $0x1490] ss:$28 sps:$4 sm:$0xff]  }
 0x21d   : > { %5496 = vmatpush1.bf16.msra.mxu0 %v19261_v28  ;;  %5337 = vmatprep.subr.bf16.mxu1 %v19272_v31  ;;  %v19327_v28 = vld [vmem:[%s21335_s25 + $0x1428] ss:$28 sps:$4 sm:$0xff]  }
 0x21e   : > { %5497 = vmatprep.subr.bf16.mxu0 %v19269_v30  ;;  %5527 = vmatprep.mubr.bf16.mxu0 %v21438_v23  ;;  %v19335_v30 = vld [vmem:[%s21335_s25 + $0x1464] ss:$28 sps:$4 sm:$0xff]   ;;  %v19338_v31 = vld [vmem:[%s21335_s25 + $0x14cc] ss:$28 sps:$4 sm:$0xff]  }
 0x220   : > { %5338 = vmatpush1.bf16.msra.mxu1 %v19270_v34 }
 0x221   : > { %5498 = vmatpush1.bf16.msra.mxu0 %v19267_v33  ;;  %5339 = vmatprep.subr.bf16.mxu1 %v19278_v36 }
 0x222   : > { %5499 = vmatprep.subr.bf16.mxu0 %v19275_v0  ;;  %v21036_v42 = vpop.eup %21035  ;;  %v19333_v0 = vld [vmem:[%s21335_s25 + $0x1460] ss:$28 sps:$4 sm:$0xff]  }
 0x223   : > { %v21038_v44 = vpop.eup %21037  ;;  %v3079_v46 = vsel %vm3075_vm2, %v21036_v42, 0.0  ;;  %v19344_v42 = vld [vmem:[%s21335_s25 + $0x1504] ss:$28 sps:$4 sm:$0xff]  }
 0x224   : > { %5340 = vmatpush1.bf16.msra.mxu1 %v19276_v37  ;;  %v3080_v48 = vadd.f32 %v3079_v46, %v21801_v20  ;;  %v3081_v49 = vsel %vm3075_vm2, %v21038_v44, 0.0  ;;  %v19341_v37 = vld [vmem:[%s21335_s25 + $0x149c] ss:$28 sps:$4 sm:$0xff]   ;;  %v19347_v46 = vld [vmem:[%s21335_s25 + $0x14d4] ss:$28 sps:$4 sm:$0xff]  }
 0x225   : > { %5500 = vmatpush1.bf16.msra.mxu0 %v19273_v2  ;;  %5341 = vmatprep.subr.bf16.mxu1 %v19284_v39  ;;  %v19336_v2 = vld [vmem:[%s21335_s25 + $0x14c8] ss:$28 sps:$4 sm:$0xff]   ;;  %v19339_v44 = vld [vmem:[%s21335_s25 + $0x1498] ss:$28 sps:$4 sm:$0xff]  }
 0x226   : > { %5501 = vmatprep.subr.bf16.mxu0 %v19281_v38  ;;  %v17993_v51 = vpop.f32.mrb[8].mxu1  ;;  %v21932_v52 = vadd.f32 %v3081_v49, %v3080_v48  ;;  %v19345_v48 = vld [vmem:[%s21335_s25 + $0x14d0] ss:$28 sps:$4 sm:$0xff]  }
 0x227   : > { %v17994_v54 = vpop.f32.mrb[9].mxu1  ;;  %v19350_v49 = vld [vmem:[%s21335_s25 + $0x150c] ss:$28 sps:$4 sm:$0xff]  }
 0x228   : > { %5342 = vmatpush1.bf16.msra.mxu1 %v19282_v45  ;;  %v21936_v20 = vadd.f32 %v17994_v54, %v17993_v51  ;;  %v17996_v57 = vpop.f32.mrb[10].mxu1  ;;  %v19342_v45 = vld [vmem:[%s21335_s25 + $0x1500] ss:$28 sps:$4 sm:$0xff]   ;;  %v19359_v51 = vld [vmem:[%s21335_s25 + $0xacc] ss:$28 sps:$4 sm:$0xff]  }
 0x229   : > { %5502 = vmatpush1.bf16.msra.mxu0 %v19279_v43  ;;  %5343 = vmatprep.subr.bf16.mxu1 %v19290_v50  ;;  %v17997_v58 = vpop.f32.mrb[11].mxu1  ;;  %v19354_v50 = vld [vmem:[%s21335_s25 + $0x1538] ss:$28 sps:$4 sm:$0xff]   ;;  %v19353_v54 = vld [vmem:[%s21335_s25 + $0x1544] ss:$28 sps:$4 sm:$0xff]  }
 0x22a   : > { %5503 = vmatprep.subr.bf16.mxu0 %v19287_v47  ;;  %v19356_v47 = vld [vmem:[%s21335_s25 + $0x153c] ss:$28 sps:$4 sm:$0xff]   ;;  %v19362_v57 = vld [vmem:[%s21335_s25 + $0xb04] ss:$28 sps:$4 sm:$0xff]  }
 0x22b   : > { %v19360_v58 = vld [vmem:[%s21335_s25 + $0xb00] ss:$28 sps:$4 sm:$0xff]  }
 0x22c   : > { %5344 = vmatpush1.bf16.msra.mxu1 %v19288_v55  ;;  %v19351_v55 = vld [vmem:[%s21335_s25 + $0x1540] ss:$28 sps:$4 sm:$0xff]  }
 0x22d   : > { %5504 = vmatpush1.bf16.msra.mxu0 %v19285_v53  ;;  %5345 = vmatprep.subr.bf16.mxu1 %v19296_v59  ;;  %v19348_v53 = vld [vmem:[%s21335_s25 + $0x1508] ss:$28 sps:$4 sm:$0xff]   ;;  %v19367_v59 = vld [vmem:[%s21335_s25 + $0xb3c] ss:$28 sps:$4 sm:$0xff]  }
 0x22e   : > { %5505 = vmatprep.subr.bf16.mxu0 %v19293_v56  ;;  %v19357_v56 = vld [vmem:[%s21335_s25 + $0xac8] ss:$28 sps:$4 sm:$0xff]  }
 0x230   : > { %5346 = vmatpush1.bf16.msra.mxu1 %v19294_v61  ;;  %v19365_v61 = vld [vmem:[%s21335_s25 + $0xb38] ss:$28 sps:$4 sm:$0xff]  }
 0x231   : > { %5506 = vmatpush1.bf16.msra.mxu0 %v19291_v60  ;;  %5347 = vmatprep.subr.bf16.mxu1 %v19302_v4  ;;  %v19364_v60 = vld [vmem:[%s21335_s25 + $0xad0] ss:$28 sps:$4 sm:$0xff]  }
 0x232   : > { %5507 = vmatprep.subr.bf16.mxu0 %v19299_v1  ;;  %v19368_v1 = vld [vmem:[%s21335_s25 + $0xcc8] ss:$28 sps:$4 sm:$0xff]   ;;  %v19372_v4 = vld [vmem:[%s21335_s25 + $0xb74] ss:$28 sps:$4 sm:$0xff]  }
 0x234   : > { %5348 = vmatpush1.bf16.msra.mxu1 %v19300_v6 }
 0x235   : > { %5508 = vmatpush1.bf16.msra.mxu0 %v19297_v5  ;;  %5349 = vmatprep.subr.bf16.mxu1 %v19308_v7 }
 0x236   : > { %5509 = vmatprep.subr.bf16.mxu0 %v19305_v40  ;;  %v19369_v40 = vld [vmem:[%s21335_s25 + $0xb08] ss:$28 sps:$4 sm:$0xff]  }
 0x238   : > { %5350 = vmatpush1.bf16.msra.mxu1 %v19306_v41 }
 0x239   : > { %5510 = vmatpush1.bf16.msra.mxu0 %v19303_v8  ;;  %5351 = vmatprep.subr.bf16.mxu1 %v19314_v10 }
 0x23a   : > { %5511 = vmatprep.subr.bf16.mxu0 %v19311_v9 }
 0x23c   : > { %5352 = vmatpush1.bf16.msra.mxu1 %v19312_v12  ;;  %v19370_v12 = vld [vmem:[%s21335_s25 + $0xb70] ss:$28 sps:$4 sm:$0xff]  }
 0x23d   : > { %5512 = vmatpush1.bf16.msra.mxu0 %v19309_v11  ;;  %5353 = vmatprep.subr.bf16.mxu1 %v19320_v15 }
 0x23e   : > { %5513 = vmatprep.subr.bf16.mxu0 %v19317_v14 }
 0x240   : > { %5354 = vmatpush1.bf16.msra.mxu1 %v19318_v18  ;;  %v19377_v18 = vld [vmem:[%s21335_s25 + $0xbac] ss:$28 sps:$4 sm:$0xff]  }
 0x241   : > { %5514 = vmatpush1.bf16.msra.mxu0 %v19315_v16  ;;  %5355 = vmatprep.subr.bf16.mxu1 %v19326_v22  ;;  %v19373_v16 = vld [vmem:[%s21335_s25 + $0xd00] ss:$28 sps:$4 sm:$0xff]  }
 0x242   : > { %5515 = vmatprep.subr.bf16.mxu0 %v19323_v21 }
 0x244   : > { %5356 = vmatpush1.bf16.msra.mxu1 %v19324_v25  ;;  %v19375_v25 = vld [vmem:[%s21335_s25 + $0xba8] ss:$28 sps:$4 sm:$0xff]  }
 0x245   : > { %5516 = vmatpush1.bf16.msra.mxu0 %v19321_v24  ;;  %5357 = vmatprep.subr.bf16.mxu1 %v19332_v27  ;;  %v19374_v24 = vld [vmem:[%s21335_s25 + $0xb40] ss:$28 sps:$4 sm:$0xff]  }
 0x246   : > { %5517 = vmatprep.subr.bf16.mxu0 %v19329_v26  ;;  %v18015_v33 = vpop.f32.mrb[12].mxu1  ;;  %v19378_v26 = vld [vmem:[%s21335_s25 + $0xd38] ss:$28 sps:$4 sm:$0xff]   ;;  %v19382_v27 = vld [vmem:[%s21335_s25 + $0xbe4] ss:$28 sps:$4 sm:$0xff]  }
 0x247   : > { %v18016_v34 = vpop.f32.mrb[13].mxu1 }
 0x248   : > { %v18017_v36 = vadd.f32 %v18016_v34, %v18015_v33  ;;  %5358 = vmatpush1.bf16.msra.mxu1 %v19330_v29  ;;  %v18018_v38 = vpop.f32.mrb[14].mxu1  ;;  %v19379_v29 = vld [vmem:[%s21335_s25 + $0xb78] ss:$28 sps:$4 sm:$0xff]   ;;  %v19380_v34 = vld [vmem:[%s21335_s25 + $0xbe0] ss:$28 sps:$4 sm:$0xff]  }
 0x249   : > { %5518 = vmatpush1.bf16.msra.mxu0 %v19327_v28  ;;  %5359 = vmatprep.subr.bf16.mxu1 %v19338_v31  ;;  %v18019_v39 = vpop.f32.mrb[15].mxu1 }
 0x24a   : > { %5519 = vmatprep.subr.bf16.mxu0 %v19335_v30  ;;  %v21973_v43 = vadd.f32 %v18017_v36, %v21936_v20  ;;  %v19363_v20 = vld [vmem:[%s21335_s25 + $0xc90] ss:$28 sps:$4 sm:$0xff]  }
 0x24c   : > { %5360 = vmatpush1.bf16.msra.mxu1 %v19336_v2 }
 0x24d   : > { %5520 = vmatpush1.bf16.msra.mxu0 %v19333_v0  ;;  %5361 = vmatprep.subr.bf16.mxu1 %v19344_v42  ;;  %v19383_v0 = vld [vmem:[%s21335_s25 + $0xd70] ss:$28 sps:$4 sm:$0xff]  }
 0x24e   : > { %5521 = vmatprep.subr.bf16.mxu0 %v19341_v37  ;;  %v19387_v37 = vld [vmem:[%s21335_s25 + $0xc1c] ss:$28 sps:$4 sm:$0xff]  }
 0x250   : > { %5362 = vmatpush1.bf16.msra.mxu1 %v19342_v45 }
 0x251   : > { %5522 = vmatpush1.bf16.msra.mxu0 %v19339_v44  ;;  %5372 = vmatprep.subr.bf16.mxu1 %v19356_v47  ;;  %v19385_v44 = vld [vmem:[%s21335_s25 + $0xc18] ss:$28 sps:$4 sm:$0xff]  }
 0x252   : > { %5523 = vmatprep.subr.bf16.mxu0 %v19347_v46  ;;  %v19388_v46 = vld [vmem:[%s21335_s25 + $0xda8] ss:$28 sps:$4 sm:$0xff]   ;;  %v19392_v47 = vld [vmem:[%s21335_s25 + $0xc54] ss:$28 sps:$4 sm:$0xff]  }
 0x253   : > { %5364 = vmatmul.mubr.bf16.vlgmr.msra.gmra.mrb[20].mxu1 %v21403_v63 }
 0x254   : > { %5373 = vmatpush1.bf16.msra.mxu1 %v19354_v50  ;;  %5404 = vmatprep.mubr.bf16.mxu1 %v21233_v32  ;;  %v19393_v50 = vld [vmem:[%s21335_s25 + $0xde0] ss:$28 sps:$4 sm:$0xff]  }
 0x255   : > { %5524 = vmatpush1.bf16.msra.mxu0 %v19345_v48  ;;  %5577 = vmatprep.subr.bf16.mxu1 %v19359_v51  ;;  %v19389_v48 = vld [vmem:[%s21335_s25 + $0xbe8] ss:$28 sps:$4 sm:$0xff]  }
 0x256   : > { %5525 = vmatprep.subr.bf16.mxu0 %v19350_v49  ;;  %v19390_v49 = vld [vmem:[%s21335_s25 + $0xc50] ss:$28 sps:$4 sm:$0xff]  }
 0x257   : > { %v19397_v51 = vld [vmem:[%s21335_s25 + $0xc8c] ss:$28 sps:$4 sm:$0xff]  }
 0x259   : > { %5526 = vmatpush1.bf16.msra.mxu0 %v19348_v53  ;;  %v19394_v53 = vld [vmem:[%s21335_s25 + $0xc20] ss:$28 sps:$4 sm:$0xff]  }
 0x25a   : > { %5536 = vmatprep.subr.bf16.mxu0 %v19353_v54  ;;  %v19395_v54 = vld [vmem:[%s21335_s25 + $0xc88] ss:$28 sps:$4 sm:$0xff]  }
 0x25c   : > { %5528 = vmatmul.mubr.bf16.vlgmr.msra.gmra.mrb[16].mxu0 %v21403_v63 }
 0x25d   : > { %5537 = vmatpush1.bf16.msra.mxu0 %v19351_v55  ;;  %5568 = vmatprep.mubr.bf16.mxu0 %v21233_v32  ;;  %v19398_v55 = vld [vmem:[%s21335_s25 + $0xe18] ss:$28 sps:$4 sm:$0xff]  }
 0x25e   : > { %18045 = vmatprep.subr.bf16.mxu0 %v19363_v20 }
 0x25f   : > { %15726 = vmatmul.mubr.msk.bf16.vlgmr.msra.gmra.mrb[20].mxu1 %vm2377_vm0, %v21518_v35 }
 0x260   : > { %5578 = vmatpush1.bf16.msra.mxu1 %v19357_v56  ;;  %5609 = vmatprep.mubr.bf16.mxu1 %v21400_v62  ;;  %v19402_v56 = vld [vmem:[%s21335_s25 + $0xcc4] ss:$28 sps:$4 sm:$0xff]  }
 0x261   : > { %5579 = vmatprep.subr.bf16.mxu1 %v19362_v57 }
 0x264   : > { %5580 = vmatpush1.bf16.msra.mxu1 %v19360_v58 }
 0x265   : > { %5581 = vmatprep.subr.bf16.mxu1 %v19367_v59  ;;  %v19399_v59 = vld [vmem:[%s21335_s25 + $0xc58] ss:$28 sps:$4 sm:$0xff]  }
 0x266   : > { %v18037_v6 = vpop.f32.mrb[16].mxu1 }
 0x267   : > { %v2866_v5 = vpop.f32.mrb[8].mxu0  ;;  %v18038_v41 = vpop.f32.mrb[17].mxu1 }
 0x268   : > { %v14988_v7 = vmul.f32 -1.442695, %v2866_v5  ;;  %15727 = vmatmul.mubr.msk.bf16.vlgmr.msra.gmra.mrb[16].mxu0 %vm2377_vm0, %v21518_v35  ;;  %v2868_v8 = vpop.f32.mrb[9].mxu0  ;;  %v18039_v11 = vadd.f32 %v18038_v41, %v18037_v6  ;;  %5582 = vmatpush1.bf16.msra.mxu1 %v19365_v61  ;;  %v18040_v14 = vpop.f32.mrb[18].mxu1  ;;  %v19403_v61 = vld [vmem:[%s21335_s25 + $0x1010] ss:$28 sps:$4 sm:$0xff]  }
 0x269   : > { %18046 = vmatpush3.bf16.msra.mxu0 %v19364_v60  ;;  %v14989_v9 = vmul.f32 -1.442695, %v2868_v8  ;;  %v2870_v10 = vpop.f32.mrb[10].mxu0  ;;  %5583 = vmatprep.subr.bf16.mxu1 %v19372_v4  ;;  %v18041_v21 = vpop.f32.mrb[19].mxu1  ;;  %v19400_v60 = vld [vmem:[%s21335_s25 + $0xcc0] ss:$28 sps:$4 sm:$0xff]  }
 0x26a   : > { %21039 = vpow2.f32 %v14988_v7  ;;  %v2871_v15 = vpop.f32.mrb[11].mxu0  ;;  %18047 = vmatprep.subr.bf16.mxu0 %v19368_v1  ;;  %v2988_v22 = vadd.f32 %v18039_v11, %v21973_v43  ;;  %5773 = vmatprep.mubr.bf16.mxu0 %v21400_v62  ;;  %v19384_v43 = vld [vmem:[%s21335_s25 + $0xbb0] ss:$28 sps:$4 sm:$0xff]   ;;  %v19407_v4 = vld [vmem:[%s21335_s25 + $0xcfc] ss:$28 sps:$4 sm:$0xff]  }
 0x26b   : > { %21041 = vpow2.f32 %v14989_v9  ;;  %v19404_v7 = vld [vmem:[%s21335_s25 + $0xe50] ss:$28 sps:$4 sm:$0xff]   ;;  %v19405_v8 = vld [vmem:[%s21335_s25 + $0xcf8] ss:$28 sps:$4 sm:$0xff]   ;;  %v19408_v41 = vld [vmem:[%s21335_s25 + $0x1048] ss:$28 sps:$4 sm:$0xff]  }
 0x26c   : > { %5584 = vmatpush1.bf16.msra.mxu1 %v19370_v12  ;;  %v19412_v10 = vld [vmem:[%s21335_s25 + $0xd34] ss:$28 sps:$4 sm:$0xff]   ;;  %v19409_v11 = vld [vmem:[%s21335_s25 + $0xe88] ss:$28 sps:$4 sm:$0xff]   ;;  %v19413_v12 = vld [vmem:[%s21335_s25 + $0x1080] ss:$28 sps:$4 sm:$0xff]  }
 0x26d   : > { %18048 = vmatpush3.bf16.msra.mxu0 %v19369_v40  ;;  %5585 = vmatprep.subr.bf16.mxu1 %v19377_v18  ;;  %v19417_v14 = vld [vmem:[%s21335_s25 + $0xd6c] ss:$28 sps:$4 sm:$0xff]   ;;  %v19414_v18 = vld [vmem:[%s21335_s25 + $0xec0] ss:$28 sps:$4 sm:$0xff]  }
 0x26e   : > { %18049 = vmatprep.subr.bf16.mxu0 %v19373_v16 }
 0x26f   : > { %v3027_v28 = vpop.f32.mrb[12].mxu0 }
 0x270   : > { %v3028_v30 = vadd.f32 %v3027_v28, %v2988_v22  ;;  %v18321_v31 = vpop.f32.mrb[13].mxu0  ;;  %5586 = vmatpush1.bf16.msra.mxu1 %v19375_v25  ;;  %v19415_v22 = vld [vmem:[%s21335_s25 + $0xd68] ss:$28 sps:$4 sm:$0xff]   ;;  %v19423_v28 = vld [vmem:[%s21335_s25 + $0x10f0] ss:$28 sps:$4 sm:$0xff]  }
 0x271   : > { %18050 = vmatpush3.bf16.msra.mxu0 %v19374_v24  ;;  %v3030_v33 = vpop.f32.mrb[14].mxu0  ;;  %5587 = vmatprep.subr.bf16.mxu1 %v19382_v27  ;;  %v19418_v24 = vld [vmem:[%s21335_s25 + $0x10b8] ss:$28 sps:$4 sm:$0xff]   ;;  %v19422_v25 = vld [vmem:[%s21335_s25 + $0xda4] ss:$28 sps:$4 sm:$0xff]  }
 0x272   : > { %v14990_v36 = vmul.f32 -1.442695, %v3028_v30  ;;  %v18322_v2 = vpop.f32.mrb[15].mxu0  ;;  %18051 = vmatprep.subr.bf16.mxu0 %v19378_v26  ;;  %v19419_v26 = vld [vmem:[%s21335_s25 + $0xef8] ss:$28 sps:$4 sm:$0xff]  }
 0x273   : > { %v19420_v27 = vld [vmem:[%s21335_s25 + $0xda0] ss:$28 sps:$4 sm:$0xff]   ;;  %v19424_v30 = vld [vmem:[%s21335_s25 + $0xf30] ss:$28 sps:$4 sm:$0xff]   ;;  %v19425_v31 = vld [vmem:[%s21335_s25 + $0xdd8] ss:$28 sps:$4 sm:$0xff]  }
 0x274   : > { %v21040_v38 = vpop.eup %21039  ;;  %21043 = vpow2.f32 %v14990_v36  ;;  %5588 = vmatpush1.bf16.msra.mxu1 %v19380_v34  ;;  %v19428_v33 = vld [vmem:[%s21335_s25 + $0x1128] ss:$28 sps:$4 sm:$0xff]   ;;  %v19432_v34 = vld [vmem:[%s21335_s25 + $0xe14] ss:$28 sps:$4 sm:$0xff]   ;;  %v19433_v2 = vld [vmem:[%s21335_s25 + $0x1160] ss:$28 sps:$4 sm:$0xff]  }
 0x275   : > { %v21042_v39 = vpop.eup %21041  ;;  %v3058_v42 = vadd.f32 1.0, %v21040_v38  ;;  %18052 = vmatpush3.bf16.msra.mxu0 %v19379_v29  ;;  %5589 = vmatprep.subr.bf16.mxu1 %v19387_v37  ;;  %v19427_v29 = vld [vmem:[%s21335_s25 + $0xddc] ss:$28 sps:$4 sm:$0xff]   ;;  %v19430_v36 = vld [vmem:[%s21335_s25 + $0xe10] ss:$28 sps:$4 sm:$0xff]  }
 0x276   : > { %v3059_v45 = vadd.f32 1.0, %v21042_v39  ;;  %18053 = vmatprep.subr.bf16.mxu0 %v19383_v0  ;;  %v19429_v0 = vld [vmem:[%s21335_s25 + $0xf68] ss:$28 sps:$4 sm:$0xff]   ;;  %v19434_v38 = vld [vmem:[%s21335_s25 + $0xfa0] ss:$28 sps:$4 sm:$0xff]  }
 0x277   : > { %21045 = vrcp.f32 %v3058_v42  ;;  %v19437_v37 = vld [vmem:[%s21335_s25 + $0xe4c] ss:$28 sps:$4 sm:$0xff]   ;;  %v19438_v42 = vld [vmem:[%s21335_s25 + $0x1198] ss:$28 sps:$4 sm:$0xff]  }
 0x278   : > { %21047 = vrcp.f32 %v3059_v45  ;;  %5590 = vmatpush1.bf16.msra.mxu1 %v19385_v44  ;;  %v19435_v39 = vld [vmem:[%s21335_s25 + $0xe48] ss:$28 sps:$4 sm:$0xff]   ;;  %v19439_v44 = vld [vmem:[%s21335_s25 + $0xfd8] ss:$28 sps:$4 sm:$0xff]   ;;  %v19440_v45 = vld [vmem:[%s21335_s25 + $0xe80] ss:$28 sps:$4 sm:$0xff]  }
 0x279   : > { %18054 = vmatpush3.bf16.msra.mxu0 %v19384_v43  ;;  %5591 = vmatprep.subr.bf16.mxu1 %v19392_v47  ;;  %v19442_v43 = vld [vmem:[%s21335_s25 + $0xe84] ss:$28 sps:$4 sm:$0xff]   ;;  %v19447_v47 = vld [vmem:[%s21335_s25 + $0xebc] ss:$28 sps:$4 sm:$0xff]  }
 0x27a   : > { %18055 = vmatprep.subr.bf16.mxu0 %v19388_v46  ;;  %v19443_v46 = vld [vmem:[%s21335_s25 + $0x1390] ss:$28 sps:$4 sm:$0xff]  }
 0x27c   : > { %5592 = vmatpush1.bf16.msra.mxu1 %v19390_v49  ;;  %v19445_v49 = vld [vmem:[%s21335_s25 + $0xeb8] ss:$28 sps:$4 sm:$0xff]  }
 0x27d   : > { %18056 = vmatpush3.bf16.msra.mxu0 %v19389_v48  ;;  %5593 = vmatprep.subr.bf16.mxu1 %v19397_v51  ;;  %v19444_v48 = vld [vmem:[%s21335_s25 + $0x11d0] ss:$28 sps:$4 sm:$0xff]  }
 0x27e   : > { %v21044_v20 = vpop.eup %21043  ;;  %18057 = vmatprep.subr.bf16.mxu0 %v19393_v50  ;;  %v19448_v50 = vld [vmem:[%s21335_s25 + $0x13c8] ss:$28 sps:$4 sm:$0xff]   ;;  %v19452_v51 = vld [vmem:[%s21335_s25 + $0xef4] ss:$28 sps:$4 sm:$0xff]  }
 0x27f   : > { %v3060_v57 = vadd.f32 1.0, %v21044_v20  ;;  %v19457_v20 = vld [vmem:[%s21335_s25 + $0xf2c] ss:$28 sps:$4 sm:$0xff]  }
 0x280   : > { %5594 = vmatpush1.bf16.msra.mxu1 %v19395_v54  ;;  %v19450_v54 = vld [vmem:[%s21335_s25 + $0xef0] ss:$28 sps:$4 sm:$0xff]  }
 0x281   : > { %v21046_v58 = vpop.eup %21045  ;;  %21049 = vrcp.f32 %v3060_v57  ;;  %18058 = vmatpush3.bf16.msra.mxu0 %v19394_v53  ;;  %5595 = vmatprep.subr.bf16.mxu1 %v19402_v56  ;;  %v19449_v53 = vld [vmem:[%s21335_s25 + $0x1208] ss:$28 sps:$4 sm:$0xff]   ;;  %v19454_v56 = vld [vmem:[%s21335_s25 + $0x1240] ss:$28 sps:$4 sm:$0xff]  }
 0x282   : > { %v21048_v1 = vpop.eup %21047  ;;  %18059 = vmatprep.subr.bf16.mxu0 %v19398_v55  ;;  %v3083_v5 = vsel %vm3075_vm2, %v21046_v58, 0.0  ;;  %v19453_v55 = vld [vmem:[%s21335_s25 + $0x1400] ss:$28 sps:$4 sm:$0xff]   ;;  %v19455_v57 = vld [vmem:[%s21335_s25 + $0xf28] ss:$28 sps:$4 sm:$0xff]  }
 0x283   : > { %v3084_v6 = vadd.f32 %v3083_v5, %v21932_v52  ;;  %v3085_v40 = vsel %vm3075_vm2, %v21048_v1, 0.0  ;;  %v19410_v52 = vld [vmem:[%s21335_s25 + $0xd30] ss:$28 sps:$4 sm:$0xff]   ;;  %v19458_v58 = vld [vmem:[%s21335_s25 + $0x1438] ss:$28 sps:$4 sm:$0xff]  }
 0x284   : > { %5596 = vmatpush1.bf16.msra.mxu1 %v19400_v60  ;;  %v19459_v60 = vld [vmem:[%s21335_s25 + $0x1278] ss:$28 sps:$4 sm:$0xff]   ;;  %v19463_v1 = vld [vmem:[%s21335_s25 + $0x1470] ss:$28 sps:$4 sm:$0xff]  }
 0x285   : > { %18060 = vmatpush3.bf16.msra.mxu0 %v19399_v59  ;;  %v3086_v9 = vadd.f32 %v3085_v40, %v3084_v6  ;;  %5597 = vmatprep.subr.bf16.mxu1 %v19407_v4  ;;  %v19462_v59 = vld [vmem:[%s21335_s25 + $0xf64] ss:$28 sps:$4 sm:$0xff]   ;;  %v19467_v4 = vld [vmem:[%s21335_s25 + $0xf9c] ss:$28 sps:$4 sm:$0xff]   ;;  %v19464_v5 = vld [vmem:[%s21335_s25 + $0x12b0] ss:$28 sps:$4 sm:$0xff]  }
 0x286   : > { %18067 = vmatprep.subr.bf16.mxu0 %v19403_v61  ;;  %v19460_v61 = vld [vmem:[%s21335_s25 + $0xf60] ss:$28 sps:$4 sm:$0xff]   ;;  %v19465_v6 = vld [vmem:[%s21335_s25 + $0xf98] ss:$28 sps:$4 sm:$0xff]   ;;  %v19468_v40 = vld [vmem:[%s21335_s25 + $0x14a8] ss:$28 sps:$4 sm:$0xff]  }
 0x288   : > { %5774 = vmatmul.mubr.bf16.vlgmr.msra.gmra.mrb[20].mxu0 %v21424_v13  ;;  %5598 = vmatpush1.bf16.msra.mxu1 %v19405_v8  ;;  %v19469_v8 = vld [vmem:[%s21335_s25 + $0x12e8] ss:$28 sps:$4 sm:$0xff]  }
 0x289   : > { %18068 = vmatpush3.bf16.msra.mxu0 %v19404_v7  ;;  %5599 = vmatprep.subr.bf16.mxu1 %v19412_v10  ;;  %v19472_v7 = vld [vmem:[%s21335_s25 + $0xfd4] ss:$28 sps:$4 sm:$0xff]   ;;  %v19477_v10 = vld [vmem:[%s21335_s25 + $0x100c] ss:$28 sps:$4 sm:$0xff]  }
 0x28a   : > { %18069 = vmatprep.subr.bf16.mxu0 %v19408_v41  ;;  %5813 = vmatprep.mubr.bf16.mxu0 %v21410_v3  ;;  %v19470_v41 = vld [vmem:[%s21335_s25 + $0xfd0] ss:$28 sps:$4 sm:$0xff]  }
 0x28b   : > { %v21050_v15 = vpop.eup %21049 }
 0x28c   : > { %v3088_v16 = vsel %vm3087_vm3, %v21050_v15, 0.0  ;;  %5600 = vmatpush1.bf16.msra.mxu1 %v19410_v52  ;;  %v19475_v52 = vld [vmem:[%s21335_s25 + $0x1008] ss:$28 sps:$4 sm:$0xff]   ;;  %v19479_v15 = vld [vmem:[%s21335_s25 + $0x1358] ss:$28 sps:$4 sm:$0xff]  }
 0x28d   : > { %18070 = vmatpush3.bf16.msra.mxu0 %v19409_v11  ;;  %v3089_v21 = vadd.f32 %v3088_v16, %v3086_v9  ;;  %5601 = vmatprep.subr.bf16.mxu1 %v19417_v14  ;;  %v19473_v9 = vld [vmem:[%s21335_s25 + $0x14e0] ss:$28 sps:$4 sm:$0xff]  }
 0x28e   : > { %18071 = vmatprep.subr.bf16.mxu0 %v19413_v12  ;;  %v19474_v11 = vld [vmem:[%s21335_s25 + $0x1320] ss:$28 sps:$4 sm:$0xff]   ;;  %v19478_v12 = vld [vmem:[%s21335_s25 + $0x1518] ss:$28 sps:$4 sm:$0xff]  }
 0x28f   : > { %3090 = vadd.xlane.f32.xlu0 %v3089_v21  ;;  %v19482_v14 = vld [vmem:[%s21335_s25 + $0x1044] ss:$28 sps:$4 sm:$0xff]   ;;  %v19483_v21 = vld [vmem:[%s21335_s25 + $0x1550] ss:$28 sps:$4 sm:$0xff]  }
 0x290   : > { %5602 = vmatpush1.bf16.msra.mxu1 %v19415_v22  ;;  %v19480_v16 = vld [vmem:[%s21335_s25 + $0x1040] ss:$28 sps:$4 sm:$0xff]   ;;  %v19484_v22 = vld [vmem:[%s21335_s25 + $0x1078] ss:$28 sps:$4 sm:$0xff]  }
 0x291   : > { %18072 = vmatpush3.bf16.msra.mxu0 %v19414_v18  ;;  %5603 = vmatprep.subr.bf16.mxu1 %v19422_v25  ;;  %v19486_v18 = vld [vmem:[%s21335_s25 + $0x107c] ss:$28 sps:$4 sm:$0xff]   ;;  %v19492_v25 = vld [vmem:[%s21335_s25 + $0x1574] ss:$28 sps:$4 sm:$0xff]  }
 0x292   : > { %18073 = vmatprep.subr.bf16.mxu0 %v19418_v24  ;;  %v19489_v24 = vld [vmem:[%s21335_s25 + $0x10b4] ss:$28 sps:$4 sm:$0xff]  }
 0x294   : > { %5604 = vmatpush1.bf16.msra.mxu1 %v19420_v27  ;;  %v19495_v27 = vld [vmem:[%s21335_s25 + $0x10ec] ss:$28 sps:$4 sm:$0xff]  }
 0x295   : > { %18074 = vmatpush3.bf16.msra.mxu0 %v19419_v26  ;;  %5605 = vmatprep.subr.bf16.mxu1 %v19427_v29  ;;  %v19487_v26 = vld [vmem:[%s21335_s25 + $0x10b0] ss:$28 sps:$4 sm:$0xff]   ;;  %v19493_v29 = vld [vmem:[%s21335_s25 + $0x10e8] ss:$28 sps:$4 sm:$0xff]  }
 0x296   : > { %18075 = vmatprep.subr.bf16.mxu0 %v19423_v28  ;;  %v19490_v28 = vld [vmem:[%s21335_s25 + $0x1570] ss:$28 sps:$4 sm:$0xff]  }
 0x298   : > { %5606 = vmatpush1.bf16.msra.mxu1 %v19425_v31  ;;  %v19501_v31 = vld [vmem:[%s21335_s25 + $0x1124] ss:$28 sps:$4 sm:$0xff]  }
 0x299   : > { %18076 = vmatpush3.bf16.msra.mxu0 %v19424_v30  ;;  %5607 = vmatprep.subr.bf16.mxu1 %v19432_v34  ;;  %v19498_v30 = vld [vmem:[%s21335_s25 + $0x15ac] ss:$28 sps:$4 sm:$0xff]   ;;  %v19499_v34 = vld [vmem:[%s21335_s25 + $0x1120] ss:$28 sps:$4 sm:$0xff]  }
 0x29a   : > { %18077 = vmatprep.subr.bf16.mxu0 %v19428_v33  ;;  %v19496_v33 = vld [vmem:[%s21335_s25 + $0x15a8] ss:$28 sps:$4 sm:$0xff]  }
 0x29c   : > { %5608 = vmatpush1.bf16.msra.mxu1 %v19430_v36  ;;  %v19507_v36 = vld [vmem:[%s21335_s25 + $0x115c] ss:$28 sps:$4 sm:$0xff]  }
 0x29d   : > { %18078 = vmatpush3.bf16.msra.mxu0 %v19429_v0  ;;  %5618 = vmatprep.subr.bf16.mxu1 %v19437_v37  ;;  %v19504_v0 = vld [vmem:[%s21335_s25 + $0x15e4] ss:$28 sps:$4 sm:$0xff]   ;;  %v19505_v37 = vld [vmem:[%s21335_s25 + $0x1158] ss:$28 sps:$4 sm:$0xff]  }
 0x29e   : > { %18079 = vmatprep.subr.bf16.mxu0 %v19433_v2  ;;  %v19502_v2 = vld [vmem:[%s21335_s25 + $0x15e0] ss:$28 sps:$4 sm:$0xff]  }
 0x29f   : > { %5610 = vmatmul.mubr.bf16.vlgmr.msra.gmra.mrb[24].mxu1 %v21424_v13 }
 0x2a0   : > { %5619 = vmatpush1.bf16.msra.mxu1 %v19435_v39  ;;  %5650 = vmatprep.mubr.bf16.mxu1 %v21410_v3  ;;  %v19513_v39 = vld [vmem:[%s21335_s25 + $0x1194] ss:$28 sps:$4 sm:$0xff]  }
 0x2a1   : > { %18080 = vmatpush3.bf16.msra.mxu0 %v19434_v38  ;;  %5620 = vmatprep.subr.bf16.mxu1 %v19442_v43  ;;  %v19510_v38 = vld [vmem:[%s21335_s25 + $0x161c] ss:$28 sps:$4 sm:$0xff]   ;;  %v19511_v43 = vld [vmem:[%s21335_s25 + $0x1190] ss:$28 sps:$4 sm:$0xff]  }
 0x2a2   : > { %18081 = vmatprep.subr.bf16.mxu0 %v19438_v42  ;;  %v19508_v42 = vld [vmem:[%s21335_s25 + $0x1618] ss:$28 sps:$4 sm:$0xff]  }
 0x2a4   : > { %5621 = vmatpush1.bf16.msra.mxu1 %v19440_v45  ;;  %v19519_v45 = vld [vmem:[%s21335_s25 + $0x11cc] ss:$28 sps:$4 sm:$0xff]  }
 0x2a5   : > { %18082 = vmatpush3.bf16.msra.mxu0 %v19439_v44  ;;  %5622 = vmatprep.subr.bf16.mxu1 %v19447_v47  ;;  %v19516_v44 = vld [vmem:[%s21335_s25 + $0x1654] ss:$28 sps:$4 sm:$0xff]   ;;  %v19517_v47 = vld [vmem:[%s21335_s25 + $0x11c8] ss:$28 sps:$4 sm:$0xff]  }
 0x2a6   : > { %18089 = vmatprep.subr.bf16.mxu0 %v19443_v46  ;;  %v19514_v46 = vld [vmem:[%s21335_s25 + $0x1650] ss:$28 sps:$4 sm:$0xff]  }
 0x2a8   : > { %5814 = vmatmul.mubr.bf16.vlgmr.msra.gmra.mrb[24].mxu0 %v21432_v19  ;;  %5623 = vmatpush1.bf16.msra.mxu1 %v19445_v49  ;;  %v19525_v49 = vld [vmem:[%s21335_s25 + $0x1204] ss:$28 sps:$4 sm:$0xff]  }
 0x2a9   : > { %18090 = vmatpush3.bf16.msra.mxu0 %v19444_v48  ;;  %5624 = vmatprep.subr.bf16.mxu1 %v19452_v51  ;;  %v19522_v48 = vld [vmem:[%s21335_s25 + $0x168c] ss:$28 sps:$4 sm:$0xff]   ;;  %v19523_v51 = vld [vmem:[%s21335_s25 + $0x1200] ss:$28 sps:$4 sm:$0xff]  }
 0x2aa   : > { %18091 = vmatprep.subr.bf16.mxu0 %v19448_v50  ;;  %5853 = vmatprep.mubr.bf16.mxu0 %v21438_v23  ;;  %v19520_v50 = vld [vmem:[%s21335_s25 + $0x1688] ss:$28 sps:$4 sm:$0xff]  }
 0x2ac   : > { %5625 = vmatpush1.bf16.msra.mxu1 %v19450_v54  ;;  %v19531_v54 = vld [vmem:[%s21335_s25 + $0x123c] ss:$28 sps:$4 sm:$0xff]  }
 0x2ad   : > { %18092 = vmatpush3.bf16.msra.mxu0 %v19449_v53  ;;  %5626 = vmatprep.subr.bf16.mxu1 %v19457_v20  ;;  %v19528_v53 = vld [vmem:[%s21335_s25 + $0x16c4] ss:$28 sps:$4 sm:$0xff]   ;;  %v19529_v20 = vld [vmem:[%s21335_s25 + $0x1238] ss:$28 sps:$4 sm:$0xff]  }
 0x2ae   : > { %18093 = vmatprep.subr.bf16.mxu0 %v19453_v55  ;;  %v19526_v55 = vld [vmem:[%s21335_s25 + $0x16c0] ss:$28 sps:$4 sm:$0xff]  }
 0x2b0   : > { %5627 = vmatpush1.bf16.msra.mxu1 %v19455_v57  ;;  %v19537_v57 = vld [vmem:[%s21335_s25 + $0x1274] ss:$28 sps:$4 sm:$0xff]  }
 0x2b1   : > { %18094 = vmatpush3.bf16.msra.mxu0 %v19454_v56  ;;  %5628 = vmatprep.subr.bf16.mxu1 %v19462_v59  ;;  %v19534_v56 = vld [vmem:[%s21335_s25 + $0x16fc] ss:$28 sps:$4 sm:$0xff]   ;;  %v19535_v59 = vld [vmem:[%s21335_s25 + $0x1270] ss:$28 sps:$4 sm:$0xff]  }
 0x2b2   : > { %18095 = vmatprep.subr.bf16.mxu0 %v19458_v58  ;;  %v19532_v58 = vld [vmem:[%s21335_s25 + $0x16f8] ss:$28 sps:$4 sm:$0xff]  }
 0x2b4   : > { %5629 = vmatpush1.bf16.msra.mxu1 %v19460_v61  ;;  %v19543_v61 = vld [vmem:[%s21335_s25 + $0x12ac] ss:$28 sps:$4 sm:$0xff]  }
 0x2b5   : > { %18096 = vmatpush3.bf16.msra.mxu0 %v19459_v60  ;;  %5630 = vmatprep.subr.bf16.mxu1 %v19467_v4  ;;  %v19540_v60 = vld [vmem:[%s21335_s25 + $0x1734] ss:$28 sps:$4 sm:$0xff]   ;;  %v19541_v4 = vld [vmem:[%s21335_s25 + $0x12a8] ss:$28 sps:$4 sm:$0xff]  }
 0x2b6   : > { %18097 = vmatprep.subr.bf16.mxu0 %v19463_v1  ;;  %v19538_v1 = vld [vmem:[%s21335_s25 + $0x1730] ss:$28 sps:$4 sm:$0xff]  }
 0x2b8   : > { %5631 = vmatpush1.bf16.msra.mxu1 %v19465_v6  ;;  %v19549_v6 = vld [vmem:[%s21335_s25 + $0x12e4] ss:$28 sps:$4 sm:$0xff]  }
 0x2b9   : > { %18098 = vmatpush3.bf16.msra.mxu0 %v19464_v5  ;;  %5632 = vmatprep.subr.bf16.mxu1 %v19472_v7  ;;  %v19546_v5 = vld [vmem:[%s21335_s25 + $0x176c] ss:$28 sps:$4 sm:$0xff]   ;;  %v19547_v7 = vld [vmem:[%s21335_s25 + $0x12e0] ss:$28 sps:$4 sm:$0xff]  }
 0x2ba   : > { %18099 = vmatprep.subr.bf16.mxu0 %v19468_v40  ;;  %v19544_v40 = vld [vmem:[%s21335_s25 + $0x1768] ss:$28 sps:$4 sm:$0xff]  }
 0x2bc   : > { %5633 = vmatpush1.bf16.msra.mxu1 %v19470_v41  ;;  %v19555_v41 = vld [vmem:[%s21335_s25 + $0x131c] ss:$28 sps:$4 sm:$0xff]  }
 0x2bd   : > { %18100 = vmatpush3.bf16.msra.mxu0 %v19469_v8  ;;  %5634 = vmatprep.subr.bf16.mxu1 %v19477_v10  ;;  %v19552_v8 = vld [vmem:[%s21335_s25 + $0x17a4] ss:$28 sps:$4 sm:$0xff]   ;;  %v19553_v10 = vld [vmem:[%s21335_s25 + $0x1318] ss:$28 sps:$4 sm:$0xff]  }
 0x2be   : > { %18101 = vmatprep.subr.bf16.mxu0 %v19473_v9  ;;  %v19550_v9 = vld [vmem:[%s21335_s25 + $0x17a0] ss:$28 sps:$4 sm:$0xff]  }
 0x2c0   : > { %5635 = vmatpush1.bf16.msra.mxu1 %v19475_v52  ;;  %v19561_v52 = vld [vmem:[%s21335_s25 + $0x1354] ss:$28 sps:$4 sm:$0xff]  }
 0x2c1   : > { %18102 = vmatpush3.bf16.msra.mxu0 %v19474_v11  ;;  %5636 = vmatprep.subr.bf16.mxu1 %v19482_v14  ;;  %v19558_v11 = vld [vmem:[%s21335_s25 + $0x17dc] ss:$28 sps:$4 sm:$0xff]   ;;  %v19559_v14 = vld [vmem:[%s21335_s25 + $0x1350] ss:$28 sps:$4 sm:$0xff]  }
 0x2c2   : > { %18103 = vmatprep.subr.bf16.mxu0 %v19478_v12  ;;  %v19556_v12 = vld [vmem:[%s21335_s25 + $0x17d8] ss:$28 sps:$4 sm:$0xff]  }
 0x2c4   : > { %5637 = vmatpush1.bf16.msra.mxu1 %v19480_v16  ;;  %v19567_v16 = vld [vmem:[%s21335_s25 + $0x138c] ss:$28 sps:$4 sm:$0xff]  }
 0x2c5   : > { %18104 = vmatpush3.bf16.msra.mxu0 %v19479_v15  ;;  %5638 = vmatprep.subr.bf16.mxu1 %v19486_v18  ;;  %v19564_v15 = vld [vmem:[%s21335_s25 + $0x1814] ss:$28 sps:$4 sm:$0xff]  }
 0x2c6   : > { %18323 = vmatprep.subr.bf16.mxu0 %v21234_v17  ;;  %v19562_v18 = vld [vmem:[%s21335_s25 + $0x1810] ss:$28 sps:$4 sm:$0xff]  }
 0x2c8   : > { %5854 = vmatmul.mubr.bf16.vlgmr.msra.gmra.mrb[28].mxu0 %v21403_v63  ;;  %5639 = vmatpush1.bf16.msra.mxu1 %v19484_v22  ;;  %v19570_v22 = vld [vmem:[%s21335_s25 + $0x184c] ss:$28 sps:$4 sm:$0xff]  }
 0x2c9   : > { %18324 = vmatpush3.bf16.msra.mxu0 %v19483_v21  ;;  %5640 = vmatprep.subr.bf16.mxu1 %v19489_v24  ;;  %v19565_v21 = vld [vmem:[%s21335_s25 + $0x1388] ss:$28 sps:$4 sm:$0xff]  }
 0x2ca   : > { %18325 = vmatprep.mubr.msk.bf16.mxu0 %vm21235_vm1, %v21234_v17  ;;  %8115 = vmatprep.subr.bf16.mxu0 %v19492_v25  ;;  %v19573_v24 = vld [vmem:[%s21335_s25 + $0x13c4] ss:$28 sps:$4 sm:$0xff]  }
 0x2cb   : > { %v19568_v25 = vld [vmem:[%s21335_s25 + $0x1848] ss:$28 sps:$4 sm:$0xff]  }
 0x2cc   : > { %5641 = vmatpush1.bf16.msra.mxu1 %v19487_v26  ;;  %v19571_v26 = vld [vmem:[%s21335_s25 + $0x13c0] ss:$28 sps:$4 sm:$0xff]  }
 0x2cd   : > { %5642 = vmatprep.subr.bf16.mxu1 %v19495_v27  ;;  %v19576_v27 = vld [vmem:[%s21335_s25 + $0x1884] ss:$28 sps:$4 sm:$0xff]  }
 0x2d0   : > { %18326 = vmatmul.mubr.msk.bf16.vlgmr.msra.gmra.mrb[32].mxu0 %vm2377_vm0, %v21518_v35  ;;  %5643 = vmatpush1.bf16.msra.mxu1 %v19493_v29  ;;  %v19574_v29 = vld [vmem:[%s21335_s25 + $0x1880] ss:$28 sps:$4 sm:$0xff]  }
 0x2d1   : > { %8116 = vmatpush1.bf16.msra.mxu0 %v19490_v28  ;;  %5644 = vmatprep.subr.bf16.mxu1 %v19501_v31  ;;  %v19579_v28 = vld [vmem:[%s21335_s25 + $0x13fc] ss:$28 sps:$4 sm:$0xff]  }
 0x2d2   : > { %8117 = vmatprep.subr.bf16.mxu0 %v19498_v30  ;;  %8147 = vmatprep.mubr.bf16.mxu0 %v21400_v62  ;;  %v19577_v30 = vld [vmem:[%s21335_s25 + $0x13f8] ss:$28 sps:$4 sm:$0xff]  }
 0x2d3   : > { %v19582_v31 = vld [vmem:[%s21335_s25 + $0x18bc] ss:$28 sps:$4 sm:$0xff]  }
 0x2d4   : > { %5645 = vmatpush1.bf16.msra.mxu1 %v19499_v34  ;;  %v19580_v34 = vld [vmem:[%s21335_s25 + $0x18b8] ss:$28 sps:$4 sm:$0xff]  }
 0x2d5   : > { %8118 = vmatpush1.bf16.msra.mxu0 %v19496_v33  ;;  %5646 = vmatprep.subr.bf16.mxu1 %v19507_v36  ;;  %v19585_v33 = vld [vmem:[%s21335_s25 + $0x1434] ss:$28 sps:$4 sm:$0xff]  }
 0x2d6   : > { %8119 = vmatprep.subr.bf16.mxu0 %v19504_v0  ;;  %v19583_v0 = vld [vmem:[%s21335_s25 + $0x1430] ss:$28 sps:$4 sm:$0xff]  }
 0x2d7   : > { %v19588_v36 = vld [vmem:[%s21335_s25 + $0x18f4] ss:$28 sps:$4 sm:$0xff]  }
 0x2d8   : > { %5647 = vmatpush1.bf16.msra.mxu1 %v19505_v37  ;;  %v19586_v37 = vld [vmem:[%s21335_s25 + $0x18f0] ss:$28 sps:$4 sm:$0xff]  }
 0x2d9   : > { %8120 = vmatpush1.bf16.msra.mxu0 %v19502_v2  ;;  %5648 = vmatprep.subr.bf16.mxu1 %v19513_v39  ;;  %v19591_v2 = vld [vmem:[%s21335_s25 + $0x146c] ss:$28 sps:$4 sm:$0xff]  }
 0x2da   : > { %8121 = vmatprep.subr.bf16.mxu0 %v19510_v38  ;;  %v19589_v38 = vld [vmem:[%s21335_s25 + $0x1468] ss:$28 sps:$4 sm:$0xff]  }
 0x2db   : > { %v19594_v39 = vld [vmem:[%s21335_s25 + $0x192c] ss:$28 sps:$4 sm:$0xff]  }
 0x2dc   : > { %5649 = vmatpush1.bf16.msra.mxu1 %v19511_v43  ;;  %v19592_v43 = vld [vmem:[%s21335_s25 + $0x1928] ss:$28 sps:$4 sm:$0xff]  }
 0x2dd   : > { %8122 = vmatpush1.bf16.msra.mxu0 %v19508_v42  ;;  %5659 = vmatprep.subr.bf16.mxu1 %v19519_v45  ;;  %v19597_v42 = vld [vmem:[%s21335_s25 + $0x14a4] ss:$28 sps:$4 sm:$0xff]  }
 0x2de   : > { %8123 = vmatprep.subr.bf16.mxu0 %v19516_v44  ;;  %v19595_v44 = vld [vmem:[%s21335_s25 + $0x14a0] ss:$28 sps:$4 sm:$0xff]  }
 0x2df   : > { %5651 = vmatmul.mubr.bf16.vlgmr.msra.gmra.mrb[24].mxu1 %v21432_v19  ;;  %v19600_v45 = vld [vmem:[%s21335_s25 + $0x1964] ss:$28 sps:$4 sm:$0xff]  }
 0x2e0   : > { %5660 = vmatpush1.bf16.msra.mxu1 %v19517_v47  ;;  %5691 = vmatprep.mubr.bf16.mxu1 %v21438_v23  ;;  %v19598_v47 = vld [vmem:[%s21335_s25 + $0x1960] ss:$28 sps:$4 sm:$0xff]  }
 0x2e1   : > { %8124 = vmatpush1.bf16.msra.mxu0 %v19514_v46  ;;  %5661 = vmatprep.subr.bf16.mxu1 %v19525_v49  ;;  %v19603_v46 = vld [vmem:[%s21335_s25 + $0x14dc] ss:$28 sps:$4 sm:$0xff]  }
 0x2e2   : > { %8125 = vmatprep.subr.bf16.mxu0 %v19522_v48  ;;  %v19601_v48 = vld [vmem:[%s21335_s25 + $0x14d8] ss:$28 sps:$4 sm:$0xff]  }
 0x2e3   : > { %v19606_v49 = vld [vmem:[%s21335_s25 + $0x199c] ss:$28 sps:$4 sm:$0xff]  }
 0x2e4   : > { %5662 = vmatpush1.bf16.msra.mxu1 %v19523_v51  ;;  %v19604_v51 = vld [vmem:[%s21335_s25 + $0x1998] ss:$28 sps:$4 sm:$0xff]  }
 0x2e5   : > { %8126 = vmatpush1.bf16.msra.mxu0 %v19520_v50  ;;  %5663 = vmatprep.subr.bf16.mxu1 %v19531_v54  ;;  %v19609_v50 = vld [vmem:[%s21335_s25 + $0x1514] ss:$28 sps:$4 sm:$0xff]  }
 0x2e6   : > { %8127 = vmatprep.subr.bf16.mxu0 %v19528_v53  ;;  %v19607_v53 = vld [vmem:[%s21335_s25 + $0x1510] ss:$28 sps:$4 sm:$0xff]  }
 0x2e7   : > { %v19612_v54 = vld [vmem:[%s21335_s25 + $0x19d4] ss:$28 sps:$4 sm:$0xff]  }
 0x2e8   : > { %5664 = vmatpush1.bf16.msra.mxu1 %v19529_v20  ;;  %v19610_v20 = vld [vmem:[%s21335_s25 + $0x19d0] ss:$28 sps:$4 sm:$0xff]  }
 0x2e9   : > { %8128 = vmatpush1.bf16.msra.mxu0 %v19526_v55  ;;  %5665 = vmatprep.subr.bf16.mxu1 %v19537_v57  ;;  %v19621_v55 = vld [vmem:[%s21335_s25 + $0x154c] ss:$28 sps:$4 sm:$0xff]  }
 0x2ea   : > { %8129 = vmatprep.subr.bf16.mxu0 %v19534_v56  ;;  %v19619_v56 = vld [vmem:[%s21335_s25 + $0x1548] ss:$28 sps:$4 sm:$0xff]  }
 0x2eb   : > { %v19615_v57 = vld [vmem:[%s21335_s25 + $0x1a0c] ss:$28 sps:$4 sm:$0xff]  }
 0x2ec   : > { %5666 = vmatpush1.bf16.msra.mxu1 %v19535_v59  ;;  %v19613_v59 = vld [vmem:[%s21335_s25 + $0x1a08] ss:$28 sps:$4 sm:$0xff]  }
 0x2ed   : > { %8130 = vmatpush1.bf16.msra.mxu0 %v19532_v58  ;;  %5667 = vmatprep.subr.bf16.mxu1 %v19543_v61  ;;  %v19627_v58 = vld [vmem:[%s21335_s25 + $0x157c] ss:$28 sps:$4 sm:$0xff]  }
 0x2ee   : > { %8131 = vmatprep.subr.bf16.mxu0 %v19540_v60  ;;  %v19618_v60 = vld [vmem:[%s21335_s25 + $0x1a44] ss:$28 sps:$4 sm:$0xff]  }
 0x2ef   : > { %v19616_v61 = vld [vmem:[%s21335_s25 + $0x1a40] ss:$28 sps:$4 sm:$0xff]  }
 0x2f0   : > { %5668 = vmatpush1.bf16.msra.mxu1 %v19541_v4  ;;  %v19622_v4 = vld [vmem:[%s21335_s25 + $0x1a78] ss:$28 sps:$4 sm:$0xff]  }
 0x2f1   : > { %8132 = vmatpush1.bf16.msra.mxu0 %v19538_v1  ;;  %5669 = vmatprep.subr.bf16.mxu1 %v19549_v6  ;;  %v19624_v1 = vld [vmem:[%s21335_s25 + $0x1a7c] ss:$28 sps:$4 sm:$0xff]   ;;  %v19630_v6 = vld [vmem:[%s21335_s25 + $0x1ab4] ss:$28 sps:$4 sm:$0xff]  }
 0x2f2   : > { %8133 = vmatprep.subr.bf16.mxu0 %v19546_v5  ;;  %v19625_v5 = vld [vmem:[%s21335_s25 + $0x1578] ss:$28 sps:$4 sm:$0xff]  }
 0x2f4   : > { %5670 = vmatpush1.bf16.msra.mxu1 %v19547_v7  ;;  %v19628_v7 = vld [vmem:[%s21335_s25 + $0x1ab0] ss:$28 sps:$4 sm:$0xff]  }
 0x2f5   : > { %8134 = vmatpush1.bf16.msra.mxu0 %v19544_v40  ;;  %5671 = vmatprep.subr.bf16.mxu1 %v19555_v41  ;;  %v19633_v40 = vld [vmem:[%s21335_s25 + $0x15b4] ss:$28 sps:$4 sm:$0xff]   ;;  %v19636_v41 = vld [vmem:[%s21335_s25 + $0x1aec] ss:$28 sps:$4 sm:$0xff]  }
 0x2f6   : > { %8135 = vmatprep.subr.bf16.mxu0 %v19552_v8  ;;  %v19631_v8 = vld [vmem:[%s21335_s25 + $0x15b0] ss:$28 sps:$4 sm:$0xff]  }
 0x2f8   : > { %5672 = vmatpush1.bf16.msra.mxu1 %v19553_v10  ;;  %v19634_v10 = vld [vmem:[%s21335_s25 + $0x1ae8] ss:$28 sps:$4 sm:$0xff]  }
 0x2f9   : > { %8136 = vmatpush1.bf16.msra.mxu0 %v19550_v9  ;;  %5673 = vmatprep.subr.bf16.mxu1 %v19561_v52  ;;  %v19639_v9 = vld [vmem:[%s21335_s25 + $0x15ec] ss:$28 sps:$4 sm:$0xff]   ;;  %v19642_v52 = vld [vmem:[%s21335_s25 + $0x1b24] ss:$28 sps:$4 sm:$0xff]  }
 0x2fa   : > { %8137 = vmatprep.subr.bf16.mxu0 %v19558_v11  ;;  %v19637_v11 = vld [vmem:[%s21335_s25 + $0x15e8] ss:$28 sps:$4 sm:$0xff]  }
 0x2fc   : > { %5674 = vmatpush1.bf16.msra.mxu1 %v19559_v14 }
 0x2fd   : > { %8138 = vmatpush1.bf16.msra.mxu0 %v19556_v12  ;;  %5675 = vmatprep.subr.bf16.mxu1 %v19567_v16  ;;  %v19645_v12 = vld [vmem:[%s21335_s25 + $0x1624] ss:$28 sps:$4 sm:$0xff]  }
 0x2fe   : > { %8139 = vmatprep.subr.bf16.mxu0 %v19564_v15  ;;  %v19640_v15 = vld [vmem:[%s21335_s25 + $0x1b20] ss:$28 sps:$4 sm:$0xff]  }
 0x300   : > { %5676 = vmatpush1.bf16.msra.mxu1 %v19565_v21 }
 0x301   : > { %8140 = vmatpush1.bf16.msra.mxu0 %v19562_v18  ;;  %5677 = vmatprep.subr.bf16.mxu1 %v19573_v24  ;;  %v19643_v24 = vld [vmem:[%s21335_s25 + $0x1620] ss:$28 sps:$4 sm:$0xff]  }
 0x302   : > { %8141 = vmatprep.subr.bf16.mxu0 %v19570_v22 }
 0x304   : > { %5678 = vmatpush1.bf16.msra.mxu1 %v19571_v26  ;;  %v19648_v26 = vld [vmem:[%s21335_s25 + $0x1b5c] ss:$28 sps:$4 sm:$0xff]  }
 0x305   : > { %8142 = vmatpush1.bf16.msra.mxu0 %v19568_v25  ;;  %5679 = vmatprep.subr.bf16.mxu1 %v19579_v28  ;;  %v19646_v28 = vld [vmem:[%s21335_s25 + $0x1b58] ss:$28 sps:$4 sm:$0xff]  }
 0x306   : > { %8143 = vmatprep.subr.bf16.mxu0 %v19576_v27  ;;  %v19651_v27 = vld [vmem:[%s21335_s25 + $0x165c] ss:$28 sps:$4 sm:$0xff]  }
 0x308   : > { %5680 = vmatpush1.bf16.msra.mxu1 %v19577_v30  ;;  %v19654_v30 = vld [vmem:[%s21335_s25 + $0x1b94] ss:$28 sps:$4 sm:$0xff]  }
 0x309   : > { %8144 = vmatpush1.bf16.msra.mxu0 %v19574_v29  ;;  %5681 = vmatprep.subr.bf16.mxu1 %v19585_v33  ;;  %v19649_v29 = vld [vmem:[%s21335_s25 + $0x1658] ss:$28 sps:$4 sm:$0xff]  }
 0x30a   : > { %8145 = vmatprep.subr.bf16.mxu0 %v19582_v31  ;;  %v19657_v31 = vld [vmem:[%s21335_s25 + $0x1694] ss:$28 sps:$4 sm:$0xff]  }
 0x30c   : > { %5682 = vmatpush1.bf16.msra.mxu1 %v19583_v0 }
 0x30d   : > { %8146 = vmatpush1.bf16.msra.mxu0 %v19580_v34  ;;  %5683 = vmatprep.subr.bf16.mxu1 %v19591_v2  ;;  %v19652_v34 = vld [vmem:[%s21335_s25 + $0x1b90] ss:$28 sps:$4 sm:$0xff]  }
 0x30e   : > { %8156 = vmatprep.subr.bf16.mxu0 %v19588_v36 }
 0x310   : > { %8148 = vmatmul.mubr.bf16.vlgmr.msra.gmra.mrb[36].mxu0 %v21424_v13  ;;  %5684 = vmatpush1.bf16.msra.mxu1 %v19589_v38  ;;  %v19655_v38 = vld [vmem:[%s21335_s25 + $0x1690] ss:$28 sps:$4 sm:$0xff]  }
 0x311   : > { %8157 = vmatpush1.bf16.msra.mxu0 %v19586_v37  ;;  %5685 = vmatprep.subr.bf16.mxu1 %v19597_v42  ;;  %v19660_v42 = vld [vmem:[%s21335_s25 + $0x1bcc] ss:$28 sps:$4 sm:$0xff]  }
 0x312   : > { %8158 = vmatprep.subr.bf16.mxu0 %v19594_v39  ;;  %8188 = vmatprep.mubr.bf16.mxu0 %v21410_v3 }
 0x314   : > { %5686 = vmatpush1.bf16.msra.mxu1 %v19595_v44 }
 0x315   : > { %8159 = vmatpush1.bf16.msra.mxu0 %v19592_v43  ;;  %5687 = vmatprep.subr.bf16.mxu1 %v19603_v46  ;;  %v19663_v43 = vld [vmem:[%s21335_s25 + $0x16cc] ss:$28 sps:$4 sm:$0xff]  }
 0x316   : > { %8160 = vmatprep.subr.bf16.mxu0 %v19600_v45 }
 0x318   : > { %5688 = vmatpush1.bf16.msra.mxu1 %v19601_v48  ;;  %v19661_v48 = vld [vmem:[%s21335_s25 + $0x16c8] ss:$28 sps:$4 sm:$0xff]  }
 0x319   : > { %8161 = vmatpush1.bf16.msra.mxu0 %v19598_v47  ;;  %5689 = vmatprep.subr.bf16.mxu1 %v19609_v50  ;;  %v19658_v47 = vld [vmem:[%s21335_s25 + $0x1bc8] ss:$28 sps:$4 sm:$0xff]  }
 0x31a   : > { %8162 = vmatprep.subr.bf16.mxu0 %v19606_v49  ;;  %v19666_v50 = vld [vmem:[%s21335_s25 + $0x1c04] ss:$28 sps:$4 sm:$0xff]  }
 0x31c   : > { %5690 = vmatpush1.bf16.msra.mxu1 %v19607_v53  ;;  %v19664_v53 = vld [vmem:[%s21335_s25 + $0x1c00] ss:$28 sps:$4 sm:$0xff]  }
 0x31d   : > { %8163 = vmatpush1.bf16.msra.mxu0 %v19604_v51  ;;  %5700 = vmatprep.subr.bf16.mxu1 %v19621_v55  ;;  %v19669_v51 = vld [vmem:[%s21335_s25 + $0x1704] ss:$28 sps:$4 sm:$0xff]   ;;  %v19672_v55 = vld [vmem:[%s21335_s25 + $0x1c3c] ss:$28 sps:$4 sm:$0xff]  }
 0x31e   : > { %8164 = vmatprep.subr.bf16.mxu0 %v19612_v54  ;;  %v19667_v54 = vld [vmem:[%s21335_s25 + $0x1700] ss:$28 sps:$4 sm:$0xff]  }
 0x31f   : > { %5692 = vmatmul.mubr.bf16.vlgmr.msra.gmra.mrb[24].mxu1 %v21403_v63 }
 0x320   : > { %5701 = vmatpush1.bf16.msra.mxu1 %v19619_v56  ;;  %5732 = vmatprep.mubr.bf16.mxu1 %v21233_v32 }
 0x321   : > { %8165 = vmatpush1.bf16.msra.mxu0 %v19610_v20  ;;  %8279 = vmatprep.subr.bf16.mxu1 %v19627_v58  ;;  %v19675_v20 = vld [vmem:[%s21335_s25 + $0x173c] ss:$28 sps:$4 sm:$0xff]  }
 0x322   : > { %8166 = vmatprep.subr.bf16.mxu0 %v19615_v57 }
 0x325   : > { %8167 = vmatpush1.bf16.msra.mxu0 %v19613_v59  ;;  %v19670_v59 = vld [vmem:[%s21335_s25 + $0x1c38] ss:$28 sps:$4 sm:$0xff]  }
 0x326   : > { %8168 = vmatprep.subr.bf16.mxu0 %v19618_v60  ;;  %v19673_v60 = vld [vmem:[%s21335_s25 + $0x1738] ss:$28 sps:$4 sm:$0xff]  }
 0x329   : > { %8169 = vmatpush1.bf16.msra.mxu0 %v19616_v61 }
 0x32a   : > { %8170 = vmatprep.subr.bf16.mxu0 %v19624_v1  ;;  %v19678_v1 = vld [vmem:[%s21335_s25 + $0x1c74] ss:$28 sps:$4 sm:$0xff]  }
 0x32b   : > { %15728 = vmatmul.mubr.msk.bf16.vlgmr.msra.gmra.mrb[24].mxu1 %vm2377_vm0, %v21518_v35 }
 0x32c   : > { %8280 = vmatpush1.bf16.msra.mxu1 %v19625_v5  ;;  %8311 = vmatprep.mubr.bf16.mxu1 %v21400_v62 }
 0x32d   : > { %8171 = vmatpush1.bf16.msra.mxu0 %v19622_v4  ;;  %8281 = vmatprep.subr.bf16.mxu1 %v19633_v40  ;;  %v19681_v4 = vld [vmem:[%s21335_s25 + $0x1774] ss:$28 sps:$4 sm:$0xff]  }
 0x32e   : > { %8172 = vmatprep.subr.bf16.mxu0 %v19630_v6  ;;  %v19676_v6 = vld [vmem:[%s21335_s25 + $0x1c70] ss:$28 sps:$4 sm:$0xff]  }
 0x32f   : > { %v19679_v40 = vld [vmem:[%s21335_s25 + $0x1770] ss:$28 sps:$4 sm:$0xff]  }
 0x330   : > { %8282 = vmatpush1.bf16.msra.mxu1 %v19631_v8 }
 0x331   : > { %8173 = vmatpush1.bf16.msra.mxu0 %v19628_v7  ;;  %8283 = vmatprep.subr.bf16.mxu1 %v19639_v9  ;;  %v19684_v7 = vld [vmem:[%s21335_s25 + $0x1cac] ss:$28 sps:$4 sm:$0xff]  }
 0x332   : > { %8174 = vmatprep.subr.bf16.mxu0 %v19636_v41  ;;  %v5406_v14 = vpop.f32.mrb[20].mxu1  ;;  %v19687_v41 = vld [vmem:[%s21335_s25 + $0x17ac] ss:$28 sps:$4 sm:$0xff]  }
 0x333   : > { %v15730_v16 = vmul.f32 -1.442695, %v5406_v14  ;;  %v5408_v18 = vpop.f32.mrb[21].mxu1  ;;  %v19690_v14 = vld [vmem:[%s21335_s25 + $0x1ce4] ss:$28 sps:$4 sm:$0xff]  }
 0x334   : > { %8284 = vmatpush1.bf16.msra.mxu1 %v19637_v11  ;;  %v15731_v21 = vmul.f32 -1.442695, %v5408_v18  ;;  %v5410_v22 = vpop.f32.mrb[22].mxu1  ;;  %v19688_v18 = vld [vmem:[%s21335_s25 + $0x1ce0] ss:$28 sps:$4 sm:$0xff]  }
 0x335   : > { %8175 = vmatpush1.bf16.msra.mxu0 %v19634_v10  ;;  %21051 = vpow2.f32 %v15730_v16  ;;  %v5411_v25 = vpop.f32.mrb[23].mxu1  ;;  %8285 = vmatprep.subr.bf16.mxu1 %v19645_v12  ;;  %v19685_v12 = vld [vmem:[%s21335_s25 + $0x17a8] ss:$28 sps:$4 sm:$0xff]   ;;  %v19696_v22 = vld [vmem:[%s21335_s25 + $0x1d1c] ss:$28 sps:$4 sm:$0xff]  }
 0x336   : > { %8176 = vmatprep.subr.bf16.mxu0 %v19642_v52  ;;  %21053 = vpow2.f32 %v15731_v21  ;;  %v19682_v52 = vld [vmem:[%s21335_s25 + $0x1ca8] ss:$28 sps:$4 sm:$0xff]   ;;  %v19691_v21 = vld [vmem:[%s21335_s25 + $0x17e0] ss:$28 sps:$4 sm:$0xff]  }
 0x337   : > { %v19699_v25 = vld [vmem:[%s21335_s25 + $0x181c] ss:$28 sps:$4 sm:$0xff]  }
 0x338   : > { %8286 = vmatpush1.bf16.msra.mxu1 %v19643_v24 }
 0x339   : > { %8177 = vmatpush1.bf16.msra.mxu0 %v19640_v15  ;;  %8287 = vmatprep.subr.bf16.mxu1 %v19651_v27  ;;  %v19693_v15 = vld [vmem:[%s21335_s25 + $0x17e4] ss:$28 sps:$4 sm:$0xff]  }
 0x33a   : > { %8178 = vmatprep.subr.bf16.mxu0 %v19648_v26 }
 0x33b   : > { %v5570_v33 = vpop.f32.mrb[16].mxu0 }
 0x33c   : > { %v15732_v0 = vmul.f32 -1.442695, %v5570_v33  ;;  %v5572_v36 = vpop.f32.mrb[17].mxu0  ;;  %8288 = vmatpush1.bf16.msra.mxu1 %v19649_v29  ;;  %v19694_v29 = vld [vmem:[%s21335_s25 + $0x1d18] ss:$28 sps:$4 sm:$0xff]  }
 0x33d   : > { %8179 = vmatpush1.bf16.msra.mxu0 %v19646_v28  ;;  %v15733_v2 = vmul.f32 -1.442695, %v5572_v36  ;;  %v5574_v37 = vpop.f32.mrb[18].mxu0  ;;  %8289 = vmatprep.subr.bf16.mxu1 %v19657_v31  ;;  %v19702_v31 = vld [vmem:[%s21335_s25 + $0x1d54] ss:$28 sps:$4 sm:$0xff]  }
 0x33e   : > { %21055 = vpow2.f32 %v15732_v0  ;;  %v5575_v39 = vpop.f32.mrb[19].mxu0  ;;  %8180 = vmatprep.subr.bf16.mxu0 %v19654_v30  ;;  %v19697_v30 = vld [vmem:[%s21335_s25 + $0x1818] ss:$28 sps:$4 sm:$0xff]  }
 0x33f   : > { %21057 = vpow2.f32 %v15733_v2  ;;  %v21052_v44 = vpop.eup %21051  ;;  %v19703_v39 = vld [vmem:[%s21335_s25 + $0x1850] ss:$28 sps:$4 sm:$0xff]  }
 0x340   : > { %v21054_v45 = vpop.eup %21053  ;;  %v5922_v46 = vadd.f32 1.0, %v21052_v44  ;;  %8290 = vmatpush1.bf16.msra.mxu1 %v19655_v38  ;;  %v19700_v38 = vld [vmem:[%s21335_s25 + $0x1d50] ss:$28 sps:$4 sm:$0xff]  }
 0x341   : > { %8181 = vmatpush1.bf16.msra.mxu0 %v19652_v34  ;;  %v5923_v49 = vadd.f32 1.0, %v21054_v45  ;;  %8291 = vmatprep.subr.bf16.mxu1 %v19663_v43  ;;  %v19705_v34 = vld [vmem:[%s21335_s25 + $0x1854] ss:$28 sps:$4 sm:$0xff]   ;;  %v19708_v43 = vld [vmem:[%s21335_s25 + $0x1d8c] ss:$28 sps:$4 sm:$0xff]  }
 0x342   : > { %8182 = vmatprep.subr.bf16.mxu0 %v19660_v42  ;;  %21059 = vrcp.f32 %v5922_v46  ;;  %v19711_v44 = vld [vmem:[%s21335_s25 + $0x188c] ss:$28 sps:$4 sm:$0xff]  }
 0x343   : > { %21061 = vrcp.f32 %v5923_v49  ;;  %v19706_v45 = vld [vmem:[%s21335_s25 + $0x1d88] ss:$28 sps:$4 sm:$0xff]   ;;  %v19712_v49 = vld [vmem:[%s21335_s25 + $0x1dc0] ss:$28 sps:$4 sm:$0xff]  }
 0x344   : > { %8292 = vmatpush1.bf16.msra.mxu1 %v19661_v48  ;;  %v19709_v46 = vld [vmem:[%s21335_s25 + $0x1888] ss:$28 sps:$4 sm:$0xff]  }
 0x345   : > { %8183 = vmatpush1.bf16.msra.mxu0 %v19658_v47  ;;  %8293 = vmatprep.subr.bf16.mxu1 %v19669_v51  ;;  %v19714_v47 = vld [vmem:[%s21335_s25 + $0x1dc4] ss:$28 sps:$4 sm:$0xff]   ;;  %v19720_v51 = vld [vmem:[%s21335_s25 + $0x1dfc] ss:$28 sps:$4 sm:$0xff]  }
 0x346   : > { %8184 = vmatprep.subr.bf16.mxu0 %v19666_v50  ;;  %v19717_v48 = vld [vmem:[%s21335_s25 + $0x18c4] ss:$28 sps:$4 sm:$0xff]  }
 0x347   : > { %v19715_v50 = vld [vmem:[%s21335_s25 + $0x18c0] ss:$28 sps:$4 sm:$0xff]  }
 0x348   : > { %v21056_v56 = vpop.eup %21055  ;;  %8294 = vmatpush1.bf16.msra.mxu1 %v19667_v54  ;;  %v19718_v54 = vld [vmem:[%s21335_s25 + $0x1df8] ss:$28 sps:$4 sm:$0xff]  }
 0x349   : > { %v21058_v57 = vpop.eup %21057  ;;  %v5924_v58 = vadd.f32 1.0, %v21056_v56  ;;  %8185 = vmatpush1.bf16.msra.mxu0 %v19664_v53  ;;  %8295 = vmatprep.subr.bf16.mxu1 %v19675_v20  ;;  %v19723_v53 = vld [vmem:[%s21335_s25 + $0x18fc] ss:$28 sps:$4 sm:$0xff]   ;;  %v19726_v20 = vld [vmem:[%s21335_s25 + $0x1e34] ss:$28 sps:$4 sm:$0xff]  }
 0x34a   : > { %v5925_v61 = vadd.f32 1.0, %v21058_v57  ;;  %8186 = vmatprep.subr.bf16.mxu0 %v19672_v55  ;;  %v19721_v55 = vld [vmem:[%s21335_s25 + $0x18f8] ss:$28 sps:$4 sm:$0xff]   ;;  %v19724_v57 = vld [vmem:[%s21335_s25 + $0x1e30] ss:$28 sps:$4 sm:$0xff]  }
 0x34b   : > { %21063 = vrcp.f32 %v5924_v58  ;;  %v19729_v56 = vld [vmem:[%s21335_s25 + $0x1934] ss:$28 sps:$4 sm:$0xff]  }
 0x34c   : > { %21065 = vrcp.f32 %v5925_v61  ;;  %v21060_v5 = vpop.eup %21059  ;;  %8296 = vmatpush1.bf16.msra.mxu1 %v19673_v60  ;;  %v19727_v58 = vld [vmem:[%s21335_s25 + $0x1930] ss:$28 sps:$4 sm:$0xff]   ;;  %v19730_v61 = vld [vmem:[%s21335_s25 + $0x1e68] ss:$28 sps:$4 sm:$0xff]  }
 0x34d   : > { %8187 = vmatpush1.bf16.msra.mxu0 %v19670_v59  ;;  %v21062_v8 = vpop.eup %21061  ;;  %8297 = vmatprep.subr.bf16.mxu1 %v19681_v4  ;;  %v5943_v9 = vsel %vm3075_vm2, %v21060_v5, 0.0  ;;  %v19732_v59 = vld [vmem:[%s21335_s25 + $0x1e6c] ss:$28 sps:$4 sm:$0xff]   ;;  %v19738_v4 = vld [vmem:[%s21335_s25 + $0x1ea4] ss:$28 sps:$4 sm:$0xff]  }
 0x34e   : > { %8197 = vmatprep.subr.bf16.mxu0 %v19678_v1  ;;  %v5944_v10 = vsel %vm3075_vm2, %v21062_v8, 0.0  ;;  %v19735_v60 = vld [vmem:[%s21335_s25 + $0x196c] ss:$28 sps:$4 sm:$0xff]   ;;  %v19741_v5 = vld [vmem:[%s21335_s25 + $0x19a4] ss:$28 sps:$4 sm:$0xff]  }
 0x34f   : > { %v5945_v11 = vadd.f32 %v5944_v10, %v5943_v9  ;;  %v19733_v1 = vld [vmem:[%s21335_s25 + $0x1968] ss:$28 sps:$4 sm:$0xff]   ;;  %v19747_v8 = vld [vmem:[%s21335_s25 + $0x19dc] ss:$28 sps:$4 sm:$0xff]   ;;  %v19750_v10 = vld [vmem:[%s21335_s25 + $0x1f14] ss:$28 sps:$4 sm:$0xff]  }
 0x350   : > { %8189 = vmatmul.mubr.bf16.vlgmr.msra.gmra.mrb[36].mxu0 %v21432_v19  ;;  %8298 = vmatpush1.bf16.msra.mxu1 %v19679_v40  ;;  %v19739_v40 = vld [vmem:[%s21335_s25 + $0x19a0] ss:$28 sps:$4 sm:$0xff]   ;;  %v19745_v9 = vld [vmem:[%s21335_s25 + $0x19d8] ss:$28 sps:$4 sm:$0xff]  }
 0x351   : > { %8198 = vmatpush1.bf16.msra.mxu0 %v19676_v6  ;;  %8299 = vmatprep.subr.bf16.mxu1 %v19687_v41  ;;  %v19736_v6 = vld [vmem:[%s21335_s25 + $0x1ea0] ss:$28 sps:$4 sm:$0xff]   ;;  %v19742_v41 = vld [vmem:[%s21335_s25 + $0x1ed8] ss:$28 sps:$4 sm:$0xff]  }
 0x352   : > { %8199 = vmatprep.subr.bf16.mxu0 %v19684_v7  ;;  %8229 = vmatprep.mubr.bf16.mxu0 %v21438_v23  ;;  %v19744_v7 = vld [vmem:[%s21335_s25 + $0x1edc] ss:$28 sps:$4 sm:$0xff]  }
 0x354   : > { %8300 = vmatpush1.bf16.msra.mxu1 %v19685_v12 }
 0x355   : > { %v21064_v16 = vpop.eup %21063  ;;  %8200 = vmatpush1.bf16.msra.mxu0 %v19682_v52  ;;  %8301 = vmatprep.subr.bf16.mxu1 %v19693_v15 }
 0x356   : > { %v21066_v24 = vpop.eup %21065  ;;  %8201 = vmatprep.subr.bf16.mxu0 %v19690_v14  ;;  %v5946_v26 = vsel %vm3075_vm2, %v21064_v16, 0.0  ;;  %v19748_v14 = vld [vmem:[%s21335_s25 + $0x1f10] ss:$28 sps:$4 sm:$0xff]  }
 0x357   : > { %v5947_v27 = vadd.f32 %v5946_v26, %v5945_v11  ;;  %v5948_v28 = vsel %vm3075_vm2, %v21066_v24, 0.0  ;;  %v19753_v11 = vld [vmem:[%s21335_s25 + $0x1a14] ss:$28 sps:$4 sm:$0xff]   ;;  %v19759_v24 = vld [vmem:[%s21335_s25 + $0x1a4c] ss:$28 sps:$4 sm:$0xff]  }
 0x358   : > { %8302 = vmatpush1.bf16.msra.mxu1 %v19691_v21  ;;  %v19756_v21 = vld [vmem:[%s21335_s25 + $0x1f4c] ss:$28 sps:$4 sm:$0xff]  }
 0x359   : > { %8202 = vmatpush1.bf16.msra.mxu0 %v19688_v18  ;;  %v22274_v33 = vadd.f32 %v5948_v28, %v5947_v27  ;;  %8303 = vmatprep.subr.bf16.mxu1 %v19699_v25  ;;  %v19751_v18 = vld [vmem:[%s21335_s25 + $0x1a10] ss:$28 sps:$4 sm:$0xff]   ;;  %v19754_v26 = vld [vmem:[%s21335_s25 + $0x1f48] ss:$28 sps:$4 sm:$0xff]  }
 0x35a   : > { %8203 = vmatprep.subr.bf16.mxu0 %v19696_v22  ;;  %v19757_v27 = vld [vmem:[%s21335_s25 + $0x1a48] ss:$28 sps:$4 sm:$0xff]  }
 0x35b   : > { %v18061_v0 = vpop.f32.mrb[20].mxu0  ;;  %v19762_v28 = vld [vmem:[%s21335_s25 + $0x1f84] ss:$28 sps:$4 sm:$0xff]  }
 0x35c   : > { %v18062_v36 = vpop.f32.mrb[21].mxu0  ;;  %8304 = vmatpush1.bf16.msra.mxu1 %v19697_v30  ;;  %v19760_v30 = vld [vmem:[%s21335_s25 + $0x1f80] ss:$28 sps:$4 sm:$0xff]  }
 0x35d   : > { %v22277_v2 = vadd.f32 %v18062_v36, %v18061_v0  ;;  %8204 = vmatpush1.bf16.msra.mxu0 %v19694_v29  ;;  %v18064_v37 = vpop.f32.mrb[22].mxu0  ;;  %8305 = vmatprep.subr.bf16.mxu1 %v19705_v34  ;;  %v19765_v29 = vld [vmem:[%s21335_s25 + $0x1a84] ss:$28 sps:$4 sm:$0xff]   ;;  %v19768_v34 = vld [vmem:[%s21335_s25 + $0x1fbc] ss:$28 sps:$4 sm:$0xff]  }
 0x35e   : > { %v18065_v42 = vpop.f32.mrb[23].mxu0  ;;  %8205 = vmatprep.subr.bf16.mxu0 %v19702_v31  ;;  %v19763_v31 = vld [vmem:[%s21335_s25 + $0x1a80] ss:$28 sps:$4 sm:$0xff]   ;;  %v19766_v36 = vld [vmem:[%s21335_s25 + $0x1fb8] ss:$28 sps:$4 sm:$0xff]  }
 0x35f   : > { %v19771_v0 = vld [vmem:[%s21335_s25 + $0x1abc] ss:$28 sps:$4 sm:$0xff]   ;;  %v19774_v37 = vld [vmem:[%s21335_s25 + $0x1ff4] ss:$28 sps:$4 sm:$0xff]  }
 0x360   : > { %8306 = vmatpush1.bf16.msra.mxu1 %v19703_v39  ;;  %v19772_v39 = vld [vmem:[%s21335_s25 + $0x1ff0] ss:$28 sps:$4 sm:$0xff]  }
 0x361   : > { %8206 = vmatpush1.bf16.msra.mxu0 %v19700_v38  ;;  %8307 = vmatprep.subr.bf16.mxu1 %v19711_v44  ;;  %v19777_v38 = vld [vmem:[%s21335_s25 + $0x1af4] ss:$28 sps:$4 sm:$0xff]   ;;  %v19786_v44 = vld [vmem:[%s21335_s25 + $0x1584] ss:$28 sps:$4 sm:$0xff]  }
 0x362   : > { %8207 = vmatprep.subr.bf16.mxu0 %v19708_v43  ;;  %v19775_v42 = vld [vmem:[%s21335_s25 + $0x1af0] ss:$28 sps:$4 sm:$0xff]  }
 0x363   : > { %v19780_v43 = vld [vmem:[%s21335_s25 + $0x1b2c] ss:$28 sps:$4 sm:$0xff]  }
 0x364   : > { %8308 = vmatpush1.bf16.msra.mxu1 %v19709_v46  ;;  %v19783_v46 = vld [vmem:[%s21335_s25 + $0x1b64] ss:$28 sps:$4 sm:$0xff]  }
 0x365   : > { %8208 = vmatpush1.bf16.msra.mxu0 %v19706_v45  ;;  %8309 = vmatprep.subr.bf16.mxu1 %v19717_v48  ;;  %v19778_v45 = vld [vmem:[%s21335_s25 + $0x1b28] ss:$28 sps:$4 sm:$0xff]   ;;  %v19789_v48 = vld [vmem:[%s21335_s25 + $0x1b9c] ss:$28 sps:$4 sm:$0xff]  }
 0x366   : > { %8209 = vmatprep.subr.bf16.mxu0 %v19714_v47  ;;  %v19781_v47 = vld [vmem:[%s21335_s25 + $0x1b60] ss:$28 sps:$4 sm:$0xff]  }
 0x368   : > { %8310 = vmatpush1.bf16.msra.mxu1 %v19715_v50  ;;  %v19787_v50 = vld [vmem:[%s21335_s25 + $0x1b98] ss:$28 sps:$4 sm:$0xff]  }
 0x369   : > { %8210 = vmatpush1.bf16.msra.mxu0 %v19712_v49  ;;  %8320 = vmatprep.subr.bf16.mxu1 %v19723_v53  ;;  %v19784_v49 = vld [vmem:[%s21335_s25 + $0x1580] ss:$28 sps:$4 sm:$0xff]   ;;  %v19795_v53 = vld [vmem:[%s21335_s25 + $0x1bd4] ss:$28 sps:$4 sm:$0xff]  }
 0x36a   : > { %8211 = vmatprep.subr.bf16.mxu0 %v19720_v51  ;;  %v19792_v51 = vld [vmem:[%s21335_s25 + $0x15bc] ss:$28 sps:$4 sm:$0xff]  }
 0x36b   : > { %8312 = vmatmul.mubr.bf16.vlgmr.msra.gmra.mrb[28].mxu1 %v21424_v13 }
 0x36c   : > { %8321 = vmatpush1.bf16.msra.mxu1 %v19721_v55  ;;  %8352 = vmatprep.mubr.bf16.mxu1 %v21410_v3 }
 0x36d   : > { %8212 = vmatpush1.bf16.msra.mxu0 %v19718_v54  ;;  %8322 = vmatprep.subr.bf16.mxu1 %v19729_v56 }
 0x36e   : > { %8213 = vmatprep.subr.bf16.mxu0 %v19726_v20  ;;  %v19790_v20 = vld [vmem:[%s21335_s25 + $0x15b8] ss:$28 sps:$4 sm:$0xff]  }
 0x370   : > { %8323 = vmatpush1.bf16.msra.mxu1 %v19727_v58  ;;  %v19793_v58 = vld [vmem:[%s21335_s25 + $0x1bd0] ss:$28 sps:$4 sm:$0xff]  }
 0x371   : > { %8214 = vmatpush1.bf16.msra.mxu0 %v19724_v57  ;;  %8324 = vmatprep.subr.bf16.mxu1 %v19735_v60 }
 0x372   : > { %8215 = vmatprep.subr.bf16.mxu0 %v19732_v59  ;;  %v19798_v59 = vld [vmem:[%s21335_s25 + $0x15f4] ss:$28 sps:$4 sm:$0xff]  }
 0x374   : > { %8325 = vmatpush1.bf16.msra.mxu1 %v19733_v1 }
 0x375   : > { %8216 = vmatpush1.bf16.msra.mxu0 %v19730_v61  ;;  %8326 = vmatprep.subr.bf16.mxu1 %v19741_v5  ;;  %v19801_v61 = vld [vmem:[%s21335_s25 + $0x1c0c] ss:$28 sps:$4 sm:$0xff]  }
 0x376   : > { %8217 = vmatprep.subr.bf16.mxu0 %v19738_v4  ;;  %v19796_v4 = vld [vmem:[%s21335_s25 + $0x15f0] ss:$28 sps:$4 sm:$0xff]   ;;  %v19799_v5 = vld [vmem:[%s21335_s25 + $0x1c08] ss:$28 sps:$4 sm:$0xff]  }
 0x378   : > { %8327 = vmatpush1.bf16.msra.mxu1 %v19739_v40  ;;  %v19807_v40 = vld [vmem:[%s21335_s25 + $0x1c44] ss:$28 sps:$4 sm:$0xff]  }
 0x379   : > { %8218 = vmatpush1.bf16.msra.mxu0 %v19736_v6  ;;  %8328 = vmatprep.subr.bf16.mxu1 %v19747_v8  ;;  %v19804_v6 = vld [vmem:[%s21335_s25 + $0x162c] ss:$28 sps:$4 sm:$0xff]  }
 0x37a   : > { %8219 = vmatprep.subr.bf16.mxu0 %v19744_v7 }
 0x37b   : > { %v18083_v52 = vpop.f32.mrb[24].mxu0 }
 0x37c   : > { %v18084_v12 = vpop.f32.mrb[25].mxu0  ;;  %8329 = vmatpush1.bf16.msra.mxu1 %v19745_v9 }
 0x37d   : > { %v18085_v15 = vadd.f32 %v18084_v12, %v18083_v52  ;;  %8220 = vmatpush1.bf16.msra.mxu0 %v19742_v41  ;;  %v18086_v16 = vpop.f32.mrb[26].mxu0  ;;  %8330 = vmatprep.subr.bf16.mxu1 %v19753_v11  ;;  %v19805_v11 = vld [vmem:[%s21335_s25 + $0x1c40] ss:$28 sps:$4 sm:$0xff]  }
 0x37e   : > { %v18087_v22 = vpop.f32.mrb[27].mxu0  ;;  %8221 = vmatprep.subr.bf16.mxu0 %v19750_v10  ;;  %v19802_v10 = vld [vmem:[%s21335_s25 + $0x1628] ss:$28 sps:$4 sm:$0xff]   ;;  %v19811_v16 = vld [vmem:[%s21335_s25 + $0x1c78] ss:$28 sps:$4 sm:$0xff]  }
 0x37f   : > { %v22318_v25 = vadd.f32 %v18085_v15, %v22277_v2  ;;  %v19769_v2 = vld [vmem:[%s21335_s25 + $0x1ab8] ss:$28 sps:$4 sm:$0xff]   ;;  %v19810_v12 = vld [vmem:[%s21335_s25 + $0x1664] ss:$28 sps:$4 sm:$0xff]  }
 0x380   : > { %8331 = vmatpush1.bf16.msra.mxu1 %v19751_v18  ;;  %v19808_v15 = vld [vmem:[%s21335_s25 + $0x1660] ss:$28 sps:$4 sm:$0xff]   ;;  %v19814_v22 = vld [vmem:[%s21335_s25 + $0x1698] ss:$28 sps:$4 sm:$0xff]  }
 0x381   : > { %8222 = vmatpush1.bf16.msra.mxu0 %v19748_v14  ;;  %8332 = vmatprep.subr.bf16.mxu1 %v19759_v24  ;;  %v19813_v14 = vld [vmem:[%s21335_s25 + $0x1c7c] ss:$28 sps:$4 sm:$0xff]   ;;  %v19817_v24 = vld [vmem:[%s21335_s25 + $0x1cb0] ss:$28 sps:$4 sm:$0xff]  }
 0x382   : > { %8223 = vmatprep.subr.bf16.mxu0 %v19756_v21  ;;  %v19816_v18 = vld [vmem:[%s21335_s25 + $0x169c] ss:$28 sps:$4 sm:$0xff]   ;;  %v19819_v21 = vld [vmem:[%s21335_s25 + $0x1cb4] ss:$28 sps:$4 sm:$0xff]  }
 0x384   : > { %8333 = vmatpush1.bf16.msra.mxu1 %v19757_v27  ;;  %v19820_v27 = vld [vmem:[%s21335_s25 + $0x16d0] ss:$28 sps:$4 sm:$0xff]  }
 0x385   : > { %8224 = vmatpush1.bf16.msra.mxu0 %v19754_v26  ;;  %8334 = vmatprep.subr.bf16.mxu1 %v19765_v29  ;;  %v19825_v26 = vld [vmem:[%s21335_s25 + $0x1cec] ss:$28 sps:$4 sm:$0xff]  }
 0x386   : > { %8225 = vmatprep.subr.bf16.mxu0 %v19762_v28  ;;  %v19823_v28 = vld [vmem:[%s21335_s25 + $0x1ce8] ss:$28 sps:$4 sm:$0xff]  }
 0x387   : > { %v19828_v29 = vld [vmem:[%s21335_s25 + $0x170c] ss:$28 sps:$4 sm:$0xff]  }
 0x388   : > { %8335 = vmatpush1.bf16.msra.mxu1 %v19763_v31  ;;  %v19826_v31 = vld [vmem:[%s21335_s25 + $0x1708] ss:$28 sps:$4 sm:$0xff]  }
 0x389   : > { %8226 = vmatpush1.bf16.msra.mxu0 %v19760_v30  ;;  %8336 = vmatprep.subr.bf16.mxu1 %v19771_v0  ;;  %v19831_v30 = vld [vmem:[%s21335_s25 + $0x1d24] ss:$28 sps:$4 sm:$0xff]  }
 0x38a   : > { %8227 = vmatprep.subr.bf16.mxu0 %v19768_v34  ;;  %v19829_v34 = vld [vmem:[%s21335_s25 + $0x1d20] ss:$28 sps:$4 sm:$0xff]  }
 0x38b   : > { %v19834_v0 = vld [vmem:[%s21335_s25 + $0x1744] ss:$28 sps:$4 sm:$0xff]  }
 0x38c   : > { %8337 = vmatpush1.bf16.msra.mxu1 %v19769_v2  ;;  %v19832_v2 = vld [vmem:[%s21335_s25 + $0x1740] ss:$28 sps:$4 sm:$0xff]  }
 0x38d   : > { %8228 = vmatpush1.bf16.msra.mxu0 %v19766_v36  ;;  %8338 = vmatprep.subr.bf16.mxu1 %v19777_v38  ;;  %v19837_v36 = vld [vmem:[%s21335_s25 + $0x1d5c] ss:$28 sps:$4 sm:$0xff]  }
 0x38e   : > { %8238 = vmatprep.subr.bf16.mxu0 %v19774_v37  ;;  %v19835_v37 = vld [vmem:[%s21335_s25 + $0x1d58] ss:$28 sps:$4 sm:$0xff]  }
 0x38f   : > { %v19840_v38 = vld [vmem:[%s21335_s25 + $0x177c] ss:$28 sps:$4 sm:$0xff]  }
 0x390   : > { %8230 = vmatmul.mubr.bf16.vlgmr.msra.gmra.mrb[36].mxu0 %v21403_v63  ;;  %8339 = vmatpush1.bf16.msra.mxu1 %v19775_v42  ;;  %v19838_v42 = vld [vmem:[%s21335_s25 + $0x1778] ss:$28 sps:$4 sm:$0xff]  }
 0x391   : > { %8239 = vmatpush1.bf16.msra.mxu0 %v19772_v39  ;;  %8340 = vmatprep.subr.bf16.mxu1 %v19780_v43  ;;  %v19843_v39 = vld [vmem:[%s21335_s25 + $0x1d94] ss:$28 sps:$4 sm:$0xff]  }
 0x392   : > { %8270 = vmatprep.mubr.bf16.mxu0 %v21233_v32  ;;  %8443 = vmatprep.subr.bf16.mxu0 %v19786_v44  ;;  %v19841_v43 = vld [vmem:[%s21335_s25 + $0x1d90] ss:$28 sps:$4 sm:$0xff]  }
 0x393   : > { %v19846_v44 = vld [vmem:[%s21335_s25 + $0x17b4] ss:$28 sps:$4 sm:$0xff]  }
 0x394   : > { %8341 = vmatpush1.bf16.msra.mxu1 %v19778_v45  ;;  %v19849_v45 = vld [vmem:[%s21335_s25 + $0x1dcc] ss:$28 sps:$4 sm:$0xff]  }
 0x395   : > { %8342 = vmatprep.subr.bf16.mxu1 %v19783_v46  ;;  %v19844_v46 = vld [vmem:[%s21335_s25 + $0x17b0] ss:$28 sps:$4 sm:$0xff]  }
 0x398   : > { %8343 = vmatpush1.bf16.msra.mxu1 %v19781_v47  ;;  %v19847_v47 = vld [vmem:[%s21335_s25 + $0x1dc8] ss:$28 sps:$4 sm:$0xff]  }
 0x399   : > { %8344 = vmatprep.subr.bf16.mxu1 %v19789_v48  ;;  %v19852_v48 = vld [vmem:[%s21335_s25 + $0x17ec] ss:$28 sps:$4 sm:$0xff]  }
 0x39b   : > { %v18105_v54 = vpop.f32.mrb[28].mxu0 }
 0x39c   : > { %16472 = vmatmul.mubr.msk.bf16.vlgmr.msra.gmra.mrb[36].mxu0 %vm2377_vm0, %v21518_v35  ;;  %v18106_v55 = vpop.f32.mrb[29].mxu0  ;;  %8345 = vmatpush1.bf16.msra.mxu1 %v19787_v50  ;;  %v19850_v50 = vld [vmem:[%s21335_s25 + $0x17e8] ss:$28 sps:$4 sm:$0xff]  }
 0x39d   : > { %8444 = vmatpush1.bf16.msra.mxu0 %v19784_v49  ;;  %v18107_v56 = vadd.f32 %v18106_v55, %v18105_v54  ;;  %v18108_v57 = vpop.f32.mrb[30].mxu0  ;;  %8346 = vmatprep.subr.bf16.mxu1 %v19795_v53  ;;  %v19855_v49 = vld [vmem:[%s21335_s25 + $0x1e04] ss:$28 sps:$4 sm:$0xff]   ;;  %v19861_v54 = vld [vmem:[%s21335_s25 + $0x1e3c] ss:$28 sps:$4 sm:$0xff]  }
 0x39e   : > { %v18109_v60 = vpop.f32.mrb[31].mxu0  ;;  %8445 = vmatprep.subr.bf16.mxu0 %v19792_v51  ;;  %8475 = vmatprep.mubr.bf16.mxu0 %v21400_v62  ;;  %v19853_v51 = vld [vmem:[%s21335_s25 + $0x1e00] ss:$28 sps:$4 sm:$0xff]   ;;  %v19867_v57 = vld [vmem:[%s21335_s25 + $0x1e74] ss:$28 sps:$4 sm:$0xff]  }
 0x39f   : > { %v5856_v1 = vadd.f32 %v18107_v56, %v22318_v25  ;;  %v19822_v25 = vld [vmem:[%s21335_s25 + $0x16d4] ss:$28 sps:$4 sm:$0xff]   ;;  %v19858_v53 = vld [vmem:[%s21335_s25 + $0x1824] ss:$28 sps:$4 sm:$0xff]   ;;  %v19864_v56 = vld [vmem:[%s21335_s25 + $0x185c] ss:$28 sps:$4 sm:$0xff]  }
 0x3a0   : > { %8347 = vmatpush1.bf16.msra.mxu1 %v19793_v58  ;;  %v19856_v55 = vld [vmem:[%s21335_s25 + $0x1820] ss:$28 sps:$4 sm:$0xff]   ;;  %v19862_v58 = vld [vmem:[%s21335_s25 + $0x1858] ss:$28 sps:$4 sm:$0xff]  }
 0x3a1   : > { %8446 = vmatpush1.bf16.msra.mxu0 %v19790_v20  ;;  %8348 = vmatprep.subr.bf16.mxu1 %v19801_v61  ;;  %v19859_v20 = vld [vmem:[%s21335_s25 + $0x1e38] ss:$28 sps:$4 sm:$0xff]   ;;  %v19873_v61 = vld [vmem:[%s21335_s25 + $0x1eac] ss:$28 sps:$4 sm:$0xff]  }
 0x3a2   : > { %8447 = vmatprep.subr.bf16.mxu0 %v19798_v59  ;;  %v19865_v59 = vld [vmem:[%s21335_s25 + $0x1e70] ss:$28 sps:$4 sm:$0xff]  }
 0x3a3   : > { %v5895_v7 = vpop.f32.mrb[32].mxu0  ;;  %v19870_v60 = vld [vmem:[%s21335_s25 + $0x1894] ss:$28 sps:$4 sm:$0xff]  }
 0x3a4   : > { %v22358_v8 = vadd.f32 %v5895_v7, %v5856_v1  ;;  %v18327_v41 = vpop.f32.mrb[33].mxu0  ;;  %8349 = vmatpush1.bf16.msra.mxu1 %v19799_v5  ;;  %v19868_v1 = vld [vmem:[%s21335_s25 + $0x1890] ss:$28 sps:$4 sm:$0xff]   ;;  %v19877_v7 = vld [vmem:[%s21335_s25 + $0x1ee0] ss:$28 sps:$4 sm:$0xff]  }
 0x3a5   : > { %8448 = vmatpush1.bf16.msra.mxu0 %v19796_v4  ;;  %v5898_v9 = vpop.f32.mrb[34].mxu0  ;;  %8350 = vmatprep.subr.bf16.mxu1 %v19807_v40  ;;  %v19871_v4 = vld [vmem:[%s21335_s25 + $0x1ea8] ss:$28 sps:$4 sm:$0xff]  }
 0x3a6   : > { %v18328_v52 = vpop.f32.mrb[35].mxu0  ;;  %8449 = vmatprep.subr.bf16.mxu0 %v19804_v6  ;;  %v19876_v5 = vld [vmem:[%s21335_s25 + $0x18cc] ss:$28 sps:$4 sm:$0xff]   ;;  %v19879_v6 = vld [vmem:[%s21335_s25 + $0x1ee4] ss:$28 sps:$4 sm:$0xff]  }
 0x3a7   : > { %v19874_v40 = vld [vmem:[%s21335_s25 + $0x18c8] ss:$28 sps:$4 sm:$0xff]   ;;  %v19885_v9 = vld [vmem:[%s21335_s25 + $0x1f1c] ss:$28 sps:$4 sm:$0xff]  }
 0x3a8   : > { %8351 = vmatpush1.bf16.msra.mxu1 %v19805_v11  ;;  %v19882_v41 = vld [vmem:[%s21335_s25 + $0x1904] ss:$28 sps:$4 sm:$0xff]   ;;  %v19883_v11 = vld [vmem:[%s21335_s25 + $0x1f18] ss:$28 sps:$4 sm:$0xff]  }
 0x3a9   : > { %8450 = vmatpush1.bf16.msra.mxu0 %v19802_v10  ;;  %8361 = vmatprep.subr.bf16.mxu1 %v19813_v14  ;;  %v19880_v10 = vld [vmem:[%s21335_s25 + $0x1900] ss:$28 sps:$4 sm:$0xff]   ;;  %v19886_v14 = vld [vmem:[%s21335_s25 + $0x1938] ss:$28 sps:$4 sm:$0xff]  }
 0x3aa   : > { %8451 = vmatprep.subr.bf16.mxu0 %v19810_v12  ;;  %v19888_v52 = vld [vmem:[%s21335_s25 + $0x193c] ss:$28 sps:$4 sm:$0xff]   ;;  %v19891_v12 = vld [vmem:[%s21335_s25 + $0x1f54] ss:$28 sps:$4 sm:$0xff]  }
 0x3ab   : > { %8353 = vmatmul.mubr.bf16.vlgmr.msra.gmra.mrb[28].mxu1 %v21432_v19 }
 0x3ac   : > { %8362 = vmatpush1.bf16.msra.mxu1 %v19811_v16  ;;  %8393 = vmatprep.mubr.bf16.mxu1 %v21438_v23  ;;  %v19894_v16 = vld [vmem:[%s21335_s25 + $0x1974] ss:$28 sps:$4 sm:$0xff]  }
 0x3ad   : > { %8452 = vmatpush1.bf16.msra.mxu0 %v19808_v15  ;;  %8363 = vmatprep.subr.bf16.mxu1 %v19819_v21  ;;  %v19889_v15 = vld [vmem:[%s21335_s25 + $0x1f50] ss:$28 sps:$4 sm:$0xff]  }
 0x3ae   : > { %8453 = vmatprep.subr.bf16.mxu0 %v19816_v18  ;;  %v19897_v18 = vld [vmem:[%s21335_s25 + $0x1f8c] ss:$28 sps:$4 sm:$0xff]  }
 0x3af   : > { %v19892_v21 = vld [vmem:[%s21335_s25 + $0x1970] ss:$28 sps:$4 sm:$0xff]  }
 0x3b0   : > { %8364 = vmatpush1.bf16.msra.mxu1 %v19817_v24  ;;  %v19900_v24 = vld [vmem:[%s21335_s25 + $0x19ac] ss:$28 sps:$4 sm:$0xff]  }
 0x3b1   : > { %8454 = vmatpush1.bf16.msra.mxu0 %v19814_v22  ;;  %8365 = vmatprep.subr.bf16.mxu1 %v19825_v26  ;;  %v19895_v22 = vld [vmem:[%s21335_s25 + $0x1f88] ss:$28 sps:$4 sm:$0xff]  }
 0x3b2   : > { %8455 = vmatprep.subr.bf16.mxu0 %v19822_v25  ;;  %v19903_v25 = vld [vmem:[%s21335_s25 + $0x1fc4] ss:$28 sps:$4 sm:$0xff]  }
 0x3b3   : > { %v19898_v26 = vld [vmem:[%s21335_s25 + $0x19a8] ss:$28 sps:$4 sm:$0xff]  }
 0x3b4   : > { %8366 = vmatpush1.bf16.msra.mxu1 %v19823_v28  ;;  %v19906_v28 = vld [vmem:[%s21335_s25 + $0x19e4] ss:$28 sps:$4 sm:$0xff]  }
 0x3b5   : > { %8456 = vmatpush1.bf16.msra.mxu0 %v19820_v27  ;;  %8367 = vmatprep.subr.bf16.mxu1 %v19831_v30  ;;  %v19901_v27 = vld [vmem:[%s21335_s25 + $0x1fc0] ss:$28 sps:$4 sm:$0xff]  }
 0x3b6   : > { %8457 = vmatprep.subr.bf16.mxu0 %v19828_v29  ;;  %v19915_v29 = vld [vmem:[%s21335_s25 + $0x1ffc] ss:$28 sps:$4 sm:$0xff]  }
 0x3b7   : > { %v19904_v30 = vld [vmem:[%s21335_s25 + $0x19e0] ss:$28 sps:$4 sm:$0xff]  }
 0x3b8   : > { %8368 = vmatpush1.bf16.msra.mxu1 %v19829_v34  ;;  %v19913_v34 = vld [vmem:[%s21335_s25 + $0x1ff8] ss:$28 sps:$4 sm:$0xff]  }
 0x3b9   : > { %8458 = vmatpush1.bf16.msra.mxu0 %v19826_v31  ;;  %8369 = vmatprep.subr.bf16.mxu1 %v19837_v36  ;;  %v19909_v31 = vld [vmem:[%s21335_s25 + $0x1a1c] ss:$28 sps:$4 sm:$0xff]  }
 0x3ba   : > { %8459 = vmatprep.subr.bf16.mxu0 %v19834_v0  ;;  %v19919_v0 = vld [vmem:[%s21335_s25 + $0x1748] ss:$28 sps:$4 sm:$0xff]   ;;  %v19907_v36 = vld [vmem:[%s21335_s25 + $0x1a18] ss:$28 sps:$4 sm:$0xff]  }
 0x3bc   : > { %8370 = vmatpush1.bf16.msra.mxu1 %v19835_v37  ;;  %v19910_v37 = vld [vmem:[%s21335_s25 + $0x1a50] ss:$28 sps:$4 sm:$0xff]  }
 0x3bd   : > { %8460 = vmatpush1.bf16.msra.mxu0 %v19832_v2  ;;  %8371 = vmatprep.subr.bf16.mxu1 %v19843_v39  ;;  %v19912_v2 = vld [vmem:[%s21335_s25 + $0x1a54] ss:$28 sps:$4 sm:$0xff]   ;;  %v19916_v39 = vld [vmem:[%s21335_s25 + $0x1a88] ss:$28 sps:$4 sm:$0xff]  }
 0x3be   : > { %8461 = vmatprep.subr.bf16.mxu0 %v19840_v38  ;;  %v19918_v38 = vld [vmem:[%s21335_s25 + $0x1a8c] ss:$28 sps:$4 sm:$0xff]  }
 0x3c0   : > { %8372 = vmatpush1.bf16.msra.mxu1 %v19841_v43  ;;  %v19923_v43 = vld [vmem:[%s21335_s25 + $0x1ac4] ss:$28 sps:$4 sm:$0xff]  }
 0x3c1   : > { %8462 = vmatpush1.bf16.msra.mxu0 %v19838_v42  ;;  %8373 = vmatprep.subr.bf16.mxu1 %v19849_v45  ;;  %v19920_v42 = vld [vmem:[%s21335_s25 + $0x1588] ss:$28 sps:$4 sm:$0xff]   ;;  %v19921_v45 = vld [vmem:[%s21335_s25 + $0x1ac0] ss:$28 sps:$4 sm:$0xff]  }
 0x3c2   : > { %8463 = vmatprep.subr.bf16.mxu0 %v19846_v44  ;;  %v19924_v44 = vld [vmem:[%s21335_s25 + $0x1780] ss:$28 sps:$4 sm:$0xff]  }
 0x3c4   : > { %8374 = vmatpush1.bf16.msra.mxu1 %v19847_v47  ;;  %v19928_v47 = vld [vmem:[%s21335_s25 + $0x1afc] ss:$28 sps:$4 sm:$0xff]  }
 0x3c5   : > { %8464 = vmatpush1.bf16.msra.mxu0 %v19844_v46  ;;  %8375 = vmatprep.subr.bf16.mxu1 %v19855_v49  ;;  %v19925_v46 = vld [vmem:[%s21335_s25 + $0x15c0] ss:$28 sps:$4 sm:$0xff]   ;;  %v19929_v49 = vld [vmem:[%s21335_s25 + $0x17b8] ss:$28 sps:$4 sm:$0xff]  }
 0x3c6   : > { %8465 = vmatprep.subr.bf16.mxu0 %v19852_v48  ;;  %v15736_v48 = vmul.f32 -1.442695, %v22358_v8  ;;  %v19934_v8 = vld [vmem:[%s21335_s25 + $0x17f0] ss:$28 sps:$4 sm:$0xff]  }
 0x3c8   : > { %8376 = vmatpush1.bf16.msra.mxu1 %v19853_v51  ;;  %v19930_v51 = vld [vmem:[%s21335_s25 + $0x15f8] ss:$28 sps:$4 sm:$0xff]   ;;  %21067 = vpow2.f32 %v15736_v48 }
 0x3c9   : > { %8466 = vmatpush1.bf16.msra.mxu0 %v19850_v50  ;;  %8377 = vmatprep.subr.bf16.mxu1 %v19861_v54  ;;  %v19926_v50 = vld [vmem:[%s21335_s25 + $0x1af8] ss:$28 sps:$4 sm:$0xff]  }
 0x3ca   : > { %8467 = vmatprep.subr.bf16.mxu0 %v19858_v53  ;;  %v19933_v53 = vld [vmem:[%s21335_s25 + $0x1b34] ss:$28 sps:$4 sm:$0xff]  }
 0x3cb   : > { %v19973_v48 = vld [vmem:[%s21335_s25 + $0x1cf4] ss:$28 sps:$4 sm:$0xff]  }
 0x3cc   : > { %8378 = vmatpush1.bf16.msra.mxu1 %v19859_v20 }
 0x3cd   : > { %8468 = vmatpush1.bf16.msra.mxu0 %v19856_v55  ;;  %8379 = vmatprep.subr.bf16.mxu1 %v19867_v57 }
 0x3ce   : > { %8469 = vmatprep.subr.bf16.mxu0 %v19864_v56  ;;  %v19931_v56 = vld [vmem:[%s21335_s25 + $0x1b30] ss:$28 sps:$4 sm:$0xff]  }
 0x3d0   : > { %8380 = vmatpush1.bf16.msra.mxu1 %v19865_v59  ;;  %v19935_v59 = vld [vmem:[%s21335_s25 + $0x1630] ss:$28 sps:$4 sm:$0xff]  }
 0x3d1   : > { %8470 = vmatpush1.bf16.msra.mxu0 %v19862_v58  ;;  %8381 = vmatprep.subr.bf16.mxu1 %v19873_v61  ;;  %v19938_v61 = vld [vmem:[%s21335_s25 + $0x1b6c] ss:$28 sps:$4 sm:$0xff]  }
 0x3d2   : > { %8471 = vmatprep.subr.bf16.mxu0 %v19870_v60 }
 0x3d4   : > { %8382 = vmatpush1.bf16.msra.mxu1 %v19871_v4  ;;  %v19936_v4 = vld [vmem:[%s21335_s25 + $0x1b68] ss:$28 sps:$4 sm:$0xff]  }
 0x3d5   : > { %8472 = vmatpush1.bf16.msra.mxu0 %v19868_v1  ;;  %8383 = vmatprep.subr.bf16.mxu1 %v19879_v6  ;;  %v19939_v1 = vld [vmem:[%s21335_s25 + $0x1828] ss:$28 sps:$4 sm:$0xff]  }
 0x3d6   : > { %8473 = vmatprep.subr.bf16.mxu0 %v19876_v5  ;;  %v19940_v5 = vld [vmem:[%s21335_s25 + $0x1668] ss:$28 sps:$4 sm:$0xff]  }
 0x3d7   : > { %v19943_v6 = vld [vmem:[%s21335_s25 + $0x1ba4] ss:$28 sps:$4 sm:$0xff]  }
 0x3d8   : > { %8384 = vmatpush1.bf16.msra.mxu1 %v19877_v7  ;;  %v21068_v7 = vpop.eup %21067 }
 0x3d9   : > { %8474 = vmatpush1.bf16.msra.mxu0 %v19874_v40  ;;  %8385 = vmatprep.subr.bf16.mxu1 %v19885_v9  ;;  %v19944_v40 = vld [vmem:[%s21335_s25 + $0x1860] ss:$28 sps:$4 sm:$0xff]  }
 0x3da   : > { %8484 = vmatprep.subr.bf16.mxu0 %v19882_v41  ;;  %v19941_v41 = vld [vmem:[%s21335_s25 + $0x1ba0] ss:$28 sps:$4 sm:$0xff]  }
 0x3db   : > { %v19945_v9 = vld [vmem:[%s21335_s25 + $0x16a0] ss:$28 sps:$4 sm:$0xff]  }
 0x3dc   : > { %8476 = vmatmul.mubr.bf16.vlgmr.msra.gmra.mrb[40].mxu0 %v21424_v13  ;;  %8386 = vmatpush1.bf16.msra.mxu1 %v19883_v11  ;;  %v19949_v11 = vld [vmem:[%s21335_s25 + $0x1898] ss:$28 sps:$4 sm:$0xff]  }
 0x3dd   : > { %8485 = vmatpush1.bf16.msra.mxu0 %v19880_v10  ;;  %8387 = vmatprep.subr.bf16.mxu1 %v19891_v12  ;;  %v19948_v10 = vld [vmem:[%s21335_s25 + $0x1bdc] ss:$28 sps:$4 sm:$0xff]  }
 0x3de   : > { %8486 = vmatprep.subr.bf16.mxu0 %v19888_v52  ;;  %8516 = vmatprep.mubr.bf16.mxu0 %v21410_v3  ;;  %v5928_v52 = vadd.f32 1.0, %v21068_v7  ;;  %v19991_v7 = vld [vmem:[%s21335_s25 + $0x1dd0] ss:$28 sps:$4 sm:$0xff]  }
 0x3e0   : > { %8388 = vmatpush1.bf16.msra.mxu1 %v19889_v15 }
 0x3e1   : > { %8487 = vmatpush1.bf16.msra.mxu0 %v19886_v14  ;;  %8389 = vmatprep.subr.bf16.mxu1 %v19897_v18  ;;  %v19946_v14 = vld [vmem:[%s21335_s25 + $0x1bd8] ss:$28 sps:$4 sm:$0xff]  }
 0x3e2   : > { %8488 = vmatprep.subr.bf16.mxu0 %v19894_v16  ;;  %v19950_v18 = vld [vmem:[%s21335_s25 + $0x16d8] ss:$28 sps:$4 sm:$0xff]  }
 0x3e4   : > { %8390 = vmatpush1.bf16.msra.mxu1 %v19895_v22 }
 0x3e5   : > { %8489 = vmatpush1.bf16.msra.mxu0 %v19892_v21  ;;  %8391 = vmatprep.subr.bf16.mxu1 %v19903_v25  ;;  %v19953_v21 = vld [vmem:[%s21335_s25 + $0x1c14] ss:$28 sps:$4 sm:$0xff]  }
 0x3e6   : > { %8490 = vmatprep.subr.bf16.mxu0 %v19900_v24  ;;  %v19954_v24 = vld [vmem:[%s21335_s25 + $0x18d0] ss:$28 sps:$4 sm:$0xff]  }
 0x3e7   : > { %v19951_v25 = vld [vmem:[%s21335_s25 + $0x1c10] ss:$28 sps:$4 sm:$0xff]  }
 0x3e8   : > { %8392 = vmatpush1.bf16.msra.mxu1 %v19901_v27  ;;  %v19958_v27 = vld [vmem:[%s21335_s25 + $0x1c4c] ss:$28 sps:$4 sm:$0xff]  }
 0x3e9   : > { %8491 = vmatpush1.bf16.msra.mxu0 %v19898_v26  ;;  %8402 = vmatprep.subr.bf16.mxu1 %v19915_v29  ;;  %v19955_v26 = vld [vmem:[%s21335_s25 + $0x1710] ss:$28 sps:$4 sm:$0xff]   ;;  %v19956_v29 = vld [vmem:[%s21335_s25 + $0x1c48] ss:$28 sps:$4 sm:$0xff]  }
 0x3ea   : > { %8492 = vmatprep.subr.bf16.mxu0 %v19906_v28  ;;  %v19959_v28 = vld [vmem:[%s21335_s25 + $0x1ac8] ss:$28 sps:$4 sm:$0xff]  }
 0x3eb   : > { %8394 = vmatmul.mubr.bf16.vlgmr.msra.gmra.mrb[28].mxu1 %v21403_v63 }
 0x3ec   : > { %8403 = vmatpush1.bf16.msra.mxu1 %v19913_v34  ;;  %8434 = vmatprep.mubr.bf16.mxu1 %v21233_v32  ;;  %v19964_v34 = vld [vmem:[%s21335_s25 + $0x1b00] ss:$28 sps:$4 sm:$0xff]  }
 0x3ed   : > { %8493 = vmatpush1.bf16.msra.mxu0 %v19904_v30  ;;  %18113 = vmatprep.subr.bf16.mxu1 %v19919_v0  ;;  %v19960_v30 = vld [vmem:[%s21335_s25 + $0x1908] ss:$28 sps:$4 sm:$0xff]  }
 0x3ee   : > { %8494 = vmatprep.subr.bf16.mxu0 %v19909_v31  ;;  %v19963_v31 = vld [vmem:[%s21335_s25 + $0x1c84] ss:$28 sps:$4 sm:$0xff]  }
 0x3f1   : > { %8495 = vmatpush1.bf16.msra.mxu0 %v19907_v36  ;;  %v19961_v36 = vld [vmem:[%s21335_s25 + $0x1c80] ss:$28 sps:$4 sm:$0xff]  }
 0x3f2   : > { %8496 = vmatprep.subr.bf16.mxu0 %v19912_v2 }
 0x3f5   : > { %8497 = vmatpush1.bf16.msra.mxu0 %v19910_v37  ;;  %v19965_v37 = vld [vmem:[%s21335_s25 + $0x1940] ss:$28 sps:$4 sm:$0xff]  }
 0x3f6   : > { %8498 = vmatprep.subr.bf16.mxu0 %v19918_v38  ;;  %v19968_v38 = vld [vmem:[%s21335_s25 + $0x1cbc] ss:$28 sps:$4 sm:$0xff]  }
 0x3f7   : > { %16473 = vmatmul.mubr.msk.bf16.vlgmr.msra.gmra.mrb[28].mxu1 %vm2377_vm0, %v21518_v35 }
 0x3f8   : > { %18114 = vmatpush3.bf16.msra.mxu1 %v19920_v42  ;;  %8639 = vmatprep.mubr.bf16.mxu1 %v21400_v62 }
 0x3f9   : > { %8499 = vmatpush1.bf16.msra.mxu0 %v19916_v39  ;;  %18115 = vmatprep.subr.bf16.mxu1 %v19924_v44  ;;  %v19969_v39 = vld [vmem:[%s21335_s25 + $0x1b38] ss:$28 sps:$4 sm:$0xff]  }
 0x3fa   : > { %8500 = vmatprep.subr.bf16.mxu0 %v19923_v43  ;;  %v19966_v44 = vld [vmem:[%s21335_s25 + $0x1cb8] ss:$28 sps:$4 sm:$0xff]  }
 0x3fc   : > { %18116 = vmatpush3.bf16.msra.mxu1 %v19925_v46 }
 0x3fd   : > { %8501 = vmatpush1.bf16.msra.mxu0 %v19921_v45  ;;  %18117 = vmatprep.subr.bf16.mxu1 %v19929_v49 }
 0x3fe   : > { %8502 = vmatprep.subr.bf16.mxu0 %v19928_v47  ;;  %v5734_v54 = vpop.f32.mrb[24].mxu1  ;;  %v19970_v47 = vld [vmem:[%s21335_s25 + $0x1978] ss:$28 sps:$4 sm:$0xff]  }
 0x3ff   : > { %v15734_v55 = vmul.f32 -1.442695, %v5734_v54  ;;  %v5736_v20 = vpop.f32.mrb[25].mxu1  ;;  %v19978_v54 = vld [vmem:[%s21335_s25 + $0x1d2c] ss:$28 sps:$4 sm:$0xff]  }
 0x400   : > { %18118 = vmatpush3.bf16.msra.mxu1 %v19930_v51  ;;  %v15735_v57 = vmul.f32 -1.442695, %v5736_v20  ;;  %v5738_v58 = vpop.f32.mrb[26].mxu1  ;;  %v19974_v51 = vld [vmem:[%s21335_s25 + $0x1b70] ss:$28 sps:$4 sm:$0xff]  }
 0x401   : > { %8503 = vmatpush1.bf16.msra.mxu0 %v19926_v50  ;;  %21069 = vpow2.f32 %v15734_v55  ;;  %v5739_v60 = vpop.f32.mrb[27].mxu1  ;;  %18119 = vmatprep.subr.bf16.mxu1 %v19934_v8  ;;  %v19975_v8 = vld [vmem:[%s21335_s25 + $0x19b0] ss:$28 sps:$4 sm:$0xff]   ;;  %v19979_v55 = vld [vmem:[%s21335_s25 + $0x1ba8] ss:$28 sps:$4 sm:$0xff]  }
 0x402   : > { %8504 = vmatprep.subr.bf16.mxu0 %v19933_v53  ;;  %21071 = vpow2.f32 %v15735_v57  ;;  %v19971_v53 = vld [vmem:[%s21335_s25 + $0x1cf0] ss:$28 sps:$4 sm:$0xff]   ;;  %v19976_v20 = vld [vmem:[%s21335_s25 + $0x1d28] ss:$28 sps:$4 sm:$0xff]   ;;  %v19984_v58 = vld [vmem:[%s21335_s25 + $0x1be0] ss:$28 sps:$4 sm:$0xff]  }
 0x403   : > { %21073 = vrcp.f32 %v5928_v52  ;;  %v19983_v57 = vld [vmem:[%s21335_s25 + $0x1d64] ss:$28 sps:$4 sm:$0xff]  }
 0x404   : > { %18120 = vmatpush3.bf16.msra.mxu1 %v19935_v59  ;;  %v19981_v59 = vld [vmem:[%s21335_s25 + $0x1d60] ss:$28 sps:$4 sm:$0xff]   ;;  %v20000_v52 = vld [vmem:[%s21335_s25 + $0x1c88] ss:$28 sps:$4 sm:$0xff]  }
 0x405   : > { %8505 = vmatpush1.bf16.msra.mxu0 %v19931_v56  ;;  %18121 = vmatprep.subr.bf16.mxu1 %v19939_v1  ;;  %v19980_v56 = vld [vmem:[%s21335_s25 + $0x19e8] ss:$28 sps:$4 sm:$0xff]   ;;  %v19985_v60 = vld [vmem:[%s21335_s25 + $0x1a20] ss:$28 sps:$4 sm:$0xff]   ;;  %v19989_v1 = vld [vmem:[%s21335_s25 + $0x1c18] ss:$28 sps:$4 sm:$0xff]  }
 0x406   : > { %8506 = vmatprep.subr.bf16.mxu0 %v19938_v61  ;;  %v19988_v61 = vld [vmem:[%s21335_s25 + $0x1d9c] ss:$28 sps:$4 sm:$0xff]  }
 0x408   : > { %18122 = vmatpush3.bf16.msra.mxu1 %v19940_v5  ;;  %v19990_v5 = vld [vmem:[%s21335_s25 + $0x1a58] ss:$28 sps:$4 sm:$0xff]  }
 0x409   : > { %8507 = vmatpush1.bf16.msra.mxu0 %v19936_v4  ;;  %18123 = vmatprep.subr.bf16.mxu1 %v19944_v40  ;;  %v19986_v4 = vld [vmem:[%s21335_s25 + $0x1d98] ss:$28 sps:$4 sm:$0xff]   ;;  %v19994_v40 = vld [vmem:[%s21335_s25 + $0x1c50] ss:$28 sps:$4 sm:$0xff]  }
 0x40a   : > { %8508 = vmatprep.subr.bf16.mxu0 %v19943_v6  ;;  %v19993_v6 = vld [vmem:[%s21335_s25 + $0x1dd4] ss:$28 sps:$4 sm:$0xff]  }
 0x40b   : > { %v21070_v12 = vpop.eup %21069 }
 0x40c   : > { %v21072_v15 = vpop.eup %21071  ;;  %v5926_v16 = vadd.f32 1.0, %v21070_v12  ;;  %18124 = vmatpush3.bf16.msra.mxu1 %v19945_v9  ;;  %v19998_v9 = vld [vmem:[%s21335_s25 + $0x1e0c] ss:$28 sps:$4 sm:$0xff]   ;;  %v20003_v12 = vld [vmem:[%s21335_s25 + $0x1e44] ss:$28 sps:$4 sm:$0xff]  }
 0x40d   : > { %8509 = vmatpush1.bf16.msra.mxu0 %v19941_v41  ;;  %v5927_v22 = vadd.f32 1.0, %v21072_v15  ;;  %18125 = vmatprep.subr.bf16.mxu1 %v19949_v11  ;;  %v21074_v0 = vpop.eup %21073  ;;  %v19995_v41 = vld [vmem:[%s21335_s25 + $0x1a90] ss:$28 sps:$4 sm:$0xff]   ;;  %v19996_v11 = vld [vmem:[%s21335_s25 + $0x1e08] ss:$28 sps:$4 sm:$0xff]  }
 0x40e   : > { %8510 = vmatprep.subr.bf16.mxu0 %v19948_v10  ;;  %21075 = vrcp.f32 %v5926_v16  ;;  %v5954_v50 = vsel %vm3087_vm3, %v21074_v0, 0.0  ;;  %v19999_v10 = vld [vmem:[%s21335_s25 + $0x1e48] ss:$28 sps:$4 sm:$0xff]   ;;  %v20001_v15 = vld [vmem:[%s21335_s25 + $0x1e40] ss:$28 sps:$4 sm:$0xff]  }
 0x40f   : > { %21077 = vrcp.f32 %v5927_v22  ;;  %v20005_v16 = vld [vmem:[%s21335_s25 + $0x1cc0] ss:$28 sps:$4 sm:$0xff]   ;;  %v20006_v22 = vld [vmem:[%s21335_s25 + $0x1e78] ss:$28 sps:$4 sm:$0xff]  }
 0x410   : > { %18126 = vmatpush3.bf16.msra.mxu1 %v19950_v18  ;;  %v20008_v18 = vld [vmem:[%s21335_s25 + $0x1e7c] ss:$28 sps:$4 sm:$0xff]   ;;  %v20023_v0 = vld [vmem:[%s21335_s25 + $0x1f24] ss:$28 sps:$4 sm:$0xff]  }
 0x411   : > { %8511 = vmatpush1.bf16.msra.mxu0 %v19946_v14  ;;  %18127 = vmatprep.subr.bf16.mxu1 %v19954_v24  ;;  %v20004_v14 = vld [vmem:[%s21335_s25 + $0x1e80] ss:$28 sps:$4 sm:$0xff]   ;;  %v20010_v24 = vld [vmem:[%s21335_s25 + $0x1cf8] ss:$28 sps:$4 sm:$0xff]  }
 0x412   : > { %8512 = vmatprep.subr.bf16.mxu0 %v19953_v21  ;;  %v20009_v21 = vld [vmem:[%s21335_s25 + $0x1eb8] ss:$28 sps:$4 sm:$0xff]  }
 0x414   : > { %18128 = vmatpush3.bf16.msra.mxu1 %v19955_v26  ;;  %v20014_v26 = vld [vmem:[%s21335_s25 + $0x1ef0] ss:$28 sps:$4 sm:$0xff]  }
 0x415   : > { %8513 = vmatpush1.bf16.msra.mxu0 %v19951_v25  ;;  %18135 = vmatprep.subr.bf16.mxu1 %v19959_v28  ;;  %v20013_v25 = vld [vmem:[%s21335_s25 + $0x1eb4] ss:$28 sps:$4 sm:$0xff]  }
 0x416   : > { %8514 = vmatprep.subr.bf16.mxu0 %v19958_v27  ;;  %v20011_v27 = vld [vmem:[%s21335_s25 + $0x1eb0] ss:$28 sps:$4 sm:$0xff]  }
 0x417   : > { %8640 = vmatmul.mubr.bf16.vlgmr.msra.gmra.mrb[32].mxu1 %v21424_v13  ;;  %v20015_v28 = vld [vmem:[%s21335_s25 + $0x1d30] ss:$28 sps:$4 sm:$0xff]  }
 0x418   : > { %v21076_v2 = vpop.eup %21075  ;;  %18136 = vmatpush3.bf16.msra.mxu1 %v19960_v30  ;;  %8679 = vmatprep.mubr.bf16.mxu1 %v21410_v3  ;;  %v20019_v30 = vld [vmem:[%s21335_s25 + $0x1f28] ss:$28 sps:$4 sm:$0xff]  }
 0x419   : > { %8515 = vmatpush1.bf16.msra.mxu0 %v19956_v29  ;;  %v21078_v42 = vpop.eup %21077  ;;  %18137 = vmatprep.subr.bf16.mxu1 %v19964_v34  ;;  %v5950_v43 = vsel %vm3075_vm2, %v21076_v2, 0.0  ;;  %v20018_v29 = vld [vmem:[%s21335_s25 + $0x1eec] ss:$28 sps:$4 sm:$0xff]   ;;  %v20021_v2 = vld [vmem:[%s21335_s25 + $0x1f20] ss:$28 sps:$4 sm:$0xff]  }
 0x41a   : > { %8525 = vmatprep.subr.bf16.mxu0 %v19963_v31  ;;  %v5951_v45 = vadd.f32 %v5950_v43, %v22274_v33  ;;  %v5952_v46 = vsel %vm3075_vm2, %v21078_v42, 0.0  ;;  %v20016_v31 = vld [vmem:[%s21335_s25 + $0x1ee8] ss:$28 sps:$4 sm:$0xff]   ;;  %v20026_v42 = vld [vmem:[%s21335_s25 + $0x1f58] ss:$28 sps:$4 sm:$0xff]  }
 0x41b   : > { %v20020_v34 = vld [vmem:[%s21335_s25 + $0x1d68] ss:$28 sps:$4 sm:$0xff]   ;;  %v20030_v43 = vld [vmem:[%s21335_s25 + $0x1dd8] ss:$28 sps:$4 sm:$0xff]  }
 0x41c   : > { %8517 = vmatmul.mubr.bf16.vlgmr.msra.gmra.mrb[40].mxu0 %v21432_v19  ;;  %18138 = vmatpush3.bf16.msra.mxu1 %v19965_v37  ;;  %v5953_v49 = vadd.f32 %v5952_v46, %v5951_v45  ;;  %v20025_v37 = vld [vmem:[%s21335_s25 + $0x1da0] ss:$28 sps:$4 sm:$0xff]   ;;  %v20034_v45 = vld [vmem:[%s21335_s25 + $0x1fd0] ss:$28 sps:$4 sm:$0xff]  }
 0x41d   : > { %8526 = vmatpush1.bf16.msra.mxu0 %v19961_v36  ;;  %18139 = vmatprep.subr.bf16.mxu1 %v19969_v39  ;;  %v20024_v36 = vld [vmem:[%s21335_s25 + $0x1f60] ss:$28 sps:$4 sm:$0xff]   ;;  %v20029_v39 = vld [vmem:[%s21335_s25 + $0x1f98] ss:$28 sps:$4 sm:$0xff]   ;;  %v20031_v46 = vld [vmem:[%s21335_s25 + $0x1f90] ss:$28 sps:$4 sm:$0xff]  }
 0x41e   : > { %8527 = vmatprep.subr.bf16.mxu0 %v19968_v38  ;;  %v5955_v33 = vadd.f32 %v5954_v50, %v5953_v49  ;;  %8557 = vmatprep.mubr.bf16.mxu0 %v21438_v23  ;;  %v20028_v38 = vld [vmem:[%s21335_s25 + $0x1f5c] ss:$28 sps:$4 sm:$0xff]   ;;  %v20036_v49 = vld [vmem:[%s21335_s25 + $0x1fc8] ss:$28 sps:$4 sm:$0xff]  }
 0x41f   : > { %v20042_v50 = vld [vmem:[%s21335_s25 + $0x2008] ss:$28 sps:$4 sm:$0xff]  }
 0x420   : > { %18140 = vmatpush3.bf16.msra.mxu1 %v19970_v47  ;;  %5956 = vadd.xlane.f32.xlu0 %v5955_v33  ;;  %v20035_v47 = vld [vmem:[%s21335_s25 + $0x1e10] ss:$28 sps:$4 sm:$0xff]  }
 0x421   : > { %8528 = vmatpush1.bf16.msra.mxu0 %v19966_v44  ;;  %18141 = vmatprep.subr.bf16.mxu1 %v19974_v51  ;;  %v20033_v44 = vld [vmem:[%s21335_s25 + $0x1f94] ss:$28 sps:$4 sm:$0xff]   ;;  %v20041_v51 = vld [vmem:[%s21335_s25 + $0x2004] ss:$28 sps:$4 sm:$0xff]   ;;  %v20045_v33 = vld [vmem:[%s21335_s25 + $0x202c] ss:$28 sps:$4 sm:$0xff]  }
 0x422   : > { %8529 = vmatprep.subr.bf16.mxu0 %v19973_v48  ;;  %v20038_v48 = vld [vmem:[%s21335_s25 + $0x1fcc] ss:$28 sps:$4 sm:$0xff]  }
 0x424   : > { %18142 = vmatpush3.bf16.msra.mxu1 %v19975_v8  ;;  %v20051_v8 = vld [vmem:[%s21335_s25 + $0x2034] ss:$28 sps:$4 sm:$0xff]  }
 0x425   : > { %8530 = vmatpush1.bf16.msra.mxu0 %v19971_v53  ;;  %18143 = vmatprep.subr.bf16.mxu1 %v19979_v55  ;;  %v20039_v53 = vld [vmem:[%s21335_s25 + $0x2000] ss:$28 sps:$4 sm:$0xff]  }
 0x426   : > { %8531 = vmatprep.subr.bf16.mxu0 %v19978_v54  ;;  %v20043_v54 = vld [vmem:[%s21335_s25 + $0x2028] ss:$28 sps:$4 sm:$0xff]  }
 0x427   : > { %v20048_v55 = vld [vmem:[%s21335_s25 + $0x2064] ss:$28 sps:$4 sm:$0xff]  }
 0x428   : > { %18144 = vmatpush3.bf16.msra.mxu1 %v19980_v56  ;;  %v20054_v56 = vld [vmem:[%s21335_s25 + $0x209c] ss:$28 sps:$4 sm:$0xff]  }
 0x429   : > { %8532 = vmatpush1.bf16.msra.mxu0 %v19976_v20  ;;  %18145 = vmatprep.subr.bf16.mxu1 %v19984_v58  ;;  %v20046_v20 = vld [vmem:[%s21335_s25 + $0x2060] ss:$28 sps:$4 sm:$0xff]   ;;  %v20052_v58 = vld [vmem:[%s21335_s25 + $0x2098] ss:$28 sps:$4 sm:$0xff]  }
 0x42a   : > { %8533 = vmatprep.subr.bf16.mxu0 %v19983_v57  ;;  %v20049_v57 = vld [vmem:[%s21335_s25 + $0x2030] ss:$28 sps:$4 sm:$0xff]  }
 0x42c   : > { %18146 = vmatpush3.bf16.msra.mxu1 %v19985_v60  ;;  %v20060_v60 = vld [vmem:[%s21335_s25 + $0x20d4] ss:$28 sps:$4 sm:$0xff]  }
 0x42d   : > { %8534 = vmatpush1.bf16.msra.mxu0 %v19981_v59  ;;  %18147 = vmatprep.subr.bf16.mxu1 %v19989_v1  ;;  %v20057_v59 = vld [vmem:[%s21335_s25 + $0x206c] ss:$28 sps:$4 sm:$0xff]  }
 0x42e   : > { %8535 = vmatprep.subr.bf16.mxu0 %v19988_v61  ;;  %v20055_v61 = vld [vmem:[%s21335_s25 + $0x2068] ss:$28 sps:$4 sm:$0xff]   ;;  %v20058_v1 = vld [vmem:[%s21335_s25 + $0x20d0] ss:$28 sps:$4 sm:$0xff]  }
 0x430   : > { %18148 = vmatpush3.bf16.msra.mxu1 %v19990_v5  ;;  %v20066_v5 = vld [vmem:[%s21335_s25 + $0x210c] ss:$28 sps:$4 sm:$0xff]  }
 0x431   : > { %8536 = vmatpush1.bf16.msra.mxu0 %v19986_v4  ;;  %18149 = vmatprep.subr.bf16.mxu1 %v19994_v40  ;;  %v20063_v4 = vld [vmem:[%s21335_s25 + $0x20a4] ss:$28 sps:$4 sm:$0xff]  }
 0x432   : > { %8537 = vmatprep.subr.bf16.mxu0 %v19993_v6  ;;  %v20061_v6 = vld [vmem:[%s21335_s25 + $0x20a0] ss:$28 sps:$4 sm:$0xff]   ;;  %v20064_v40 = vld [vmem:[%s21335_s25 + $0x2108] ss:$28 sps:$4 sm:$0xff]  }
 0x434   : > { %18150 = vmatpush3.bf16.msra.mxu1 %v19995_v41  ;;  %v20072_v41 = vld [vmem:[%s21335_s25 + $0x2144] ss:$28 sps:$4 sm:$0xff]  }
 0x435   : > { %8538 = vmatpush1.bf16.msra.mxu0 %v19991_v7  ;;  %18157 = vmatprep.subr.bf16.mxu1 %v19999_v10  ;;  %v20069_v7 = vld [vmem:[%s21335_s25 + $0x20dc] ss:$28 sps:$4 sm:$0xff]  }
 0x436   : > { %8539 = vmatprep.subr.bf16.mxu0 %v19998_v9 }
 0x437   : > { %8680 = vmatmul.mubr.bf16.vlgmr.msra.gmra.mrb[36].mxu1 %v21432_v19 }
 0x438   : > { %18158 = vmatpush3.bf16.msra.mxu1 %v20000_v52  ;;  %8719 = vmatprep.mubr.bf16.mxu1 %v21438_v23  ;;  %v20067_v52 = vld [vmem:[%s21335_s25 + $0x20d8] ss:$28 sps:$4 sm:$0xff]  }
 0x439   : > { %8540 = vmatpush1.bf16.msra.mxu0 %v19996_v11  ;;  %18159 = vmatprep.subr.bf16.mxu1 %v20004_v14 }
 0x43a   : > { %8541 = vmatprep.subr.bf16.mxu0 %v20003_v12 }
 0x43c   : > { %18160 = vmatpush3.bf16.msra.mxu1 %v20005_v16 }
 0x43d   : > { %8542 = vmatpush1.bf16.msra.mxu0 %v20001_v15  ;;  %18161 = vmatprep.subr.bf16.mxu1 %v20009_v21  ;;  %v20070_v15 = vld [vmem:[%s21335_s25 + $0x2140] ss:$28 sps:$4 sm:$0xff]  }
 0x43e   : > { %8543 = vmatprep.subr.bf16.mxu0 %v20008_v18  ;;  %v20075_v18 = vld [vmem:[%s21335_s25 + $0x2114] ss:$28 sps:$4 sm:$0xff]   ;;  %v20078_v21 = vld [vmem:[%s21335_s25 + $0x217c] ss:$28 sps:$4 sm:$0xff]  }
 0x440   : > { %18162 = vmatpush3.bf16.msra.mxu1 %v20010_v24  ;;  %v20076_v24 = vld [vmem:[%s21335_s25 + $0x2178] ss:$28 sps:$4 sm:$0xff]  }
 0x441   : > { %8544 = vmatpush1.bf16.msra.mxu0 %v20006_v22  ;;  %18163 = vmatprep.subr.bf16.mxu1 %v20014_v26  ;;  %v20073_v22 = vld [vmem:[%s21335_s25 + $0x2110] ss:$28 sps:$4 sm:$0xff]  }
 0x442   : > { %8545 = vmatprep.subr.bf16.mxu0 %v20013_v25  ;;  %v20081_v25 = vld [vmem:[%s21335_s25 + $0x214c] ss:$28 sps:$4 sm:$0xff]   ;;  %v20084_v26 = vld [vmem:[%s21335_s25 + $0x21b4] ss:$28 sps:$4 sm:$0xff]  }
 0x444   : > { %18164 = vmatpush3.bf16.msra.mxu1 %v20015_v28  ;;  %v20082_v28 = vld [vmem:[%s21335_s25 + $0x21b0] ss:$28 sps:$4 sm:$0xff]  }
 0x445   : > { %8546 = vmatpush1.bf16.msra.mxu0 %v20011_v27  ;;  %18165 = vmatprep.subr.bf16.mxu1 %v20019_v30  ;;  %v20079_v27 = vld [vmem:[%s21335_s25 + $0x2148] ss:$28 sps:$4 sm:$0xff]  }
 0x446   : > { %8547 = vmatprep.subr.bf16.mxu0 %v20018_v29  ;;  %v20087_v29 = vld [vmem:[%s21335_s25 + $0x2184] ss:$28 sps:$4 sm:$0xff]   ;;  %v20090_v30 = vld [vmem:[%s21335_s25 + $0x21ec] ss:$28 sps:$4 sm:$0xff]  }
 0x448   : > { %18166 = vmatpush3.bf16.msra.mxu1 %v20020_v34 }
 0x449   : > { %8548 = vmatpush1.bf16.msra.mxu0 %v20016_v31  ;;  %18167 = vmatprep.subr.bf16.mxu1 %v20024_v36  ;;  %v20085_v36 = vld [vmem:[%s21335_s25 + $0x2180] ss:$28 sps:$4 sm:$0xff]  }
 0x44a   : > { %8549 = vmatprep.subr.bf16.mxu0 %v20023_v0 }
 0x44c   : > { %18168 = vmatpush3.bf16.msra.mxu1 %v20025_v37 }
 0x44d   : > { %8550 = vmatpush1.bf16.msra.mxu0 %v20021_v2  ;;  %18169 = vmatprep.subr.bf16.mxu1 %v20029_v39  ;;  %v20088_v2 = vld [vmem:[%s21335_s25 + $0x21e8] ss:$28 sps:$4 sm:$0xff]  }
 0x44e   : > { %8551 = vmatprep.subr.bf16.mxu0 %v20028_v38  ;;  %v20093_v38 = vld [vmem:[%s21335_s25 + $0x21bc] ss:$28 sps:$4 sm:$0xff]   ;;  %v20096_v39 = vld [vmem:[%s21335_s25 + $0x2224] ss:$28 sps:$4 sm:$0xff]  }
 0x450   : > { %18170 = vmatpush3.bf16.msra.mxu1 %v20030_v43  ;;  %v20094_v43 = vld [vmem:[%s21335_s25 + $0x2220] ss:$28 sps:$4 sm:$0xff]  }
 0x451   : > { %8552 = vmatpush1.bf16.msra.mxu0 %v20026_v42  ;;  %18171 = vmatprep.subr.bf16.mxu1 %v20034_v45  ;;  %v20091_v42 = vld [vmem:[%s21335_s25 + $0x21b8] ss:$28 sps:$4 sm:$0xff]  }
 0x452   : > { %8553 = vmatprep.subr.bf16.mxu0 %v20033_v44  ;;  %v20099_v44 = vld [vmem:[%s21335_s25 + $0x21f4] ss:$28 sps:$4 sm:$0xff]   ;;  %v20102_v45 = vld [vmem:[%s21335_s25 + $0x225c] ss:$28 sps:$4 sm:$0xff]  }
 0x454   : > { %18172 = vmatpush3.bf16.msra.mxu1 %v20035_v47  ;;  %v20100_v47 = vld [vmem:[%s21335_s25 + $0x2258] ss:$28 sps:$4 sm:$0xff]  }
 0x455   : > { %8554 = vmatpush1.bf16.msra.mxu0 %v20031_v46  ;;  %18329 = vmatprep.subr.bf16.mxu1 %v21234_v17  ;;  %v20097_v46 = vld [vmem:[%s21335_s25 + $0x21f0] ss:$28 sps:$4 sm:$0xff]  }
 0x456   : > { %8555 = vmatprep.subr.bf16.mxu0 %v20038_v48  ;;  %v20105_v48 = vld [vmem:[%s21335_s25 + $0x222c] ss:$28 sps:$4 sm:$0xff]  }
 0x457   : > { %8720 = vmatmul.mubr.bf16.vlgmr.msra.gmra.mrb[40].mxu1 %v21403_v63 }
 0x458   : > { %18330 = vmatpush3.bf16.msra.mxu1 %v20042_v50  ;;  %18331 = vmatprep.mubr.msk.bf16.mxu1 %vm21235_vm1, %v21234_v17 }
 0x459   : > { %8556 = vmatpush1.bf16.msra.mxu0 %v20036_v49  ;;  %10981 = vmatprep.subr.bf16.mxu1 %v20045_v33  ;;  %v20108_v49 = vld [vmem:[%s21335_s25 + $0x2294] ss:$28 sps:$4 sm:$0xff]  }
 0x45a   : > { %8566 = vmatprep.subr.bf16.mxu0 %v20041_v51  ;;  %v20103_v51 = vld [vmem:[%s21335_s25 + $0x2228] ss:$28 sps:$4 sm:$0xff]   ;;  %v20106_v33 = vld [vmem:[%s21335_s25 + $0x2290] ss:$28 sps:$4 sm:$0xff]  }
 0x45c   : > { %8558 = vmatmul.mubr.bf16.vlgmr.msra.gmra.mrb[40].mxu0 %v21403_v63 }
 0x45d   : > { %8567 = vmatpush1.bf16.msra.mxu0 %v20039_v53  ;;  %8598 = vmatprep.mubr.bf16.mxu0 %v21233_v32 }
 0x45e   : > { %11145 = vmatprep.subr.bf16.mxu0 %v20051_v8  ;;  %v20111_v8 = vld [vmem:[%s21335_s25 + $0x2264] ss:$28 sps:$4 sm:$0xff]  }
 0x45f   : > { %18332 = vmatmul.mubr.msk.bf16.vlgmr.msra.gmra.mrb[44].mxu1 %vm2377_vm0, %v21518_v35 }
 0x460   : > { %10982 = vmatpush1.bf16.msra.mxu1 %v20043_v54  ;;  %11013 = vmatprep.mubr.bf16.mxu1 %v21400_v62  ;;  %v20114_v54 = vld [vmem:[%s21335_s25 + $0x22cc] ss:$28 sps:$4 sm:$0xff]  }
 0x461   : > { %10983 = vmatprep.subr.bf16.mxu1 %v20048_v55 }
 0x464   : > { %10984 = vmatpush1.bf16.msra.mxu1 %v20046_v20 }
 0x465   : > { %10985 = vmatprep.subr.bf16.mxu1 %v20054_v56 }
 0x468   : > { %16474 = vmatmul.mubr.msk.bf16.vlgmr.msra.gmra.mrb[40].mxu0 %vm2377_vm0, %v21518_v35  ;;  %10986 = vmatpush1.bf16.msra.mxu1 %v20052_v58  ;;  %v20112_v58 = vld [vmem:[%s21335_s25 + $0x22c8] ss:$28 sps:$4 sm:$0xff]  }
 0x469   : > { %11146 = vmatpush1.bf16.msra.mxu0 %v20049_v57  ;;  %10987 = vmatprep.subr.bf16.mxu1 %v20060_v60  ;;  %v20109_v57 = vld [vmem:[%s21335_s25 + $0x2260] ss:$28 sps:$4 sm:$0xff]  }
 0x46a   : > { %11147 = vmatprep.subr.bf16.mxu0 %v20057_v59  ;;  %11177 = vmatprep.mubr.bf16.mxu0 %v21400_v62  ;;  %v20117_v59 = vld [vmem:[%s21335_s25 + $0x229c] ss:$28 sps:$4 sm:$0xff]   ;;  %v20120_v60 = vld [vmem:[%s21335_s25 + $0x2304] ss:$28 sps:$4 sm:$0xff]  }
 0x46c   : > { %10988 = vmatpush1.bf16.msra.mxu1 %v20058_v1  ;;  %v20118_v1 = vld [vmem:[%s21335_s25 + $0x2300] ss:$28 sps:$4 sm:$0xff]  }
 0x46d   : > { %11148 = vmatpush1.bf16.msra.mxu0 %v20055_v61  ;;  %10989 = vmatprep.subr.bf16.mxu1 %v20066_v5  ;;  %v20115_v61 = vld [vmem:[%s21335_s25 + $0x2298] ss:$28 sps:$4 sm:$0xff]  }
 0x46e   : > { %11149 = vmatprep.subr.bf16.mxu0 %v20063_v4  ;;  %v20123_v4 = vld [vmem:[%s21335_s25 + $0x22d4] ss:$28 sps:$4 sm:$0xff]   ;;  %v20126_v5 = vld [vmem:[%s21335_s25 + $0x233c] ss:$28 sps:$4 sm:$0xff]  }
 0x46f   : > { %v8272_v9 = vpop.f32.mrb[36].mxu0 }
 0x470   : > { %v16476_v10 = vmul.f32 -1.442695, %v8272_v9  ;;  %v8274_v11 = vpop.f32.mrb[37].mxu0  ;;  %10990 = vmatpush1.bf16.msra.mxu1 %v20064_v40  ;;  %v20124_v40 = vld [vmem:[%s21335_s25 + $0x2338] ss:$28 sps:$4 sm:$0xff]  }
 0x471   : > { %11150 = vmatpush1.bf16.msra.mxu0 %v20061_v6  ;;  %v16477_v12 = vmul.f32 -1.442695, %v8274_v11  ;;  %v8276_v14 = vpop.f32.mrb[38].mxu0  ;;  %10991 = vmatprep.subr.bf16.mxu1 %v20072_v41  ;;  %v20121_v6 = vld [vmem:[%s21335_s25 + $0x22d0] ss:$28 sps:$4 sm:$0xff]  }
 0x472   : > { %21079 = vpow2.f32 %v16476_v10  ;;  %v8277_v16 = vpop.f32.mrb[39].mxu0  ;;  %11151 = vmatprep.subr.bf16.mxu0 %v20069_v7  ;;  %v20129_v7 = vld [vmem:[%s21335_s25 + $0x230c] ss:$28 sps:$4 sm:$0xff]   ;;  %v20132_v41 = vld [vmem:[%s21335_s25 + $0x2374] ss:$28 sps:$4 sm:$0xff]  }
 0x473   : > { %21081 = vpow2.f32 %v16477_v12  ;;  %v20127_v9 = vld [vmem:[%s21335_s25 + $0x2308] ss:$28 sps:$4 sm:$0xff]   ;;  %v20130_v10 = vld [vmem:[%s21335_s25 + $0x2370] ss:$28 sps:$4 sm:$0xff]   ;;  %v20133_v12 = vld [vmem:[%s21335_s25 + $0x2340] ss:$28 sps:$4 sm:$0xff]  }
 0x474   : > { %10992 = vmatpush1.bf16.msra.mxu1 %v20070_v15  ;;  %v20135_v11 = vld [vmem:[%s21335_s25 + $0x2344] ss:$28 sps:$4 sm:$0xff]   ;;  %v20141_v15 = vld [vmem:[%s21335_s25 + $0x237c] ss:$28 sps:$4 sm:$0xff]  }
 0x475   : > { %11152 = vmatpush1.bf16.msra.mxu0 %v20067_v52  ;;  %10993 = vmatprep.subr.bf16.mxu1 %v20078_v21  ;;  %v20138_v52 = vld [vmem:[%s21335_s25 + $0x23ac] ss:$28 sps:$4 sm:$0xff]   ;;  %v20144_v16 = vld [vmem:[%s21335_s25 + $0x23e4] ss:$28 sps:$4 sm:$0xff]  }
 0x476   : > { %11153 = vmatprep.subr.bf16.mxu0 %v20075_v18  ;;  %v20136_v14 = vld [vmem:[%s21335_s25 + $0x23a8] ss:$28 sps:$4 sm:$0xff]   ;;  %v20139_v18 = vld [vmem:[%s21335_s25 + $0x2378] ss:$28 sps:$4 sm:$0xff]   ;;  %v20142_v21 = vld [vmem:[%s21335_s25 + $0x23e0] ss:$28 sps:$4 sm:$0xff]  }
 0x478   : > { %10994 = vmatpush1.bf16.msra.mxu1 %v20076_v24  ;;  %v20150_v24 = vld [vmem:[%s21335_s25 + $0x241c] ss:$28 sps:$4 sm:$0xff]  }
 0x479   : > { %11154 = vmatpush1.bf16.msra.mxu0 %v20073_v22  ;;  %10995 = vmatprep.subr.bf16.mxu1 %v20084_v26  ;;  %v20147_v22 = vld [vmem:[%s21335_s25 + $0x23b4] ss:$28 sps:$4 sm:$0xff]  }
 0x47a   : > { %11155 = vmatprep.subr.bf16.mxu0 %v20081_v25  ;;  %v20145_v25 = vld [vmem:[%s21335_s25 + $0x23b0] ss:$28 sps:$4 sm:$0xff]   ;;  %v20148_v26 = vld [vmem:[%s21335_s25 + $0x2418] ss:$28 sps:$4 sm:$0xff]  }
 0x47c   : > { %v21080_v31 = vpop.eup %21079  ;;  %10996 = vmatpush1.bf16.msra.mxu1 %v20082_v28  ;;  %v20156_v28 = vld [vmem:[%s21335_s25 + $0x2454] ss:$28 sps:$4 sm:$0xff]  }
 0x47d   : > { %v21082_v34 = vpop.eup %21081  ;;  %v8788_v0 = vadd.f32 1.0, %v21080_v31  ;;  %11156 = vmatpush1.bf16.msra.mxu0 %v20079_v27  ;;  %10997 = vmatprep.subr.bf16.mxu1 %v20090_v30  ;;  %v20153_v27 = vld [vmem:[%s21335_s25 + $0x23ec] ss:$28 sps:$4 sm:$0xff]   ;;  %v20159_v31 = vld [vmem:[%s21335_s25 + $0x2424] ss:$28 sps:$4 sm:$0xff]  }
 0x47e   : > { %v8789_v37 = vadd.f32 1.0, %v21082_v34  ;;  %11157 = vmatprep.subr.bf16.mxu0 %v20087_v29  ;;  %v20151_v29 = vld [vmem:[%s21335_s25 + $0x23e8] ss:$28 sps:$4 sm:$0xff]   ;;  %v20154_v30 = vld [vmem:[%s21335_s25 + $0x2450] ss:$28 sps:$4 sm:$0xff]  }
 0x47f   : > { %21083 = vrcp.f32 %v8788_v0  ;;  %v20162_v34 = vld [vmem:[%s21335_s25 + $0x248c] ss:$28 sps:$4 sm:$0xff]   ;;  %v20157_v0 = vld [vmem:[%s21335_s25 + $0x2420] ss:$28 sps:$4 sm:$0xff]  }
 0x480   : > { %21085 = vrcp.f32 %v8789_v37  ;;  %10998 = vmatpush1.bf16.msra.mxu1 %v20088_v2  ;;  %v20165_v2 = vld [vmem:[%s21335_s25 + $0x245c] ss:$28 sps:$4 sm:$0xff]   ;;  %v20168_v37 = vld [vmem:[%s21335_s25 + $0x24c4] ss:$28 sps:$4 sm:$0xff]  }
 0x481   : > { %11158 = vmatpush1.bf16.msra.mxu0 %v20085_v36  ;;  %10999 = vmatprep.subr.bf16.mxu1 %v20096_v39  ;;  %v20160_v36 = vld [vmem:[%s21335_s25 + $0x2488] ss:$28 sps:$4 sm:$0xff]   ;;  %v20166_v39 = vld [vmem:[%s21335_s25 + $0x24c0] ss:$28 sps:$4 sm:$0xff]  }
 0x482   : > { %11159 = vmatprep.subr.bf16.mxu0 %v20093_v38  ;;  %v20163_v38 = vld [vmem:[%s21335_s25 + $0x2458] ss:$28 sps:$4 sm:$0xff]  }
 0x484   : > { %11000 = vmatpush1.bf16.msra.mxu1 %v20094_v43  ;;  %v20174_v43 = vld [vmem:[%s21335_s25 + $0x24fc] ss:$28 sps:$4 sm:$0xff]  }
 0x485   : > { %11160 = vmatpush1.bf16.msra.mxu0 %v20091_v42  ;;  %11001 = vmatprep.subr.bf16.mxu1 %v20102_v45  ;;  %v20171_v42 = vld [vmem:[%s21335_s25 + $0x2494] ss:$28 sps:$4 sm:$0xff]  }
 0x486   : > { %11161 = vmatprep.subr.bf16.mxu0 %v20099_v44  ;;  %v20169_v44 = vld [vmem:[%s21335_s25 + $0x2490] ss:$28 sps:$4 sm:$0xff]   ;;  %v20172_v45 = vld [vmem:[%s21335_s25 + $0x24f8] ss:$28 sps:$4 sm:$0xff]  }
 0x488   : > { %11002 = vmatpush1.bf16.msra.mxu1 %v20100_v47  ;;  %v20180_v47 = vld [vmem:[%s21335_s25 + $0x2534] ss:$28 sps:$4 sm:$0xff]  }
 0x489   : > { %v21084_v50 = vpop.eup %21083  ;;  %11162 = vmatpush1.bf16.msra.mxu0 %v20097_v46  ;;  %11003 = vmatprep.subr.bf16.mxu1 %v20108_v49  ;;  %v20177_v46 = vld [vmem:[%s21335_s25 + $0x24cc] ss:$28 sps:$4 sm:$0xff]  }
 0x48a   : > { %v21086_v53 = vpop.eup %21085  ;;  %11163 = vmatprep.subr.bf16.mxu0 %v20105_v48  ;;  %v8809_v55 = vsel %vm3075_vm2, %v21084_v50, 0.0  ;;  %v20175_v48 = vld [vmem:[%s21335_s25 + $0x24c8] ss:$28 sps:$4 sm:$0xff]   ;;  %v20178_v49 = vld [vmem:[%s21335_s25 + $0x2530] ss:$28 sps:$4 sm:$0xff]  }
 0x48b   : > { %v8810_v20 = vsel %vm3075_vm2, %v21086_v53, 0.0  ;;  %v20183_v50 = vld [vmem:[%s21335_s25 + $0x2504] ss:$28 sps:$4 sm:$0xff]  }
 0x48c   : > { %v22615_v56 = vadd.f32 %v8810_v20, %v8809_v55  ;;  %11004 = vmatpush1.bf16.msra.mxu1 %v20106_v33  ;;  %v20181_v33 = vld [vmem:[%s21335_s25 + $0x2500] ss:$28 sps:$4 sm:$0xff]   ;;  %v20184_v53 = vld [vmem:[%s21335_s25 + $0x2568] ss:$28 sps:$4 sm:$0xff]   ;;  %v20187_v55 = vld [vmem:[%s21335_s25 + $0x2538] ss:$28 sps:$4 sm:$0xff]  }
 0x48d   : > { %11164 = vmatpush1.bf16.msra.mxu0 %v20103_v51  ;;  %11005 = vmatprep.subr.bf16.mxu1 %v20114_v54  ;;  %v20186_v51 = vld [vmem:[%s21335_s25 + $0x256c] ss:$28 sps:$4 sm:$0xff]   ;;  %v20192_v54 = vld [vmem:[%s21335_s25 + $0x25a4] ss:$28 sps:$4 sm:$0xff]  }
 0x48e   : > { %11165 = vmatprep.subr.bf16.mxu0 %v20111_v8  ;;  %v20189_v8 = vld [vmem:[%s21335_s25 + $0x253c] ss:$28 sps:$4 sm:$0xff]  }
 0x48f   : > { %v20190_v20 = vld [vmem:[%s21335_s25 + $0x25a0] ss:$28 sps:$4 sm:$0xff]  }
 0x490   : > { %11006 = vmatpush1.bf16.msra.mxu1 %v20112_v58  ;;  %v20198_v58 = vld [vmem:[%s21335_s25 + $0x25dc] ss:$28 sps:$4 sm:$0xff]  }
 0x491   : > { %11166 = vmatpush1.bf16.msra.mxu0 %v20109_v57  ;;  %11007 = vmatprep.subr.bf16.mxu1 %v20120_v60  ;;  %v20195_v57 = vld [vmem:[%s21335_s25 + $0x2574] ss:$28 sps:$4 sm:$0xff]  }
 0x492   : > { %11167 = vmatprep.subr.bf16.mxu0 %v20117_v59  ;;  %v20193_v59 = vld [vmem:[%s21335_s25 + $0x2570] ss:$28 sps:$4 sm:$0xff]   ;;  %v20196_v60 = vld [vmem:[%s21335_s25 + $0x25d8] ss:$28 sps:$4 sm:$0xff]  }
 0x494   : > { %11008 = vmatpush1.bf16.msra.mxu1 %v20118_v1  ;;  %v20204_v1 = vld [vmem:[%s21335_s25 + $0x2614] ss:$28 sps:$4 sm:$0xff]  }
 0x495   : > { %11168 = vmatpush1.bf16.msra.mxu0 %v20115_v61  ;;  %11009 = vmatprep.subr.bf16.mxu1 %v20126_v5  ;;  %v20201_v61 = vld [vmem:[%s21335_s25 + $0x25ac] ss:$28 sps:$4 sm:$0xff]  }
 0x496   : > { %11169 = vmatprep.subr.bf16.mxu0 %v20123_v4  ;;  %v20199_v4 = vld [vmem:[%s21335_s25 + $0x25a8] ss:$28 sps:$4 sm:$0xff]   ;;  %v20202_v5 = vld [vmem:[%s21335_s25 + $0x2610] ss:$28 sps:$4 sm:$0xff]  }
 0x498   : > { %11010 = vmatpush1.bf16.msra.mxu1 %v20124_v40  ;;  %v20210_v40 = vld [vmem:[%s21335_s25 + $0x264c] ss:$28 sps:$4 sm:$0xff]  }
 0x499   : > { %11170 = vmatpush1.bf16.msra.mxu0 %v20121_v6  ;;  %11011 = vmatprep.subr.bf16.mxu1 %v20132_v41  ;;  %v20207_v6 = vld [vmem:[%s21335_s25 + $0x25e4] ss:$28 sps:$4 sm:$0xff]  }
 0x49a   : > { %11171 = vmatprep.subr.bf16.mxu0 %v20129_v7 }
 0x49c   : > { %11012 = vmatpush1.bf16.msra.mxu1 %v20130_v10  ;;  %v20205_v10 = vld [vmem:[%s21335_s25 + $0x25e0] ss:$28 sps:$4 sm:$0xff]  }
 0x49d   : > { %11172 = vmatpush1.bf16.msra.mxu0 %v20127_v9  ;;  %11022 = vmatprep.subr.bf16.mxu1 %v20138_v52 }
 0x49e   : > { %11173 = vmatprep.subr.bf16.mxu0 %v20135_v11 }
 0x49f   : > { %11014 = vmatmul.mubr.bf16.vlgmr.msra.gmra.mrb[48].mxu1 %v21424_v13 }
 0x4a0   : > { %11023 = vmatpush1.bf16.msra.mxu1 %v20136_v14  ;;  %11054 = vmatprep.mubr.bf16.mxu1 %v21410_v3 }
 0x4a1   : > { %11174 = vmatpush1.bf16.msra.mxu0 %v20133_v12  ;;  %11024 = vmatprep.subr.bf16.mxu1 %v20144_v16  ;;  %v20208_v12 = vld [vmem:[%s21335_s25 + $0x2648] ss:$28 sps:$4 sm:$0xff]  }
 0x4a2   : > { %11175 = vmatprep.subr.bf16.mxu0 %v20141_v15  ;;  %v20213_v15 = vld [vmem:[%s21335_s25 + $0x261c] ss:$28 sps:$4 sm:$0xff]   ;;  %v20216_v16 = vld [vmem:[%s21335_s25 + $0x2684] ss:$28 sps:$4 sm:$0xff]  }
 0x4a4   : > { %11025 = vmatpush1.bf16.msra.mxu1 %v20142_v21  ;;  %v20214_v21 = vld [vmem:[%s21335_s25 + $0x2680] ss:$28 sps:$4 sm:$0xff]  }
 0x4a5   : > { %11176 = vmatpush1.bf16.msra.mxu0 %v20139_v18  ;;  %11026 = vmatprep.subr.bf16.mxu1 %v20150_v24  ;;  %v20211_v18 = vld [vmem:[%s21335_s25 + $0x2618] ss:$28 sps:$4 sm:$0xff]  }
 0x4a6   : > { %11186 = vmatprep.subr.bf16.mxu0 %v20147_v22  ;;  %v20219_v22 = vld [vmem:[%s21335_s25 + $0x2654] ss:$28 sps:$4 sm:$0xff]   ;;  %v20222_v24 = vld [vmem:[%s21335_s25 + $0x26bc] ss:$28 sps:$4 sm:$0xff]  }
 0x4a8   : > { %11178 = vmatmul.mubr.bf16.vlgmr.msra.gmra.mrb[44].mxu0 %v21424_v13  ;;  %11027 = vmatpush1.bf16.msra.mxu1 %v20148_v26  ;;  %v20220_v26 = vld [vmem:[%s21335_s25 + $0x26b8] ss:$28 sps:$4 sm:$0xff]  }
 0x4a9   : > { %11187 = vmatpush1.bf16.msra.mxu0 %v20145_v25  ;;  %11028 = vmatprep.subr.bf16.mxu1 %v20156_v28  ;;  %v20217_v25 = vld [vmem:[%s21335_s25 + $0x2650] ss:$28 sps:$4 sm:$0xff]  }
 0x4aa   : > { %11188 = vmatprep.subr.bf16.mxu0 %v20153_v27  ;;  %11218 = vmatprep.mubr.bf16.mxu0 %v21410_v3  ;;  %v20225_v27 = vld [vmem:[%s21335_s25 + $0x268c] ss:$28 sps:$4 sm:$0xff]   ;;  %v20228_v28 = vld [vmem:[%s21335_s25 + $0x26f4] ss:$28 sps:$4 sm:$0xff]  }
 0x4ac   : > { %11029 = vmatpush1.bf16.msra.mxu1 %v20154_v30 }
 0x4ad   : > { %11189 = vmatpush1.bf16.msra.mxu0 %v20151_v29  ;;  %11030 = vmatprep.subr.bf16.mxu1 %v20162_v34  ;;  %v20223_v34 = vld [vmem:[%s21335_s25 + $0x2688] ss:$28 sps:$4 sm:$0xff]  }
 0x4ae   : > { %11190 = vmatprep.subr.bf16.mxu0 %v20159_v31 }
 0x4b0   : > { %11031 = vmatpush1.bf16.msra.mxu1 %v20160_v36 }
 0x4b1   : > { %11191 = vmatpush1.bf16.msra.mxu0 %v20157_v0  ;;  %11032 = vmatprep.subr.bf16.mxu1 %v20168_v37  ;;  %v20226_v0 = vld [vmem:[%s21335_s25 + $0x26f0] ss:$28 sps:$4 sm:$0xff]  }
 0x4b2   : > { %11192 = vmatprep.subr.bf16.mxu0 %v20165_v2  ;;  %v20231_v2 = vld [vmem:[%s21335_s25 + $0x26c4] ss:$28 sps:$4 sm:$0xff]   ;;  %v20234_v37 = vld [vmem:[%s21335_s25 + $0x272c] ss:$28 sps:$4 sm:$0xff]  }
 0x4b4   : > { %11033 = vmatpush1.bf16.msra.mxu1 %v20166_v39  ;;  %v20232_v39 = vld [vmem:[%s21335_s25 + $0x2728] ss:$28 sps:$4 sm:$0xff]  }
 0x4b5   : > { %11193 = vmatpush1.bf16.msra.mxu0 %v20163_v38  ;;  %11034 = vmatprep.subr.bf16.mxu1 %v20174_v43  ;;  %v20229_v38 = vld [vmem:[%s21335_s25 + $0x26c0] ss:$28 sps:$4 sm:$0xff]  }
 0x4b6   : > { %11194 = vmatprep.subr.bf16.mxu0 %v20171_v42  ;;  %v20237_v42 = vld [vmem:[%s21335_s25 + $0x26fc] ss:$28 sps:$4 sm:$0xff]   ;;  %v20240_v43 = vld [vmem:[%s21335_s25 + $0x2764] ss:$28 sps:$4 sm:$0xff]  }
 0x4b8   : > { %11035 = vmatpush1.bf16.msra.mxu1 %v20172_v45  ;;  %v20238_v45 = vld [vmem:[%s21335_s25 + $0x2760] ss:$28 sps:$4 sm:$0xff]  }
 0x4b9   : > { %11195 = vmatpush1.bf16.msra.mxu0 %v20169_v44  ;;  %11036 = vmatprep.subr.bf16.mxu1 %v20180_v47  ;;  %v20235_v44 = vld [vmem:[%s21335_s25 + $0x26f8] ss:$28 sps:$4 sm:$0xff]  }
 0x4ba   : > { %11196 = vmatprep.subr.bf16.mxu0 %v20177_v46  ;;  %v20243_v46 = vld [vmem:[%s21335_s25 + $0x2734] ss:$28 sps:$4 sm:$0xff]   ;;  %v20246_v47 = vld [vmem:[%s21335_s25 + $0x279c] ss:$28 sps:$4 sm:$0xff]  }
 0x4bc   : > { %11037 = vmatpush1.bf16.msra.mxu1 %v20178_v49  ;;  %v20241_v49 = vld [vmem:[%s21335_s25 + $0x2730] ss:$28 sps:$4 sm:$0xff]  }
 0x4bd   : > { %11197 = vmatpush1.bf16.msra.mxu0 %v20175_v48  ;;  %11038 = vmatprep.subr.bf16.mxu1 %v20186_v51 }
 0x4be   : > { %11198 = vmatprep.subr.bf16.mxu0 %v20183_v50  ;;  %v20244_v50 = vld [vmem:[%s21335_s25 + $0x2798] ss:$28 sps:$4 sm:$0xff]  }
 0x4c0   : > { %11039 = vmatpush1.bf16.msra.mxu1 %v20184_v53  ;;  %v20252_v53 = vld [vmem:[%s21335_s25 + $0x27d4] ss:$28 sps:$4 sm:$0xff]  }
 0x4c1   : > { %11199 = vmatpush1.bf16.msra.mxu0 %v20181_v33  ;;  %11040 = vmatprep.subr.bf16.mxu1 %v20192_v54  ;;  %v20249_v33 = vld [vmem:[%s21335_s25 + $0x276c] ss:$28 sps:$4 sm:$0xff]  }
 0x4c2   : > { %11200 = vmatprep.subr.bf16.mxu0 %v20189_v8 }
 0x4c4   : > { %11041 = vmatpush1.bf16.msra.mxu1 %v20190_v20  ;;  %v20247_v20 = vld [vmem:[%s21335_s25 + $0x2768] ss:$28 sps:$4 sm:$0xff]  }
 0x4c5   : > { %11201 = vmatpush1.bf16.msra.mxu0 %v20187_v55  ;;  %11042 = vmatprep.subr.bf16.mxu1 %v20198_v58 }
 0x4c6   : > { %11202 = vmatprep.subr.bf16.mxu0 %v20195_v57  ;;  %v20250_v57 = vld [vmem:[%s21335_s25 + $0x27d0] ss:$28 sps:$4 sm:$0xff]  }
 0x4c8   : > { %11043 = vmatpush1.bf16.msra.mxu1 %v20196_v60  ;;  %v20258_v60 = vld [vmem:[%s21335_s25 + $0x280c] ss:$28 sps:$4 sm:$0xff]  }
 0x4c9   : > { %11203 = vmatpush1.bf16.msra.mxu0 %v20193_v59  ;;  %11044 = vmatprep.subr.bf16.mxu1 %v20204_v1  ;;  %v20255_v59 = vld [vmem:[%s21335_s25 + $0x27a4] ss:$28 sps:$4 sm:$0xff]  }
 0x4ca   : > { %11204 = vmatprep.subr.bf16.mxu0 %v20201_v61  ;;  %v8436_v7 = vpop.f32.mrb[28].mxu1  ;;  %v20253_v1 = vld [vmem:[%s21335_s25 + $0x27a0] ss:$28 sps:$4 sm:$0xff]  }
 0x4cb   : > { %v16478_v41 = vmul.f32 -1.442695, %v8436_v7  ;;  %v8438_v9 = vpop.f32.mrb[29].mxu1  ;;  %v20264_v7 = vld [vmem:[%s21335_s25 + $0x2844] ss:$28 sps:$4 sm:$0xff]  }
 0x4cc   : > { %11045 = vmatpush1.bf16.msra.mxu1 %v20202_v5  ;;  %v16479_v11 = vmul.f32 -1.442695, %v8438_v9  ;;  %v8440_v52 = vpop.f32.mrb[30].mxu1  ;;  %v20259_v9 = vld [vmem:[%s21335_s25 + $0x27d8] ss:$28 sps:$4 sm:$0xff]  }
 0x4cd   : > { %11205 = vmatpush1.bf16.msra.mxu0 %v20199_v4  ;;  %21087 = vpow2.f32 %v16478_v41  ;;  %v8441_v14 = vpop.f32.mrb[31].mxu1  ;;  %11046 = vmatprep.subr.bf16.mxu1 %v20210_v40  ;;  %v20256_v4 = vld [vmem:[%s21335_s25 + $0x2808] ss:$28 sps:$4 sm:$0xff]   ;;  %v20261_v40 = vld [vmem:[%s21335_s25 + $0x27dc] ss:$28 sps:$4 sm:$0xff]  }
 0x4ce   : > { %11206 = vmatprep.subr.bf16.mxu0 %v20207_v6  ;;  %21089 = vpow2.f32 %v16479_v11  ;;  %v20267_v11 = vld [vmem:[%s21335_s25 + $0x2814] ss:$28 sps:$4 sm:$0xff]   ;;  %v20270_v52 = vld [vmem:[%s21335_s25 + $0x287c] ss:$28 sps:$4 sm:$0xff]  }
 0x4cf   : > { %v20268_v14 = vld [vmem:[%s21335_s25 + $0x2878] ss:$28 sps:$4 sm:$0xff]  }
 0x4d0   : > { %11047 = vmatpush1.bf16.msra.mxu1 %v20208_v12  ;;  %v20265_v12 = vld [vmem:[%s21335_s25 + $0x2810] ss:$28 sps:$4 sm:$0xff]  }
 0x4d1   : > { %11207 = vmatpush1.bf16.msra.mxu0 %v20205_v10  ;;  %11048 = vmatprep.subr.bf16.mxu1 %v20216_v16  ;;  %v20262_v10 = vld [vmem:[%s21335_s25 + $0x2840] ss:$28 sps:$4 sm:$0xff]   ;;  %v20276_v16 = vld [vmem:[%s21335_s25 + $0x28b4] ss:$28 sps:$4 sm:$0xff]  }
 0x4d2   : > { %11208 = vmatprep.subr.bf16.mxu0 %v20213_v15  ;;  %v20273_v15 = vld [vmem:[%s21335_s25 + $0x284c] ss:$28 sps:$4 sm:$0xff]  }
 0x4d4   : > { %11049 = vmatpush1.bf16.msra.mxu1 %v20214_v21  ;;  %v20274_v21 = vld [vmem:[%s21335_s25 + $0x28b0] ss:$28 sps:$4 sm:$0xff]  }
 0x4d5   : > { %11209 = vmatpush1.bf16.msra.mxu0 %v20211_v18  ;;  %11050 = vmatprep.subr.bf16.mxu1 %v20222_v24  ;;  %v20271_v18 = vld [vmem:[%s21335_s25 + $0x2848] ss:$28 sps:$4 sm:$0xff]  }
 0x4d6   : > { %11210 = vmatprep.subr.bf16.mxu0 %v20219_v22  ;;  %v20279_v22 = vld [vmem:[%s21335_s25 + $0x2884] ss:$28 sps:$4 sm:$0xff]   ;;  %v20282_v24 = vld [vmem:[%s21335_s25 + $0x28ec] ss:$28 sps:$4 sm:$0xff]  }
 0x4d7   : > { %v21088_v29 = vpop.eup %21087 }
 0x4d8   : > { %v21090_v30 = vpop.eup %21089  ;;  %v8790_v31 = vadd.f32 1.0, %v21088_v29  ;;  %11051 = vmatpush1.bf16.msra.mxu1 %v20220_v26  ;;  %v20280_v26 = vld [vmem:[%s21335_s25 + $0x28e8] ss:$28 sps:$4 sm:$0xff]   ;;  %v20283_v29 = vld [vmem:[%s21335_s25 + $0x28b8] ss:$28 sps:$4 sm:$0xff]  }
 0x4d9   : > { %11211 = vmatpush1.bf16.msra.mxu0 %v20217_v25  ;;  %v8791_v36 = vadd.f32 1.0, %v21090_v30  ;;  %11052 = vmatprep.subr.bf16.mxu1 %v20228_v28  ;;  %v20277_v25 = vld [vmem:[%s21335_s25 + $0x2880] ss:$28 sps:$4 sm:$0xff]  }
 0x4da   : > { %11212 = vmatprep.subr.bf16.mxu0 %v20225_v27  ;;  %21091 = vrcp.f32 %v8790_v31  ;;  %v20285_v27 = vld [vmem:[%s21335_s25 + $0x28bc] ss:$28 sps:$4 sm:$0xff]   ;;  %v20288_v28 = vld [vmem:[%s21335_s25 + $0x2924] ss:$28 sps:$4 sm:$0xff]   ;;  %v20291_v31 = vld [vmem:[%s21335_s25 + $0x28f4] ss:$28 sps:$4 sm:$0xff]  }
 0x4db   : > { %21093 = vrcp.f32 %v8791_v36  ;;  %v20286_v30 = vld [vmem:[%s21335_s25 + $0x2920] ss:$28 sps:$4 sm:$0xff]   ;;  %v20292_v36 = vld [vmem:[%s21335_s25 + $0x2958] ss:$28 sps:$4 sm:$0xff]  }
 0x4dc   : > { %11053 = vmatpush1.bf16.msra.mxu1 %v20226_v0  ;;  %v20289_v0 = vld [vmem:[%s21335_s25 + $0x28f0] ss:$28 sps:$4 sm:$0xff]  }
 0x4dd   : > { %11213 = vmatpush1.bf16.msra.mxu0 %v20223_v34  ;;  %11063 = vmatprep.subr.bf16.mxu1 %v20234_v37  ;;  %v20294_v34 = vld [vmem:[%s21335_s25 + $0x295c] ss:$28 sps:$4 sm:$0xff]   ;;  %v20300_v37 = vld [vmem:[%s21335_s25 + $0x2994] ss:$28 sps:$4 sm:$0xff]  }
 0x4de   : > { %11214 = vmatprep.subr.bf16.mxu0 %v20231_v2  ;;  %v20297_v2 = vld [vmem:[%s21335_s25 + $0x292c] ss:$28 sps:$4 sm:$0xff]  }
 0x4df   : > { %11055 = vmatmul.mubr.bf16.vlgmr.msra.gmra.mrb[48].mxu1 %v21432_v19 }
 0x4e0   : > { %11064 = vmatpush1.bf16.msra.mxu1 %v20232_v39  ;;  %11095 = vmatprep.mubr.bf16.mxu1 %v21438_v23  ;;  %v20298_v39 = vld [vmem:[%s21335_s25 + $0x2990] ss:$28 sps:$4 sm:$0xff]  }
 0x4e1   : > { %11215 = vmatpush1.bf16.msra.mxu0 %v20229_v38  ;;  %11065 = vmatprep.subr.bf16.mxu1 %v20240_v43  ;;  %v20295_v38 = vld [vmem:[%s21335_s25 + $0x2928] ss:$28 sps:$4 sm:$0xff]  }
 0x4e2   : > { %11216 = vmatprep.subr.bf16.mxu0 %v20237_v42  ;;  %v20303_v42 = vld [vmem:[%s21335_s25 + $0x2964] ss:$28 sps:$4 sm:$0xff]   ;;  %v20306_v43 = vld [vmem:[%s21335_s25 + $0x29cc] ss:$28 sps:$4 sm:$0xff]  }
 0x4e4   : > { %v21092_v48 = vpop.eup %21091  ;;  %11066 = vmatpush1.bf16.msra.mxu1 %v20238_v45 }
 0x4e5   : > { %11217 = vmatpush1.bf16.msra.mxu0 %v20235_v44  ;;  %v21094_v51 = vpop.eup %21093  ;;  %11067 = vmatprep.subr.bf16.mxu1 %v20246_v47  ;;  %v8812_v8 = vsel %vm3075_vm2, %v21092_v48, 0.0  ;;  %v20301_v47 = vld [vmem:[%s21335_s25 + $0x2960] ss:$28 sps:$4 sm:$0xff]   ;;  %v20304_v48 = vld [vmem:[%s21335_s25 + $0x29c8] ss:$28 sps:$4 sm:$0xff]  }
 0x4e6   : > { %11227 = vmatprep.subr.bf16.mxu0 %v20243_v46  ;;  %v8813_v54 = vadd.f32 %v8812_v8, %v22615_v56  ;;  %v8814_v55 = vsel %vm3075_vm2, %v21094_v51, 0.0  ;;  %v20312_v51 = vld [vmem:[%s21335_s25 + $0x2a04] ss:$28 sps:$4 sm:$0xff]   ;;  %v20307_v8 = vld [vmem:[%s21335_s25 + $0x2998] ss:$28 sps:$4 sm:$0xff]  }
 0x4e8   : > { %11219 = vmatmul.mubr.bf16.vlgmr.msra.gmra.mrb[44].mxu0 %v21432_v19  ;;  %11068 = vmatpush1.bf16.msra.mxu1 %v20244_v50  ;;  %v22721_v58 = vadd.f32 %v8814_v55, %v8813_v54  ;;  %v20309_v50 = vld [vmem:[%s21335_s25 + $0x299c] ss:$28 sps:$4 sm:$0xff]   ;;  %v20315_v55 = vld [vmem:[%s21335_s25 + $0x29d4] ss:$28 sps:$4 sm:$0xff]  }
 0x4e9   : > { %11228 = vmatpush1.bf16.msra.mxu0 %v20241_v49  ;;  %11069 = vmatprep.subr.bf16.mxu1 %v20252_v53  ;;  %v20310_v54 = vld [vmem:[%s21335_s25 + $0x2a00] ss:$28 sps:$4 sm:$0xff]  }
 0x4ea   : > { %11229 = vmatprep.subr.bf16.mxu0 %v20249_v33  ;;  %v18129_v61 = vpop.f32.mrb[32].mxu1  ;;  %11259 = vmatprep.mubr.bf16.mxu0 %v21438_v23 }
 0x4eb   : > { %v18130_v56 = vpop.f32.mrb[33].mxu1 }
 0x4ec   : > { %11070 = vmatpush1.bf16.msra.mxu1 %v20250_v57  ;;  %v22728_v5 = vadd.f32 %v18130_v56, %v18129_v61  ;;  %v18132_v6 = vpop.f32.mrb[34].mxu1  ;;  %v20313_v57 = vld [vmem:[%s21335_s25 + $0x29d0] ss:$28 sps:$4 sm:$0xff]   ;;  %v20319_v56 = vld [vmem:[%s21335_s25 + $0x2a08] ss:$28 sps:$4 sm:$0xff]  }
 0x4ed   : > { %11230 = vmatpush1.bf16.msra.mxu0 %v20247_v20  ;;  %11071 = vmatprep.subr.bf16.mxu1 %v20258_v60  ;;  %v18133_v41 = vpop.f32.mrb[35].mxu1  ;;  %v20318_v20 = vld [vmem:[%s21335_s25 + $0x2a3c] ss:$28 sps:$4 sm:$0xff]   ;;  %v20321_v60 = vld [vmem:[%s21335_s25 + $0x2a0c] ss:$28 sps:$4 sm:$0xff]  }
 0x4ee   : > { %11231 = vmatprep.subr.bf16.mxu0 %v20255_v59  ;;  %v20316_v59 = vld [vmem:[%s21335_s25 + $0x2a38] ss:$28 sps:$4 sm:$0xff]   ;;  %v20325_v6 = vld [vmem:[%s21335_s25 + $0x2a40] ss:$28 sps:$4 sm:$0xff]  }
 0x4ef   : > { %v20324_v61 = vld [vmem:[%s21335_s25 + $0x2a74] ss:$28 sps:$4 sm:$0xff]   ;;  %v20339_v41 = vld [vmem:[%s21335_s25 + $0x203c] ss:$28 sps:$4 sm:$0xff]  }
 0x4f0   : > { %11072 = vmatpush1.bf16.msra.mxu1 %v20256_v4  ;;  %v20327_v4 = vld [vmem:[%s21335_s25 + $0x2a44] ss:$28 sps:$4 sm:$0xff]  }
 0x4f1   : > { %11232 = vmatpush1.bf16.msra.mxu0 %v20253_v1  ;;  %11073 = vmatprep.subr.bf16.mxu1 %v20264_v7  ;;  %v20322_v1 = vld [vmem:[%s21335_s25 + $0x2a70] ss:$28 sps:$4 sm:$0xff]   ;;  %v20330_v7 = vld [vmem:[%s21335_s25 + $0x2a7c] ss:$28 sps:$4 sm:$0xff]  }
 0x4f2   : > { %11233 = vmatprep.subr.bf16.mxu0 %v20261_v40  ;;  %v20334_v40 = vld [vmem:[%s21335_s25 + $0x2aa8] ss:$28 sps:$4 sm:$0xff]  }
 0x4f4   : > { %11074 = vmatpush1.bf16.msra.mxu1 %v20262_v10  ;;  %v20333_v10 = vld [vmem:[%s21335_s25 + $0x2ab4] ss:$28 sps:$4 sm:$0xff]  }
 0x4f5   : > { %11234 = vmatpush1.bf16.msra.mxu0 %v20259_v9  ;;  %11075 = vmatprep.subr.bf16.mxu1 %v20270_v52  ;;  %v20328_v9 = vld [vmem:[%s21335_s25 + $0x2a78] ss:$28 sps:$4 sm:$0xff]   ;;  %v20343_v52 = vld [vmem:[%s21335_s25 + $0x2200] ss:$28 sps:$4 sm:$0xff]  }
 0x4f6   : > { %11235 = vmatprep.subr.bf16.mxu0 %v20267_v11  ;;  %v20331_v11 = vld [vmem:[%s21335_s25 + $0x2ab0] ss:$28 sps:$4 sm:$0xff]  }
 0x4f8   : > { %11076 = vmatpush1.bf16.msra.mxu1 %v20268_v14  ;;  %v20342_v14 = vld [vmem:[%s21335_s25 + $0x2074] ss:$28 sps:$4 sm:$0xff]  }
 0x4f9   : > { %11236 = vmatpush1.bf16.msra.mxu0 %v20265_v12  ;;  %11077 = vmatprep.subr.bf16.mxu1 %v20276_v16  ;;  %v20337_v12 = vld [vmem:[%s21335_s25 + $0x2038] ss:$28 sps:$4 sm:$0xff]  }
 0x4fa   : > { %11237 = vmatprep.subr.bf16.mxu0 %v20273_v15 }
 0x4fc   : > { %11078 = vmatpush1.bf16.msra.mxu1 %v20274_v21  ;;  %v20340_v21 = vld [vmem:[%s21335_s25 + $0x2070] ss:$28 sps:$4 sm:$0xff]  }
 0x4fd   : > { %11238 = vmatpush1.bf16.msra.mxu0 %v20271_v18  ;;  %11079 = vmatprep.subr.bf16.mxu1 %v20282_v24 }
 0x4fe   : > { %11239 = vmatprep.subr.bf16.mxu0 %v20279_v22 }
 0x500   : > { %11080 = vmatpush1.bf16.msra.mxu1 %v20280_v26 }
 0x501   : > { %11240 = vmatpush1.bf16.msra.mxu0 %v20277_v25  ;;  %11081 = vmatprep.subr.bf16.mxu1 %v20288_v28  ;;  %v20347_v25 = vld [vmem:[%s21335_s25 + $0x20ac] ss:$28 sps:$4 sm:$0xff]  }
 0x502   : > { %11241 = vmatprep.subr.bf16.mxu0 %v20285_v27  ;;  %v20344_v27 = vld [vmem:[%s21335_s25 + $0x2040] ss:$28 sps:$4 sm:$0xff]   ;;  %v20345_v28 = vld [vmem:[%s21335_s25 + $0x20a8] ss:$28 sps:$4 sm:$0xff]  }
 0x504   : > { %11082 = vmatpush1.bf16.msra.mxu1 %v20286_v30  ;;  %v20352_v30 = vld [vmem:[%s21335_s25 + $0x20e4] ss:$28 sps:$4 sm:$0xff]  }
 0x505   : > { %11242 = vmatpush1.bf16.msra.mxu0 %v20283_v29  ;;  %11083 = vmatprep.subr.bf16.mxu1 %v20294_v34  ;;  %v20348_v29 = vld [vmem:[%s21335_s25 + $0x2238] ss:$28 sps:$4 sm:$0xff]  }
 0x506   : > { %11243 = vmatprep.subr.bf16.mxu0 %v20291_v31 }
 0x508   : > { %11084 = vmatpush1.bf16.msra.mxu1 %v20292_v36  ;;  %v20349_v36 = vld [vmem:[%s21335_s25 + $0x2078] ss:$28 sps:$4 sm:$0xff]  }
 0x509   : > { %11244 = vmatpush1.bf16.msra.mxu0 %v20289_v0  ;;  %11085 = vmatprep.subr.bf16.mxu1 %v20300_v37 }
 0x50a   : > { %11245 = vmatprep.subr.bf16.mxu0 %v20297_v2  ;;  %v18151_v44 = vpop.f32.mrb[36].mxu1  ;;  %v20350_v2 = vld [vmem:[%s21335_s25 + $0x20e0] ss:$28 sps:$4 sm:$0xff]  }
 0x50b   : > { %v18152_v45 = vpop.f32.mrb[37].mxu1 }
 0x50c   : > { %v18153_v46 = vadd.f32 %v18152_v45, %v18151_v44  ;;  %11086 = vmatpush1.bf16.msra.mxu1 %v20298_v39  ;;  %v18154_v49 = vpop.f32.mrb[38].mxu1  ;;  %v20357_v39 = vld [vmem:[%s21335_s25 + $0x211c] ss:$28 sps:$4 sm:$0xff]   ;;  %v20354_v44 = vld [vmem:[%s21335_s25 + $0x20b0] ss:$28 sps:$4 sm:$0xff]  }
 0x50d   : > { %11246 = vmatpush1.bf16.msra.mxu0 %v20295_v38  ;;  %11087 = vmatprep.subr.bf16.mxu1 %v20306_v43  ;;  %v18155_v33 = vpop.f32.mrb[39].mxu1  ;;  %v20353_v38 = vld [vmem:[%s21335_s25 + $0x2270] ss:$28 sps:$4 sm:$0xff]   ;;  %v20355_v45 = vld [vmem:[%s21335_s25 + $0x2118] ss:$28 sps:$4 sm:$0xff]  }
 0x50e   : > { %11247 = vmatprep.subr.bf16.mxu0 %v20303_v42  ;;  %v8682_v53 = vadd.f32 %v18153_v46, %v22728_v5  ;;  %v20336_v5 = vld [vmem:[%s21335_s25 + $0x2aac] ss:$28 sps:$4 sm:$0xff]  }
 0x50f   : > { %v20358_v46 = vld [vmem:[%s21335_s25 + $0x22a8] ss:$28 sps:$4 sm:$0xff]  }
 0x510   : > { %11088 = vmatpush1.bf16.msra.mxu1 %v20304_v48 }
 0x511   : > { %11248 = vmatpush1.bf16.msra.mxu0 %v20301_v47  ;;  %11089 = vmatprep.subr.bf16.mxu1 %v20312_v51  ;;  %v20362_v47 = vld [vmem:[%s21335_s25 + $0x2154] ss:$28 sps:$4 sm:$0xff]   ;;  %v20359_v51 = vld [vmem:[%s21335_s25 + $0x20e8] ss:$28 sps:$4 sm:$0xff]  }
 0x512   : > { %11249 = vmatprep.subr.bf16.mxu0 %v20309_v50 }
 0x514   : > { %11090 = vmatpush1.bf16.msra.mxu1 %v20310_v54 }
 0x515   : > { %11250 = vmatpush1.bf16.msra.mxu0 %v20307_v8  ;;  %11091 = vmatprep.subr.bf16.mxu1 %v20318_v20  ;;  %v20360_v8 = vld [vmem:[%s21335_s25 + $0x2150] ss:$28 sps:$4 sm:$0xff]  }
 0x516   : > { %11251 = vmatprep.subr.bf16.mxu0 %v20315_v55  ;;  %v20363_v55 = vld [vmem:[%s21335_s25 + $0x22e0] ss:$28 sps:$4 sm:$0xff]   ;;  %v20367_v20 = vld [vmem:[%s21335_s25 + $0x218c] ss:$28 sps:$4 sm:$0xff]  }
 0x518   : > { %11092 = vmatpush1.bf16.msra.mxu1 %v20316_v59  ;;  %v20365_v59 = vld [vmem:[%s21335_s25 + $0x2188] ss:$28 sps:$4 sm:$0xff]  }
 0x519   : > { %11252 = vmatpush1.bf16.msra.mxu0 %v20313_v57  ;;  %11093 = vmatprep.subr.bf16.mxu1 %v20324_v61  ;;  %v20364_v57 = vld [vmem:[%s21335_s25 + $0x2120] ss:$28 sps:$4 sm:$0xff]  }
 0x51a   : > { %11253 = vmatprep.subr.bf16.mxu0 %v20321_v60  ;;  %v20368_v60 = vld [vmem:[%s21335_s25 + $0x2318] ss:$28 sps:$4 sm:$0xff]   ;;  %v20372_v61 = vld [vmem:[%s21335_s25 + $0x21c4] ss:$28 sps:$4 sm:$0xff]  }
 0x51c   : > { %11094 = vmatpush1.bf16.msra.mxu1 %v20322_v1  ;;  %v20370_v1 = vld [vmem:[%s21335_s25 + $0x21c0] ss:$28 sps:$4 sm:$0xff]  }
 0x51d   : > { %11254 = vmatpush1.bf16.msra.mxu0 %v20319_v56  ;;  %11104 = vmatprep.subr.bf16.mxu1 %v20336_v5  ;;  %v20369_v56 = vld [vmem:[%s21335_s25 + $0x2158] ss:$28 sps:$4 sm:$0xff]   ;;  %v20373_v5 = vld [vmem:[%s21335_s25 + $0x2350] ss:$28 sps:$4 sm:$0xff]  }
 0x51e   : > { %11255 = vmatprep.subr.bf16.mxu0 %v20327_v4 }
 0x51f   : > { %11096 = vmatmul.mubr.bf16.vlgmr.msra.gmra.mrb[48].mxu1 %v21403_v63 }
 0x520   : > { %11105 = vmatpush1.bf16.msra.mxu1 %v20334_v40  ;;  %11136 = vmatprep.mubr.bf16.mxu1 %v21233_v32 }
 0x521   : > { %11256 = vmatpush1.bf16.msra.mxu0 %v20325_v6  ;;  %11309 = vmatprep.subr.bf16.mxu1 %v20339_v41  ;;  %v20377_v6 = vld [vmem:[%s21335_s25 + $0x21fc] ss:$28 sps:$4 sm:$0xff]  }
 0x522   : > { %11257 = vmatprep.subr.bf16.mxu0 %v20330_v7 }
 0x525   : > { %11258 = vmatpush1.bf16.msra.mxu0 %v20328_v9 }
 0x526   : > { %11268 = vmatprep.subr.bf16.mxu0 %v20333_v10  ;;  %v20374_v10 = vld [vmem:[%s21335_s25 + $0x2190] ss:$28 sps:$4 sm:$0xff]  }
 0x528   : > { %11260 = vmatmul.mubr.bf16.vlgmr.msra.gmra.mrb[44].mxu0 %v21403_v63 }
 0x529   : > { %11269 = vmatpush1.bf16.msra.mxu0 %v20331_v11  ;;  %11300 = vmatprep.mubr.bf16.mxu0 %v21233_v32  ;;  %v20375_v11 = vld [vmem:[%s21335_s25 + $0x21f8] ss:$28 sps:$4 sm:$0xff]  }
 0x52a   : > { %18181 = vmatprep.subr.bf16.mxu0 %v20343_v52  ;;  %v18173_v15 = vpop.f32.mrb[40].mxu1 }
 0x52b   : > { %17218 = vmatmul.mubr.msk.bf16.vlgmr.msra.gmra.mrb[48].mxu1 %vm2377_vm0, %v21518_v35  ;;  %v18174_v16 = vpop.f32.mrb[41].mxu1 }
 0x52c   : > { %11310 = vmatpush1.bf16.msra.mxu1 %v20337_v12  ;;  %v18175_v18 = vadd.f32 %v18174_v16, %v18173_v15  ;;  %v18176_v22 = vpop.f32.mrb[42].mxu1  ;;  %11341 = vmatprep.mubr.bf16.mxu1 %v21400_v62  ;;  %v20378_v12 = vld [vmem:[%s21335_s25 + $0x2388] ss:$28 sps:$4 sm:$0xff]   ;;  %v20380_v16 = vld [vmem:[%s21335_s25 + $0x2230] ss:$28 sps:$4 sm:$0xff]  }
 0x52d   : > { %11311 = vmatprep.subr.bf16.mxu1 %v20342_v14  ;;  %v18177_v24 = vpop.f32.mrb[43].mxu1  ;;  %v20382_v14 = vld [vmem:[%s21335_s25 + $0x2234] ss:$28 sps:$4 sm:$0xff]   ;;  %v20379_v15 = vld [vmem:[%s21335_s25 + $0x21c8] ss:$28 sps:$4 sm:$0xff]  }
 0x52e   : > { %v8722_v26 = vadd.f32 %v18175_v18, %v8682_v53  ;;  %v20383_v18 = vld [vmem:[%s21335_s25 + $0x2580] ss:$28 sps:$4 sm:$0xff]   ;;  %v20385_v24 = vld [vmem:[%s21335_s25 + $0x2268] ss:$28 sps:$4 sm:$0xff]  }
 0x52f   : > { %v20384_v22 = vld [vmem:[%s21335_s25 + $0x23c0] ss:$28 sps:$4 sm:$0xff]  }
 0x530   : > { %11312 = vmatpush1.bf16.msra.mxu1 %v20340_v21  ;;  %v20387_v21 = vld [vmem:[%s21335_s25 + $0x226c] ss:$28 sps:$4 sm:$0xff]  }
 0x531   : > { %11313 = vmatprep.subr.bf16.mxu1 %v20347_v25  ;;  %v20388_v25 = vld [vmem:[%s21335_s25 + $0x25b8] ss:$28 sps:$4 sm:$0xff]  }
 0x532   : > { %v8761_v31 = vpop.f32.mrb[44].mxu1 }
 0x533   : > { %v8762_v34 = vadd.f32 %v8761_v31, %v8722_v26  ;;  %v18333_v0 = vpop.f32.mrb[45].mxu1  ;;  %v20392_v26 = vld [vmem:[%s21335_s25 + $0x22a4] ss:$28 sps:$4 sm:$0xff]   ;;  %v20393_v31 = vld [vmem:[%s21335_s25 + $0x25f0] ss:$28 sps:$4 sm:$0xff]  }
 0x534   : > { %17219 = vmatmul.mubr.msk.bf16.vlgmr.msra.gmra.mrb[44].mxu0 %vm2377_vm0, %v21518_v35  ;;  %11314 = vmatpush1.bf16.msra.mxu1 %v20345_v28  ;;  %v8764_v37 = vpop.f32.mrb[46].mxu1  ;;  %v20389_v28 = vld [vmem:[%s21335_s25 + $0x23f8] ss:$28 sps:$4 sm:$0xff]  }
 0x535   : > { %18182 = vmatpush3.bf16.msra.mxu0 %v20344_v27  ;;  %11315 = vmatprep.subr.bf16.mxu1 %v20352_v30  ;;  %v18334_v42 = vpop.f32.mrb[47].mxu1  ;;  %v16482_v43 = vmul.f32 -1.442695, %v8762_v34  ;;  %v20397_v34 = vld [vmem:[%s21335_s25 + $0x22dc] ss:$28 sps:$4 sm:$0xff]  }
 0x536   : > { %18183 = vmatprep.subr.bf16.mxu0 %v20348_v29  ;;  %11505 = vmatprep.mubr.bf16.mxu0 %v21400_v62  ;;  %v20390_v29 = vld [vmem:[%s21335_s25 + $0x22a0] ss:$28 sps:$4 sm:$0xff]  }
 0x537   : > { %21095 = vpow2.f32 %v16482_v43 }
 0x538   : > { %11316 = vmatpush1.bf16.msra.mxu1 %v20350_v2 }
 0x539   : > { %18184 = vmatpush3.bf16.msra.mxu0 %v20349_v36  ;;  %11317 = vmatprep.subr.bf16.mxu1 %v20357_v39  ;;  %v20395_v39 = vld [vmem:[%s21335_s25 + $0x22d8] ss:$28 sps:$4 sm:$0xff]  }
 0x53a   : > { %18185 = vmatprep.subr.bf16.mxu0 %v20353_v38  ;;  %v20394_v38 = vld [vmem:[%s21335_s25 + $0x2430] ss:$28 sps:$4 sm:$0xff]  }
 0x53b   : > { %v8600_v48 = vpop.f32.mrb[40].mxu0 }
 0x53c   : > { %v16480_v49 = vmul.f32 -1.442695, %v8600_v48  ;;  %v8602_v50 = vpop.f32.mrb[41].mxu0  ;;  %11318 = vmatpush1.bf16.msra.mxu1 %v20355_v45  ;;  %v20402_v45 = vld [vmem:[%s21335_s25 + $0x2314] ss:$28 sps:$4 sm:$0xff]  }
 0x53d   : > { %18186 = vmatpush3.bf16.msra.mxu0 %v20354_v44  ;;  %v16481_v33 = vmul.f32 -1.442695, %v8602_v50  ;;  %v8604_v53 = vpop.f32.mrb[42].mxu0  ;;  %11319 = vmatprep.subr.bf16.mxu1 %v20362_v47  ;;  %v20400_v47 = vld [vmem:[%s21335_s25 + $0x2310] ss:$28 sps:$4 sm:$0xff]  }
 0x53e   : > { %21097 = vpow2.f32 %v16480_v49  ;;  %v8605_v54 = vpop.f32.mrb[43].mxu0  ;;  %18187 = vmatprep.subr.bf16.mxu0 %v20358_v46  ;;  %v20399_v46 = vld [vmem:[%s21335_s25 + $0x2468] ss:$28 sps:$4 sm:$0xff]   ;;  %v20403_v48 = vld [vmem:[%s21335_s25 + $0x2660] ss:$28 sps:$4 sm:$0xff]  }
 0x53f   : > { %21099 = vpow2.f32 %v16481_v33  ;;  %v20407_v49 = vld [vmem:[%s21335_s25 + $0x234c] ss:$28 sps:$4 sm:$0xff]   ;;  %v20404_v50 = vld [vmem:[%s21335_s25 + $0x24a0] ss:$28 sps:$4 sm:$0xff]   ;;  %v20408_v33 = vld [vmem:[%s21335_s25 + $0x2698] ss:$28 sps:$4 sm:$0xff]  }
 0x540   : > { %11320 = vmatpush1.bf16.msra.mxu1 %v20360_v8  ;;  %v20412_v53 = vld [vmem:[%s21335_s25 + $0x2384] ss:$28 sps:$4 sm:$0xff]   ;;  %v20409_v8 = vld [vmem:[%s21335_s25 + $0x24d8] ss:$28 sps:$4 sm:$0xff]  }
 0x541   : > { %18188 = vmatpush3.bf16.msra.mxu0 %v20359_v51  ;;  %11321 = vmatprep.subr.bf16.mxu1 %v20367_v20  ;;  %v21096_v4 = vpop.eup %21095  ;;  %v20405_v51 = vld [vmem:[%s21335_s25 + $0x2348] ss:$28 sps:$4 sm:$0xff]   ;;  %v20410_v54 = vld [vmem:[%s21335_s25 + $0x2380] ss:$28 sps:$4 sm:$0xff]  }
 0x542   : > { %18189 = vmatprep.subr.bf16.mxu0 %v20363_v55  ;;  %v8794_v41 = vadd.f32 1.0, %v21096_v4  ;;  %v20413_v55 = vld [vmem:[%s21335_s25 + $0x26d0] ss:$28 sps:$4 sm:$0xff]   ;;  %v20417_v20 = vld [vmem:[%s21335_s25 + $0x23bc] ss:$28 sps:$4 sm:$0xff]  }
 0x543   : > { %v20423_v4 = vld [vmem:[%s21335_s25 + $0x2900] ss:$28 sps:$4 sm:$0xff]  }
 0x544   : > { %11322 = vmatpush1.bf16.msra.mxu1 %v20365_v59  ;;  %v20415_v59 = vld [vmem:[%s21335_s25 + $0x23b8] ss:$28 sps:$4 sm:$0xff]  }
 0x545   : > { %18190 = vmatpush3.bf16.msra.mxu0 %v20364_v57  ;;  %11323 = vmatprep.subr.bf16.mxu1 %v20372_v61  ;;  %v20414_v57 = vld [vmem:[%s21335_s25 + $0x2510] ss:$28 sps:$4 sm:$0xff]  }
 0x546   : > { %18191 = vmatprep.subr.bf16.mxu0 %v20368_v60  ;;  %v20418_v60 = vld [vmem:[%s21335_s25 + $0x2708] ss:$28 sps:$4 sm:$0xff]   ;;  %v20422_v61 = vld [vmem:[%s21335_s25 + $0x23f4] ss:$28 sps:$4 sm:$0xff]  }
 0x548   : > { %v21098_v40 = vpop.eup %21097  ;;  %11324 = vmatpush1.bf16.msra.mxu1 %v20370_v1  ;;  %v20420_v1 = vld [vmem:[%s21335_s25 + $0x23f0] ss:$28 sps:$4 sm:$0xff]  }
 0x549   : > { %v21100_v7 = vpop.eup %21099  ;;  %v8792_v9 = vadd.f32 1.0, %v21098_v40  ;;  %18192 = vmatpush3.bf16.msra.mxu0 %v20369_v56  ;;  %11325 = vmatprep.subr.bf16.mxu1 %v20377_v6  ;;  %v20419_v56 = vld [vmem:[%s21335_s25 + $0x2548] ss:$28 sps:$4 sm:$0xff]   ;;  %v20424_v6 = vld [vmem:[%s21335_s25 + $0x2740] ss:$28 sps:$4 sm:$0xff]  }
 0x54a   : > { %v8793_v52 = vadd.f32 1.0, %v21100_v7  ;;  %18193 = vmatprep.subr.bf16.mxu0 %v20373_v5  ;;  %v20427_v5 = vld [vmem:[%s21335_s25 + $0x242c] ss:$28 sps:$4 sm:$0xff]   ;;  %v20428_v7 = vld [vmem:[%s21335_s25 + $0x2938] ss:$28 sps:$4 sm:$0xff]  }
 0x54b   : > { %21101 = vrcp.f32 %v8792_v9  ;;  %v20425_v40 = vld [vmem:[%s21335_s25 + $0x2428] ss:$28 sps:$4 sm:$0xff]   ;;  %v20429_v9 = vld [vmem:[%s21335_s25 + $0x2778] ss:$28 sps:$4 sm:$0xff]  }
 0x54c   : > { %21103 = vrcp.f32 %v8793_v52  ;;  %11326 = vmatpush1.bf16.msra.mxu1 %v20375_v11  ;;  %v20433_v11 = vld [vmem:[%s21335_s25 + $0x2970] ss:$28 sps:$4 sm:$0xff]   ;;  %v20437_v52 = vld [vmem:[%s21335_s25 + $0x249c] ss:$28 sps:$4 sm:$0xff]  }
 0x54d   : > { %21105 = vrcp.f32 %v8794_v41  ;;  %18194 = vmatpush3.bf16.msra.mxu0 %v20374_v10  ;;  %11327 = vmatprep.subr.bf16.mxu1 %v20382_v14  ;;  %v20432_v41 = vld [vmem:[%s21335_s25 + $0x2464] ss:$28 sps:$4 sm:$0xff]   ;;  %v20435_v14 = vld [vmem:[%s21335_s25 + $0x2498] ss:$28 sps:$4 sm:$0xff]  }
 0x54e   : > { %18195 = vmatprep.subr.bf16.mxu0 %v20378_v12  ;;  %v20430_v10 = vld [vmem:[%s21335_s25 + $0x2460] ss:$28 sps:$4 sm:$0xff]   ;;  %v20434_v12 = vld [vmem:[%s21335_s25 + $0x27b0] ss:$28 sps:$4 sm:$0xff]  }
 0x550   : > { %11328 = vmatpush1.bf16.msra.mxu1 %v20380_v16  ;;  %v20442_v16 = vld [vmem:[%s21335_s25 + $0x24d4] ss:$28 sps:$4 sm:$0xff]  }
 0x551   : > { %18196 = vmatpush3.bf16.msra.mxu0 %v20379_v15  ;;  %11329 = vmatprep.subr.bf16.mxu1 %v20387_v21  ;;  %v20438_v15 = vld [vmem:[%s21335_s25 + $0x29a8] ss:$28 sps:$4 sm:$0xff]   ;;  %v20440_v21 = vld [vmem:[%s21335_s25 + $0x24d0] ss:$28 sps:$4 sm:$0xff]  }
 0x552   : > { %18203 = vmatprep.subr.bf16.mxu0 %v20383_v18  ;;  %v20439_v18 = vld [vmem:[%s21335_s25 + $0x27e8] ss:$28 sps:$4 sm:$0xff]  }
 0x554   : > { %11506 = vmatmul.mubr.bf16.vlgmr.msra.gmra.mrb[48].mxu0 %v21424_v13  ;;  %11330 = vmatpush1.bf16.msra.mxu1 %v20385_v24  ;;  %v20447_v24 = vld [vmem:[%s21335_s25 + $0x250c] ss:$28 sps:$4 sm:$0xff]  }
 0x555   : > { %v21102_v27 = vpop.eup %21101  ;;  %18204 = vmatpush3.bf16.msra.mxu0 %v20384_v22  ;;  %11331 = vmatprep.subr.bf16.mxu1 %v20392_v26  ;;  %v20443_v22 = vld [vmem:[%s21335_s25 + $0x29e0] ss:$28 sps:$4 sm:$0xff]   ;;  %v20445_v26 = vld [vmem:[%s21335_s25 + $0x2508] ss:$28 sps:$4 sm:$0xff]  }
 0x556   : > { %v21104_v30 = vpop.eup %21103  ;;  %18205 = vmatprep.subr.bf16.mxu0 %v20388_v25  ;;  %v8816_v0 = vsel %vm3075_vm2, %v21102_v27, 0.0  ;;  %11545 = vmatprep.mubr.bf16.mxu0 %v21410_v3  ;;  %v20444_v25 = vld [vmem:[%s21335_s25 + $0x2820] ss:$28 sps:$4 sm:$0xff]   ;;  %v20448_v27 = vld [vmem:[%s21335_s25 + $0x2a18] ss:$28 sps:$4 sm:$0xff]  }
 0x557   : > { %v21106_v36 = vpop.eup %21105  ;;  %v8817_v2 = vadd.f32 %v8816_v0, %v22721_v58  ;;  %v8818_v37 = vsel %vm3075_vm2, %v21104_v30, 0.0  ;;  %v20398_v58 = vld [vmem:[%s21335_s25 + $0x2628] ss:$28 sps:$4 sm:$0xff]   ;;  %v20450_v30 = vld [vmem:[%s21335_s25 + $0x2540] ss:$28 sps:$4 sm:$0xff]  }
 0x558   : > { %11332 = vmatpush1.bf16.msra.mxu1 %v20390_v29  ;;  %v8820_v43 = vsel %vm3087_vm3, %v21106_v36, 0.0  ;;  %v20449_v29 = vld [vmem:[%s21335_s25 + $0x2858] ss:$28 sps:$4 sm:$0xff]   ;;  %v20454_v0 = vld [vmem:[%s21335_s25 + $0x2890] ss:$28 sps:$4 sm:$0xff]  }
 0x559   : > { %18206 = vmatpush3.bf16.msra.mxu0 %v20389_v28  ;;  %v8819_v42 = vadd.f32 %v8818_v37, %v8817_v2  ;;  %11333 = vmatprep.subr.bf16.mxu1 %v20397_v34  ;;  %v20452_v28 = vld [vmem:[%s21335_s25 + $0x2544] ss:$28 sps:$4 sm:$0xff]   ;;  %v20457_v34 = vld [vmem:[%s21335_s25 + $0x257c] ss:$28 sps:$4 sm:$0xff]   ;;  %v20462_v37 = vld [vmem:[%s21335_s25 + $0x25b4] ss:$28 sps:$4 sm:$0xff]  }
 0x55a   : > { %18207 = vmatprep.subr.bf16.mxu0 %v20393_v31  ;;  %v20453_v31 = vld [vmem:[%s21335_s25 + $0x2a50] ss:$28 sps:$4 sm:$0xff]   ;;  %v20455_v36 = vld [vmem:[%s21335_s25 + $0x2578] ss:$28 sps:$4 sm:$0xff]   ;;  %v20458_v2 = vld [vmem:[%s21335_s25 + $0x2a88] ss:$28 sps:$4 sm:$0xff]  }
 0x55b   : > { %v8821_v44 = vadd.f32 %v8820_v43, %v8819_v42  ;;  %v20466_v42 = vld [vmem:[%s21335_s25 + $0x25ec] ss:$28 sps:$4 sm:$0xff]   ;;  %v20463_v43 = vld [vmem:[%s21335_s25 + $0x2ac0] ss:$28 sps:$4 sm:$0xff]  }
 0x55c   : > { %11334 = vmatpush1.bf16.msra.mxu1 %v20395_v39  ;;  %v20460_v39 = vld [vmem:[%s21335_s25 + $0x25b0] ss:$28 sps:$4 sm:$0xff]  }
 0x55d   : > { %18208 = vmatpush3.bf16.msra.mxu0 %v20394_v38  ;;  %8822 = vadd.xlane.f32.xlu1 %v8821_v44  ;;  %v20459_v38 = vld [vmem:[%s21335_s25 + $0x28c8] ss:$28 sps:$4 sm:$0xff]  }
 0x55e   : > { %18209 = vmatprep.subr.bf16.mxu0 %v20398_v58  ;;  %11335 = vmatprep.subr.bf16.mxu1 %v20402_v45  ;;  %v20464_v58 = vld [vmem:[%s21335_s25 + $0x25e8] ss:$28 sps:$4 sm:$0xff]  }
 0x55f   : > { %v20469_v44 = vld [vmem:[%s21335_s25 + $0x2624] ss:$28 sps:$4 sm:$0xff]  }
 0x560   : > { %11336 = vmatpush1.bf16.msra.mxu1 %v20400_v47  ;;  %v20472_v45 = vld [vmem:[%s21335_s25 + $0x2ae4] ss:$28 sps:$4 sm:$0xff]   ;;  %v20475_v47 = vld [vmem:[%s21335_s25 + $0x265c] ss:$28 sps:$4 sm:$0xff]  }
 0x561   : > { %18210 = vmatpush3.bf16.msra.mxu0 %v20399_v46  ;;  %11337 = vmatprep.subr.bf16.mxu1 %v20407_v49  ;;  %v20467_v46 = vld [vmem:[%s21335_s25 + $0x2620] ss:$28 sps:$4 sm:$0xff]   ;;  %v20473_v49 = vld [vmem:[%s21335_s25 + $0x2658] ss:$28 sps:$4 sm:$0xff]  }
 0x562   : > { %18211 = vmatprep.subr.bf16.mxu0 %v20403_v48  ;;  %v20470_v48 = vld [vmem:[%s21335_s25 + $0x2ae0] ss:$28 sps:$4 sm:$0xff]  }
 0x564   : > { %11338 = vmatpush1.bf16.msra.mxu1 %v20405_v51  ;;  %v20481_v51 = vld [vmem:[%s21335_s25 + $0x2694] ss:$28 sps:$4 sm:$0xff]  }
 0x565   : > { %18212 = vmatpush3.bf16.msra.mxu0 %v20404_v50  ;;  %11339 = vmatprep.subr.bf16.mxu1 %v20412_v53  ;;  %v20478_v50 = vld [vmem:[%s21335_s25 + $0x2b1c] ss:$28 sps:$4 sm:$0xff]   ;;  %v20479_v53 = vld [vmem:[%s21335_s25 + $0x2690] ss:$28 sps:$4 sm:$0xff]  }
 0x566   : > { %18213 = vmatprep.subr.bf16.mxu0 %v20408_v33  ;;  %v20476_v33 = vld [vmem:[%s21335_s25 + $0x2b18] ss:$28 sps:$4 sm:$0xff]  }
 0x568   : > { %11340 = vmatpush1.bf16.msra.mxu1 %v20410_v54  ;;  %v20487_v54 = vld [vmem:[%s21335_s25 + $0x26cc] ss:$28 sps:$4 sm:$0xff]  }
 0x569   : > { %18214 = vmatpush3.bf16.msra.mxu0 %v20409_v8  ;;  %11350 = vmatprep.subr.bf16.mxu1 %v20417_v20  ;;  %v20484_v8 = vld [vmem:[%s21335_s25 + $0x2b54] ss:$28 sps:$4 sm:$0xff]   ;;  %v20485_v20 = vld [vmem:[%s21335_s25 + $0x26c8] ss:$28 sps:$4 sm:$0xff]  }
 0x56a   : > { %18215 = vmatprep.subr.bf16.mxu0 %v20413_v55  ;;  %v20482_v55 = vld [vmem:[%s21335_s25 + $0x2b50] ss:$28 sps:$4 sm:$0xff]  }
 0x56b   : > { %11342 = vmatmul.mubr.bf16.vlgmr.msra.gmra.mrb[52].mxu1 %v21424_v13 }
 0x56c   : > { %11351 = vmatpush1.bf16.msra.mxu1 %v20415_v59  ;;  %11382 = vmatprep.mubr.bf16.mxu1 %v21410_v3  ;;  %v20493_v59 = vld [vmem:[%s21335_s25 + $0x2704] ss:$28 sps:$4 sm:$0xff]  }
 0x56d   : > { %18216 = vmatpush3.bf16.msra.mxu0 %v20414_v57  ;;  %11352 = vmatprep.subr.bf16.mxu1 %v20422_v61  ;;  %v20490_v57 = vld [vmem:[%s21335_s25 + $0x2b8c] ss:$28 sps:$4 sm:$0xff]   ;;  %v20491_v61 = vld [vmem:[%s21335_s25 + $0x2700] ss:$28 sps:$4 sm:$0xff]  }
 0x56e   : > { %18217 = vmatprep.subr.bf16.mxu0 %v20418_v60  ;;  %v20488_v60 = vld [vmem:[%s21335_s25 + $0x2b88] ss:$28 sps:$4 sm:$0xff]  }
 0x570   : > { %11353 = vmatpush1.bf16.msra.mxu1 %v20420_v1  ;;  %v20499_v1 = vld [vmem:[%s21335_s25 + $0x273c] ss:$28 sps:$4 sm:$0xff]  }
 0x571   : > { %18218 = vmatpush3.bf16.msra.mxu0 %v20419_v56  ;;  %11354 = vmatprep.subr.bf16.mxu1 %v20427_v5  ;;  %v20496_v56 = vld [vmem:[%s21335_s25 + $0x2bc4] ss:$28 sps:$4 sm:$0xff]   ;;  %v20497_v5 = vld [vmem:[%s21335_s25 + $0x2738] ss:$28 sps:$4 sm:$0xff]  }
 0x572   : > { %18225 = vmatprep.subr.bf16.mxu0 %v20423_v4  ;;  %v20494_v4 = vld [vmem:[%s21335_s25 + $0x2bc0] ss:$28 sps:$4 sm:$0xff]  }
 0x574   : > { %11546 = vmatmul.mubr.bf16.vlgmr.msra.gmra.mrb[52].mxu0 %v21432_v19  ;;  %11355 = vmatpush1.bf16.msra.mxu1 %v20425_v40  ;;  %v20505_v40 = vld [vmem:[%s21335_s25 + $0x2774] ss:$28 sps:$4 sm:$0xff]  }
 0x575   : > { %18226 = vmatpush3.bf16.msra.mxu0 %v20424_v6  ;;  %11356 = vmatprep.subr.bf16.mxu1 %v20432_v41  ;;  %v20502_v6 = vld [vmem:[%s21335_s25 + $0x2bfc] ss:$28 sps:$4 sm:$0xff]   ;;  %v20503_v41 = vld [vmem:[%s21335_s25 + $0x2770] ss:$28 sps:$4 sm:$0xff]  }
 0x576   : > { %18227 = vmatprep.subr.bf16.mxu0 %v20428_v7  ;;  %11585 = vmatprep.mubr.bf16.mxu0 %v21438_v23  ;;  %v20500_v7 = vld [vmem:[%s21335_s25 + $0x2bf8] ss:$28 sps:$4 sm:$0xff]  }
 0x578   : > { %11357 = vmatpush1.bf16.msra.mxu1 %v20430_v10  ;;  %v20511_v10 = vld [vmem:[%s21335_s25 + $0x27ac] ss:$28 sps:$4 sm:$0xff]  }
 0x579   : > { %18228 = vmatpush3.bf16.msra.mxu0 %v20429_v9  ;;  %11358 = vmatprep.subr.bf16.mxu1 %v20437_v52  ;;  %v20508_v9 = vld [vmem:[%s21335_s25 + $0x2c34] ss:$28 sps:$4 sm:$0xff]   ;;  %v20509_v52 = vld [vmem:[%s21335_s25 + $0x27a8] ss:$28 sps:$4 sm:$0xff]  }
 0x57a   : > { %18229 = vmatprep.subr.bf16.mxu0 %v20433_v11  ;;  %v20506_v11 = vld [vmem:[%s21335_s25 + $0x2c30] ss:$28 sps:$4 sm:$0xff]  }
 0x57c   : > { %11359 = vmatpush1.bf16.msra.mxu1 %v20435_v14  ;;  %v20517_v14 = vld [vmem:[%s21335_s25 + $0x27e4] ss:$28 sps:$4 sm:$0xff]  }
 0x57d   : > { %18230 = vmatpush3.bf16.msra.mxu0 %v20434_v12  ;;  %11360 = vmatprep.subr.bf16.mxu1 %v20442_v16  ;;  %v20514_v12 = vld [vmem:[%s21335_s25 + $0x2c6c] ss:$28 sps:$4 sm:$0xff]   ;;  %v20515_v16 = vld [vmem:[%s21335_s25 + $0x27e0] ss:$28 sps:$4 sm:$0xff]  }
 0x57e   : > { %18231 = vmatprep.subr.bf16.mxu0 %v20438_v15  ;;  %v20512_v15 = vld [vmem:[%s21335_s25 + $0x2c68] ss:$28 sps:$4 sm:$0xff]  }
 0x580   : > { %11361 = vmatpush1.bf16.msra.mxu1 %v20440_v21  ;;  %v20523_v21 = vld [vmem:[%s21335_s25 + $0x281c] ss:$28 sps:$4 sm:$0xff]  }
 0x581   : > { %18232 = vmatpush3.bf16.msra.mxu0 %v20439_v18  ;;  %11362 = vmatprep.subr.bf16.mxu1 %v20447_v24  ;;  %v20520_v18 = vld [vmem:[%s21335_s25 + $0x2ca4] ss:$28 sps:$4 sm:$0xff]   ;;  %v20521_v24 = vld [vmem:[%s21335_s25 + $0x2818] ss:$28 sps:$4 sm:$0xff]  }
 0x582   : > { %18233 = vmatprep.subr.bf16.mxu0 %v20443_v22  ;;  %v20518_v22 = vld [vmem:[%s21335_s25 + $0x2ca0] ss:$28 sps:$4 sm:$0xff]  }
 0x584   : > { %11363 = vmatpush1.bf16.msra.mxu1 %v20445_v26  ;;  %v20529_v26 = vld [vmem:[%s21335_s25 + $0x2854] ss:$28 sps:$4 sm:$0xff]  }
 0x585   : > { %18234 = vmatpush3.bf16.msra.mxu0 %v20444_v25  ;;  %11364 = vmatprep.subr.bf16.mxu1 %v20452_v28  ;;  %v20526_v25 = vld [vmem:[%s21335_s25 + $0x2cdc] ss:$28 sps:$4 sm:$0xff]   ;;  %v20527_v28 = vld [vmem:[%s21335_s25 + $0x2850] ss:$28 sps:$4 sm:$0xff]  }
 0x586   : > { %18235 = vmatprep.subr.bf16.mxu0 %v20448_v27  ;;  %v20524_v27 = vld [vmem:[%s21335_s25 + $0x2cd8] ss:$28 sps:$4 sm:$0xff]  }
 0x588   : > { %11365 = vmatpush1.bf16.msra.mxu1 %v20450_v30  ;;  %v20535_v30 = vld [vmem:[%s21335_s25 + $0x288c] ss:$28 sps:$4 sm:$0xff]  }
 0x589   : > { %18236 = vmatpush3.bf16.msra.mxu0 %v20449_v29  ;;  %11366 = vmatprep.subr.bf16.mxu1 %v20457_v34  ;;  %v20532_v29 = vld [vmem:[%s21335_s25 + $0x2d14] ss:$28 sps:$4 sm:$0xff]   ;;  %v20533_v34 = vld [vmem:[%s21335_s25 + $0x2888] ss:$28 sps:$4 sm:$0xff]  }
 0x58a   : > { %18237 = vmatprep.subr.bf16.mxu0 %v20453_v31  ;;  %v20530_v31 = vld [vmem:[%s21335_s25 + $0x2d10] ss:$28 sps:$4 sm:$0xff]  }
 0x58c   : > { %11367 = vmatpush1.bf16.msra.mxu1 %v20455_v36  ;;  %v20541_v36 = vld [vmem:[%s21335_s25 + $0x28c4] ss:$28 sps:$4 sm:$0xff]  }
 0x58d   : > { %18238 = vmatpush3.bf16.msra.mxu0 %v20454_v0  ;;  %11368 = vmatprep.subr.bf16.mxu1 %v20462_v37  ;;  %v20538_v0 = vld [vmem:[%s21335_s25 + $0x2d4c] ss:$28 sps:$4 sm:$0xff]   ;;  %v20539_v37 = vld [vmem:[%s21335_s25 + $0x28c0] ss:$28 sps:$4 sm:$0xff]  }
 0x58e   : > { %18239 = vmatprep.subr.bf16.mxu0 %v20458_v2  ;;  %v20536_v2 = vld [vmem:[%s21335_s25 + $0x2d48] ss:$28 sps:$4 sm:$0xff]  }
 0x590   : > { %11369 = vmatpush1.bf16.msra.mxu1 %v20460_v39  ;;  %v20547_v39 = vld [vmem:[%s21335_s25 + $0x28fc] ss:$28 sps:$4 sm:$0xff]  }
 0x591   : > { %18240 = vmatpush3.bf16.msra.mxu0 %v20459_v38  ;;  %11370 = vmatprep.subr.bf16.mxu1 %v20466_v42  ;;  %v20544_v38 = vld [vmem:[%s21335_s25 + $0x2d84] ss:$28 sps:$4 sm:$0xff]  }
 0x592   : > { %18335 = vmatprep.subr.bf16.mxu0 %v21234_v17  ;;  %v20542_v42 = vld [vmem:[%s21335_s25 + $0x2d80] ss:$28 sps:$4 sm:$0xff]  }
 0x594   : > { %11586 = vmatmul.mubr.bf16.vlgmr.msra.gmra.mrb[56].mxu0 %v21403_v63  ;;  %11371 = vmatpush1.bf16.msra.mxu1 %v20464_v58  ;;  %v20550_v58 = vld [vmem:[%s21335_s25 + $0x2dbc] ss:$28 sps:$4 sm:$0xff]  }
 0x595   : > { %18336 = vmatpush3.bf16.msra.mxu0 %v20463_v43  ;;  %11372 = vmatprep.subr.bf16.mxu1 %v20469_v44  ;;  %v20545_v43 = vld [vmem:[%s21335_s25 + $0x28f8] ss:$28 sps:$4 sm:$0xff]  }
 0x596   : > { %18337 = vmatprep.mubr.msk.bf16.mxu0 %vm21235_vm1, %v21234_v17  ;;  %13847 = vmatprep.subr.bf16.mxu0 %v20472_v45  ;;  %v20553_v44 = vld [vmem:[%s21335_s25 + $0x2934] ss:$28 sps:$4 sm:$0xff]  }
 0x597   : > { %v20548_v45 = vld [vmem:[%s21335_s25 + $0x2db8] ss:$28 sps:$4 sm:$0xff]  }
 0x598   : > { %11373 = vmatpush1.bf16.msra.mxu1 %v20467_v46  ;;  %v20551_v46 = vld [vmem:[%s21335_s25 + $0x2930] ss:$28 sps:$4 sm:$0xff]  }
 0x599   : > { %11374 = vmatprep.subr.bf16.mxu1 %v20475_v47  ;;  %v20556_v47 = vld [vmem:[%s21335_s25 + $0x2df4] ss:$28 sps:$4 sm:$0xff]  }
 0x59c   : > { %18338 = vmatmul.mubr.msk.bf16.vlgmr.msra.gmra.mrb[60].mxu0 %vm2377_vm0, %v21518_v35  ;;  %11375 = vmatpush1.bf16.msra.mxu1 %v20473_v49  ;;  %v20554_v49 = vld [vmem:[%s21335_s25 + $0x2df0] ss:$28 sps:$4 sm:$0xff]  }
 0x59d   : > { %13848 = vmatpush1.bf16.msra.mxu0 %v20470_v48  ;;  %11376 = vmatprep.subr.bf16.mxu1 %v20481_v51  ;;  %v20559_v48 = vld [vmem:[%s21335_s25 + $0x296c] ss:$28 sps:$4 sm:$0xff]  }
 0x59e   : > { %13849 = vmatprep.subr.bf16.mxu0 %v20478_v50  ;;  %13879 = vmatprep.mubr.bf16.mxu0 %v21400_v62  ;;  %v20557_v50 = vld [vmem:[%s21335_s25 + $0x2968] ss:$28 sps:$4 sm:$0xff]  }
 0x59f   : > { %v20562_v51 = vld [vmem:[%s21335_s25 + $0x2e2c] ss:$28 sps:$4 sm:$0xff]  }
 0x5a0   : > { %11377 = vmatpush1.bf16.msra.mxu1 %v20479_v53  ;;  %v20560_v53 = vld [vmem:[%s21335_s25 + $0x2e28] ss:$28 sps:$4 sm:$0xff]  }
 0x5a1   : > { %13850 = vmatpush1.bf16.msra.mxu0 %v20476_v33  ;;  %11378 = vmatprep.subr.bf16.mxu1 %v20487_v54  ;;  %v20565_v33 = vld [vmem:[%s21335_s25 + $0x29a4] ss:$28 sps:$4 sm:$0xff]  }
 0x5a2   : > { %13851 = vmatprep.subr.bf16.mxu0 %v20484_v8  ;;  %v20563_v8 = vld [vmem:[%s21335_s25 + $0x29a0] ss:$28 sps:$4 sm:$0xff]  }
 0x5a3   : > { %v20568_v54 = vld [vmem:[%s21335_s25 + $0x2e64] ss:$28 sps:$4 sm:$0xff]  }
 0x5a4   : > { %11379 = vmatpush1.bf16.msra.mxu1 %v20485_v20  ;;  %v20566_v20 = vld [vmem:[%s21335_s25 + $0x2e60] ss:$28 sps:$4 sm:$0xff]  }
 0x5a5   : > { %13852 = vmatpush1.bf16.msra.mxu0 %v20482_v55  ;;  %11380 = vmatprep.subr.bf16.mxu1 %v20493_v59  ;;  %v20571_v55 = vld [vmem:[%s21335_s25 + $0x29dc] ss:$28 sps:$4 sm:$0xff]  }
 0x5a6   : > { %13853 = vmatprep.subr.bf16.mxu0 %v20490_v57  ;;  %v20569_v57 = vld [vmem:[%s21335_s25 + $0x29d8] ss:$28 sps:$4 sm:$0xff]  }
 0x5a7   : > { %v20574_v59 = vld [vmem:[%s21335_s25 + $0x2e9c] ss:$28 sps:$4 sm:$0xff]  }
 0x5a8   : > { %11381 = vmatpush1.bf16.msra.mxu1 %v20491_v61  ;;  %v20572_v61 = vld [vmem:[%s21335_s25 + $0x2e98] ss:$28 sps:$4 sm:$0xff]  }
 0x5a9   : > { %13854 = vmatpush1.bf16.msra.mxu0 %v20488_v60  ;;  %11391 = vmatprep.subr.bf16.mxu1 %v20499_v1  ;;  %v20577_v60 = vld [vmem:[%s21335_s25 + $0x2a14] ss:$28 sps:$4 sm:$0xff]  }
 0x5aa   : > { %13855 = vmatprep.subr.bf16.mxu0 %v20496_v56  ;;  %v20575_v56 = vld [vmem:[%s21335_s25 + $0x2a10] ss:$28 sps:$4 sm:$0xff]  }
 0x5ab   : > { %11383 = vmatmul.mubr.bf16.vlgmr.msra.gmra.mrb[52].mxu1 %v21432_v19  ;;  %v20580_v1 = vld [vmem:[%s21335_s25 + $0x2ed4] ss:$28 sps:$4 sm:$0xff]  }
 0x5ac   : > { %11392 = vmatpush1.bf16.msra.mxu1 %v20497_v5  ;;  %11423 = vmatprep.mubr.bf16.mxu1 %v21438_v23  ;;  %v20578_v5 = vld [vmem:[%s21335_s25 + $0x2ed0] ss:$28 sps:$4 sm:$0xff]  }
 0x5ad   : > { %13856 = vmatpush1.bf16.msra.mxu0 %v20494_v4  ;;  %11393 = vmatprep.subr.bf16.mxu1 %v20505_v40  ;;  %v20583_v4 = vld [vmem:[%s21335_s25 + $0x2a4c] ss:$28 sps:$4 sm:$0xff]  }
 0x5ae   : > { %13857 = vmatprep.subr.bf16.mxu0 %v20502_v6  ;;  %v20581_v6 = vld [vmem:[%s21335_s25 + $0x2a48] ss:$28 sps:$4 sm:$0xff]  }
 0x5af   : > { %v20586_v40 = vld [vmem:[%s21335_s25 + $0x2f0c] ss:$28 sps:$4 sm:$0xff]  }
 0x5b0   : > { %11394 = vmatpush1.bf16.msra.mxu1 %v20503_v41  ;;  %v20584_v41 = vld [vmem:[%s21335_s25 + $0x2f08] ss:$28 sps:$4 sm:$0xff]  }
 0x5b1   : > { %13858 = vmatpush1.bf16.msra.mxu0 %v20500_v7  ;;  %11395 = vmatprep.subr.bf16.mxu1 %v20511_v10  ;;  %v20589_v7 = vld [vmem:[%s21335_s25 + $0x2a84] ss:$28 sps:$4 sm:$0xff]  }
 0x5b2   : > { %13859 = vmatprep.subr.bf16.mxu0 %v20508_v9  ;;  %v20587_v9 = vld [vmem:[%s21335_s25 + $0x2a80] ss:$28 sps:$4 sm:$0xff]  }
 0x5b3   : > { %v20592_v10 = vld [vmem:[%s21335_s25 + $0x2f44] ss:$28 sps:$4 sm:$0xff]  }
 0x5b4   : > { %11396 = vmatpush1.bf16.msra.mxu1 %v20509_v52  ;;  %v20590_v52 = vld [vmem:[%s21335_s25 + $0x2f40] ss:$28 sps:$4 sm:$0xff]  }
 0x5b5   : > { %13860 = vmatpush1.bf16.msra.mxu0 %v20506_v11  ;;  %11397 = vmatprep.subr.bf16.mxu1 %v20517_v14  ;;  %v20601_v11 = vld [vmem:[%s21335_s25 + $0x2abc] ss:$28 sps:$4 sm:$0xff]  }
 0x5b6   : > { %13861 = vmatprep.subr.bf16.mxu0 %v20514_v12  ;;  %v20599_v12 = vld [vmem:[%s21335_s25 + $0x2ab8] ss:$28 sps:$4 sm:$0xff]  }
 0x5b7   : > { %v20595_v14 = vld [vmem:[%s21335_s25 + $0x2f7c] ss:$28 sps:$4 sm:$0xff]  }
 0x5b8   : > { %11398 = vmatpush1.bf16.msra.mxu1 %v20515_v16  ;;  %v20593_v16 = vld [vmem:[%s21335_s25 + $0x2f78] ss:$28 sps:$4 sm:$0xff]  }
 0x5b9   : > { %13862 = vmatpush1.bf16.msra.mxu0 %v20512_v15  ;;  %11399 = vmatprep.subr.bf16.mxu1 %v20523_v21  ;;  %v20607_v15 = vld [vmem:[%s21335_s25 + $0x2aec] ss:$28 sps:$4 sm:$0xff]  }
 0x5ba   : > { %13863 = vmatprep.subr.bf16.mxu0 %v20520_v18  ;;  %v20598_v18 = vld [vmem:[%s21335_s25 + $0x2fb4] ss:$28 sps:$4 sm:$0xff]  }
 0x5bb   : > { %v20596_v21 = vld [vmem:[%s21335_s25 + $0x2fb0] ss:$28 sps:$4 sm:$0xff]  }
 0x5bc   : > { %11400 = vmatpush1.bf16.msra.mxu1 %v20521_v24  ;;  %v20602_v24 = vld [vmem:[%s21335_s25 + $0x2fe8] ss:$28 sps:$4 sm:$0xff]  }
 0x5bd   : > { %13864 = vmatpush1.bf16.msra.mxu0 %v20518_v22  ;;  %11401 = vmatprep.subr.bf16.mxu1 %v20529_v26  ;;  %v20604_v22 = vld [vmem:[%s21335_s25 + $0x2fec] ss:$28 sps:$4 sm:$0xff]   ;;  %v20610_v26 = vld [vmem:[%s21335_s25 + $0x3024] ss:$28 sps:$4 sm:$0xff]  }
 0x5be   : > { %13865 = vmatprep.subr.bf16.mxu0 %v20526_v25  ;;  %v20605_v25 = vld [vmem:[%s21335_s25 + $0x2ae8] ss:$28 sps:$4 sm:$0xff]  }
 0x5c0   : > { %11402 = vmatpush1.bf16.msra.mxu1 %v20527_v28  ;;  %v20608_v28 = vld [vmem:[%s21335_s25 + $0x3020] ss:$28 sps:$4 sm:$0xff]  }
 0x5c1   : > { %13866 = vmatpush1.bf16.msra.mxu0 %v20524_v27  ;;  %11403 = vmatprep.subr.bf16.mxu1 %v20535_v30  ;;  %v20613_v27 = vld [vmem:[%s21335_s25 + $0x2b24] ss:$28 sps:$4 sm:$0xff]   ;;  %v20616_v30 = vld [vmem:[%s21335_s25 + $0x305c] ss:$28 sps:$4 sm:$0xff]  }
 0x5c2   : > { %13867 = vmatprep.subr.bf16.mxu0 %v20532_v29  ;;  %v20611_v29 = vld [vmem:[%s21335_s25 + $0x2b20] ss:$28 sps:$4 sm:$0xff]  }
 0x5c4   : > { %11404 = vmatpush1.bf16.msra.mxu1 %v20533_v34  ;;  %v20614_v34 = vld [vmem:[%s21335_s25 + $0x3058] ss:$28 sps:$4 sm:$0xff]  }
 0x5c5   : > { %13868 = vmatpush1.bf16.msra.mxu0 %v20530_v31  ;;  %11405 = vmatprep.subr.bf16.mxu1 %v20541_v36  ;;  %v20619_v31 = vld [vmem:[%s21335_s25 + $0x2b5c] ss:$28 sps:$4 sm:$0xff]   ;;  %v20622_v36 = vld [vmem:[%s21335_s25 + $0x3094] ss:$28 sps:$4 sm:$0xff]  }
 0x5c6   : > { %13869 = vmatprep.subr.bf16.mxu0 %v20538_v0  ;;  %v20617_v0 = vld [vmem:[%s21335_s25 + $0x2b58] ss:$28 sps:$4 sm:$0xff]  }
 0x5c8   : > { %11406 = vmatpush1.bf16.msra.mxu1 %v20539_v37 }
 0x5c9   : > { %13870 = vmatpush1.bf16.msra.mxu0 %v20536_v2  ;;  %11407 = vmatprep.subr.bf16.mxu1 %v20547_v39  ;;  %v20625_v2 = vld [vmem:[%s21335_s25 + $0x2b94] ss:$28 sps:$4 sm:$0xff]  }
 0x5ca   : > { %13871 = vmatprep.subr.bf16.mxu0 %v20544_v38 }
 0x5cc   : > { %11408 = vmatpush1.bf16.msra.mxu1 %v20545_v43 }
 0x5cd   : > { %13872 = vmatpush1.bf16.msra.mxu0 %v20542_v42  ;;  %11409 = vmatprep.subr.bf16.mxu1 %v20553_v44  ;;  %v20620_v42 = vld [vmem:[%s21335_s25 + $0x3090] ss:$28 sps:$4 sm:$0xff]  }
 0x5ce   : > { %13873 = vmatprep.subr.bf16.mxu0 %v20550_v58  ;;  %v20623_v44 = vld [vmem:[%s21335_s25 + $0x2b90] ss:$28 sps:$4 sm:$0xff]  }
 0x5d0   : > { %11410 = vmatpush1.bf16.msra.mxu1 %v20551_v46  ;;  %v20628_v46 = vld [vmem:[%s21335_s25 + $0x30cc] ss:$28 sps:$4 sm:$0xff]  }
 0x5d1   : > { %13874 = vmatpush1.bf16.msra.mxu0 %v20548_v45  ;;  %11411 = vmatprep.subr.bf16.mxu1 %v20559_v48  ;;  %v20626_v48 = vld [vmem:[%s21335_s25 + $0x30c8] ss:$28 sps:$4 sm:$0xff]  }
 0x5d2   : > { %13875 = vmatprep.subr.bf16.mxu0 %v20556_v47  ;;  %v20631_v47 = vld [vmem:[%s21335_s25 + $0x2bcc] ss:$28 sps:$4 sm:$0xff]  }
 0x5d4   : > { %11412 = vmatpush1.bf16.msra.mxu1 %v20557_v50  ;;  %v20634_v50 = vld [vmem:[%s21335_s25 + $0x3104] ss:$28 sps:$4 sm:$0xff]  }
 0x5d5   : > { %13876 = vmatpush1.bf16.msra.mxu0 %v20554_v49  ;;  %11413 = vmatprep.subr.bf16.mxu1 %v20565_v33  ;;  %v20629_v49 = vld [vmem:[%s21335_s25 + $0x2bc8] ss:$28 sps:$4 sm:$0xff]  }
 0x5d6   : > { %13877 = vmatprep.subr.bf16.mxu0 %v20562_v51  ;;  %v20637_v51 = vld [vmem:[%s21335_s25 + $0x2c04] ss:$28 sps:$4 sm:$0xff]  }
 0x5d8   : > { %11414 = vmatpush1.bf16.msra.mxu1 %v20563_v8 }
 0x5d9   : > { %13878 = vmatpush1.bf16.msra.mxu0 %v20560_v53  ;;  %11415 = vmatprep.subr.bf16.mxu1 %v20571_v55 }
 0x5da   : > { %13888 = vmatprep.subr.bf16.mxu0 %v20568_v54  ;;  %v20632_v54 = vld [vmem:[%s21335_s25 + $0x3100] ss:$28 sps:$4 sm:$0xff]  }
 0x5dc   : > { %13880 = vmatmul.mubr.bf16.vlgmr.msra.gmra.mrb[64].mxu0 %v21424_v13  ;;  %11416 = vmatpush1.bf16.msra.mxu1 %v20569_v57  ;;  %v20635_v57 = vld [vmem:[%s21335_s25 + $0x2c00] ss:$28 sps:$4 sm:$0xff]  }
 0x5dd   : > { %13889 = vmatpush1.bf16.msra.mxu0 %v20566_v20  ;;  %11417 = vmatprep.subr.bf16.mxu1 %v20577_v60  ;;  %v20640_v60 = vld [vmem:[%s21335_s25 + $0x313c] ss:$28 sps:$4 sm:$0xff]  }
 0x5de   : > { %13890 = vmatprep.subr.bf16.mxu0 %v20574_v59  ;;  %13920 = vmatprep.mubr.bf16.mxu0 %v21410_v3 }
 0x5e0   : > { %11418 = vmatpush1.bf16.msra.mxu1 %v20575_v56 }
 0x5e1   : > { %13891 = vmatpush1.bf16.msra.mxu0 %v20572_v61  ;;  %11419 = vmatprep.subr.bf16.mxu1 %v20583_v4  ;;  %v20643_v61 = vld [vmem:[%s21335_s25 + $0x2c3c] ss:$28 sps:$4 sm:$0xff]  }
 0x5e2   : > { %13892 = vmatprep.subr.bf16.mxu0 %v20580_v1 }
 0x5e4   : > { %11420 = vmatpush1.bf16.msra.mxu1 %v20581_v6  ;;  %v20641_v6 = vld [vmem:[%s21335_s25 + $0x2c38] ss:$28 sps:$4 sm:$0xff]  }
 0x5e5   : > { %13893 = vmatpush1.bf16.msra.mxu0 %v20578_v5  ;;  %11421 = vmatprep.subr.bf16.mxu1 %v20589_v7  ;;  %v20638_v5 = vld [vmem:[%s21335_s25 + $0x3138] ss:$28 sps:$4 sm:$0xff]  }
 0x5e6   : > { %13894 = vmatprep.subr.bf16.mxu0 %v20586_v40  ;;  %v20646_v7 = vld [vmem:[%s21335_s25 + $0x3174] ss:$28 sps:$4 sm:$0xff]  }
 0x5e8   : > { %11422 = vmatpush1.bf16.msra.mxu1 %v20587_v9  ;;  %v20644_v9 = vld [vmem:[%s21335_s25 + $0x3170] ss:$28 sps:$4 sm:$0xff]  }
 0x5e9   : > { %13895 = vmatpush1.bf16.msra.mxu0 %v20584_v41  ;;  %11432 = vmatprep.subr.bf16.mxu1 %v20601_v11  ;;  %v20649_v41 = vld [vmem:[%s21335_s25 + $0x2c74] ss:$28 sps:$4 sm:$0xff]   ;;  %v20652_v11 = vld [vmem:[%s21335_s25 + $0x31ac] ss:$28 sps:$4 sm:$0xff]  }
 0x5ea   : > { %13896 = vmatprep.subr.bf16.mxu0 %v20592_v10  ;;  %v20647_v10 = vld [vmem:[%s21335_s25 + $0x2c70] ss:$28 sps:$4 sm:$0xff]  }
 0x5eb   : > { %11424 = vmatmul.mubr.bf16.vlgmr.msra.gmra.mrb[52].mxu1 %v21403_v63 }
 0x5ec   : > { %11433 = vmatpush1.bf16.msra.mxu1 %v20599_v12  ;;  %11464 = vmatprep.mubr.bf16.mxu1 %v21233_v32 }
 0x5ed   : > { %13897 = vmatpush1.bf16.msra.mxu0 %v20590_v52  ;;  %14011 = vmatprep.subr.bf16.mxu1 %v20607_v15  ;;  %v20655_v52 = vld [vmem:[%s21335_s25 + $0x2cac] ss:$28 sps:$4 sm:$0xff]  }
 0x5ee   : > { %13898 = vmatprep.subr.bf16.mxu0 %v20595_v14 }
 0x5f1   : > { %13899 = vmatpush1.bf16.msra.mxu0 %v20593_v16  ;;  %v20650_v16 = vld [vmem:[%s21335_s25 + $0x31a8] ss:$28 sps:$4 sm:$0xff]  }
 0x5f2   : > { %13900 = vmatprep.subr.bf16.mxu0 %v20598_v18  ;;  %v20653_v18 = vld [vmem:[%s21335_s25 + $0x2ca8] ss:$28 sps:$4 sm:$0xff]  }
 0x5f5   : > { %13901 = vmatpush1.bf16.msra.mxu0 %v20596_v21 }
 0x5f6   : > { %13902 = vmatprep.subr.bf16.mxu0 %v20604_v22  ;;  %v20658_v22 = vld [vmem:[%s21335_s25 + $0x31e4] ss:$28 sps:$4 sm:$0xff]  }
 0x5f7   : > { %17220 = vmatmul.mubr.msk.bf16.vlgmr.msra.gmra.mrb[52].mxu1 %vm2377_vm0, %v21518_v35 }
 0x5f8   : > { %14012 = vmatpush1.bf16.msra.mxu1 %v20605_v25  ;;  %14043 = vmatprep.mubr.bf16.mxu1 %v21400_v62 }
 0x5f9   : > { %13903 = vmatpush1.bf16.msra.mxu0 %v20602_v24  ;;  %14013 = vmatprep.subr.bf16.mxu1 %v20613_v27  ;;  %v20661_v24 = vld [vmem:[%s21335_s25 + $0x2ce4] ss:$28 sps:$4 sm:$0xff]  }
 0x5fa   : > { %13904 = vmatprep.subr.bf16.mxu0 %v20610_v26  ;;  %v20656_v26 = vld [vmem:[%s21335_s25 + $0x31e0] ss:$28 sps:$4 sm:$0xff]  }
 0x5fb   : > { %v20659_v27 = vld [vmem:[%s21335_s25 + $0x2ce0] ss:$28 sps:$4 sm:$0xff]  }
 0x5fc   : > { %14014 = vmatpush1.bf16.msra.mxu1 %v20611_v29  ;;  %v20664_v29 = vld [vmem:[%s21335_s25 + $0x321c] ss:$28 sps:$4 sm:$0xff]  }
 0x5fd   : > { %13905 = vmatpush1.bf16.msra.mxu0 %v20608_v28  ;;  %14015 = vmatprep.subr.bf16.mxu1 %v20619_v31 }
 0x5fe   : > { %13906 = vmatprep.subr.bf16.mxu0 %v20616_v30  ;;  %v11138_v37 = vpop.f32.mrb[48].mxu1  ;;  %v20667_v30 = vld [vmem:[%s21335_s25 + $0x2d1c] ss:$28 sps:$4 sm:$0xff]  }
 0x5ff   : > { %v17222_v38 = vmul.f32 -1.442695, %v11138_v37  ;;  %v11140_v39 = vpop.f32.mrb[49].mxu1  ;;  %v20670_v37 = vld [vmem:[%s21335_s25 + $0x3254] ss:$28 sps:$4 sm:$0xff]  }
 0x600   : > { %14016 = vmatpush1.bf16.msra.mxu1 %v20617_v0  ;;  %v17223_v43 = vmul.f32 -1.442695, %v11140_v39  ;;  %v11142_v58 = vpop.f32.mrb[50].mxu1 }
 0x601   : > { %13907 = vmatpush1.bf16.msra.mxu0 %v20614_v34  ;;  %21107 = vpow2.f32 %v17222_v38  ;;  %v11143_v45 = vpop.f32.mrb[51].mxu1  ;;  %14017 = vmatprep.subr.bf16.mxu1 %v20625_v2  ;;  %v20665_v2 = vld [vmem:[%s21335_s25 + $0x2d18] ss:$28 sps:$4 sm:$0xff]  }
 0x602   : > { %13908 = vmatprep.subr.bf16.mxu0 %v20622_v36  ;;  %21109 = vpow2.f32 %v17223_v43  ;;  %v20662_v36 = vld [vmem:[%s21335_s25 + $0x3218] ss:$28 sps:$4 sm:$0xff]   ;;  %v20671_v43 = vld [vmem:[%s21335_s25 + $0x2d50] ss:$28 sps:$4 sm:$0xff]  }
 0x603   : > { %v20673_v38 = vld [vmem:[%s21335_s25 + $0x2d54] ss:$28 sps:$4 sm:$0xff]   ;;  %v20679_v45 = vld [vmem:[%s21335_s25 + $0x2d8c] ss:$28 sps:$4 sm:$0xff]  }
 0x604   : > { %14018 = vmatpush1.bf16.msra.mxu1 %v20623_v44  ;;  %v20676_v44 = vld [vmem:[%s21335_s25 + $0x328c] ss:$28 sps:$4 sm:$0xff]  }
 0x605   : > { %13909 = vmatpush1.bf16.msra.mxu0 %v20620_v42  ;;  %14019 = vmatprep.subr.bf16.mxu1 %v20631_v47  ;;  %v20668_v42 = vld [vmem:[%s21335_s25 + $0x3250] ss:$28 sps:$4 sm:$0xff]  }
 0x606   : > { %13910 = vmatprep.subr.bf16.mxu0 %v20628_v46 }
 0x607   : > { %v11302_v33 = vpop.f32.mrb[44].mxu0 }
 0x608   : > { %v17224_v53 = vmul.f32 -1.442695, %v11302_v33  ;;  %v11304_v8 = vpop.f32.mrb[45].mxu0  ;;  %14020 = vmatpush1.bf16.msra.mxu1 %v20629_v49  ;;  %v20674_v49 = vld [vmem:[%s21335_s25 + $0x3288] ss:$28 sps:$4 sm:$0xff]  }
 0x609   : > { %13911 = vmatpush1.bf16.msra.mxu0 %v20626_v48  ;;  %v17225_v55 = vmul.f32 -1.442695, %v11304_v8  ;;  %v11306_v20 = vpop.f32.mrb[46].mxu0  ;;  %14021 = vmatprep.subr.bf16.mxu1 %v20637_v51  ;;  %v20682_v33 = vld [vmem:[%s21335_s25 + $0x32c4] ss:$28 sps:$4 sm:$0xff]  }
 0x60a   : > { %21111 = vpow2.f32 %v17224_v53  ;;  %v11307_v59 = vpop.f32.mrb[47].mxu0  ;;  %13912 = vmatprep.subr.bf16.mxu0 %v20634_v50  ;;  %v20677_v50 = vld [vmem:[%s21335_s25 + $0x2d88] ss:$28 sps:$4 sm:$0xff]  }
 0x60b   : > { %21113 = vpow2.f32 %v17225_v55  ;;  %v21108_v56 = vpop.eup %21107  ;;  %v20685_v53 = vld [vmem:[%s21335_s25 + $0x2dc4] ss:$28 sps:$4 sm:$0xff]  }
 0x60c   : > { %v21110_v1 = vpop.eup %21109  ;;  %v11654_v4 = vadd.f32 1.0, %v21108_v56  ;;  %14022 = vmatpush1.bf16.msra.mxu1 %v20635_v57  ;;  %v20680_v57 = vld [vmem:[%s21335_s25 + $0x32c0] ss:$28 sps:$4 sm:$0xff]  }
 0x60d   : > { %13913 = vmatpush1.bf16.msra.mxu0 %v20632_v54  ;;  %v11655_v40 = vadd.f32 1.0, %v21110_v1  ;;  %14023 = vmatprep.subr.bf16.mxu1 %v20643_v61  ;;  %v20683_v59 = vld [vmem:[%s21335_s25 + $0x2dc0] ss:$28 sps:$4 sm:$0xff]   ;;  %v20686_v1 = vld [vmem:[%s21335_s25 + $0x32f8] ss:$28 sps:$4 sm:$0xff]  }
 0x60e   : > { %13914 = vmatprep.subr.bf16.mxu0 %v20640_v60  ;;  %21115 = vrcp.f32 %v11654_v4  ;;  %v20688_v61 = vld [vmem:[%s21335_s25 + $0x32fc] ss:$28 sps:$4 sm:$0xff]  }
 0x60f   : > { %21117 = vrcp.f32 %v11655_v40  ;;  %v20691_v56 = vld [vmem:[%s21335_s25 + $0x2dfc] ss:$28 sps:$4 sm:$0xff]   ;;  %v20692_v40 = vld [vmem:[%s21335_s25 + $0x3330] ss:$28 sps:$4 sm:$0xff]  }
 0x610   : > { %14024 = vmatpush1.bf16.msra.mxu1 %v20641_v6  ;;  %v20689_v4 = vld [vmem:[%s21335_s25 + $0x2df8] ss:$28 sps:$4 sm:$0xff]  }
 0x611   : > { %13915 = vmatpush1.bf16.msra.mxu0 %v20638_v5  ;;  %14025 = vmatprep.subr.bf16.mxu1 %v20649_v41  ;;  %v20694_v5 = vld [vmem:[%s21335_s25 + $0x3334] ss:$28 sps:$4 sm:$0xff]   ;;  %v20700_v41 = vld [vmem:[%s21335_s25 + $0x336c] ss:$28 sps:$4 sm:$0xff]  }
 0x612   : > { %13916 = vmatprep.subr.bf16.mxu0 %v20646_v7  ;;  %v20697_v6 = vld [vmem:[%s21335_s25 + $0x2e34] ss:$28 sps:$4 sm:$0xff]  }
 0x613   : > { %v20695_v7 = vld [vmem:[%s21335_s25 + $0x2e30] ss:$28 sps:$4 sm:$0xff]  }
 0x614   : > { %v21112_v12 = vpop.eup %21111  ;;  %14026 = vmatpush1.bf16.msra.mxu1 %v20647_v10  ;;  %v20698_v10 = vld [vmem:[%s21335_s25 + $0x3368] ss:$28 sps:$4 sm:$0xff]  }
 0x615   : > { %v21114_v14 = vpop.eup %21113  ;;  %v11656_v15 = vadd.f32 1.0, %v21112_v12  ;;  %13917 = vmatpush1.bf16.msra.mxu0 %v20644_v9  ;;  %14027 = vmatprep.subr.bf16.mxu1 %v20655_v52  ;;  %v20703_v9 = vld [vmem:[%s21335_s25 + $0x2e6c] ss:$28 sps:$4 sm:$0xff]   ;;  %v20706_v52 = vld [vmem:[%s21335_s25 + $0x33a4] ss:$28 sps:$4 sm:$0xff]  }
 0x616   : > { %v11657_v21 = vadd.f32 1.0, %v21114_v14  ;;  %13918 = vmatprep.subr.bf16.mxu0 %v20652_v11  ;;  %v20701_v11 = vld [vmem:[%s21335_s25 + $0x2e68] ss:$28 sps:$4 sm:$0xff]   ;;  %v20704_v14 = vld [vmem:[%s21335_s25 + $0x33a0] ss:$28 sps:$4 sm:$0xff]  }
 0x617   : > { %21119 = vrcp.f32 %v11656_v15  ;;  %v20709_v12 = vld [vmem:[%s21335_s25 + $0x2ea4] ss:$28 sps:$4 sm:$0xff]  }
 0x618   : > { %21121 = vrcp.f32 %v11657_v21  ;;  %v21116_v25 = vpop.eup %21115  ;;  %14028 = vmatpush1.bf16.msra.mxu1 %v20653_v18  ;;  %v20707_v15 = vld [vmem:[%s21335_s25 + $0x2ea0] ss:$28 sps:$4 sm:$0xff]   ;;  %v20710_v21 = vld [vmem:[%s21335_s25 + $0x33d8] ss:$28 sps:$4 sm:$0xff]  }
 0x619   : > { %13919 = vmatpush1.bf16.msra.mxu0 %v20650_v16  ;;  %v21118_v28 = vpop.eup %21117  ;;  %14029 = vmatprep.subr.bf16.mxu1 %v20661_v24  ;;  %v11675_v31 = vsel %vm3075_vm2, %v21116_v25, 0.0  ;;  %v20712_v16 = vld [vmem:[%s21335_s25 + $0x33dc] ss:$28 sps:$4 sm:$0xff]   ;;  %v20718_v24 = vld [vmem:[%s21335_s25 + $0x3414] ss:$28 sps:$4 sm:$0xff]  }
 0x61a   : > { %13929 = vmatprep.subr.bf16.mxu0 %v20658_v22  ;;  %v11676_v34 = vsel %vm3075_vm2, %v21118_v28, 0.0  ;;  %v20715_v18 = vld [vmem:[%s21335_s25 + $0x2edc] ss:$28 sps:$4 sm:$0xff]   ;;  %v20721_v25 = vld [vmem:[%s21335_s25 + $0x2f14] ss:$28 sps:$4 sm:$0xff]  }
 0x61b   : > { %v11677_v0 = vadd.f32 %v11676_v34, %v11675_v31  ;;  %v20713_v22 = vld [vmem:[%s21335_s25 + $0x2ed8] ss:$28 sps:$4 sm:$0xff]   ;;  %v20724_v28 = vld [vmem:[%s21335_s25 + $0x344c] ss:$28 sps:$4 sm:$0xff]   ;;  %v20730_v34 = vld [vmem:[%s21335_s25 + $0x3484] ss:$28 sps:$4 sm:$0xff]  }
 0x61c   : > { %13921 = vmatmul.mubr.bf16.vlgmr.msra.gmra.mrb[64].mxu0 %v21432_v19  ;;  %14030 = vmatpush1.bf16.msra.mxu1 %v20659_v27  ;;  %v20719_v27 = vld [vmem:[%s21335_s25 + $0x2f10] ss:$28 sps:$4 sm:$0xff]   ;;  %v20725_v31 = vld [vmem:[%s21335_s25 + $0x2f48] ss:$28 sps:$4 sm:$0xff]  }
 0x61d   : > { %13930 = vmatpush1.bf16.msra.mxu0 %v20656_v26  ;;  %14031 = vmatprep.subr.bf16.mxu1 %v20667_v30  ;;  %v20716_v26 = vld [vmem:[%s21335_s25 + $0x3410] ss:$28 sps:$4 sm:$0xff]   ;;  %v20722_v30 = vld [vmem:[%s21335_s25 + $0x3448] ss:$28 sps:$4 sm:$0xff]  }
 0x61e   : > { %13931 = vmatprep.subr.bf16.mxu0 %v20664_v29  ;;  %13961 = vmatprep.mubr.bf16.mxu0 %v21438_v23  ;;  %v20727_v29 = vld [vmem:[%s21335_s25 + $0x2f4c] ss:$28 sps:$4 sm:$0xff]  }
 0x620   : > { %14032 = vmatpush1.bf16.msra.mxu1 %v20665_v2 }
 0x621   : > { %v21120_v39 = vpop.eup %21119  ;;  %13932 = vmatpush1.bf16.msra.mxu0 %v20662_v36  ;;  %14033 = vmatprep.subr.bf16.mxu1 %v20673_v38 }
 0x622   : > { %v21122_v58 = vpop.eup %21121  ;;  %13933 = vmatprep.subr.bf16.mxu0 %v20670_v37  ;;  %v11678_v46 = vsel %vm3075_vm2, %v21120_v39, 0.0  ;;  %v20728_v39 = vld [vmem:[%s21335_s25 + $0x3480] ss:$28 sps:$4 sm:$0xff]  }
 0x623   : > { %v11679_v47 = vadd.f32 %v11678_v46, %v11677_v0  ;;  %v11680_v48 = vsel %vm3075_vm2, %v21122_v58, 0.0  ;;  %v20733_v0 = vld [vmem:[%s21335_s25 + $0x2f84] ss:$28 sps:$4 sm:$0xff]   ;;  %v20736_v58 = vld [vmem:[%s21335_s25 + $0x34bc] ss:$28 sps:$4 sm:$0xff]  }
 0x624   : > { %14034 = vmatpush1.bf16.msra.mxu1 %v20671_v43  ;;  %v20734_v46 = vld [vmem:[%s21335_s25 + $0x34b8] ss:$28 sps:$4 sm:$0xff]  }
 0x625   : > { %13934 = vmatpush1.bf16.msra.mxu0 %v20668_v42  ;;  %v23070_v51 = vadd.f32 %v11680_v48, %v11679_v47  ;;  %14035 = vmatprep.subr.bf16.mxu1 %v20679_v45  ;;  %v20731_v42 = vld [vmem:[%s21335_s25 + $0x2f80] ss:$28 sps:$4 sm:$0xff]   ;;  %v20737_v47 = vld [vmem:[%s21335_s25 + $0x2fb8] ss:$28 sps:$4 sm:$0xff]  }
 0x626   : > { %13935 = vmatprep.subr.bf16.mxu0 %v20676_v44  ;;  %v20739_v44 = vld [vmem:[%s21335_s25 + $0x2fbc] ss:$28 sps:$4 sm:$0xff]   ;;  %v20742_v48 = vld [vmem:[%s21335_s25 + $0x34f4] ss:$28 sps:$4 sm:$0xff]  }
 0x627   : > { %v18197_v8 = vpop.f32.mrb[48].mxu0 }
 0x628   : > { %v18198_v54 = vpop.f32.mrb[49].mxu0  ;;  %14036 = vmatpush1.bf16.msra.mxu1 %v20677_v50  ;;  %v20740_v50 = vld [vmem:[%s21335_s25 + $0x34f0] ss:$28 sps:$4 sm:$0xff]  }
 0x629   : > { %v23074_v55 = vadd.f32 %v18198_v54, %v18197_v8  ;;  %13936 = vmatpush1.bf16.msra.mxu0 %v20674_v49  ;;  %v18200_v20 = vpop.f32.mrb[50].mxu0  ;;  %14037 = vmatprep.subr.bf16.mxu1 %v20685_v53  ;;  %v20745_v49 = vld [vmem:[%s21335_s25 + $0x2ff4] ss:$28 sps:$4 sm:$0xff]   ;;  %v20748_v53 = vld [vmem:[%s21335_s25 + $0x352c] ss:$28 sps:$4 sm:$0xff]  }
 0x62a   : > { %v18201_v60 = vpop.f32.mrb[51].mxu0  ;;  %13937 = vmatprep.subr.bf16.mxu0 %v20682_v33  ;;  %v20743_v33 = vld [vmem:[%s21335_s25 + $0x2ff0] ss:$28 sps:$4 sm:$0xff]   ;;  %v20746_v54 = vld [vmem:[%s21335_s25 + $0x3528] ss:$28 sps:$4 sm:$0xff]  }
 0x62b   : > { %v20751_v8 = vld [vmem:[%s21335_s25 + $0x302c] ss:$28 sps:$4 sm:$0xff]   ;;  %v20754_v20 = vld [vmem:[%s21335_s25 + $0x3564] ss:$28 sps:$4 sm:$0xff]  }
 0x62c   : > { %14038 = vmatpush1.bf16.msra.mxu1 %v20683_v59  ;;  %v20752_v59 = vld [vmem:[%s21335_s25 + $0x3560] ss:$28 sps:$4 sm:$0xff]  }
 0x62d   : > { %13938 = vmatpush1.bf16.msra.mxu0 %v20680_v57  ;;  %14039 = vmatprep.subr.bf16.mxu1 %v20691_v56  ;;  %v20757_v57 = vld [vmem:[%s21335_s25 + $0x3064] ss:$28 sps:$4 sm:$0xff]   ;;  %v20766_v56 = vld [vmem:[%s21335_s25 + $0x2af4] ss:$28 sps:$4 sm:$0xff]  }
 0x62e   : > { %13939 = vmatprep.subr.bf16.mxu0 %v20688_v61  ;;  %v20755_v60 = vld [vmem:[%s21335_s25 + $0x3060] ss:$28 sps:$4 sm:$0xff]  }
 0x62f   : > { %v20760_v61 = vld [vmem:[%s21335_s25 + $0x309c] ss:$28 sps:$4 sm:$0xff]  }
 0x630   : > { %14040 = vmatpush1.bf16.msra.mxu1 %v20689_v4  ;;  %v20763_v4 = vld [vmem:[%s21335_s25 + $0x30d4] ss:$28 sps:$4 sm:$0xff]  }
 0x631   : > { %13940 = vmatpush1.bf16.msra.mxu0 %v20686_v1  ;;  %14041 = vmatprep.subr.bf16.mxu1 %v20697_v6  ;;  %v20758_v1 = vld [vmem:[%s21335_s25 + $0x3098] ss:$28 sps:$4 sm:$0xff]   ;;  %v20769_v6 = vld [vmem:[%s21335_s25 + $0x310c] ss:$28 sps:$4 sm:$0xff]  }
 0x632   : > { %13941 = vmatprep.subr.bf16.mxu0 %v20694_v5  ;;  %v20761_v5 = vld [vmem:[%s21335_s25 + $0x30d0] ss:$28 sps:$4 sm:$0xff]  }
 0x634   : > { %14042 = vmatpush1.bf16.msra.mxu1 %v20695_v7  ;;  %v20767_v7 = vld [vmem:[%s21335_s25 + $0x3108] ss:$28 sps:$4 sm:$0xff]  }
 0x635   : > { %13942 = vmatpush1.bf16.msra.mxu0 %v20692_v40  ;;  %14052 = vmatprep.subr.bf16.mxu1 %v20703_v9  ;;  %v20764_v40 = vld [vmem:[%s21335_s25 + $0x2af0] ss:$28 sps:$4 sm:$0xff]   ;;  %v20775_v9 = vld [vmem:[%s21335_s25 + $0x3144] ss:$28 sps:$4 sm:$0xff]  }
 0x636   : > { %13943 = vmatprep.subr.bf16.mxu0 %v20700_v41  ;;  %v20772_v41 = vld [vmem:[%s21335_s25 + $0x2b2c] ss:$28 sps:$4 sm:$0xff]  }
 0x637   : > { %14044 = vmatmul.mubr.bf16.vlgmr.msra.gmra.mrb[56].mxu1 %v21424_v13 }
 0x638   : > { %14053 = vmatpush1.bf16.msra.mxu1 %v20701_v11  ;;  %14084 = vmatprep.mubr.bf16.mxu1 %v21410_v3 }
 0x639   : > { %13944 = vmatpush1.bf16.msra.mxu0 %v20698_v10  ;;  %14054 = vmatprep.subr.bf16.mxu1 %v20709_v12 }
 0x63a   : > { %13945 = vmatprep.subr.bf16.mxu0 %v20706_v52 }
 0x63c   : > { %14055 = vmatpush1.bf16.msra.mxu1 %v20707_v15  ;;  %v20773_v15 = vld [vmem:[%s21335_s25 + $0x3140] ss:$28 sps:$4 sm:$0xff]  }
 0x63d   : > { %13946 = vmatpush1.bf16.msra.mxu0 %v20704_v14  ;;  %14056 = vmatprep.subr.bf16.mxu1 %v20715_v18  ;;  %v20770_v14 = vld [vmem:[%s21335_s25 + $0x2b28] ss:$28 sps:$4 sm:$0xff]  }
 0x63e   : > { %13947 = vmatprep.subr.bf16.mxu0 %v20712_v16  ;;  %v20778_v18 = vld [vmem:[%s21335_s25 + $0x2b64] ss:$28 sps:$4 sm:$0xff]  }
 0x640   : > { %14057 = vmatpush1.bf16.msra.mxu1 %v20713_v22 }
 0x641   : > { %13948 = vmatpush1.bf16.msra.mxu0 %v20710_v21  ;;  %14058 = vmatprep.subr.bf16.mxu1 %v20721_v25  ;;  %v20781_v21 = vld [vmem:[%s21335_s25 + $0x317c] ss:$28 sps:$4 sm:$0xff]  }
 0x642   : > { %13949 = vmatprep.subr.bf16.mxu0 %v20718_v24  ;;  %v20776_v24 = vld [vmem:[%s21335_s25 + $0x2b60] ss:$28 sps:$4 sm:$0xff]   ;;  %v20779_v25 = vld [vmem:[%s21335_s25 + $0x3178] ss:$28 sps:$4 sm:$0xff]  }
 0x644   : > { %14059 = vmatpush1.bf16.msra.mxu1 %v20719_v27  ;;  %v20787_v27 = vld [vmem:[%s21335_s25 + $0x31b4] ss:$28 sps:$4 sm:$0xff]  }
 0x645   : > { %13950 = vmatpush1.bf16.msra.mxu0 %v20716_v26  ;;  %14060 = vmatprep.subr.bf16.mxu1 %v20727_v29  ;;  %v20784_v26 = vld [vmem:[%s21335_s25 + $0x2b9c] ss:$28 sps:$4 sm:$0xff]  }
 0x646   : > { %13951 = vmatprep.subr.bf16.mxu0 %v20724_v28 }
 0x647   : > { %v18219_v36 = vpop.f32.mrb[52].mxu0 }
 0x648   : > { %v18220_v2 = vpop.f32.mrb[53].mxu0  ;;  %14061 = vmatpush1.bf16.msra.mxu1 %v20725_v31 }
 0x649   : > { %v18221_v37 = vadd.f32 %v18220_v2, %v18219_v36  ;;  %13952 = vmatpush1.bf16.msra.mxu0 %v20722_v30  ;;  %v18222_v38 = vpop.f32.mrb[54].mxu0  ;;  %14062 = vmatprep.subr.bf16.mxu1 %v20733_v0  ;;  %v20785_v0 = vld [vmem:[%s21335_s25 + $0x31b0] ss:$28 sps:$4 sm:$0xff]  }
 0x64a   : > { %v18223_v43 = vpop.f32.mrb[55].mxu0  ;;  %13953 = vmatprep.subr.bf16.mxu0 %v20730_v34  ;;  %v20782_v34 = vld [vmem:[%s21335_s25 + $0x2b98] ss:$28 sps:$4 sm:$0xff]   ;;  %v20788_v38 = vld [vmem:[%s21335_s25 + $0x2bd0] ss:$28 sps:$4 sm:$0xff]  }
 0x64b   : > { %v23115_v45 = vadd.f32 %v18221_v37, %v23074_v55  ;;  %v20749_v55 = vld [vmem:[%s21335_s25 + $0x3028] ss:$28 sps:$4 sm:$0xff]   ;;  %v20790_v2 = vld [vmem:[%s21335_s25 + $0x2bd4] ss:$28 sps:$4 sm:$0xff]  }
 0x64c   : > { %14063 = vmatpush1.bf16.msra.mxu1 %v20731_v42  ;;  %v20793_v37 = vld [vmem:[%s21335_s25 + $0x31ec] ss:$28 sps:$4 sm:$0xff]   ;;  %v20799_v43 = vld [vmem:[%s21335_s25 + $0x3224] ss:$28 sps:$4 sm:$0xff]  }
 0x64d   : > { %13954 = vmatpush1.bf16.msra.mxu0 %v20728_v39  ;;  %14064 = vmatprep.subr.bf16.mxu1 %v20739_v44  ;;  %v20791_v39 = vld [vmem:[%s21335_s25 + $0x31e8] ss:$28 sps:$4 sm:$0xff]   ;;  %v20797_v44 = vld [vmem:[%s21335_s25 + $0x3220] ss:$28 sps:$4 sm:$0xff]  }
 0x64e   : > { %13955 = vmatprep.subr.bf16.mxu0 %v20736_v58  ;;  %v20796_v42 = vld [vmem:[%s21335_s25 + $0x2c0c] ss:$28 sps:$4 sm:$0xff]  }
 0x64f   : > { %v20794_v58 = vld [vmem:[%s21335_s25 + $0x2c08] ss:$28 sps:$4 sm:$0xff]  }
 0x650   : > { %14065 = vmatpush1.bf16.msra.mxu1 %v20737_v47  ;;  %v20800_v47 = vld [vmem:[%s21335_s25 + $0x2c40] ss:$28 sps:$4 sm:$0xff]  }
 0x651   : > { %13956 = vmatpush1.bf16.msra.mxu0 %v20734_v46  ;;  %14066 = vmatprep.subr.bf16.mxu1 %v20745_v49  ;;  %v20805_v46 = vld [vmem:[%s21335_s25 + $0x325c] ss:$28 sps:$4 sm:$0xff]  }
 0x652   : > { %13957 = vmatprep.subr.bf16.mxu0 %v20742_v48  ;;  %v20803_v48 = vld [vmem:[%s21335_s25 + $0x3258] ss:$28 sps:$4 sm:$0xff]  }
 0x653   : > { %v20808_v49 = vld [vmem:[%s21335_s25 + $0x2c7c] ss:$28 sps:$4 sm:$0xff]  }
 0x654   : > { %14067 = vmatpush1.bf16.msra.mxu1 %v20743_v33  ;;  %v20806_v33 = vld [vmem:[%s21335_s25 + $0x2c78] ss:$28 sps:$4 sm:$0xff]  }
 0x655   : > { %13958 = vmatpush1.bf16.msra.mxu0 %v20740_v50  ;;  %14068 = vmatprep.subr.bf16.mxu1 %v20751_v8  ;;  %v20811_v50 = vld [vmem:[%s21335_s25 + $0x3294] ss:$28 sps:$4 sm:$0xff]  }
 0x656   : > { %13959 = vmatprep.subr.bf16.mxu0 %v20748_v53  ;;  %v20809_v53 = vld [vmem:[%s21335_s25 + $0x3290] ss:$28 sps:$4 sm:$0xff]  }
 0x657   : > { %v20814_v8 = vld [vmem:[%s21335_s25 + $0x2cb4] ss:$28 sps:$4 sm:$0xff]  }
 0x658   : > { %14069 = vmatpush1.bf16.msra.mxu1 %v20749_v55  ;;  %v20812_v55 = vld [vmem:[%s21335_s25 + $0x2cb0] ss:$28 sps:$4 sm:$0xff]  }
 0x659   : > { %13960 = vmatpush1.bf16.msra.mxu0 %v20746_v54  ;;  %14070 = vmatprep.subr.bf16.mxu1 %v20757_v57  ;;  %v20817_v54 = vld [vmem:[%s21335_s25 + $0x32cc] ss:$28 sps:$4 sm:$0xff]  }
 0x65a   : > { %13970 = vmatprep.subr.bf16.mxu0 %v20754_v20  ;;  %v20815_v20 = vld [vmem:[%s21335_s25 + $0x32c8] ss:$28 sps:$4 sm:$0xff]  }
 0x65b   : > { %v20820_v57 = vld [vmem:[%s21335_s25 + $0x2cec] ss:$28 sps:$4 sm:$0xff]  }
 0x65c   : > { %13962 = vmatmul.mubr.bf16.vlgmr.msra.gmra.mrb[64].mxu0 %v21403_v63  ;;  %14071 = vmatpush1.bf16.msra.mxu1 %v20755_v60  ;;  %v20818_v60 = vld [vmem:[%s21335_s25 + $0x2ce8] ss:$28 sps:$4 sm:$0xff]  }
 0x65d   : > { %13971 = vmatpush1.bf16.msra.mxu0 %v20752_v59  ;;  %14072 = vmatprep.subr.bf16.mxu1 %v20760_v61  ;;  %v20823_v59 = vld [vmem:[%s21335_s25 + $0x3304] ss:$28 sps:$4 sm:$0xff]  }
 0x65e   : > { %14002 = vmatprep.mubr.bf16.mxu0 %v21233_v32  ;;  %14175 = vmatprep.subr.bf16.mxu0 %v20766_v56  ;;  %v20821_v61 = vld [vmem:[%s21335_s25 + $0x3300] ss:$28 sps:$4 sm:$0xff]  }
 0x65f   : > { %v20826_v56 = vld [vmem:[%s21335_s25 + $0x2d24] ss:$28 sps:$4 sm:$0xff]  }
 0x660   : > { %14073 = vmatpush1.bf16.msra.mxu1 %v20758_v1  ;;  %v20829_v1 = vld [vmem:[%s21335_s25 + $0x333c] ss:$28 sps:$4 sm:$0xff]  }
 0x661   : > { %14074 = vmatprep.subr.bf16.mxu1 %v20763_v4  ;;  %v20824_v4 = vld [vmem:[%s21335_s25 + $0x2d20] ss:$28 sps:$4 sm:$0xff]  }
 0x664   : > { %14075 = vmatpush1.bf16.msra.mxu1 %v20761_v5  ;;  %v20827_v5 = vld [vmem:[%s21335_s25 + $0x3338] ss:$28 sps:$4 sm:$0xff]  }
 0x665   : > { %14076 = vmatprep.subr.bf16.mxu1 %v20769_v6  ;;  %v20832_v6 = vld [vmem:[%s21335_s25 + $0x2d5c] ss:$28 sps:$4 sm:$0xff]  }
 0x667   : > { %v18241_v10 = vpop.f32.mrb[56].mxu0 }
 0x668   : > { %17964 = vmatmul.mubr.msk.bf16.vlgmr.msra.gmra.mrb[64].mxu0 %vm2377_vm0, %v21518_v35  ;;  %v18242_v11 = vpop.f32.mrb[57].mxu0  ;;  %14077 = vmatpush1.bf16.msra.mxu1 %v20767_v7  ;;  %v20830_v7 = vld [vmem:[%s21335_s25 + $0x2d58] ss:$28 sps:$4 sm:$0xff]  }
 0x669   : > { %14176 = vmatpush1.bf16.msra.mxu0 %v20764_v40  ;;  %v18243_v52 = vadd.f32 %v18242_v11, %v18241_v10  ;;  %v18244_v12 = vpop.f32.mrb[58].mxu0  ;;  %14078 = vmatprep.subr.bf16.mxu1 %v20775_v9  ;;  %v20835_v40 = vld [vmem:[%s21335_s25 + $0x3374] ss:$28 sps:$4 sm:$0xff]   ;;  %v20841_v10 = vld [vmem:[%s21335_s25 + $0x33ac] ss:$28 sps:$4 sm:$0xff]  }
 0x66a   : > { %v18245_v16 = vpop.f32.mrb[59].mxu0  ;;  %14177 = vmatprep.subr.bf16.mxu0 %v20772_v41  ;;  %14207 = vmatprep.mubr.bf16.mxu0 %v21400_v62  ;;  %v20833_v41 = vld [vmem:[%s21335_s25 + $0x3370] ss:$28 sps:$4 sm:$0xff]  }
 0x66b   : > { %v11588_v22 = vadd.f32 %v18243_v52, %v23115_v45  ;;  %v20802_v45 = vld [vmem:[%s21335_s25 + $0x2c44] ss:$28 sps:$4 sm:$0xff]   ;;  %v20838_v9 = vld [vmem:[%s21335_s25 + $0x2d94] ss:$28 sps:$4 sm:$0xff]   ;;  %v20844_v12 = vld [vmem:[%s21335_s25 + $0x2dcc] ss:$28 sps:$4 sm:$0xff]  }
 0x66c   : > { %14079 = vmatpush1.bf16.msra.mxu1 %v20773_v15  ;;  %v20836_v11 = vld [vmem:[%s21335_s25 + $0x2d90] ss:$28 sps:$4 sm:$0xff]   ;;  %v20839_v52 = vld [vmem:[%s21335_s25 + $0x33a8] ss:$28 sps:$4 sm:$0xff]   ;;  %v20845_v16 = vld [vmem:[%s21335_s25 + $0x33e0] ss:$28 sps:$4 sm:$0xff]  }
 0x66d   : > { %14178 = vmatpush1.bf16.msra.mxu0 %v20770_v14  ;;  %14080 = vmatprep.subr.bf16.mxu1 %v20781_v21  ;;  %v20847_v14 = vld [vmem:[%s21335_s25 + $0x33e4] ss:$28 sps:$4 sm:$0xff]   ;;  %v20853_v21 = vld [vmem:[%s21335_s25 + $0x341c] ss:$28 sps:$4 sm:$0xff]  }
 0x66e   : > { %14179 = vmatprep.subr.bf16.mxu0 %v20778_v18  ;;  %v20842_v15 = vld [vmem:[%s21335_s25 + $0x2dc8] ss:$28 sps:$4 sm:$0xff]  }
 0x66f   : > { %v11627_v28 = vpop.f32.mrb[60].mxu0  ;;  %v20850_v18 = vld [vmem:[%s21335_s25 + $0x2e04] ss:$28 sps:$4 sm:$0xff]  }
 0x670   : > { %v23155_v29 = vadd.f32 %v11627_v28, %v11588_v22  ;;  %v18339_v30 = vpop.f32.mrb[61].mxu0  ;;  %14081 = vmatpush1.bf16.msra.mxu1 %v20779_v25  ;;  %v20848_v22 = vld [vmem:[%s21335_s25 + $0x2e00] ss:$28 sps:$4 sm:$0xff]   ;;  %v20857_v28 = vld [vmem:[%s21335_s25 + $0x3450] ss:$28 sps:$4 sm:$0xff]  }
 0x671   : > { %14180 = vmatpush1.bf16.msra.mxu0 %v20776_v24  ;;  %v11630_v31 = vpop.f32.mrb[62].mxu0  ;;  %14082 = vmatprep.subr.bf16.mxu1 %v20787_v27  ;;  %v20851_v24 = vld [vmem:[%s21335_s25 + $0x3418] ss:$28 sps:$4 sm:$0xff]  }
 0x672   : > { %v18340_v36 = vpop.f32.mrb[63].mxu0  ;;  %14181 = vmatprep.subr.bf16.mxu0 %v20784_v26  ;;  %v20856_v25 = vld [vmem:[%s21335_s25 + $0x2e3c] ss:$28 sps:$4 sm:$0xff]   ;;  %v20859_v26 = vld [vmem:[%s21335_s25 + $0x3454] ss:$28 sps:$4 sm:$0xff]  }
 0x673   : > { %v20854_v27 = vld [vmem:[%s21335_s25 + $0x2e38] ss:$28 sps:$4 sm:$0xff]   ;;  %v20865_v31 = vld [vmem:[%s21335_s25 + $0x348c] ss:$28 sps:$4 sm:$0xff]  }
 0x674   : > { %14083 = vmatpush1.bf16.msra.mxu1 %v20785_v0  ;;  %v20862_v30 = vld [vmem:[%s21335_s25 + $0x2e74] ss:$28 sps:$4 sm:$0xff]   ;;  %v20863_v0 = vld [vmem:[%s21335_s25 + $0x3488] ss:$28 sps:$4 sm:$0xff]  }
 0x675   : > { %14182 = vmatpush1.bf16.msra.mxu0 %v20782_v34  ;;  %14093 = vmatprep.subr.bf16.mxu1 %v20793_v37  ;;  %v20860_v34 = vld [vmem:[%s21335_s25 + $0x2e70] ss:$28 sps:$4 sm:$0xff]   ;;  %v20866_v37 = vld [vmem:[%s21335_s25 + $0x2ea8] ss:$28 sps:$4 sm:$0xff]  }
 0x676   : > { %14183 = vmatprep.subr.bf16.mxu0 %v20790_v2  ;;  %v20868_v36 = vld [vmem:[%s21335_s25 + $0x2eac] ss:$28 sps:$4 sm:$0xff]   ;;  %v20871_v2 = vld [vmem:[%s21335_s25 + $0x34c4] ss:$28 sps:$4 sm:$0xff]  }
 0x677   : > { %14085 = vmatmul.mubr.bf16.vlgmr.msra.gmra.mrb[56].mxu1 %v21432_v19 }
 0x678   : > { %14094 = vmatpush1.bf16.msra.mxu1 %v20791_v39  ;;  %14125 = vmatprep.mubr.bf16.mxu1 %v21438_v23  ;;  %v20874_v39 = vld [vmem:[%s21335_s25 + $0x2ee4] ss:$28 sps:$4 sm:$0xff]  }
 0x679   : > { %14184 = vmatpush1.bf16.msra.mxu0 %v20788_v38  ;;  %14095 = vmatprep.subr.bf16.mxu1 %v20799_v43  ;;  %v20869_v38 = vld [vmem:[%s21335_s25 + $0x34c0] ss:$28 sps:$4 sm:$0xff]  }
 0x67a   : > { %14185 = vmatprep.subr.bf16.mxu0 %v20796_v42  ;;  %v20877_v42 = vld [vmem:[%s21335_s25 + $0x34fc] ss:$28 sps:$4 sm:$0xff]  }
 0x67b   : > { %v20872_v43 = vld [vmem:[%s21335_s25 + $0x2ee0] ss:$28 sps:$4 sm:$0xff]  }
 0x67c   : > { %14096 = vmatpush1.bf16.msra.mxu1 %v20797_v44  ;;  %v20880_v44 = vld [vmem:[%s21335_s25 + $0x2f1c] ss:$28 sps:$4 sm:$0xff]  }
 0x67d   : > { %14186 = vmatpush1.bf16.msra.mxu0 %v20794_v58  ;;  %14097 = vmatprep.subr.bf16.mxu1 %v20805_v46  ;;  %v20875_v58 = vld [vmem:[%s21335_s25 + $0x34f8] ss:$28 sps:$4 sm:$0xff]  }
 0x67e   : > { %14187 = vmatprep.subr.bf16.mxu0 %v20802_v45  ;;  %v20883_v45 = vld [vmem:[%s21335_s25 + $0x3534] ss:$28 sps:$4 sm:$0xff]  }
 0x67f   : > { %v20878_v46 = vld [vmem:[%s21335_s25 + $0x2f18] ss:$28 sps:$4 sm:$0xff]  }
 0x680   : > { %14098 = vmatpush1.bf16.msra.mxu1 %v20803_v48  ;;  %v20886_v48 = vld [vmem:[%s21335_s25 + $0x2f54] ss:$28 sps:$4 sm:$0xff]  }
 0x681   : > { %14188 = vmatpush1.bf16.msra.mxu0 %v20800_v47  ;;  %14099 = vmatprep.subr.bf16.mxu1 %v20811_v50  ;;  %v20881_v47 = vld [vmem:[%s21335_s25 + $0x3530] ss:$28 sps:$4 sm:$0xff]  }
 0x682   : > { %14189 = vmatprep.subr.bf16.mxu0 %v20808_v49  ;;  %v20895_v49 = vld [vmem:[%s21335_s25 + $0x356c] ss:$28 sps:$4 sm:$0xff]  }
 0x683   : > { %v20884_v50 = vld [vmem:[%s21335_s25 + $0x2f50] ss:$28 sps:$4 sm:$0xff]  }
 0x684   : > { %14100 = vmatpush1.bf16.msra.mxu1 %v20809_v53  ;;  %v20889_v53 = vld [vmem:[%s21335_s25 + $0x2f8c] ss:$28 sps:$4 sm:$0xff]  }
 0x685   : > { %14190 = vmatpush1.bf16.msra.mxu0 %v20806_v33  ;;  %14101 = vmatprep.subr.bf16.mxu1 %v20817_v54  ;;  %v20893_v33 = vld [vmem:[%s21335_s25 + $0x3568] ss:$28 sps:$4 sm:$0xff]  }
 0x686   : > { %14191 = vmatprep.subr.bf16.mxu0 %v20814_v8  ;;  %v20899_v8 = vld [vmem:[%s21335_s25 + $0x2cb8] ss:$28 sps:$4 sm:$0xff]   ;;  %v20887_v54 = vld [vmem:[%s21335_s25 + $0x2f88] ss:$28 sps:$4 sm:$0xff]  }
 0x688   : > { %14102 = vmatpush1.bf16.msra.mxu1 %v20815_v20  ;;  %v20890_v20 = vld [vmem:[%s21335_s25 + $0x2fc0] ss:$28 sps:$4 sm:$0xff]  }
 0x689   : > { %14192 = vmatpush1.bf16.msra.mxu0 %v20812_v55  ;;  %14103 = vmatprep.subr.bf16.mxu1 %v20823_v59  ;;  %v20892_v55 = vld [vmem:[%s21335_s25 + $0x2fc4] ss:$28 sps:$4 sm:$0xff]   ;;  %v20896_v59 = vld [vmem:[%s21335_s25 + $0x2ff8] ss:$28 sps:$4 sm:$0xff]  }
 0x68a   : > { %14193 = vmatprep.subr.bf16.mxu0 %v20820_v57  ;;  %v20898_v57 = vld [vmem:[%s21335_s25 + $0x2ffc] ss:$28 sps:$4 sm:$0xff]  }
 0x68c   : > { %14104 = vmatpush1.bf16.msra.mxu1 %v20821_v61  ;;  %v20903_v61 = vld [vmem:[%s21335_s25 + $0x3034] ss:$28 sps:$4 sm:$0xff]  }
 0x68d   : > { %14194 = vmatpush1.bf16.msra.mxu0 %v20818_v60  ;;  %14105 = vmatprep.subr.bf16.mxu1 %v20829_v1  ;;  %v20900_v60 = vld [vmem:[%s21335_s25 + $0x2af8] ss:$28 sps:$4 sm:$0xff]   ;;  %v20901_v1 = vld [vmem:[%s21335_s25 + $0x3030] ss:$28 sps:$4 sm:$0xff]  }
 0x68e   : > { %14195 = vmatprep.subr.bf16.mxu0 %v20826_v56  ;;  %v20904_v56 = vld [vmem:[%s21335_s25 + $0x2cf0] ss:$28 sps:$4 sm:$0xff]  }
 0x690   : > { %14106 = vmatpush1.bf16.msra.mxu1 %v20827_v5  ;;  %v20908_v5 = vld [vmem:[%s21335_s25 + $0x306c] ss:$28 sps:$4 sm:$0xff]  }
 0x691   : > { %14196 = vmatpush1.bf16.msra.mxu0 %v20824_v4  ;;  %14107 = vmatprep.subr.bf16.mxu1 %v20835_v40  ;;  %v20905_v4 = vld [vmem:[%s21335_s25 + $0x2b30] ss:$28 sps:$4 sm:$0xff]   ;;  %v17228_v40 = vmul.f32 -1.442695, %v23155_v29 }
 0x692   : > { %14197 = vmatprep.subr.bf16.mxu0 %v20832_v6  ;;  %v20909_v6 = vld [vmem:[%s21335_s25 + $0x2d28] ss:$28 sps:$4 sm:$0xff]  }
 0x693   : > { %21123 = vpow2.f32 %v17228_v40  ;;  %v20951_v40 = vld [vmem:[%s21335_s25 + $0x3260] ss:$28 sps:$4 sm:$0xff]  }
 0x694   : > { %14108 = vmatpush1.bf16.msra.mxu1 %v20833_v41  ;;  %v20910_v41 = vld [vmem:[%s21335_s25 + $0x2b68] ss:$28 sps:$4 sm:$0xff]  }
 0x695   : > { %14198 = vmatpush1.bf16.msra.mxu0 %v20830_v7  ;;  %14109 = vmatprep.subr.bf16.mxu1 %v20841_v10  ;;  %v20906_v7 = vld [vmem:[%s21335_s25 + $0x3068] ss:$28 sps:$4 sm:$0xff]   ;;  %v20914_v10 = vld [vmem:[%s21335_s25 + $0x2d60] ss:$28 sps:$4 sm:$0xff]  }
 0x696   : > { %14199 = vmatprep.subr.bf16.mxu0 %v20838_v9  ;;  %v20913_v9 = vld [vmem:[%s21335_s25 + $0x30a4] ss:$28 sps:$4 sm:$0xff]  }
 0x698   : > { %14110 = vmatpush1.bf16.msra.mxu1 %v20839_v52 }
 0x699   : > { %14200 = vmatpush1.bf16.msra.mxu0 %v20836_v11  ;;  %14111 = vmatprep.subr.bf16.mxu1 %v20847_v14  ;;  %v20911_v14 = vld [vmem:[%s21335_s25 + $0x30a0] ss:$28 sps:$4 sm:$0xff]  }
 0x69a   : > { %14201 = vmatprep.subr.bf16.mxu0 %v20844_v12 }
 0x69c   : > { %14112 = vmatpush1.bf16.msra.mxu1 %v20845_v16 }
 0x69d   : > { %14202 = vmatpush1.bf16.msra.mxu0 %v20842_v15  ;;  %14113 = vmatprep.subr.bf16.mxu1 %v20853_v21  ;;  %v20915_v15 = vld [vmem:[%s21335_s25 + $0x2ba0] ss:$28 sps:$4 sm:$0xff]   ;;  %v20919_v21 = vld [vmem:[%s21335_s25 + $0x2d98] ss:$28 sps:$4 sm:$0xff]  }
 0x69e   : > { %14203 = vmatprep.subr.bf16.mxu0 %v20850_v18  ;;  %v20918_v18 = vld [vmem:[%s21335_s25 + $0x30dc] ss:$28 sps:$4 sm:$0xff]  }
 0x6a0   : > { %14114 = vmatpush1.bf16.msra.mxu1 %v20851_v24  ;;  %v20920_v24 = vld [vmem:[%s21335_s25 + $0x2bd8] ss:$28 sps:$4 sm:$0xff]  }
 0x6a1   : > { %14204 = vmatpush1.bf16.msra.mxu0 %v20848_v22  ;;  %14115 = vmatprep.subr.bf16.mxu1 %v20859_v26  ;;  %v20916_v22 = vld [vmem:[%s21335_s25 + $0x30d8] ss:$28 sps:$4 sm:$0xff]   ;;  %v20924_v26 = vld [vmem:[%s21335_s25 + $0x2dd0] ss:$28 sps:$4 sm:$0xff]  }
 0x6a2   : > { %14205 = vmatprep.subr.bf16.mxu0 %v20856_v25  ;;  %v20923_v25 = vld [vmem:[%s21335_s25 + $0x3114] ss:$28 sps:$4 sm:$0xff]  }
 0x6a4   : > { %14116 = vmatpush1.bf16.msra.mxu1 %v20857_v28  ;;  %v20925_v28 = vld [vmem:[%s21335_s25 + $0x2c10] ss:$28 sps:$4 sm:$0xff]  }
 0x6a5   : > { %14206 = vmatpush1.bf16.msra.mxu0 %v20854_v27  ;;  %14117 = vmatprep.subr.bf16.mxu1 %v20865_v31  ;;  %v20921_v27 = vld [vmem:[%s21335_s25 + $0x3110] ss:$28 sps:$4 sm:$0xff]  }
 0x6a6   : > { %14216 = vmatprep.subr.bf16.mxu0 %v20862_v30  ;;  %v21124_v30 = vpop.eup %21123  ;;  %v20928_v31 = vld [vmem:[%s21335_s25 + $0x314c] ss:$28 sps:$4 sm:$0xff]  }
 0x6a8   : > { %14208 = vmatmul.mubr.bf16.vlgmr.msra.gmra.mrb[68].mxu0 %v21424_v13  ;;  %14118 = vmatpush1.bf16.msra.mxu1 %v20863_v0 }
 0x6a9   : > { %14217 = vmatpush1.bf16.msra.mxu0 %v20860_v34  ;;  %14119 = vmatprep.subr.bf16.mxu1 %v20871_v2  ;;  %v20929_v34 = vld [vmem:[%s21335_s25 + $0x2e08] ss:$28 sps:$4 sm:$0xff]   ;;  %v11660_v2 = vadd.f32 1.0, %v21124_v30  ;;  %v20980_v30 = vld [vmem:[%s21335_s25 + $0x31f8] ss:$28 sps:$4 sm:$0xff]  }
 0x6aa   : > { %14218 = vmatprep.subr.bf16.mxu0 %v20868_v36  ;;  %14248 = vmatprep.mubr.bf16.mxu0 %v21410_v3 }
 0x6ac   : > { %14120 = vmatpush1.bf16.msra.mxu1 %v20869_v38  ;;  %v20926_v38 = vld [vmem:[%s21335_s25 + $0x3148] ss:$28 sps:$4 sm:$0xff]  }
 0x6ad   : > { %14219 = vmatpush1.bf16.msra.mxu0 %v20866_v37  ;;  %14121 = vmatprep.subr.bf16.mxu1 %v20877_v42 }
 0x6ae   : > { %14220 = vmatprep.subr.bf16.mxu0 %v20874_v39  ;;  %v20930_v39 = vld [vmem:[%s21335_s25 + $0x2c48] ss:$28 sps:$4 sm:$0xff]  }
 0x6b0   : > { %14122 = vmatpush1.bf16.msra.mxu1 %v20875_v58  ;;  %v20934_v58 = vld [vmem:[%s21335_s25 + $0x2e40] ss:$28 sps:$4 sm:$0xff]  }
 0x6b1   : > { %14221 = vmatpush1.bf16.msra.mxu0 %v20872_v43  ;;  %14123 = vmatprep.subr.bf16.mxu1 %v20883_v45  ;;  %v20933_v43 = vld [vmem:[%s21335_s25 + $0x3184] ss:$28 sps:$4 sm:$0xff]  }
 0x6b2   : > { %14222 = vmatprep.subr.bf16.mxu0 %v20880_v44  ;;  %v20931_v44 = vld [vmem:[%s21335_s25 + $0x3180] ss:$28 sps:$4 sm:$0xff]  }
 0x6b3   : > { %v20935_v45 = vld [vmem:[%s21335_s25 + $0x2c80] ss:$28 sps:$4 sm:$0xff]  }
 0x6b4   : > { %14124 = vmatpush1.bf16.msra.mxu1 %v20881_v47  ;;  %v20939_v47 = vld [vmem:[%s21335_s25 + $0x3038] ss:$28 sps:$4 sm:$0xff]  }
 0x6b5   : > { %14223 = vmatpush1.bf16.msra.mxu0 %v20878_v46  ;;  %14134 = vmatprep.subr.bf16.mxu1 %v20895_v49  ;;  %v20938_v46 = vld [vmem:[%s21335_s25 + $0x31bc] ss:$28 sps:$4 sm:$0xff]  }
 0x6b6   : > { %14224 = vmatprep.subr.bf16.mxu0 %v20886_v48  ;;  %v20936_v48 = vld [vmem:[%s21335_s25 + $0x31b8] ss:$28 sps:$4 sm:$0xff]  }
 0x6b7   : > { %14126 = vmatmul.mubr.bf16.vlgmr.msra.gmra.mrb[56].mxu1 %v21403_v63  ;;  %v20940_v49 = vld [vmem:[%s21335_s25 + $0x2e78] ss:$28 sps:$4 sm:$0xff]  }
 0x6b8   : > { %14135 = vmatpush1.bf16.msra.mxu1 %v20893_v33  ;;  %14166 = vmatprep.mubr.bf16.mxu1 %v21233_v32  ;;  %v20944_v33 = vld [vmem:[%s21335_s25 + $0x3070] ss:$28 sps:$4 sm:$0xff]  }
 0x6b9   : > { %14225 = vmatpush1.bf16.msra.mxu0 %v20884_v50  ;;  %18249 = vmatprep.subr.bf16.mxu1 %v20899_v8  ;;  %v20943_v50 = vld [vmem:[%s21335_s25 + $0x31f4] ss:$28 sps:$4 sm:$0xff]  }
 0x6ba   : > { %14226 = vmatprep.subr.bf16.mxu0 %v20889_v53  ;;  %v20941_v8 = vld [vmem:[%s21335_s25 + $0x31f0] ss:$28 sps:$4 sm:$0xff]  }
 0x6bd   : > { %14227 = vmatpush1.bf16.msra.mxu0 %v20887_v54  ;;  %v20945_v54 = vld [vmem:[%s21335_s25 + $0x2eb0] ss:$28 sps:$4 sm:$0xff]  }
 0x6be   : > { %14228 = vmatprep.subr.bf16.mxu0 %v20892_v55 }
 0x6c1   : > { %14229 = vmatpush1.bf16.msra.mxu0 %v20890_v20  ;;  %v20948_v20 = vld [vmem:[%s21335_s25 + $0x322c] ss:$28 sps:$4 sm:$0xff]  }
 0x6c2   : > { %14230 = vmatprep.subr.bf16.mxu0 %v20898_v57  ;;  %v20949_v57 = vld [vmem:[%s21335_s25 + $0x30a8] ss:$28 sps:$4 sm:$0xff]  }
 0x6c3   : > { %17965 = vmatmul.mubr.msk.bf16.vlgmr.msra.gmra.mrb[56].mxu1 %vm2377_vm0, %v21518_v35 }
 0x6c4   : > { %18250 = vmatpush3.bf16.msra.mxu1 %v20900_v60  ;;  %14371 = vmatprep.mubr.bf16.mxu1 %v21400_v62 }
 0x6c5   : > { %14231 = vmatpush1.bf16.msra.mxu0 %v20896_v59  ;;  %18251 = vmatprep.subr.bf16.mxu1 %v20904_v56  ;;  %v20946_v56 = vld [vmem:[%s21335_s25 + $0x3228] ss:$28 sps:$4 sm:$0xff]  }
 0x6c6   : > { %14232 = vmatprep.subr.bf16.mxu0 %v20903_v61 }
 0x6c8   : > { %18252 = vmatpush3.bf16.msra.mxu1 %v20905_v4 }
 0x6c9   : > { %14233 = vmatpush1.bf16.msra.mxu0 %v20901_v1  ;;  %18253 = vmatprep.subr.bf16.mxu1 %v20909_v6  ;;  %v20950_v1 = vld [vmem:[%s21335_s25 + $0x2ee8] ss:$28 sps:$4 sm:$0xff]  }
 0x6ca   : > { %14234 = vmatprep.subr.bf16.mxu0 %v20908_v5  ;;  %v11466_v11 = vpop.f32.mrb[52].mxu1  ;;  %v20953_v5 = vld [vmem:[%s21335_s25 + $0x3264] ss:$28 sps:$4 sm:$0xff]  }
 0x6cb   : > { %v17226_v52 = vmul.f32 -1.442695, %v11466_v11  ;;  %v11468_v12 = vpop.f32.mrb[53].mxu1  ;;  %v20960_v11 = vld [vmem:[%s21335_s25 + $0x2f58] ss:$28 sps:$4 sm:$0xff]  }
 0x6cc   : > { %18254 = vmatpush3.bf16.msra.mxu1 %v20910_v41  ;;  %v17227_v62 = vmul.f32 -1.442695, %v11468_v12  ;;  %v11470_v29 = vpop.f32.mrb[54].mxu1  ;;  %v20958_v41 = vld [vmem:[%s21335_s25 + $0x329c] ss:$28 sps:$4 sm:$0xff]  }
 0x6cd   : > { %14235 = vmatpush1.bf16.msra.mxu0 %v20906_v7  ;;  %21125 = vpow2.f32 %v17226_v52  ;;  %v11471_v16 = vpop.f32.mrb[55].mxu1  ;;  %18255 = vmatprep.subr.bf16.mxu1 %v20914_v10  ;;  %v20955_v7 = vld [vmem:[%s21335_s25 + $0x2f20] ss:$28 sps:$4 sm:$0xff]   ;;  %v20956_v10 = vld [vmem:[%s21335_s25 + $0x3298] ss:$28 sps:$4 sm:$0xff]  }
 0x6ce   : > { %14236 = vmatprep.subr.bf16.mxu0 %v20913_v9  ;;  %21127 = vpow2.f32 %v17227_v62  ;;  %v20959_v9 = vld [vmem:[%s21335_s25 + $0x3118] ss:$28 sps:$4 sm:$0xff]   ;;  %v20964_v12 = vld [vmem:[%s21335_s25 + $0x3150] ss:$28 sps:$4 sm:$0xff]   ;;  %v20966_v16 = vld [vmem:[%s21335_s25 + $0x3308] ss:$28 sps:$4 sm:$0xff]  }
 0x6cf   : > { %v20963_v52 = vld [vmem:[%s21335_s25 + $0x32d4] ss:$28 sps:$4 sm:$0xff]   ;;  %v20968_v29 = vld [vmem:[%s21335_s25 + $0x330c] ss:$28 sps:$4 sm:$0xff]  }
 0x6d0   : > { %18256 = vmatpush3.bf16.msra.mxu1 %v20915_v15  ;;  %v20965_v62 = vld [vmem:[%s21335_s25 + $0x2f90] ss:$28 sps:$4 sm:$0xff]   ;;  %v20969_v15 = vld [vmem:[%s21335_s25 + $0x3188] ss:$28 sps:$4 sm:$0xff]  }
 0x6d1   : > { %14237 = vmatpush1.bf16.msra.mxu0 %v20911_v14  ;;  %18257 = vmatprep.subr.bf16.mxu1 %v20919_v21  ;;  %v20961_v14 = vld [vmem:[%s21335_s25 + $0x32d0] ss:$28 sps:$4 sm:$0xff]   ;;  %v20973_v21 = vld [vmem:[%s21335_s25 + $0x3344] ss:$28 sps:$4 sm:$0xff]  }
 0x6d2   : > { %14238 = vmatprep.subr.bf16.mxu0 %v20918_v18  ;;  %v20970_v18 = vld [vmem:[%s21335_s25 + $0x2fc8] ss:$28 sps:$4 sm:$0xff]  }
 0x6d4   : > { %18258 = vmatpush3.bf16.msra.mxu1 %v20920_v24  ;;  %v20971_v24 = vld [vmem:[%s21335_s25 + $0x3340] ss:$28 sps:$4 sm:$0xff]  }
 0x6d5   : > { %14239 = vmatpush1.bf16.msra.mxu0 %v20916_v22  ;;  %18259 = vmatprep.subr.bf16.mxu1 %v20924_v26  ;;  %v20974_v22 = vld [vmem:[%s21335_s25 + $0x31c0] ss:$28 sps:$4 sm:$0xff]  }
 0x6d6   : > { %14240 = vmatprep.subr.bf16.mxu0 %v20923_v25  ;;  %v20975_v25 = vld [vmem:[%s21335_s25 + $0x3000] ss:$28 sps:$4 sm:$0xff]  }
 0x6d7   : > { %v21126_v0 = vpop.eup %21125  ;;  %v20978_v26 = vld [vmem:[%s21335_s25 + $0x337c] ss:$28 sps:$4 sm:$0xff]  }
 0x6d8   : > { %v21128_v36 = vpop.eup %21127  ;;  %v11658_v37 = vadd.f32 1.0, %v21126_v0  ;;  %18260 = vmatpush3.bf16.msra.mxu1 %v20925_v28  ;;  %v20976_v28 = vld [vmem:[%s21335_s25 + $0x3378] ss:$28 sps:$4 sm:$0xff]   ;;  %v20981_v0 = vld [vmem:[%s21335_s25 + $0x33b0] ss:$28 sps:$4 sm:$0xff]  }
 0x6d9   : > { %14241 = vmatpush1.bf16.msra.mxu0 %v20921_v27  ;;  %v11659_v42 = vadd.f32 1.0, %v21128_v36  ;;  %18261 = vmatprep.subr.bf16.mxu1 %v20929_v34  ;;  %v20979_v27 = vld [vmem:[%s21335_s25 + $0x33b8] ss:$28 sps:$4 sm:$0xff]   ;;  %v20984_v34 = vld [vmem:[%s21335_s25 + $0x33f0] ss:$28 sps:$4 sm:$0xff]  }
 0x6da   : > { %14242 = vmatprep.subr.bf16.mxu0 %v20928_v31  ;;  %21129 = vrcp.f32 %v11658_v37  ;;  %v20983_v31 = vld [vmem:[%s21335_s25 + $0x33b4] ss:$28 sps:$4 sm:$0xff]   ;;  %v20989_v37 = vld [vmem:[%s21335_s25 + $0x3428] ss:$28 sps:$4 sm:$0xff]  }
 0x6db   : > { %21131 = vrcp.f32 %v11659_v42  ;;  %v20985_v36 = vld [vmem:[%s21335_s25 + $0x3230] ss:$28 sps:$4 sm:$0xff]   ;;  %v20994_v42 = vld [vmem:[%s21335_s25 + $0x3460] ss:$28 sps:$4 sm:$0xff]  }
 0x6dc   : > { %21133 = vrcp.f32 %v11660_v2  ;;  %18262 = vmatpush3.bf16.msra.mxu1 %v20930_v39  ;;  %v20988_v2 = vld [vmem:[%s21335_s25 + $0x33ec] ss:$28 sps:$4 sm:$0xff]   ;;  %v20993_v39 = vld [vmem:[%s21335_s25 + $0x3424] ss:$28 sps:$4 sm:$0xff]  }
 0x6dd   : > { %14243 = vmatpush1.bf16.msra.mxu0 %v20926_v38  ;;  %18263 = vmatprep.subr.bf16.mxu1 %v20934_v58  ;;  %v20986_v38 = vld [vmem:[%s21335_s25 + $0x33e8] ss:$28 sps:$4 sm:$0xff]   ;;  %v20995_v58 = vld [vmem:[%s21335_s25 + $0x32a0] ss:$28 sps:$4 sm:$0xff]  }
 0x6de   : > { %14244 = vmatprep.subr.bf16.mxu0 %v20933_v43  ;;  %v20991_v43 = vld [vmem:[%s21335_s25 + $0x3420] ss:$28 sps:$4 sm:$0xff]  }
 0x6e0   : > { %18264 = vmatpush3.bf16.msra.mxu1 %v20935_v45  ;;  %v20996_v45 = vld [vmem:[%s21335_s25 + $0x3458] ss:$28 sps:$4 sm:$0xff]  }
 0x6e1   : > { %14245 = vmatpush1.bf16.msra.mxu0 %v20931_v44  ;;  %18271 = vmatprep.subr.bf16.mxu1 %v20939_v47  ;;  %v20999_v44 = vld [vmem:[%s21335_s25 + $0x3498] ss:$28 sps:$4 sm:$0xff]  }
 0x6e2   : > { %14246 = vmatprep.subr.bf16.mxu0 %v20938_v46  ;;  %v21000_v46 = vld [vmem:[%s21335_s25 + $0x32d8] ss:$28 sps:$4 sm:$0xff]  }
 0x6e3   : > { %14372 = vmatmul.mubr.bf16.vlgmr.msra.gmra.mrb[60].mxu1 %v21424_v13  ;;  %v21003_v47 = vld [vmem:[%s21335_s25 + $0x3494] ss:$28 sps:$4 sm:$0xff]  }
 0x6e4   : > { %v21130_v53 = vpop.eup %21129  ;;  %18272 = vmatpush3.bf16.msra.mxu1 %v20940_v49  ;;  %14411 = vmatprep.mubr.bf16.mxu1 %v21410_v3  ;;  %v20954_v3 = vld [vmem:[%s21335_s25 + $0x30e0] ss:$28 sps:$4 sm:$0xff]   ;;  %v21001_v49 = vld [vmem:[%s21335_s25 + $0x3490] ss:$28 sps:$4 sm:$0xff]  }
 0x6e5   : > { %14247 = vmatpush1.bf16.msra.mxu0 %v20936_v48  ;;  %v21132_v55 = vpop.eup %21131  ;;  %18273 = vmatprep.subr.bf16.mxu1 %v20944_v33  ;;  %v11682_v59 = vsel %vm3075_vm2, %v21130_v53, 0.0  ;;  %v21004_v48 = vld [vmem:[%s21335_s25 + $0x34d0] ss:$28 sps:$4 sm:$0xff]   ;;  %v21009_v53 = vld [vmem:[%s21335_s25 + $0x3508] ss:$28 sps:$4 sm:$0xff]  }
 0x6e6   : > { %14257 = vmatprep.subr.bf16.mxu0 %v20943_v50  ;;  %v21134_v60 = vpop.eup %21133  ;;  %v11683_v61 = vadd.f32 %v11682_v59, %v23070_v51  ;;  %v11684_v13 = vsel %vm3075_vm2, %v21132_v55, 0.0  ;;  %v21005_v50 = vld [vmem:[%s21335_s25 + $0x3310] ss:$28 sps:$4 sm:$0xff]   ;;  %v21013_v55 = vld [vmem:[%s21335_s25 + $0x3504] ss:$28 sps:$4 sm:$0xff]  }
 0x6e7   : > { %v11686_v51 = vsel %vm3087_vm3, %v21134_v60, 0.0  ;;  %v21008_v33 = vld [vmem:[%s21335_s25 + $0x34cc] ss:$28 sps:$4 sm:$0xff]   ;;  %v21015_v59 = vld [vmem:[%s21335_s25 + $0x3380] ss:$28 sps:$4 sm:$0xff]  }
 0x6e8   : > { %14249 = vmatmul.mubr.bf16.vlgmr.msra.gmra.mrb[68].mxu0 %v21432_v19  ;;  %18274 = vmatpush3.bf16.msra.mxu1 %v20945_v54  ;;  %v11685_v4 = vadd.f32 %v11684_v13, %v11683_v61  ;;  %v21010_v54 = vld [vmem:[%s21335_s25 + $0x3348] ss:$28 sps:$4 sm:$0xff]   ;;  %v21018_v60 = vld [vmem:[%s21335_s25 + $0x353c] ss:$28 sps:$4 sm:$0xff]  }
 0x6e9   : > { %14258 = vmatpush1.bf16.msra.mxu0 %v20941_v8  ;;  %18275 = vmatprep.subr.bf16.mxu1 %v20949_v57  ;;  %v21006_v8 = vld [vmem:[%s21335_s25 + $0x34c8] ss:$28 sps:$4 sm:$0xff]   ;;  %v21011_v57 = vld [vmem:[%s21335_s25 + $0x3500] ss:$28 sps:$4 sm:$0xff]   ;;  %v21016_v61 = vld [vmem:[%s21335_s25 + $0x3538] ss:$28 sps:$4 sm:$0xff]  }
 0x6ea   : > { %14259 = vmatprep.subr.bf16.mxu0 %v20948_v20  ;;  %v11687_v6 = vadd.f32 %v11686_v51, %v11685_v4  ;;  %14289 = vmatprep.mubr.bf16.mxu0 %v21438_v23  ;;  %v21014_v20 = vld [vmem:[%s21335_s25 + $0x3540] ss:$28 sps:$4 sm:$0xff]   ;;  %v21022_v13 = vld [vmem:[%s21335_s25 + $0x3578] ss:$28 sps:$4 sm:$0xff]  }
 0x6ec   : > { %18276 = vmatpush3.bf16.msra.mxu1 %v20950_v1  ;;  %11688 = vadd.xlane.f32.xlu1 %v11687_v6  ;;  %v21019_v1 = vld [vmem:[%s21335_s25 + $0x3570] ss:$28 sps:$4 sm:$0xff]  }
 0x6ed   : > { %14260 = vmatpush1.bf16.msra.mxu0 %v20946_v56  ;;  %18277 = vmatprep.subr.bf16.mxu1 %v20954_v3  ;;  %v21021_v56 = vld [vmem:[%s21335_s25 + $0x3574] ss:$28 sps:$4 sm:$0xff]  }
 0x6ee   : > { %14261 = vmatprep.subr.bf16.mxu0 %v20953_v5 }
 0x6f0   : > { %18278 = vmatpush3.bf16.msra.mxu1 %v20955_v7 }
 0x6f1   : > { %14262 = vmatpush1.bf16.msra.mxu0 %v20951_v40  ;;  %18279 = vmatprep.subr.bf16.mxu1 %v20959_v9 }
 0x6f2   : > { %14263 = vmatprep.subr.bf16.mxu0 %v20958_v41 }
 0x6f4   : > { %18280 = vmatpush3.bf16.msra.mxu1 %v20960_v11 }
 0x6f5   : > { %14264 = vmatpush1.bf16.msra.mxu0 %v20956_v10  ;;  %18281 = vmatprep.subr.bf16.mxu1 %v20964_v12 }
 0x6f6   : > { %14265 = vmatprep.subr.bf16.mxu0 %v20963_v52 }
 0x6f8   : > { %18282 = vmatpush3.bf16.msra.mxu1 %v20965_v62 }
 0x6f9   : > { %14266 = vmatpush1.bf16.msra.mxu0 %v20961_v14  ;;  %18283 = vmatprep.subr.bf16.mxu1 %v20969_v15 }
 0x6fa   : > { %14267 = vmatprep.subr.bf16.mxu0 %v20968_v29 }
 0x6fc   : > { %18284 = vmatpush3.bf16.msra.mxu1 %v20970_v18 }
 0x6fd   : > { %14268 = vmatpush1.bf16.msra.mxu0 %v20966_v16  ;;  %18285 = vmatprep.subr.bf16.mxu1 %v20974_v22 }
 0x6fe   : > { %14269 = vmatprep.subr.bf16.mxu0 %v20973_v21 }
 0x700   : > { %18286 = vmatpush3.bf16.msra.mxu1 %v20975_v25 }
 0x701   : > { %14270 = vmatpush1.bf16.msra.mxu0 %v20971_v24  ;;  %18293 = vmatprep.subr.bf16.mxu1 %v20979_v27 }
 0x702   : > { %14271 = vmatprep.subr.bf16.mxu0 %v20978_v26 }
 0x703   : > { %14412 = vmatmul.mubr.bf16.vlgmr.msra.gmra.mrb[64].mxu1 %v21432_v19  ;;  %v20990_v19 = vld [vmem:[%s21335_s25 + $0x3268] ss:$28 sps:$4 sm:$0xff]  }
 0x704   : > { %18294 = vmatpush3.bf16.msra.mxu1 %v20980_v30  ;;  %14451 = vmatprep.mubr.bf16.mxu1 %v21438_v23  ;;  %v20998_v23 = vld [vmem:[%s21335_s25 + $0x345c] ss:$28 sps:$4 sm:$0xff]  }
 0x705   : > { %14272 = vmatpush1.bf16.msra.mxu0 %v20976_v28  ;;  %18295 = vmatprep.subr.bf16.mxu1 %v20984_v34 }
 0x706   : > { %14273 = vmatprep.subr.bf16.mxu0 %v20983_v31 }
 0x708   : > { %18296 = vmatpush3.bf16.msra.mxu1 %v20985_v36 }
 0x709   : > { %14274 = vmatpush1.bf16.msra.mxu0 %v20981_v0  ;;  %18297 = vmatprep.subr.bf16.mxu1 %v20989_v37 }
 0x70a   : > { %14275 = vmatprep.subr.bf16.mxu0 %v20988_v2 }
 0x70c   : > { %18298 = vmatpush3.bf16.msra.mxu1 %v20990_v19 }
 0x70d   : > { %14276 = vmatpush1.bf16.msra.mxu0 %v20986_v38  ;;  %18299 = vmatprep.subr.bf16.mxu1 %v20994_v42 }
 0x70e   : > { %14277 = vmatprep.subr.bf16.mxu0 %v20993_v39 }
 0x710   : > { %18300 = vmatpush3.bf16.msra.mxu1 %v20995_v58 }
 0x711   : > { %14278 = vmatpush1.bf16.msra.mxu0 %v20991_v43  ;;  %18301 = vmatprep.subr.bf16.mxu1 %v20999_v44 }
 0x712   : > { %14279 = vmatprep.subr.bf16.mxu0 %v20998_v23 }
 0x714   : > { %18302 = vmatpush3.bf16.msra.mxu1 %v21000_v46 }
 0x715   : > { %14280 = vmatpush1.bf16.msra.mxu0 %v20996_v45  ;;  %18303 = vmatprep.subr.bf16.mxu1 %v21004_v48 }
 0x716   : > { %14281 = vmatprep.subr.bf16.mxu0 %v21003_v47 }
 0x718   : > { %18304 = vmatpush3.bf16.msra.mxu1 %v21005_v50 }
 0x719   : > { %14282 = vmatpush1.bf16.msra.mxu0 %v21001_v49  ;;  %18305 = vmatprep.subr.bf16.mxu1 %v21009_v53 }
 0x71a   : > { %14283 = vmatprep.subr.bf16.mxu0 %v21008_v33 }
 0x71c   : > { %18306 = vmatpush3.bf16.msra.mxu1 %v21010_v54 }
 0x71d   : > { %14284 = vmatpush1.bf16.msra.mxu0 %v21006_v8  ;;  %18307 = vmatprep.subr.bf16.mxu1 %v21014_v20 }
 0x71e   : > { %14285 = vmatprep.subr.bf16.mxu0 %v21013_v55 }
 0x720   : > { %18308 = vmatpush3.bf16.msra.mxu1 %v21015_v59 }
 0x721   : > { %14286 = vmatpush1.bf16.msra.mxu0 %v21011_v57  ;;  %18341 = vmatprep.subr.bf16.mxu1 %v21234_v17 }
 0x722   : > { %14287 = vmatprep.subr.bf16.mxu0 %v21018_v60 }
 0x723   : > { %14452 = vmatmul.mubr.bf16.vlgmr.msra.gmra.mrb[68].mxu1 %v21403_v63 }
 0x724   : > { %18342 = vmatpush3.bf16.msra.mxu1 %v21022_v13  ;;  %18343 = vmatprep.mubr.msk.bf16.mxu1 %vm21235_vm1, %v21234_v17 }
 0x725   : > { %14288 = vmatpush1.bf16.msra.mxu0 %v21016_v61 }
 0x726   : > { %14298 = vmatprep.subr.bf16.mxu0 %v21021_v56 }
 0x728   : > { %14290 = vmatmul.mubr.bf16.vlgmr.msra.gmra.mrb[68].mxu0 %v21403_v63 }
 0x729   : > { %14299 = vmatpush1.bf16.msra.mxu0 %v21019_v1  ;;  %14330 = vmatprep.mubr.bf16.mxu0 %v21233_v32 }
 0x72b   : > { %18344 = vmatmul.mubr.msk.bf16.vlgmr.msra.gmra.mrb[72].mxu1 %vm2377_vm0, %v21518_v35 }
 0x734   : > { %17966 = vmatmul.mubr.msk.bf16.vlgmr.msra.gmra.mrb[68].mxu0 %vm2377_vm0, %v21518_v35 }
 0x73b   : > { %v14004_v4 = vpop.f32.mrb[64].mxu0 }
 0x73c   : > { %v17968_v5 = vmul.f32 -1.442695, %v14004_v4  ;;  %v14006_v51 = vpop.f32.mrb[65].mxu0 }
 0x73d   : > { %v17969_v6 = vmul.f32 -1.442695, %v14006_v51  ;;  %v14008_v3 = vpop.f32.mrb[66].mxu0 }
 0x73e   : > { %21135 = vpow2.f32 %v17968_v5  ;;  %v14009_v40 = vpop.f32.mrb[67].mxu0 }
 0x73f   : > { %21137 = vpow2.f32 %v17969_v6 }
 0x748   : > { %v21136_v17 = vpop.eup %21135 }
 0x749   : > { %v21138_v7 = vpop.eup %21137  ;;  %v14520_v63 = vadd.f32 1.0, %v21136_v17 }
 0x74a   : > { %v14521_v41 = vadd.f32 1.0, %v21138_v7 }
 0x74b   : > { %21139 = vrcp.f32 %v14520_v63 }
 0x74c   : > { %21141 = vrcp.f32 %v14521_v41 }
 0x755   : > { %v21140_v32 = vpop.eup %21139 }
 0x756   : > { %v21142_v9 = vpop.eup %21141  ;;  %v14541_v10 = vsel %vm3075_vm2, %v21140_v32, 0.0 }
 0x757   : > { %v14542_v35 = vsel %vm3075_vm2, %v21142_v9, 0.0  ;;  %v3091_v9 = vpop.xlane.xlu0 %3090 }
 0x758   : > { %v14543_v11 = vadd.f32 %v14542_v35, %v14541_v10  ;;  %v8823_v10 = vpop.xlane.xlu1 %8822 }
 0x75b   : > { %v5957_v35 = vpop.xlane.xlu0 %5956 }
 0x796   : > { %v14168_v52 = vpop.f32.mrb[56].mxu1 }
 0x797   : > { %v17970_v12 = vmul.f32 -1.442695, %v14168_v52  ;;  %v14170_v14 = vpop.f32.mrb[57].mxu1  ;;  %v14557_v52 = vsel %vm14556_vm4, %v3091_v9, %v5957_v35 }
 0x798   : > { %v17971_v62 = vmul.f32 -1.442695, %v14170_v14  ;;  %v14172_v29 = vpop.f32.mrb[58].mxu1 }
 0x799   : > { %21143 = vpow2.f32 %v17970_v12  ;;  %v14173_v15 = vpop.f32.mrb[59].mxu1  ;;  %v14559_v12 = vsel %vm14558_vm5, %v14557_v52, %v8823_v10 }
 0x79a   : > { %21145 = vpow2.f32 %v17971_v62 }
 0x7a3   : > { %v21144_v16 = vpop.eup %21143 }
 0x7a4   : > { %v21146_v18 = vpop.eup %21145  ;;  %v14522_v21 = vadd.f32 1.0, %v21144_v16 }
 0x7a5   : > { %v14523_v22 = vadd.f32 1.0, %v21146_v18 }
 0x7a6   : > { %21147 = vrcp.f32 %v14522_v21 }
 0x7a7   : > { %21149 = vrcp.f32 %v14523_v22 }
 0x7b0   : > { %v21148_v24 = vpop.eup %21147 }
 0x7b1   : > { %v21150_v25 = vpop.eup %21149  ;;  %v14544_v26 = vsel %vm3075_vm2, %v21148_v24, 0.0 }
 0x7b2   : > { %v14545_v27 = vadd.f32 %v14544_v26, %v14543_v11  ;;  %v14546_v28 = vsel %vm3075_vm2, %v21150_v25, 0.0  ;;  %v11689_v11 = vpop.xlane.xlu1 %11688 }
 0x7b3   : > { %v14561_v14 = vsel %vm14560_vm6, %v14559_v12, %v11689_v11 }
 0x7b4   : > { %v14547_v30 = vadd.f32 %v14546_v28, %v14545_v27 }
 0x7b6   : > { %v18265_v31 = vpop.f32.mrb[60].mxu1 }
 0x7b7   : > { %v18266_v34 = vpop.f32.mrb[61].mxu1 }
 0x7b8   : > { %v18267_v0 = vadd.f32 %v18266_v34, %v18265_v31  ;;  %v18268_v36 = vpop.f32.mrb[62].mxu1 }
 0x7b9   : > { %v18269_v2 = vpop.f32.mrb[63].mxu1 }
 0x7d6   : > { %v18287_v37 = vpop.f32.mrb[64].mxu1 }
 0x7d7   : > { %v18288_v38 = vpop.f32.mrb[65].mxu1 }
 0x7d8   : > { %v18289_v19 = vadd.f32 %v18288_v38, %v18287_v37  ;;  %v18290_v39 = vpop.f32.mrb[66].mxu1 }
 0x7d9   : > { %v18291_v42 = vpop.f32.mrb[67].mxu1 }
 0x7da   : > { %v14414_v43 = vadd.f32 %v18289_v19, %v18267_v0 }
 0x7f6   : > { %v18309_v58 = vpop.f32.mrb[68].mxu1 }
 0x7f7   : > { %v18310_v23 = vpop.f32.mrb[69].mxu1 }
 0x7f8   : > { %v18311_v44 = vadd.f32 %v18310_v23, %v18309_v58  ;;  %v18312_v45 = vpop.f32.mrb[70].mxu1 }
 0x7f9   : > { %v18313_v46 = vpop.f32.mrb[71].mxu1 }
 0x7fa   : > { %v14454_v47 = vadd.f32 %v18311_v44, %v14414_v43 }
 0x7fe   : > { %v14493_v48 = vpop.f32.mrb[72].mxu1 }
 0x7ff   : > { %v14494_v49 = vadd.f32 %v14493_v48, %v14454_v47  ;;  %v18345_v50 = vpop.f32.mrb[73].mxu1 }
 0x800   : > { %v14496_v33 = vpop.f32.mrb[74].mxu1 }
 0x801   : > { %v18346_v53 = vpop.f32.mrb[75].mxu1  ;;  %v17974_v8 = vmul.f32 -1.442695, %v14494_v49 }
 0x803   : > { %21151 = vpow2.f32 %v17974_v8 }
 0x807   : > { %v14332_v54 = vpop.f32.mrb[68].mxu0 }
 0x808   : > { %v17972_v55 = vmul.f32 -1.442695, %v14332_v54  ;;  %v14334_v20 = vpop.f32.mrb[69].mxu0 }
 0x809   : > { %v17973_v57 = vmul.f32 -1.442695, %v14334_v20  ;;  %v14336_v59 = vpop.f32.mrb[70].mxu0 }
 0x80a   : > { %21153 = vpow2.f32 %v17972_v55  ;;  %v14337_v60 = vpop.f32.mrb[71].mxu0 }
 0x80b   : > { %21155 = vpow2.f32 %v17973_v57 }
 0x80d   : > { %v21152_v61 = vpop.eup %21151 }
 0x80e   : > { %v14526_v1 = vadd.f32 1.0, %v21152_v61 }
 0x814   : > { %v21154_v13 = vpop.eup %21153 }
 0x815   : > { %v21156_v56 = vpop.eup %21155  ;;  %v14524_v4 = vadd.f32 1.0, %v21154_v13 }
 0x816   : > { %v14525_v5 = vadd.f32 1.0, %v21156_v56 }
 0x817   : > { %21157 = vrcp.f32 %v14524_v4 }
 0x818   : > { %21159 = vrcp.f32 %v14525_v5 }
 0x819   : > { %21161 = vrcp.f32 %v14526_v1 }
 0x821   : > { %v21158_v51 = vpop.eup %21157 }
 0x822   : > { %v21160_v6 = vpop.eup %21159  ;;  %v14548_v3 = vsel %vm3075_vm2, %v21158_v51, 0.0 }
 0x823   : > { %v21162_v40 = vpop.eup %21161  ;;  %v14549_v17 = vadd.f32 %v14548_v3, %v14547_v30  ;;  %v14550_v7 = vsel %vm3075_vm2, %v21160_v6, 0.0 }
 0x824   : > { %v14552_v41 = vsel %vm3087_vm3, %v21162_v40, 0.0 }
 0x825   : > { %v14551_v63 = vadd.f32 %v14550_v7, %v14549_v17 }
 0x827   : > { %v14553_v32 = vadd.f32 %v14552_v41, %v14551_v63 }
 0x829   : > { %14554 = vadd.xlane.f32.xlu0 %v14553_v32 }
 0x8b6   : > { %v14555_v62 = vpop.xlane.xlu0 %14554 }
 0x8b7   : > { %v14563_v29 = vsel %vm14562_vm7, %v14561_v14, %v14555_v62 }
 0x8b8   : > { %14565 = vst.msk [vmem:[%s163_s27] sm:$0x3] %vm14564_vm8, %v14563_v29 }
 0x8b9 PF: > { %p12_p8 = scmp.ge.s32.totalorder %s21273_s14, 4   ;;  %s23392_s9 = smov %s21219_s10 }
 0x8ba   : > { %s23393_s10 = smov %s21223_s11  ;;  %s23394_s11 = smov %s21283_s17 }
 0x8bb   : > { %s23395_s12 = smov %s21273_s14  ;;  %14 = sbr.rel (!%p12_p8) target bundleno = 3 (0x3), region = 72 }
 0x8c2   :  { %14585 = vsyncpa [#allocation3], 1 }
 0x8c3   :  { %14587 = vsyncpa [#allocation3 + $0x1], 1 }

</bundles_post_ra>
